<compile_context>
chip_gen: v5e
topology: v5e:2x2
jax: 0.10.0
libtpu: 0.0.40
codegen_flags: <defaults>
</compile_context>

<pallas_src>
import math

import jax
import jax.numpy as jnp
from jax import lax
from jax.experimental import pallas as pl
from jax.experimental.pallas import tpu as pltpu


def _round_up(x, m):
    return ((x + m - 1) // m) * m


def _gelu(x, approximate):
    if approximate:
        # tanh approximation runs on the EUP (otherwise idle VLIW slot); tiny deviation vs torch.
        return jax.nn.gelu(x, approximate=True)
    # exact erf-based GELU == torch.nn.GELU() default
    return 0.5 * x * (1.0 + lax.erf(x * (1.0 / math.sqrt(2.0))))


def _make_kernel(*, TH, W, C, WP, WM, CH, eps, has_halo, approx_gelu, dw_bf16):
    f32 = jnp.float32
    mac_dt = jnp.bfloat16 if dw_bf16 else f32

    def kernel(*refs):
        if has_halo:
            (x_ref, prev_ref, next_ref,
             dww_ref, dwb_ref, w1_ref, b1_ref, w2_ref, b2_ref,
             out_ref, xpad_ref, xn_ref) = refs
        else:
            (x_ref,
             dww_ref, dwb_ref, w1_ref, b1_ref, w2_ref, b2_ref,
             out_ref, xpad_ref, xn_ref) = refs
            prev_ref = next_ref = None

        t = pl.program_id(1)
        n_t = pl.num_programs(1)

        # ---- assemble the zero-padded tile (TH+6, WP, C) in VMEM ----
        # Data packed at sublane offset 0 (aligned stores); zeros only in [W, WP).
        # The LEFT zero halo is supplied implicitly by the roll wrapping into the zero tail.
        xpad_ref[:, W:WP, :] = jnp.zeros((TH + 6, WP - W, C), f32)
        xpad_ref[3:TH + 3, 0:W, :] = x_ref[...].astype(f32)
        if has_halo:
            top = prev_ref[5:8, :, :].astype(f32)            # image rows t*TH-3 .. t*TH-1
            bot = next_ref[0:3, :, :].astype(f32)            # image rows (t+1)*TH .. (t+1)*TH+2
            xpad_ref[0:3, 0:W, :] = jnp.where(t > 0, top, 0.0)
            xpad_ref[TH + 3:TH + 6, 0:W, :] = jnp.where(t < n_t - 1, bot, 0.0)
        else:
            z3 = jnp.zeros((3, W, C), f32)
            xpad_ref[0:3, 0:W, :] = z3
            xpad_ref[TH + 3:TH + 6, 0:W, :] = z3

        # ---- depthwise 7x7 conv ----
        # Column taps: roll the FULL padded tile once per kx (6 XLU rolls total, not 42).
        # shift = (3 - kx) mod WP, so out[w] reads x[w - 3 + kx]; out-of-range taps wrap into
        # the zero tail [W, WP) (left pad) or hit it directly (right pad).
        xfull = xpad_ref[...].astype(mac_dt)                 # (TH+6, WP, C)
        rolled = []
        for kx in range(7):
            shift = (3 - kx) % WP
            rolled.append(xfull if shift == 0 else pltpu.roll(xfull, shift, axis=1))

        dww = dww_ref[...].astype(mac_dt)                    # (7, 7, C)
        wtap = [[dww[ky, kx] for kx in range(7)] for ky in range(7)]
        dwb = dwb_ref[...]                                   # (1, C) f32

        if WM > W:
            # junk columns flow through the MLP and are sliced off at the end
            xn_ref[:, W:WM, :] = jnp.zeros((TH, WM - W, C), xn_ref.dtype)

        # Chunked accumulation: CH output rows per chunk so the f32 accumulator stays
        # vreg-resident across all 49 taps; each finished chunk is LayerNorm'ed and written
        # exactly once.  (LN affine and layer-scale were folded into w1/b1/w2/b2 host-side.)
        for r0 in range(0, TH, CH):
            acc = jnp.zeros((CH, W, C), f32)
            for ky in range(7):
                for kx in range(7):
                    tap = rolled[kx][r0 + ky:r0 + ky + CH, 0:W, :]
                    acc = acc + (tap * wtap[ky][kx]).astype(f32)
            acc = acc + dwb
            # LayerNorm over channels (biased variance, eps inside rsqrt == F.layer_norm)
            u = jnp.mean(acc, axis=-1, keepdims=True)
            d = acc - u
            var = jnp.mean(d * d, axis=-1, keepdims=True)
            xn_ref[r0:r0 + CH, 0:W, :] = (d * lax.rsqrt(var + eps)).astype(xn_ref.dtype)

        # ---- pointwise MLP on the MXU: bf16 operands, f32 accumulation ----
        # reshape (TH, WM, C) -> (TH*WM, C) is layout-free since WM % 8 == 0.
        xf = xn_ref[...].reshape(TH * WM, C)
        h = jnp.dot(xf, w1_ref[...], preferred_element_type=f32) + b1_ref[...]
        h = _gelu(h, approx_gelu)
        y = jnp.dot(h.astype(w2_ref.dtype), w2_ref[...],
                    preferred_element_type=f32) + b2_ref[...]
        y = y.reshape(TH, WM, C)
        if WM > W:
            y = y[:, 0:W, :]

        # ---- residual ----
        # TODO(synk): drop_path (stochastic depth) is Identity at drop_path=0.0 (module default).
        out_ref[...] = (x_ref[...].astype(f32) + y).astype(out_ref.dtype)

    return kernel


def _vmem_capacity_bytes():
    """Best-effort physical VMEM query; falls back to the v7x-conservative 64 MiB."""
    try:
        info = pltpu.get_tpu_info()
        cap = int(getattr(info, "vmem_capacity_bytes", 0))
        if cap > 0:
            return cap
    except Exception:
        pass
    return 64 << 20


def _pick_row_tile(H, W, C, tile_budget):
    """Largest multiple-of-8 divisor of H whose per-step tile working set fits tile_budget."""
    if H % 8 != 0:
        return H
    WP = _round_up(W + 3, 8)
    WM = _round_up(W, 8)
    cand = [d for d in range(8, H + 1, 8) if H % d == 0]

    def step_bytes(th):
        rolled = 8 * (th + 6) * WP * C * 4      # xpad scratch + 7 rolled copies (f32)
        hidden = th * WM * 4 * C * 4            # f32 MLP hidden activation
        io = 4 * th * W * C * 4                 # double-buffered input + output blocks
        return rolled + hidden + io

    ok = [d for d in cand if step_bytes(d) <= tile_budget]
    return ok[-1] if ok else cand[0]


def _pick_conv_chunk(TH, W, C):
    """Rows per dwconv chunk so the (CH, W, C) f32 accumulator stays within ~16 vregs."""
    per_row = ((W + 7) // 8) * ((C + 127) // 128)
    ch = max(1, 16 // max(per_row, 1))
    ch = min(ch, TH)
    while TH % ch != 0:
        ch -= 1
    return ch


def convnext_block_nhwc(x_nhwc, params, *, eps=1e-6, row_tile=None,
                        approx_gelu=False, dwconv_bf16=False):
    """Fused ConvNeXt block on a channels-last (N, H, W, C) tensor."""
    N, H, W, C = x_nhwc.shape
    dww, dwb, lnw, lnb, w1, b1, w2, b2, gamma = params
    C4 = 4 * C

    # ---- fold LayerNorm affine + layer scale into the MLP weights (f32 fold, then bf16) ----
    #   h  = (xn*lnw + lnb) @ w1 + b1 = xn @ (lnw[:,None]*w1) + (b1 + lnb@w1)
    #   y  = (h2 @ w2 + b2) * gamma   = h2 @ (w2*gamma)       + b2*gamma
    lnw_f = lnw.reshape(C).astype(jnp.float32)
    lnb_f = lnb.reshape(1, C).astype(jnp.float32)
    gam_f = gamma.reshape(1, C).astype(jnp.float32)
    w1f = w1.astype(jnp.float32)
    w2f = w2.astype(jnp.float32)
    w1_folded = (lnw_f[:, None] * w1f).astype(jnp.bfloat16)                 # (C, 4C) bf16
    b1_folded = b1.reshape(1, C4).astype(jnp.float32) + lnb_f @ w1f         # (1, 4C) f32
    w2_folded = (w2f * gam_f).astype(jnp.bfloat16)                          # (4C, C) bf16
    b2_folded = b2.reshape(1, C).astype(jnp.float32) * gam_f                # (1, C)  f32

    # ---- generation-aware VMEM budgets ----
    cap = _vmem_capacity_bytes()
    if cap >= (100 << 20):          # v5e / v6e: 128 MiB physical VMEM, slower HBM -> bigger tiles
        tile_budget, vmem_limit = 40 << 20, 80 << 20
    else:                           # v7x: 64 MiB physical VMEM -> conservative
        tile_budget, vmem_limit = 14 << 20, 48 << 20

    TH = _pick_row_tile(H, W, C, tile_budget) if row_tile is None else int(row_tile)
    assert H % TH == 0, "row_tile must divide H"
    assert TH == H or TH % 8 == 0, "row_tile must be a multiple of 8 (or H itself)"
    HT = H // TH
    has_halo = HT > 1
    WP = _round_up(W + 3, 8)        # padded conv width (right zero tail doubles as left halo)
    WM = _round_up(W, 8)            # MLP width (layout-free reshapes)
    CH = _pick_conv_chunk(TH, W, C)

    kernel = _make_kernel(TH=TH, W=W, C=C, WP=WP, WM=WM, CH=CH, eps=eps,
                          has_halo=has_halo, approx_gelu=approx_gelu,
                          dw_bf16=dwconv_bf16)

    x_spec = pl.BlockSpec((None, TH, W, C), lambda b, t: (b, t, 0, 0))
    out_spec = pl.BlockSpec((None, TH, W, C), lambda b, t: (b, t, 0, 0))
    # TODO(synk): on v7x, pipeline_mode=pl.Buffered(1) on these constant-index param blocks
    # would halve their VMEM footprint (they never change across the grid).
    param_specs = [
        pl.BlockSpec((7, 7, C), lambda b, t: (0, 0, 0)),   # dwconv weight
        pl.BlockSpec((1, C),    lambda b, t: (0, 0)),      # dwconv bias (f32)
        pl.BlockSpec((C, C4),   lambda b, t: (0, 0)),      # pwconv1 weight (LN-folded, bf16)
        pl.BlockSpec((1, C4),   lambda b, t: (0, 0)),      # pwconv1 bias   (LN-folded, f32)
        pl.BlockSpec((C4, C),   lambda b, t: (0, 0)),      # pwconv2 weight (gamma-folded, bf16)
        pl.BlockSpec((1, C),    lambda b, t: (0, 0)),      # pwconv2 bias   (gamma-folded, f32)
    ]
    params_in = (dww, dwb.reshape(1, C).astype(jnp.float32),
                 w1_folded, b1_folded, w2_folded, b2_folded)

    if has_halo:
        # Halo rows come from the neighbouring 8-row blocks of the SAME input array:
        # no host padding; 16 extra rows of DMA per tile (amortized by larger TH when auto-picked).
        rpb = TH // 8
        last8 = H // 8 - 1
        prev_spec = pl.BlockSpec(
            (None, 8, W, C), lambda b, t: (b, jnp.maximum(t * rpb - 1, 0), 0, 0))
        next_spec = pl.BlockSpec(
            (None, 8, W, C), lambda b, t: (b, jnp.minimum((t + 1) * rpb, last8), 0, 0))
        in_specs = [x_spec, prev_spec, next_spec] + param_specs
        inputs = (x_nhwc, x_nhwc, x_nhwc) + params_in
    else:
        in_specs = [x_spec] + param_specs
        inputs = (x_nhwc,) + params_in

    out_nhwc = pl.pallas_call(
        kernel,
        out_shape=jax.ShapeDtypeStruct((N, H, W, C), x_nhwc.dtype),
        grid_spec=pltpu.PrefetchScalarGridSpec(
            num_scalar_prefetch=0,
            grid=(N, HT),
            in_specs=in_specs,
            out_specs=out_spec,
            scratch_shapes=[pltpu.VMEM((TH + 6, WP, C), jnp.float32),
                            pltpu.VMEM((TH, WM, C), jnp.bfloat16)],
        ),
        compiler_params=pltpu.CompilerParams(
            dimension_semantics=("parallel", "parallel"),
            vmem_limit_bytes=vmem_limit,
        ),
    )(*inputs)
    return out_nhwc


def convnext_block(x_nchw, params, *, eps=1e-6, row_tile=None,
                   approx_gelu=False, dwconv_bf16=False):
    """PyTorch-interface wrapper: (N, C, H, W) in / out.
    (A model kept in NHWC end-to-end should call convnext_block_nhwc directly and skip
    the two transposes below — they are layout plumbing for the torch interface.)"""
    x_nhwc = jnp.transpose(x_nchw, (0, 2, 3, 1))
    out_nhwc = convnext_block_nhwc(x_nhwc, params, eps=eps, row_tile=row_tile,
                                   approx_gelu=approx_gelu, dwconv_bf16=dwconv_bf16)
    return jnp.transpose(out_nhwc, (0, 3, 1, 2))


def init_params(key, dim, layer_scale_init_value=1e-6):
    """Synthetic parameters with the layouts the PyTorch module implies.
    dwconv: torch (C,1,7,7) -> stored (7,7,C) with dww[ky,kx,c] == torch_w[c,0,ky,kx]
    pwconv1: torch Linear weight (4C,C) -> stored transposed (C,4C)
    pwconv2: torch Linear weight (C,4C) -> stored transposed (4C,C)
    """
    ks = jax.random.split(key, 6)
    C, C4 = dim, 4 * dim
    dww = jax.random.normal(ks[0], (7, 7, C), jnp.float32) * (1.0 / 7.0)
    dwb = jax.random.normal(ks[1], (1, C), jnp.float32) * 0.02
    lnw = jnp.ones((1, C), jnp.float32)
    lnb = jnp.zeros((1, C), jnp.float32)
    w1 = jax.random.normal(ks[2], (C, C4), jnp.float32) * (1.0 / math.sqrt(C))
    b1 = jax.random.normal(ks[3], (1, C4), jnp.float32) * 0.02
    w2 = jax.random.normal(ks[4], (C4, C), jnp.float32) * (1.0 / math.sqrt(C4))
    b2 = jax.random.normal(ks[5], (1, C), jnp.float32) * 0.02
    gamma = jnp.full((1, C), layer_scale_init_value, jnp.float32)
    return (dww, dwb, lnw, lnb, w1, b1, w2, b2, gamma)


def convnext_block_ref(x_nchw, params, *, eps=1e-6):
    """Pure-JAX (XLA) reference for numerical validation."""
    dww, dwb, lnw, lnb, w1, b1, w2, b2, gamma = params
    x = jnp.transpose(x_nchw, (0, 2, 3, 1)).astype(jnp.float32)      # NHWC
    C = x.shape[-1]
    y = lax.conv_general_dilated(
        x, dww[:, :, None, :],                                       # HWIO kernel, groups=C
        window_strides=(1, 1), padding=((3, 3), (3, 3)),
        dimension_numbers=("NHWC", "HWIO", "NHWC"),
        feature_group_count=C, precision=lax.Precision.HIGHEST)
    y = y + dwb.reshape(1, 1, 1, C)
    u = y.mean(-1, keepdims=True)
    v = ((y - u) ** 2).mean(-1, keepdims=True)
    y = (y - u) * lax.rsqrt(v + eps) * lnw.reshape(1, 1, 1, C) + lnb.reshape(1, 1, 1, C)
    h = jnp.einsum("nhwc,cd->nhwd", y, w1,
                   precision=lax.Precision.HIGHEST) + b1.reshape(1, 1, 1, -1)
    h = 0.5 * h * (1.0 + lax.erf(h * (1.0 / math.sqrt(2.0))))
    o = jnp.einsum("nhwd,dc->nhwc", h, w2,
                   precision=lax.Precision.HIGHEST) + b2.reshape(1, 1, 1, C)
    o = o * gamma.reshape(1, 1, 1, C)
    return jnp.transpose(x + o, (0, 3, 1, 2))


if __name__ == "__main__":
    N, C, H, W = 2, 32, 16, 16        # dim=32 -> hidden=128 (one MXU lane tile)
    key = jax.random.PRNGKey(0)
    kx_, kp = jax.random.split(key)
    x = jax.random.normal(kx_, (N, C, H, W), jnp.float32)
    # layer_scale=0.5 (instead of the 1e-6 init) so the MLP branch is visible to the check.
    params = init_params(kp, C, layer_scale_init_value=0.5)

    # row_tile=8 -> 2 row tiles per image: exercises the halo path + H pipelining.
    out = convnext_block(x, params, row_tile=8)
    out = jax.block_until_ready(out)
    assert out.shape == (N, C, H, W)
    assert bool(jnp.all(jnp.isfinite(out)))

    # numerical check vs a pure-JAX reference (bf16 MXU matmuls -> loose tolerance)
    ref = convnext_block_ref(x, params)
    err = float(jnp.max(jnp.abs(out - ref)))
    assert err < 5e-2, f"max abs error {err}"
    print("KERNEL_OK")
</pallas_src>

<mosaic_0001>
module attributes {stable_mosaic.version = 11 : i64} {
  func.func @kernel(%arg0: i32, %arg1: i32, %arg2: memref<1x8x16x32xf32, #tpu.memory_space<vmem>>, %arg3: memref<1x8x16x32xf32, #tpu.memory_space<vmem>>, %arg4: memref<1x8x16x32xf32, #tpu.memory_space<vmem>>, %arg5: memref<7x7x32xf32, #tpu.memory_space<vmem>>, %arg6: memref<1x32xf32, #tpu.memory_space<vmem>>, %arg7: memref<32x128xbf16, #tpu.memory_space<vmem>>, %arg8: memref<1x128xf32, #tpu.memory_space<vmem>>, %arg9: memref<128x32xbf16, #tpu.memory_space<vmem>>, %arg10: memref<1x32xf32, #tpu.memory_space<vmem>>, %arg11: memref<1x8x16x32xf32, #tpu.memory_space<vmem>>, %arg12: memref<14x24x32xf32, #tpu.memory_space<vmem>>, %arg13: memref<8x16x32xbf16, #tpu.memory_space<vmem>>) attributes {dimension_semantics = [#tpu.dimension_semantics<parallel>, #tpu.dimension_semantics<parallel>], iteration_bounds = array<i64: 2, 2>, scalar_prefetch = 0 : i64, scratch_operands = 2 : i64, tpu.core_type = #tpu.core_type<tc>, window_params = [{transform_indices = @transform_0, window_bounds = array<i64: 1, 8, 16, 32>}, {transform_indices = @transform_1, window_bounds = array<i64: 1, 8, 16, 32>}, {transform_indices = @transform_2, window_bounds = array<i64: 1, 8, 16, 32>}, {pipeline_mode = #tpu.pipeline_mode<synchronous>, transform_indices = @transform_3, window_bounds = array<i64: 7, 7, 32>}, {pipeline_mode = #tpu.pipeline_mode<synchronous>, transform_indices = @transform_4, window_bounds = array<i64: 1, 32>}, {pipeline_mode = #tpu.pipeline_mode<synchronous>, transform_indices = @transform_5, window_bounds = array<i64: 32, 128>}, {pipeline_mode = #tpu.pipeline_mode<synchronous>, transform_indices = @transform_6, window_bounds = array<i64: 1, 128>}, {pipeline_mode = #tpu.pipeline_mode<synchronous>, transform_indices = @transform_7, window_bounds = array<i64: 128, 32>}, {pipeline_mode = #tpu.pipeline_mode<synchronous>, transform_indices = @transform_8, window_bounds = array<i64: 1, 32>}, {transform_indices = @transform_9, window_bounds = array<i64: 1, 8, 16, 32>}]} {
    %cst = arith.constant 0.000000e+00 : f32
    %0 = vector.broadcast %cst : f32 to vector<14x8x32xf32>
    %c0 = arith.constant 0 : index
    %c16 = arith.constant 16 : index
    %c0_0 = arith.constant 0 : index
    %1 = vector.load %arg12[%c0, %c16, %c0_0] : memref<14x24x32xf32, #tpu.memory_space<vmem>>, vector<14x8x32xf32>
    tpu.vector_store %arg12[%c0, %c16, %c0_0], %0 {strides = array<i32>} : memref<14x24x32xf32, #tpu.memory_space<vmem>>, vector<14x8x32xf32>,
    %c0_1 = arith.constant 0 : index
    %c0_2 = arith.constant 0 : index
    %c0_3 = arith.constant 0 : index
    %c0_4 = arith.constant 0 : index
    %2 = vector.load %arg2[%c0_1, %c0_2, %c0_3, %c0_4] : memref<1x8x16x32xf32, #tpu.memory_space<vmem>>, vector<1x8x16x32xf32>
    %3 = vector.shape_cast %2 : vector<1x8x16x32xf32> to vector<8x16x32xf32>
    %c3 = arith.constant 3 : index
    %c0_5 = arith.constant 0 : index
    %c0_6 = arith.constant 0 : index
    %4 = vector.load %arg12[%c3, %c0_5, %c0_6] : memref<14x24x32xf32, #tpu.memory_space<vmem>>, vector<8x16x32xf32>
    tpu.vector_store %arg12[%c3, %c0_5, %c0_6], %3 {strides = array<i32>} : memref<14x24x32xf32, #tpu.memory_space<vmem>>, vector<8x16x32xf32>,
    %c0_7 = arith.constant 0 : index
    %c5 = arith.constant 5 : index
    %c0_8 = arith.constant 0 : index
    %c0_9 = arith.constant 0 : index
    %5 = vector.load %arg3[%c0_7, %c5, %c0_8, %c0_9] : memref<1x8x16x32xf32, #tpu.memory_space<vmem>>, vector<1x3x16x32xf32>
    %6 = vector.shape_cast %5 : vector<1x3x16x32xf32> to vector<3x16x32xf32>
    %c0_10 = arith.constant 0 : index
    %c0_11 = arith.constant 0 : index
    %c0_12 = arith.constant 0 : index
    %c0_13 = arith.constant 0 : index
    %7 = vector.load %arg4[%c0_10, %c0_11, %c0_12, %c0_13] : memref<1x8x16x32xf32, #tpu.memory_space<vmem>>, vector<1x3x16x32xf32>
    %8 = vector.shape_cast %7 : vector<1x3x16x32xf32> to vector<3x16x32xf32>
    %c0_i32 = arith.constant 0 : i32
    %9 = arith.cmpi sgt, %arg1, %c0_i32 : i32
    %cst_14 = arith.constant 0.000000e+00 : f32
    %10 = vector.broadcast %cst_14 : f32 to vector<3x16x32xf32>
    %11 = arith.select %9, %6, %10 : vector<3x16x32xf32>
    %c0_15 = arith.constant 0 : index
    %c0_16 = arith.constant 0 : index
    %c0_17 = arith.constant 0 : index
    %12 = vector.load %arg12[%c0_15, %c0_16, %c0_17] : memref<14x24x32xf32, #tpu.memory_space<vmem>>, vector<3x16x32xf32>
    tpu.vector_store %arg12[%c0_15, %c0_16, %c0_17], %11 {strides = array<i32>} : memref<14x24x32xf32, #tpu.memory_space<vmem>>, vector<3x16x32xf32>,
    %c1_i32 = arith.constant 1 : i32
    %13 = arith.cmpi slt, %arg1, %c1_i32 : i32
    %cst_18 = arith.constant 0.000000e+00 : f32
    %14 = vector.broadcast %cst_18 : f32 to vector<3x16x32xf32>
    %15 = arith.select %13, %8, %14 : vector<3x16x32xf32>
    %c11 = arith.constant 11 : index
    %c0_19 = arith.constant 0 : index
    %c0_20 = arith.constant 0 : index
    %16 = vector.load %arg12[%c11, %c0_19, %c0_20] : memref<14x24x32xf32, #tpu.memory_space<vmem>>, vector<3x16x32xf32>
    tpu.vector_store %arg12[%c11, %c0_19, %c0_20], %15 {strides = array<i32>} : memref<14x24x32xf32, #tpu.memory_space<vmem>>, vector<3x16x32xf32>,
    %c0_21 = arith.constant 0 : index
    %c0_22 = arith.constant 0 : index
    %c0_23 = arith.constant 0 : index
    %17 = vector.load %arg12[%c0_21, %c0_22, %c0_23] : memref<14x24x32xf32, #tpu.memory_space<vmem>>, vector<14x24x32xf32>
    %c3_i32 = arith.constant 3 : i32
    %18 = tpu.dynamic_rotate %17 by %c3_i32 dim 1 : vector<14x24x32xf32>, i32 -> vector<14x24x32xf32>
    %c2_i32 = arith.constant 2 : i32
    %19 = tpu.dynamic_rotate %17 by %c2_i32 dim 1 : vector<14x24x32xf32>, i32 -> vector<14x24x32xf32>
    %c1_i32_24 = arith.constant 1 : i32
    %20 = tpu.dynamic_rotate %17 by %c1_i32_24 dim 1 : vector<14x24x32xf32>, i32 -> vector<14x24x32xf32>
    %c23_i32 = arith.constant 23 : i32
    %21 = tpu.dynamic_rotate %17 by %c23_i32 dim 1 : vector<14x24x32xf32>, i32 -> vector<14x24x32xf32>
    %c22_i32 = arith.constant 22 : i32
    %22 = tpu.dynamic_rotate %17 by %c22_i32 dim 1 : vector<14x24x32xf32>, i32 -> vector<14x24x32xf32>
    %c21_i32 = arith.constant 21 : i32
    %23 = tpu.dynamic_rotate %17 by %c21_i32 dim 1 : vector<14x24x32xf32>, i32 -> vector<14x24x32xf32>
    %c0_25 = arith.constant 0 : index
    %c0_26 = arith.constant 0 : index
    %c0_27 = arith.constant 0 : index
    %24 = vector.load %arg5[%c0_25, %c0_26, %c0_27] : memref<7x7x32xf32, #tpu.memory_space<vmem>>, vector<7x7x32xf32>
    %25 = vector.extract_strided_slice %24 {offsets = [0, 0, 0], sizes = [1, 1, 32], strides = [1, 1, 1]} : vector<7x7x32xf32> to vector<1x1x32xf32>
    %26 = vector.shape_cast %25 : vector<1x1x32xf32> to vector<32xf32>
    %27 = vector.extract_strided_slice %24 {offsets = [0, 1, 0], sizes = [1, 1, 32], strides = [1, 1, 1]} : vector<7x7x32xf32> to vector<1x1x32xf32>
    %28 = vector.shape_cast %27 : vector<1x1x32xf32> to vector<32xf32>
    %29 = vector.extract_strided_slice %24 {offsets = [0, 2, 0], sizes = [1, 1, 32], strides = [1, 1, 1]} : vector<7x7x32xf32> to vector<1x1x32xf32>
    %30 = vector.shape_cast %29 : vector<1x1x32xf32> to vector<32xf32>
    %31 = vector.extract_strided_slice %24 {offsets = [0, 3, 0], sizes = [1, 1, 32], strides = [1, 1, 1]} : vector<7x7x32xf32> to vector<1x1x32xf32>
    %32 = vector.shape_cast %31 : vector<1x1x32xf32> to vector<32xf32>
    %33 = vector.extract_strided_slice %24 {offsets = [0, 4, 0], sizes = [1, 1, 32], strides = [1, 1, 1]} : vector<7x7x32xf32> to vector<1x1x32xf32>
    %34 = vector.shape_cast %33 : vector<1x1x32xf32> to vector<32xf32>
    %35 = vector.extract_strided_slice %24 {offsets = [0, 5, 0], sizes = [1, 1, 32], strides = [1, 1, 1]} : vector<7x7x32xf32> to vector<1x1x32xf32>
    %36 = vector.shape_cast %35 : vector<1x1x32xf32> to vector<32xf32>
    %37 = vector.extract_strided_slice %24 {offsets = [0, 6, 0], sizes = [1, 1, 32], strides = [1, 1, 1]} : vector<7x7x32xf32> to vector<1x1x32xf32>
    %38 = vector.shape_cast %37 : vector<1x1x32xf32> to vector<32xf32>
    %39 = vector.extract_strided_slice %24 {offsets = [1, 0, 0], sizes = [1, 1, 32], strides = [1, 1, 1]} : vector<7x7x32xf32> to vector<1x1x32xf32>
    %40 = vector.shape_cast %39 : vector<1x1x32xf32> to vector<32xf32>
    %41 = vector.extract_strided_slice %24 {offsets = [1, 1, 0], sizes = [1, 1, 32], strides = [1, 1, 1]} : vector<7x7x32xf32> to vector<1x1x32xf32>
    %42 = vector.shape_cast %41 : vector<1x1x32xf32> to vector<32xf32>
    %43 = vector.extract_strided_slice %24 {offsets = [1, 2, 0], sizes = [1, 1, 32], strides = [1, 1, 1]} : vector<7x7x32xf32> to vector<1x1x32xf32>
    %44 = vector.shape_cast %43 : vector<1x1x32xf32> to vector<32xf32>
    %45 = vector.extract_strided_slice %24 {offsets = [1, 3, 0], sizes = [1, 1, 32], strides = [1, 1, 1]} : vector<7x7x32xf32> to vector<1x1x32xf32>
    %46 = vector.shape_cast %45 : vector<1x1x32xf32> to vector<32xf32>
    %47 = vector.extract_strided_slice %24 {offsets = [1, 4, 0], sizes = [1, 1, 32], strides = [1, 1, 1]} : vector<7x7x32xf32> to vector<1x1x32xf32>
    %48 = vector.shape_cast %47 : vector<1x1x32xf32> to vector<32xf32>
    %49 = vector.extract_strided_slice %24 {offsets = [1, 5, 0], sizes = [1, 1, 32], strides = [1, 1, 1]} : vector<7x7x32xf32> to vector<1x1x32xf32>
    %50 = vector.shape_cast %49 : vector<1x1x32xf32> to vector<32xf32>
    %51 = vector.extract_strided_slice %24 {offsets = [1, 6, 0], sizes = [1, 1, 32], strides = [1, 1, 1]} : vector<7x7x32xf32> to vector<1x1x32xf32>
    %52 = vector.shape_cast %51 : vector<1x1x32xf32> to vector<32xf32>
    %53 = vector.extract_strided_slice %24 {offsets = [2, 0, 0], sizes = [1, 1, 32], strides = [1, 1, 1]} : vector<7x7x32xf32> to vector<1x1x32xf32>
    %54 = vector.shape_cast %53 : vector<1x1x32xf32> to vector<32xf32>
    %55 = vector.extract_strided_slice %24 {offsets = [2, 1, 0], sizes = [1, 1, 32], strides = [1, 1, 1]} : vector<7x7x32xf32> to vector<1x1x32xf32>
    %56 = vector.shape_cast %55 : vector<1x1x32xf32> to vector<32xf32>
    %57 = vector.extract_strided_slice %24 {offsets = [2, 2, 0], sizes = [1, 1, 32], strides = [1, 1, 1]} : vector<7x7x32xf32> to vector<1x1x32xf32>
    %58 = vector.shape_cast %57 : vector<1x1x32xf32> to vector<32xf32>
    %59 = vector.extract_strided_slice %24 {offsets = [2, 3, 0], sizes = [1, 1, 32], strides = [1, 1, 1]} : vector<7x7x32xf32> to vector<1x1x32xf32>
    %60 = vector.shape_cast %59 : vector<1x1x32xf32> to vector<32xf32>
    %61 = vector.extract_strided_slice %24 {offsets = [2, 4, 0], sizes = [1, 1, 32], strides = [1, 1, 1]} : vector<7x7x32xf32> to vector<1x1x32xf32>
    %62 = vector.shape_cast %61 : vector<1x1x32xf32> to vector<32xf32>
    %63 = vector.extract_strided_slice %24 {offsets = [2, 5, 0], sizes = [1, 1, 32], strides = [1, 1, 1]} : vector<7x7x32xf32> to vector<1x1x32xf32>
    %64 = vector.shape_cast %63 : vector<1x1x32xf32> to vector<32xf32>
    %65 = vector.extract_strided_slice %24 {offsets = [2, 6, 0], sizes = [1, 1, 32], strides = [1, 1, 1]} : vector<7x7x32xf32> to vector<1x1x32xf32>
    %66 = vector.shape_cast %65 : vector<1x1x32xf32> to vector<32xf32>
    %67 = vector.extract_strided_slice %24 {offsets = [3, 0, 0], sizes = [1, 1, 32], strides = [1, 1, 1]} : vector<7x7x32xf32> to vector<1x1x32xf32>
    %68 = vector.shape_cast %67 : vector<1x1x32xf32> to vector<32xf32>
    %69 = vector.extract_strided_slice %24 {offsets = [3, 1, 0], sizes = [1, 1, 32], strides = [1, 1, 1]} : vector<7x7x32xf32> to vector<1x1x32xf32>
    %70 = vector.shape_cast %69 : vector<1x1x32xf32> to vector<32xf32>
    %71 = vector.extract_strided_slice %24 {offsets = [3, 2, 0], sizes = [1, 1, 32], strides = [1, 1, 1]} : vector<7x7x32xf32> to vector<1x1x32xf32>
    %72 = vector.shape_cast %71 : vector<1x1x32xf32> to vector<32xf32>
    %73 = vector.extract_strided_slice %24 {offsets = [3, 3, 0], sizes = [1, 1, 32], strides = [1, 1, 1]} : vector<7x7x32xf32> to vector<1x1x32xf32>
    %74 = vector.shape_cast %73 : vector<1x1x32xf32> to vector<32xf32>
    %75 = vector.extract_strided_slice %24 {offsets = [3, 4, 0], sizes = [1, 1, 32], strides = [1, 1, 1]} : vector<7x7x32xf32> to vector<1x1x32xf32>
    %76 = vector.shape_cast %75 : vector<1x1x32xf32> to vector<32xf32>
    %77 = vector.extract_strided_slice %24 {offsets = [3, 5, 0], sizes = [1, 1, 32], strides = [1, 1, 1]} : vector<7x7x32xf32> to vector<1x1x32xf32>
    %78 = vector.shape_cast %77 : vector<1x1x32xf32> to vector<32xf32>
    %79 = vector.extract_strided_slice %24 {offsets = [3, 6, 0], sizes = [1, 1, 32], strides = [1, 1, 1]} : vector<7x7x32xf32> to vector<1x1x32xf32>
    %80 = vector.shape_cast %79 : vector<1x1x32xf32> to vector<32xf32>
    %81 = vector.extract_strided_slice %24 {offsets = [4, 0, 0], sizes = [1, 1, 32], strides = [1, 1, 1]} : vector<7x7x32xf32> to vector<1x1x32xf32>
    %82 = vector.shape_cast %81 : vector<1x1x32xf32> to vector<32xf32>
    %83 = vector.extract_strided_slice %24 {offsets = [4, 1, 0], sizes = [1, 1, 32], strides = [1, 1, 1]} : vector<7x7x32xf32> to vector<1x1x32xf32>
    %84 = vector.shape_cast %83 : vector<1x1x32xf32> to vector<32xf32>
    %85 = vector.extract_strided_slice %24 {offsets = [4, 2, 0], sizes = [1, 1, 32], strides = [1, 1, 1]} : vector<7x7x32xf32> to vector<1x1x32xf32>
    %86 = vector.shape_cast %85 : vector<1x1x32xf32> to vector<32xf32>
    %87 = vector.extract_strided_slice %24 {offsets = [4, 3, 0], sizes = [1, 1, 32], strides = [1, 1, 1]} : vector<7x7x32xf32> to vector<1x1x32xf32>
    %88 = vector.shape_cast %87 : vector<1x1x32xf32> to vector<32xf32>
    %89 = vector.extract_strided_slice %24 {offsets = [4, 4, 0], sizes = [1, 1, 32], strides = [1, 1, 1]} : vector<7x7x32xf32> to vector<1x1x32xf32>
    %90 = vector.shape_cast %89 : vector<1x1x32xf32> to vector<32xf32>
    %91 = vector.extract_strided_slice %24 {offsets = [4, 5, 0], sizes = [1, 1, 32], strides = [1, 1, 1]} : vector<7x7x32xf32> to vector<1x1x32xf32>
    %92 = vector.shape_cast %91 : vector<1x1x32xf32> to vector<32xf32>
    %93 = vector.extract_strided_slice %24 {offsets = [4, 6, 0], sizes = [1, 1, 32], strides = [1, 1, 1]} : vector<7x7x32xf32> to vector<1x1x32xf32>
    %94 = vector.shape_cast %93 : vector<1x1x32xf32> to vector<32xf32>
    %95 = vector.extract_strided_slice %24 {offsets = [5, 0, 0], sizes = [1, 1, 32], strides = [1, 1, 1]} : vector<7x7x32xf32> to vector<1x1x32xf32>
    %96 = vector.shape_cast %95 : vector<1x1x32xf32> to vector<32xf32>
    %97 = vector.extract_strided_slice %24 {offsets = [5, 1, 0], sizes = [1, 1, 32], strides = [1, 1, 1]} : vector<7x7x32xf32> to vector<1x1x32xf32>
    %98 = vector.shape_cast %97 : vector<1x1x32xf32> to vector<32xf32>
    %99 = vector.extract_strided_slice %24 {offsets = [5, 2, 0], sizes = [1, 1, 32], strides = [1, 1, 1]} : vector<7x7x32xf32> to vector<1x1x32xf32>
    %100 = vector.shape_cast %99 : vector<1x1x32xf32> to vector<32xf32>
    %101 = vector.extract_strided_slice %24 {offsets = [5, 3, 0], sizes = [1, 1, 32], strides = [1, 1, 1]} : vector<7x7x32xf32> to vector<1x1x32xf32>
    %102 = vector.shape_cast %101 : vector<1x1x32xf32> to vector<32xf32>
    %103 = vector.extract_strided_slice %24 {offsets = [5, 4, 0], sizes = [1, 1, 32], strides = [1, 1, 1]} : vector<7x7x32xf32> to vector<1x1x32xf32>
    %104 = vector.shape_cast %103 : vector<1x1x32xf32> to vector<32xf32>
    %105 = vector.extract_strided_slice %24 {offsets = [5, 5, 0], sizes = [1, 1, 32], strides = [1, 1, 1]} : vector<7x7x32xf32> to vector<1x1x32xf32>
    %106 = vector.shape_cast %105 : vector<1x1x32xf32> to vector<32xf32>
    %107 = vector.extract_strided_slice %24 {offsets = [5, 6, 0], sizes = [1, 1, 32], strides = [1, 1, 1]} : vector<7x7x32xf32> to vector<1x1x32xf32>
    %108 = vector.shape_cast %107 : vector<1x1x32xf32> to vector<32xf32>
    %109 = vector.extract_strided_slice %24 {offsets = [6, 0, 0], sizes = [1, 1, 32], strides = [1, 1, 1]} : vector<7x7x32xf32> to vector<1x1x32xf32>
    %110 = vector.shape_cast %109 : vector<1x1x32xf32> to vector<32xf32>
    %111 = vector.extract_strided_slice %24 {offsets = [6, 1, 0], sizes = [1, 1, 32], strides = [1, 1, 1]} : vector<7x7x32xf32> to vector<1x1x32xf32>
    %112 = vector.shape_cast %111 : vector<1x1x32xf32> to vector<32xf32>
    %113 = vector.extract_strided_slice %24 {offsets = [6, 2, 0], sizes = [1, 1, 32], strides = [1, 1, 1]} : vector<7x7x32xf32> to vector<1x1x32xf32>
    %114 = vector.shape_cast %113 : vector<1x1x32xf32> to vector<32xf32>
    %115 = vector.extract_strided_slice %24 {offsets = [6, 3, 0], sizes = [1, 1, 32], strides = [1, 1, 1]} : vector<7x7x32xf32> to vector<1x1x32xf32>
    %116 = vector.shape_cast %115 : vector<1x1x32xf32> to vector<32xf32>
    %117 = vector.extract_strided_slice %24 {offsets = [6, 4, 0], sizes = [1, 1, 32], strides = [1, 1, 1]} : vector<7x7x32xf32> to vector<1x1x32xf32>
    %118 = vector.shape_cast %117 : vector<1x1x32xf32> to vector<32xf32>
    %119 = vector.extract_strided_slice %24 {offsets = [6, 5, 0], sizes = [1, 1, 32], strides = [1, 1, 1]} : vector<7x7x32xf32> to vector<1x1x32xf32>
    %120 = vector.shape_cast %119 : vector<1x1x32xf32> to vector<32xf32>
    %121 = vector.extract_strided_slice %24 {offsets = [6, 6, 0], sizes = [1, 1, 32], strides = [1, 1, 1]} : vector<7x7x32xf32> to vector<1x1x32xf32>
    %122 = vector.shape_cast %121 : vector<1x1x32xf32> to vector<32xf32>
    %c0_28 = arith.constant 0 : index
    %c0_29 = arith.constant 0 : index
    %123 = vector.load %arg6[%c0_28, %c0_29] : memref<1x32xf32, #tpu.memory_space<vmem>>, vector<1x32xf32>
    %cst_30 = arith.constant 0.000000e+00 : f32
    %124 = vector.broadcast %cst_30 : f32 to vector<8x16x32xf32>
    %125 = vector.extract_strided_slice %18 {offsets = [0, 0, 0], sizes = [8, 16, 32], strides = [1, 1, 1]} : vector<14x24x32xf32> to vector<8x16x32xf32>
    %126 = vector.shape_cast %26 : vector<32xf32> to vector<1x1x32xf32>
    %127 = vector.broadcast %126 : vector<1x1x32xf32> to vector<8x16x32xf32>
    %128 = arith.mulf %125, %127 : vector<8x16x32xf32>
    %129 = arith.addf %124, %128 : vector<8x16x32xf32>
    %130 = vector.extract_strided_slice %19 {offsets = [0, 0, 0], sizes = [8, 16, 32], strides = [1, 1, 1]} : vector<14x24x32xf32> to vector<8x16x32xf32>
    %131 = vector.shape_cast %28 : vector<32xf32> to vector<1x1x32xf32>
    %132 = vector.broadcast %131 : vector<1x1x32xf32> to vector<8x16x32xf32>
    %133 = arith.mulf %130, %132 : vector<8x16x32xf32>
    %134 = arith.addf %129, %133 : vector<8x16x32xf32>
    %135 = vector.extract_strided_slice %20 {offsets = [0, 0, 0], sizes = [8, 16, 32], strides = [1, 1, 1]} : vector<14x24x32xf32> to vector<8x16x32xf32>
    %136 = vector.shape_cast %30 : vector<32xf32> to vector<1x1x32xf32>
    %137 = vector.broadcast %136 : vector<1x1x32xf32> to vector<8x16x32xf32>
    %138 = arith.mulf %135, %137 : vector<8x16x32xf32>
    %139 = arith.addf %134, %138 : vector<8x16x32xf32>
    %140 = vector.extract_strided_slice %17 {offsets = [0, 0, 0], sizes = [8, 16, 32], strides = [1, 1, 1]} : vector<14x24x32xf32> to vector<8x16x32xf32>
    %141 = vector.shape_cast %32 : vector<32xf32> to vector<1x1x32xf32>
    %142 = vector.broadcast %141 : vector<1x1x32xf32> to vector<8x16x32xf32>
    %143 = arith.mulf %140, %142 : vector<8x16x32xf32>
    %144 = arith.addf %139, %143 : vector<8x16x32xf32>
    %145 = vector.extract_strided_slice %21 {offsets = [0, 0, 0], sizes = [8, 16, 32], strides = [1, 1, 1]} : vector<14x24x32xf32> to vector<8x16x32xf32>
    %146 = vector.shape_cast %34 : vector<32xf32> to vector<1x1x32xf32>
    %147 = vector.broadcast %146 : vector<1x1x32xf32> to vector<8x16x32xf32>
    %148 = arith.mulf %145, %147 : vector<8x16x32xf32>
    %149 = arith.addf %144, %148 : vector<8x16x32xf32>
    %150 = vector.extract_strided_slice %22 {offsets = [0, 0, 0], sizes = [8, 16, 32], strides = [1, 1, 1]} : vector<14x24x32xf32> to vector<8x16x32xf32>
    %151 = vector.shape_cast %36 : vector<32xf32> to vector<1x1x32xf32>
    %152 = vector.broadcast %151 : vector<1x1x32xf32> to vector<8x16x32xf32>
    %153 = arith.mulf %150, %152 : vector<8x16x32xf32>
    %154 = arith.addf %149, %153 : vector<8x16x32xf32>
    %155 = vector.extract_strided_slice %23 {offsets = [0, 0, 0], sizes = [8, 16, 32], strides = [1, 1, 1]} : vector<14x24x32xf32> to vector<8x16x32xf32>
    %156 = vector.shape_cast %38 : vector<32xf32> to vector<1x1x32xf32>
    %157 = vector.broadcast %156 : vector<1x1x32xf32> to vector<8x16x32xf32>
    %158 = arith.mulf %155, %157 : vector<8x16x32xf32>
    %159 = arith.addf %154, %158 : vector<8x16x32xf32>
    %160 = vector.extract_strided_slice %18 {offsets = [1, 0, 0], sizes = [8, 16, 32], strides = [1, 1, 1]} : vector<14x24x32xf32> to vector<8x16x32xf32>
    %161 = vector.shape_cast %40 : vector<32xf32> to vector<1x1x32xf32>
    %162 = vector.broadcast %161 : vector<1x1x32xf32> to vector<8x16x32xf32>
    %163 = arith.mulf %160, %162 : vector<8x16x32xf32>
    %164 = arith.addf %159, %163 : vector<8x16x32xf32>
    %165 = vector.extract_strided_slice %19 {offsets = [1, 0, 0], sizes = [8, 16, 32], strides = [1, 1, 1]} : vector<14x24x32xf32> to vector<8x16x32xf32>
    %166 = vector.shape_cast %42 : vector<32xf32> to vector<1x1x32xf32>
    %167 = vector.broadcast %166 : vector<1x1x32xf32> to vector<8x16x32xf32>
    %168 = arith.mulf %165, %167 : vector<8x16x32xf32>
    %169 = arith.addf %164, %168 : vector<8x16x32xf32>
    %170 = vector.extract_strided_slice %20 {offsets = [1, 0, 0], sizes = [8, 16, 32], strides = [1, 1, 1]} : vector<14x24x32xf32> to vector<8x16x32xf32>
    %171 = vector.shape_cast %44 : vector<32xf32> to vector<1x1x32xf32>
    %172 = vector.broadcast %171 : vector<1x1x32xf32> to vector<8x16x32xf32>
    %173 = arith.mulf %170, %172 : vector<8x16x32xf32>
    %174 = arith.addf %169, %173 : vector<8x16x32xf32>
    %175 = vector.extract_strided_slice %17 {offsets = [1, 0, 0], sizes = [8, 16, 32], strides = [1, 1, 1]} : vector<14x24x32xf32> to vector<8x16x32xf32>
    %176 = vector.shape_cast %46 : vector<32xf32> to vector<1x1x32xf32>
    %177 = vector.broadcast %176 : vector<1x1x32xf32> to vector<8x16x32xf32>
    %178 = arith.mulf %175, %177 : vector<8x16x32xf32>
    %179 = arith.addf %174, %178 : vector<8x16x32xf32>
    %180 = vector.extract_strided_slice %21 {offsets = [1, 0, 0], sizes = [8, 16, 32], strides = [1, 1, 1]} : vector<14x24x32xf32> to vector<8x16x32xf32>
    %181 = vector.shape_cast %48 : vector<32xf32> to vector<1x1x32xf32>
    %182 = vector.broadcast %181 : vector<1x1x32xf32> to vector<8x16x32xf32>
    %183 = arith.mulf %180, %182 : vector<8x16x32xf32>
    %184 = arith.addf %179, %183 : vector<8x16x32xf32>
    %185 = vector.extract_strided_slice %22 {offsets = [1, 0, 0], sizes = [8, 16, 32], strides = [1, 1, 1]} : vector<14x24x32xf32> to vector<8x16x32xf32>
    %186 = vector.shape_cast %50 : vector<32xf32> to vector<1x1x32xf32>
    %187 = vector.broadcast %186 : vector<1x1x32xf32> to vector<8x16x32xf32>
    %188 = arith.mulf %185, %187 : vector<8x16x32xf32>
    %189 = arith.addf %184, %188 : vector<8x16x32xf32>
    %190 = vector.extract_strided_slice %23 {offsets = [1, 0, 0], sizes = [8, 16, 32], strides = [1, 1, 1]} : vector<14x24x32xf32> to vector<8x16x32xf32>
    %191 = vector.shape_cast %52 : vector<32xf32> to vector<1x1x32xf32>
    %192 = vector.broadcast %191 : vector<1x1x32xf32> to vector<8x16x32xf32>
    %193 = arith.mulf %190, %192 : vector<8x16x32xf32>
    %194 = arith.addf %189, %193 : vector<8x16x32xf32>
    %195 = vector.extract_strided_slice %18 {offsets = [2, 0, 0], sizes = [8, 16, 32], strides = [1, 1, 1]} : vector<14x24x32xf32> to vector<8x16x32xf32>
    %196 = vector.shape_cast %54 : vector<32xf32> to vector<1x1x32xf32>
    %197 = vector.broadcast %196 : vector<1x1x32xf32> to vector<8x16x32xf32>
    %198 = arith.mulf %195, %197 : vector<8x16x32xf32>
    %199 = arith.addf %194, %198 : vector<8x16x32xf32>
    %200 = vector.extract_strided_slice %19 {offsets = [2, 0, 0], sizes = [8, 16, 32], strides = [1, 1, 1]} : vector<14x24x32xf32> to vector<8x16x32xf32>
    %201 = vector.shape_cast %56 : vector<32xf32> to vector<1x1x32xf32>
    %202 = vector.broadcast %201 : vector<1x1x32xf32> to vector<8x16x32xf32>
    %203 = arith.mulf %200, %202 : vector<8x16x32xf32>
    %204 = arith.addf %199, %203 : vector<8x16x32xf32>
    %205 = vector.extract_strided_slice %20 {offsets = [2, 0, 0], sizes = [8, 16, 32], strides = [1, 1, 1]} : vector<14x24x32xf32> to vector<8x16x32xf32>
    %206 = vector.shape_cast %58 : vector<32xf32> to vector<1x1x32xf32>
    %207 = vector.broadcast %206 : vector<1x1x32xf32> to vector<8x16x32xf32>
    %208 = arith.mulf %205, %207 : vector<8x16x32xf32>
    %209 = arith.addf %204, %208 : vector<8x16x32xf32>
    %210 = vector.extract_strided_slice %17 {offsets = [2, 0, 0], sizes = [8, 16, 32], strides = [1, 1, 1]} : vector<14x24x32xf32> to vector<8x16x32xf32>
    %211 = vector.shape_cast %60 : vector<32xf32> to vector<1x1x32xf32>
    %212 = vector.broadcast %211 : vector<1x1x32xf32> to vector<8x16x32xf32>
    %213 = arith.mulf %210, %212 : vector<8x16x32xf32>
    %214 = arith.addf %209, %213 : vector<8x16x32xf32>
    %215 = vector.extract_strided_slice %21 {offsets = [2, 0, 0], sizes = [8, 16, 32], strides = [1, 1, 1]} : vector<14x24x32xf32> to vector<8x16x32xf32>
    %216 = vector.shape_cast %62 : vector<32xf32> to vector<1x1x32xf32>
    %217 = vector.broadcast %216 : vector<1x1x32xf32> to vector<8x16x32xf32>
    %218 = arith.mulf %215, %217 : vector<8x16x32xf32>
    %219 = arith.addf %214, %218 : vector<8x16x32xf32>
    %220 = vector.extract_strided_slice %22 {offsets = [2, 0, 0], sizes = [8, 16, 32], strides = [1, 1, 1]} : vector<14x24x32xf32> to vector<8x16x32xf32>
    %221 = vector.shape_cast %64 : vector<32xf32> to vector<1x1x32xf32>
    %222 = vector.broadcast %221 : vector<1x1x32xf32> to vector<8x16x32xf32>
    %223 = arith.mulf %220, %222 : vector<8x16x32xf32>
    %224 = arith.addf %219, %223 : vector<8x16x32xf32>
    %225 = vector.extract_strided_slice %23 {offsets = [2, 0, 0], sizes = [8, 16, 32], strides = [1, 1, 1]} : vector<14x24x32xf32> to vector<8x16x32xf32>
    %226 = vector.shape_cast %66 : vector<32xf32> to vector<1x1x32xf32>
    %227 = vector.broadcast %226 : vector<1x1x32xf32> to vector<8x16x32xf32>
    %228 = arith.mulf %225, %227 : vector<8x16x32xf32>
    %229 = arith.addf %224, %228 : vector<8x16x32xf32>
    %230 = vector.extract_strided_slice %18 {offsets = [3, 0, 0], sizes = [8, 16, 32], strides = [1, 1, 1]} : vector<14x24x32xf32> to vector<8x16x32xf32>
    %231 = vector.shape_cast %68 : vector<32xf32> to vector<1x1x32xf32>
    %232 = vector.broadcast %231 : vector<1x1x32xf32> to vector<8x16x32xf32>
    %233 = arith.mulf %230, %232 : vector<8x16x32xf32>
    %234 = arith.addf %229, %233 : vector<8x16x32xf32>
    %235 = vector.extract_strided_slice %19 {offsets = [3, 0, 0], sizes = [8, 16, 32], strides = [1, 1, 1]} : vector<14x24x32xf32> to vector<8x16x32xf32>
    %236 = vector.shape_cast %70 : vector<32xf32> to vector<1x1x32xf32>
    %237 = vector.broadcast %236 : vector<1x1x32xf32> to vector<8x16x32xf32>
    %238 = arith.mulf %235, %237 : vector<8x16x32xf32>
    %239 = arith.addf %234, %238 : vector<8x16x32xf32>
    %240 = vector.extract_strided_slice %20 {offsets = [3, 0, 0], sizes = [8, 16, 32], strides = [1, 1, 1]} : vector<14x24x32xf32> to vector<8x16x32xf32>
    %241 = vector.shape_cast %72 : vector<32xf32> to vector<1x1x32xf32>
    %242 = vector.broadcast %241 : vector<1x1x32xf32> to vector<8x16x32xf32>
    %243 = arith.mulf %240, %242 : vector<8x16x32xf32>
    %244 = arith.addf %239, %243 : vector<8x16x32xf32>
    %245 = vector.extract_strided_slice %17 {offsets = [3, 0, 0], sizes = [8, 16, 32], strides = [1, 1, 1]} : vector<14x24x32xf32> to vector<8x16x32xf32>
    %246 = vector.shape_cast %74 : vector<32xf32> to vector<1x1x32xf32>
    %247 = vector.broadcast %246 : vector<1x1x32xf32> to vector<8x16x32xf32>
    %248 = arith.mulf %245, %247 : vector<8x16x32xf32>
    %249 = arith.addf %244, %248 : vector<8x16x32xf32>
    %250 = vector.extract_strided_slice %21 {offsets = [3, 0, 0], sizes = [8, 16, 32], strides = [1, 1, 1]} : vector<14x24x32xf32> to vector<8x16x32xf32>
    %251 = vector.shape_cast %76 : vector<32xf32> to vector<1x1x32xf32>
    %252 = vector.broadcast %251 : vector<1x1x32xf32> to vector<8x16x32xf32>
    %253 = arith.mulf %250, %252 : vector<8x16x32xf32>
    %254 = arith.addf %249, %253 : vector<8x16x32xf32>
    %255 = vector.extract_strided_slice %22 {offsets = [3, 0, 0], sizes = [8, 16, 32], strides = [1, 1, 1]} : vector<14x24x32xf32> to vector<8x16x32xf32>
    %256 = vector.shape_cast %78 : vector<32xf32> to vector<1x1x32xf32>
    %257 = vector.broadcast %256 : vector<1x1x32xf32> to vector<8x16x32xf32>
    %258 = arith.mulf %255, %257 : vector<8x16x32xf32>
    %259 = arith.addf %254, %258 : vector<8x16x32xf32>
    %260 = vector.extract_strided_slice %23 {offsets = [3, 0, 0], sizes = [8, 16, 32], strides = [1, 1, 1]} : vector<14x24x32xf32> to vector<8x16x32xf32>
    %261 = vector.shape_cast %80 : vector<32xf32> to vector<1x1x32xf32>
    %262 = vector.broadcast %261 : vector<1x1x32xf32> to vector<8x16x32xf32>
    %263 = arith.mulf %260, %262 : vector<8x16x32xf32>
    %264 = arith.addf %259, %263 : vector<8x16x32xf32>
    %265 = vector.extract_strided_slice %18 {offsets = [4, 0, 0], sizes = [8, 16, 32], strides = [1, 1, 1]} : vector<14x24x32xf32> to vector<8x16x32xf32>
    %266 = vector.shape_cast %82 : vector<32xf32> to vector<1x1x32xf32>
    %267 = vector.broadcast %266 : vector<1x1x32xf32> to vector<8x16x32xf32>
    %268 = arith.mulf %265, %267 : vector<8x16x32xf32>
    %269 = arith.addf %264, %268 : vector<8x16x32xf32>
    %270 = vector.extract_strided_slice %19 {offsets = [4, 0, 0], sizes = [8, 16, 32], strides = [1, 1, 1]} : vector<14x24x32xf32> to vector<8x16x32xf32>
    %271 = vector.shape_cast %84 : vector<32xf32> to vector<1x1x32xf32>
    %272 = vector.broadcast %271 : vector<1x1x32xf32> to vector<8x16x32xf32>
    %273 = arith.mulf %270, %272 : vector<8x16x32xf32>
    %274 = arith.addf %269, %273 : vector<8x16x32xf32>
    %275 = vector.extract_strided_slice %20 {offsets = [4, 0, 0], sizes = [8, 16, 32], strides = [1, 1, 1]} : vector<14x24x32xf32> to vector<8x16x32xf32>
    %276 = vector.shape_cast %86 : vector<32xf32> to vector<1x1x32xf32>
    %277 = vector.broadcast %276 : vector<1x1x32xf32> to vector<8x16x32xf32>
    %278 = arith.mulf %275, %277 : vector<8x16x32xf32>
    %279 = arith.addf %274, %278 : vector<8x16x32xf32>
    %280 = vector.extract_strided_slice %17 {offsets = [4, 0, 0], sizes = [8, 16, 32], strides = [1, 1, 1]} : vector<14x24x32xf32> to vector<8x16x32xf32>
    %281 = vector.shape_cast %88 : vector<32xf32> to vector<1x1x32xf32>
    %282 = vector.broadcast %281 : vector<1x1x32xf32> to vector<8x16x32xf32>
    %283 = arith.mulf %280, %282 : vector<8x16x32xf32>
    %284 = arith.addf %279, %283 : vector<8x16x32xf32>
    %285 = vector.extract_strided_slice %21 {offsets = [4, 0, 0], sizes = [8, 16, 32], strides = [1, 1, 1]} : vector<14x24x32xf32> to vector<8x16x32xf32>
    %286 = vector.shape_cast %90 : vector<32xf32> to vector<1x1x32xf32>
    %287 = vector.broadcast %286 : vector<1x1x32xf32> to vector<8x16x32xf32>
    %288 = arith.mulf %285, %287 : vector<8x16x32xf32>
    %289 = arith.addf %284, %288 : vector<8x16x32xf32>
    %290 = vector.extract_strided_slice %22 {offsets = [4, 0, 0], sizes = [8, 16, 32], strides = [1, 1, 1]} : vector<14x24x32xf32> to vector<8x16x32xf32>
    %291 = vector.shape_cast %92 : vector<32xf32> to vector<1x1x32xf32>
    %292 = vector.broadcast %291 : vector<1x1x32xf32> to vector<8x16x32xf32>
    %293 = arith.mulf %290, %292 : vector<8x16x32xf32>
    %294 = arith.addf %289, %293 : vector<8x16x32xf32>
    %295 = vector.extract_strided_slice %23 {offsets = [4, 0, 0], sizes = [8, 16, 32], strides = [1, 1, 1]} : vector<14x24x32xf32> to vector<8x16x32xf32>
    %296 = vector.shape_cast %94 : vector<32xf32> to vector<1x1x32xf32>
    %297 = vector.broadcast %296 : vector<1x1x32xf32> to vector<8x16x32xf32>
    %298 = arith.mulf %295, %297 : vector<8x16x32xf32>
    %299 = arith.addf %294, %298 : vector<8x16x32xf32>
    %300 = vector.extract_strided_slice %18 {offsets = [5, 0, 0], sizes = [8, 16, 32], strides = [1, 1, 1]} : vector<14x24x32xf32> to vector<8x16x32xf32>
    %301 = vector.shape_cast %96 : vector<32xf32> to vector<1x1x32xf32>
    %302 = vector.broadcast %301 : vector<1x1x32xf32> to vector<8x16x32xf32>
    %303 = arith.mulf %300, %302 : vector<8x16x32xf32>
    %304 = arith.addf %299, %303 : vector<8x16x32xf32>
    %305 = vector.extract_strided_slice %19 {offsets = [5, 0, 0], sizes = [8, 16, 32], strides = [1, 1, 1]} : vector<14x24x32xf32> to vector<8x16x32xf32>
    %306 = vector.shape_cast %98 : vector<32xf32> to vector<1x1x32xf32>
    %307 = vector.broadcast %306 : vector<1x1x32xf32> to vector<8x16x32xf32>
    %308 = arith.mulf %305, %307 : vector<8x16x32xf32>
    %309 = arith.addf %304, %308 : vector<8x16x32xf32>
    %310 = vector.extract_strided_slice %20 {offsets = [5, 0, 0], sizes = [8, 16, 32], strides = [1, 1, 1]} : vector<14x24x32xf32> to vector<8x16x32xf32>
    %311 = vector.shape_cast %100 : vector<32xf32> to vector<1x1x32xf32>
    %312 = vector.broadcast %311 : vector<1x1x32xf32> to vector<8x16x32xf32>
    %313 = arith.mulf %310, %312 : vector<8x16x32xf32>
    %314 = arith.addf %309, %313 : vector<8x16x32xf32>
    %315 = vector.extract_strided_slice %17 {offsets = [5, 0, 0], sizes = [8, 16, 32], strides = [1, 1, 1]} : vector<14x24x32xf32> to vector<8x16x32xf32>
    %316 = vector.shape_cast %102 : vector<32xf32> to vector<1x1x32xf32>
    %317 = vector.broadcast %316 : vector<1x1x32xf32> to vector<8x16x32xf32>
    %318 = arith.mulf %315, %317 : vector<8x16x32xf32>
    %319 = arith.addf %314, %318 : vector<8x16x32xf32>
    %320 = vector.extract_strided_slice %21 {offsets = [5, 0, 0], sizes = [8, 16, 32], strides = [1, 1, 1]} : vector<14x24x32xf32> to vector<8x16x32xf32>
    %321 = vector.shape_cast %104 : vector<32xf32> to vector<1x1x32xf32>
    %322 = vector.broadcast %321 : vector<1x1x32xf32> to vector<8x16x32xf32>
    %323 = arith.mulf %320, %322 : vector<8x16x32xf32>
    %324 = arith.addf %319, %323 : vector<8x16x32xf32>
    %325 = vector.extract_strided_slice %22 {offsets = [5, 0, 0], sizes = [8, 16, 32], strides = [1, 1, 1]} : vector<14x24x32xf32> to vector<8x16x32xf32>
    %326 = vector.shape_cast %106 : vector<32xf32> to vector<1x1x32xf32>
    %327 = vector.broadcast %326 : vector<1x1x32xf32> to vector<8x16x32xf32>
    %328 = arith.mulf %325, %327 : vector<8x16x32xf32>
    %329 = arith.addf %324, %328 : vector<8x16x32xf32>
    %330 = vector.extract_strided_slice %23 {offsets = [5, 0, 0], sizes = [8, 16, 32], strides = [1, 1, 1]} : vector<14x24x32xf32> to vector<8x16x32xf32>
    %331 = vector.shape_cast %108 : vector<32xf32> to vector<1x1x32xf32>
    %332 = vector.broadcast %331 : vector<1x1x32xf32> to vector<8x16x32xf32>
    %333 = arith.mulf %330, %332 : vector<8x16x32xf32>
    %334 = arith.addf %329, %333 : vector<8x16x32xf32>
    %335 = vector.extract_strided_slice %18 {offsets = [6, 0, 0], sizes = [8, 16, 32], strides = [1, 1, 1]} : vector<14x24x32xf32> to vector<8x16x32xf32>
    %336 = vector.shape_cast %110 : vector<32xf32> to vector<1x1x32xf32>
    %337 = vector.broadcast %336 : vector<1x1x32xf32> to vector<8x16x32xf32>
    %338 = arith.mulf %335, %337 : vector<8x16x32xf32>
    %339 = arith.addf %334, %338 : vector<8x16x32xf32>
    %340 = vector.extract_strided_slice %19 {offsets = [6, 0, 0], sizes = [8, 16, 32], strides = [1, 1, 1]} : vector<14x24x32xf32> to vector<8x16x32xf32>
    %341 = vector.shape_cast %112 : vector<32xf32> to vector<1x1x32xf32>
    %342 = vector.broadcast %341 : vector<1x1x32xf32> to vector<8x16x32xf32>
    %343 = arith.mulf %340, %342 : vector<8x16x32xf32>
    %344 = arith.addf %339, %343 : vector<8x16x32xf32>
    %345 = vector.extract_strided_slice %20 {offsets = [6, 0, 0], sizes = [8, 16, 32], strides = [1, 1, 1]} : vector<14x24x32xf32> to vector<8x16x32xf32>
    %346 = vector.shape_cast %114 : vector<32xf32> to vector<1x1x32xf32>
    %347 = vector.broadcast %346 : vector<1x1x32xf32> to vector<8x16x32xf32>
    %348 = arith.mulf %345, %347 : vector<8x16x32xf32>
    %349 = arith.addf %344, %348 : vector<8x16x32xf32>
    %350 = vector.extract_strided_slice %17 {offsets = [6, 0, 0], sizes = [8, 16, 32], strides = [1, 1, 1]} : vector<14x24x32xf32> to vector<8x16x32xf32>
    %351 = vector.shape_cast %116 : vector<32xf32> to vector<1x1x32xf32>
    %352 = vector.broadcast %351 : vector<1x1x32xf32> to vector<8x16x32xf32>
    %353 = arith.mulf %350, %352 : vector<8x16x32xf32>
    %354 = arith.addf %349, %353 : vector<8x16x32xf32>
    %355 = vector.extract_strided_slice %21 {offsets = [6, 0, 0], sizes = [8, 16, 32], strides = [1, 1, 1]} : vector<14x24x32xf32> to vector<8x16x32xf32>
    %356 = vector.shape_cast %118 : vector<32xf32> to vector<1x1x32xf32>
    %357 = vector.broadcast %356 : vector<1x1x32xf32> to vector<8x16x32xf32>
    %358 = arith.mulf %355, %357 : vector<8x16x32xf32>
    %359 = arith.addf %354, %358 : vector<8x16x32xf32>
    %360 = vector.extract_strided_slice %22 {offsets = [6, 0, 0], sizes = [8, 16, 32], strides = [1, 1, 1]} : vector<14x24x32xf32> to vector<8x16x32xf32>
    %361 = vector.shape_cast %120 : vector<32xf32> to vector<1x1x32xf32>
    %362 = vector.broadcast %361 : vector<1x1x32xf32> to vector<8x16x32xf32>
    %363 = arith.mulf %360, %362 : vector<8x16x32xf32>
    %364 = arith.addf %359, %363 : vector<8x16x32xf32>
    %365 = vector.extract_strided_slice %23 {offsets = [6, 0, 0], sizes = [8, 16, 32], strides = [1, 1, 1]} : vector<14x24x32xf32> to vector<8x16x32xf32>
    %366 = vector.shape_cast %122 : vector<32xf32> to vector<1x1x32xf32>
    %367 = vector.broadcast %366 : vector<1x1x32xf32> to vector<8x16x32xf32>
    %368 = arith.mulf %365, %367 : vector<8x16x32xf32>
    %369 = arith.addf %364, %368 : vector<8x16x32xf32>
    %370 = vector.shape_cast %123 : vector<1x32xf32> to vector<1x1x32xf32>
    %371 = vector.broadcast %370 : vector<1x1x32xf32> to vector<8x16x32xf32>
    %372 = arith.addf %369, %371 : vector<8x16x32xf32>
    %cst_31 = arith.constant dense<0.000000e+00> : vector<8x16xf32>
    %373 = vector.multi_reduction <add>, %372, %cst_31 [2] : vector<8x16x32xf32> to vector<8x16xf32>
    %374 = vector.shape_cast %373 : vector<8x16xf32> to vector<8x16x1xf32>
    %cst_32 = arith.constant 3.200000e+01 : f32
    %375 = vector.broadcast %cst_32 : f32 to vector<8x16x1xf32>
    %376 = arith.divf %374, %375 : vector<8x16x1xf32>
    %377 = vector.broadcast %376 : vector<8x16x1xf32> to vector<8x16x32xf32>
    %378 = arith.subf %372, %377 : vector<8x16x32xf32>
    %379 = arith.mulf %378, %378 : vector<8x16x32xf32>
    %cst_33 = arith.constant dense<0.000000e+00> : vector<8x16xf32>
    %380 = vector.multi_reduction <add>, %379, %cst_33 [2] : vector<8x16x32xf32> to vector<8x16xf32>
    %381 = vector.shape_cast %380 : vector<8x16xf32> to vector<8x16x1xf32>
    %cst_34 = arith.constant 3.200000e+01 : f32
    %382 = vector.broadcast %cst_34 : f32 to vector<8x16x1xf32>
    %383 = arith.divf %381, %382 : vector<8x16x1xf32>
    %cst_35 = arith.constant 9.99999997E-7 : f32
    %384 = vector.broadcast %cst_35 : f32 to vector<8x16x1xf32>
    %385 = arith.addf %383, %384 : vector<8x16x1xf32>
    %386 = math.rsqrt %385 : vector<8x16x1xf32>
    %387 = vector.broadcast %386 : vector<8x16x1xf32> to vector<8x16x32xf32>
    %388 = arith.mulf %378, %387 : vector<8x16x32xf32>
    %389 = arith.truncf %388 : vector<8x16x32xf32> to vector<8x16x32xbf16>
    %c0_36 = arith.constant 0 : index
    %c0_37 = arith.constant 0 : index
    %c0_38 = arith.constant 0 : index
    %390 = vector.load %arg13[%c0_36, %c0_37, %c0_38] : memref<8x16x32xbf16, #tpu.memory_space<vmem>>, vector<8x16x32xbf16>
    tpu.vector_store %arg13[%c0_36, %c0_37, %c0_38], %389 {strides = array<i32>} : memref<8x16x32xbf16, #tpu.memory_space<vmem>>, vector<8x16x32xbf16>,
    %c0_39 = arith.constant 0 : index
    %c0_40 = arith.constant 0 : index
    %c0_41 = arith.constant 0 : index
    %391 = vector.load %arg13[%c0_39, %c0_40, %c0_41] : memref<8x16x32xbf16, #tpu.memory_space<vmem>>, vector<8x16x32xbf16>
    %392 = vector.shape_cast %391 : vector<8x16x32xbf16> to vector<128x32xbf16>
    %c0_42 = arith.constant 0 : index
    %c0_43 = arith.constant 0 : index
    %393 = vector.load %arg7[%c0_42, %c0_43] : memref<32x128xbf16, #tpu.memory_space<vmem>>, vector<32x128xbf16>
    %cst_44 = arith.constant dense<0.000000e+00> : vector<128x128xf32>
    %394 = tpu.matmul %392, %393, %cst_44 {dimension_numbers = #tpu.dot_dimension_numbers<[1], [0], [0], [1], [0, 0, 1, 1], [], []>} : vector<128x32xbf16>, vector<32x128xbf16>, vector<128x128xf32> -> vector<128x128xf32>
    %c0_45 = arith.constant 0 : index
    %c0_46 = arith.constant 0 : index
    %395 = vector.load %arg8[%c0_45, %c0_46] : memref<1x128xf32, #tpu.memory_space<vmem>>, vector<1x128xf32>
    %396 = vector.broadcast %395 : vector<1x128xf32> to vector<128x128xf32>
    %397 = arith.addf %394, %396 : vector<128x128xf32>
    %cst_47 = arith.constant 5.000000e-01 : f32
    %398 = vector.broadcast %cst_47 : f32 to vector<128x128xf32>
    %399 = arith.mulf %398, %397 : vector<128x128xf32>
    %cst_48 = arith.constant 0.707106769 : f32
    %400 = vector.broadcast %cst_48 : f32 to vector<128x128xf32>
    %401 = arith.mulf %397, %400 : vector<128x128xf32>
    %402 = math.erf %401 : vector<128x128xf32>
    %cst_49 = arith.constant 1.000000e+00 : f32
    %403 = vector.broadcast %cst_49 : f32 to vector<128x128xf32>
    %404 = arith.addf %403, %402 : vector<128x128xf32>
    %405 = arith.mulf %399, %404 : vector<128x128xf32>
    %406 = arith.truncf %405 : vector<128x128xf32> to vector<128x128xbf16>
    %c0_50 = arith.constant 0 : index
    %c0_51 = arith.constant 0 : index
    %407 = vector.load %arg9[%c0_50, %c0_51] : memref<128x32xbf16, #tpu.memory_space<vmem>>, vector<128x32xbf16>
    %cst_52 = arith.constant dense<0.000000e+00> : vector<128x32xf32>
    %408 = tpu.matmul %406, %407, %cst_52 {dimension_numbers = #tpu.dot_dimension_numbers<[1], [0], [0], [1], [0, 0, 1, 1], [], []>} : vector<128x128xbf16>, vector<128x32xbf16>, vector<128x32xf32> -> vector<128x32xf32>
    %c0_53 = arith.constant 0 : index
    %c0_54 = arith.constant 0 : index
    %409 = vector.load %arg10[%c0_53, %c0_54] : memref<1x32xf32, #tpu.memory_space<vmem>>, vector<1x32xf32>
    %410 = vector.broadcast %409 : vector<1x32xf32> to vector<128x32xf32>
    %411 = arith.addf %408, %410 : vector<128x32xf32>
    %412 = vector.shape_cast %411 : vector<128x32xf32> to vector<8x16x32xf32>
    %c0_55 = arith.constant 0 : index
    %c0_56 = arith.constant 0 : index
    %c0_57 = arith.constant 0 : index
    %c0_58 = arith.constant 0 : index
    %413 = vector.load %arg2[%c0_55, %c0_56, %c0_57, %c0_58] : memref<1x8x16x32xf32, #tpu.memory_space<vmem>>, vector<1x8x16x32xf32>
    %414 = vector.shape_cast %413 : vector<1x8x16x32xf32> to vector<8x16x32xf32>
    %415 = arith.addf %414, %412 : vector<8x16x32xf32>
    %c0_59 = arith.constant 0 : index
    %c0_60 = arith.constant 0 : index
    %c0_61 = arith.constant 0 : index
    %c0_62 = arith.constant 0 : index
    %416 = vector.load %arg11[%c0_59, %c0_60, %c0_61, %c0_62] : memref<1x8x16x32xf32, #tpu.memory_space<vmem>>, vector<1x8x16x32xf32>
    %417 = vector.shape_cast %416 : vector<1x8x16x32xf32> to vector<8x16x32xf32>
    %418 = vector.shape_cast %415 : vector<8x16x32xf32> to vector<1x8x16x32xf32>
    tpu.vector_store %arg11[%c0_59, %c0_60, %c0_61, %c0_62], %418 {strides = array<i32>} : memref<1x8x16x32xf32, #tpu.memory_space<vmem>>, vector<1x8x16x32xf32>,
    return
  }
  func.func @transform_0(%arg0: i32, %arg1: i32) -> (i32, i32, i32, i32) {
    %c0_i32 = arith.constant 0 : i32
    %c0_i32_0 = arith.constant 0 : i32
    %c0_i32_1 = arith.constant 0 : i32
    return %arg0, %arg1, %c0_i32, %c0_i32_0 : i32, i32, i32, i32
  }
  func.func @transform_1(%arg0: i32, %arg1: i32) -> (i32, i32, i32, i32) {
    %c1_i32 = arith.constant 1 : i32
    %0 = arith.muli %arg1, %c1_i32 : i32
    %c1_i32_0 = arith.constant 1 : i32
    %1 = arith.subi %0, %c1_i32_0 : i32
    %c0_i32 = arith.constant 0 : i32
    %2 = arith.maxsi %1, %c0_i32 : i32
    %c0_i32_1 = arith.constant 0 : i32
    %c0_i32_2 = arith.constant 0 : i32
    %c0_i32_3 = arith.constant 0 : i32
    return %arg0, %2, %c0_i32_1, %c0_i32_2 : i32, i32, i32, i32
  }
  func.func @transform_2(%arg0: i32, %arg1: i32) -> (i32, i32, i32, i32) {
    %c1_i32 = arith.constant 1 : i32
    %0 = arith.addi %arg1, %c1_i32 : i32
    %c1_i32_0 = arith.constant 1 : i32
    %1 = arith.muli %0, %c1_i32_0 : i32
    %c1_i32_1 = arith.constant 1 : i32
    %2 = arith.minsi %1, %c1_i32_1 : i32
    %c0_i32 = arith.constant 0 : i32
    %c0_i32_2 = arith.constant 0 : i32
    %c0_i32_3 = arith.constant 0 : i32
    return %arg0, %2, %c0_i32, %c0_i32_2 : i32, i32, i32, i32
  }
  func.func @transform_3(%arg0: i32, %arg1: i32) -> (i32, i32, i32) {
    %c0_i32 = arith.constant 0 : i32
    %c0_i32_0 = arith.constant 0 : i32
    %c0_i32_1 = arith.constant 0 : i32
    %c0_i32_2 = arith.constant 0 : i32
    return %c0_i32, %c0_i32_0, %c0_i32_1 : i32, i32, i32
  }
  func.func @transform_4(%arg0: i32, %arg1: i32) -> (i32, i32) {
    %c0_i32 = arith.constant 0 : i32
    %c0_i32_0 = arith.constant 0 : i32
    %c0_i32_1 = arith.constant 0 : i32
    return %c0_i32, %c0_i32_0 : i32, i32
  }
  func.func @transform_5(%arg0: i32, %arg1: i32) -> (i32, i32) {
    %c0_i32 = arith.constant 0 : i32
    %c0_i32_0 = arith.constant 0 : i32
    %c0_i32_1 = arith.constant 0 : i32
    return %c0_i32, %c0_i32_0 : i32, i32
  }
  func.func @transform_6(%arg0: i32, %arg1: i32) -> (i32, i32) {
    %c0_i32 = arith.constant 0 : i32
    %c0_i32_0 = arith.constant 0 : i32
    %c0_i32_1 = arith.constant 0 : i32
    return %c0_i32, %c0_i32_0 : i32, i32
  }
  func.func @transform_7(%arg0: i32, %arg1: i32) -> (i32, i32) {
    %c0_i32 = arith.constant 0 : i32
    %c0_i32_0 = arith.constant 0 : i32
    %c0_i32_1 = arith.constant 0 : i32
    return %c0_i32, %c0_i32_0 : i32, i32
  }
  func.func @transform_8(%arg0: i32, %arg1: i32) -> (i32, i32) {
    %c0_i32 = arith.constant 0 : i32
    %c0_i32_0 = arith.constant 0 : i32
    %c0_i32_1 = arith.constant 0 : i32
    return %c0_i32, %c0_i32_0 : i32, i32
  }
  func.func @transform_9(%arg0: i32, %arg1: i32) -> (i32, i32, i32, i32) {
    %c0_i32 = arith.constant 0 : i32
    %c0_i32_0 = arith.constant 0 : i32
    %c0_i32_1 = arith.constant 0 : i32
    return %arg0, %arg1, %c0_i32, %c0_i32_0 : i32, i32, i32, i32
  }
}

</mosaic_0001>

<bundles_post_ra>
// kernel: tpu_custom_call.1
= control target key start
LH: loop header
LB: loop body
LE: loop exit
PB: predicated region body
PF: predicated region fallthrough
CT: control target
= control target key end

     0   :  { %s9595_s0 = inlined_call_operand.hbm [shape: f32[2,16,16,32], index: 0, kind: input, shape index: {}]   ;;  %s9596_s1 = inlined_call_operand.hbm [shape: f32[2,16,16,32], index: 1, kind: input, shape index: {}]   ;;  %s9597_s2 = inlined_call_operand.hbm [shape: f32[2,16,16,32], index: 2, kind: input, shape index: {}]   ;;  %s9598_s3 = inlined_call_operand.vmem [shape: f32[7,7,32], index: 3, kind: input, shape index: {}]   ;;  %s9599_s4 = inlined_call_operand.vmem [shape: f32[1,32], index: 4, kind: input, shape index: {}]   ;;  %s9600_s5 = inlined_call_operand.vmem [shape: bf16[32,128], index: 5, kind: input, shape index: {}]   ;;  %s9601_s6 = inlined_call_operand.vmem [shape: f32[1,128], index: 6, kind: input, shape index: {}]   ;;  %s9602_s7 = inlined_call_operand.vmem [shape: bf16[128,32], index: 7, kind: input, shape index: {}]   ;;  %s9603_s8 = inlined_call_operand.vmem [shape: f32[1,32], index: 8, kind: input, shape index: {}]   ;;  %s9604_s9 = inlined_call_operand.hbm [shape: f32[2,16,16,32], index: 9, kind: output, shape index: {}]  }
   0x1   :  { %10111 = sst [smem:[#allocation166_spill]] %s9595_s0 }
   0x2   :  { %10112 = sst [smem:[#allocation167_spill]] %s9596_s1 }
   0x3   :  { %10113 = sst [smem:[#allocation168_spill]] %s9598_s3 }
   0x4   :  { %10114 = sst [smem:[#allocation169_spill]] %s9599_s4 }
   0x5   :  { %10115 = sst [smem:[#allocation170_spill]] %s9600_s5 }
   0x6   :  { %10116 = sst [smem:[#allocation171_spill]] %s9601_s6 }
   0x7   :  { %10117 = sst [smem:[#allocation172_spill]] %s9602_s7 }
   0x8   :  { %10118 = sst [smem:[#allocation173_spill]] %s9603_s8 }
   0x9   :  { %10119 = sst [smem:[#allocation174_spill]] %s9604_s9 }
   0xa   :  { %14 = vsyncpa [#allocation5], 0 }
   0xb   :  { %16 = vsyncpa [#allocation5 + $0x1], 0 }
   0xc   :  { %17 = vsyncpa [#allocation8], 0 }
   0xd   :  { %19 = vsyncpa [#allocation8 + $0x1], 0 }
   0xe   :  { %20 = vsyncpa [#allocation6], 0 }
   0xf   :  { %22 = vsyncpa [#allocation6 + $0x1], 0  ;;  %s5026_s30 = smov 0   ;;  %s5028_s10 = smov 0  }
  0x10   :  { %s5030_s11 = smov 0   ;;  %s5032_s12 = smov 0  }
  0x11   :  { %s5034_s13 = smov 0   ;;  %s5036_s14 = smov 0  }
  0x12   :  { %s5038_s15 = smov 0   ;;  %s5040_s16 = smov 0  }
  0x13   :  { %s5042_s17 = smov 0   ;;  %s5044_s18 = smov 0  }
  0x14   :  { %s5046_s19 = smov 0   ;;  %s5048_s20 = smov 0  }
  0x15   :  { %s5050_s21 = smov 0   ;;  %s5052_s22 = smov 0  }
  0x16 LB: > { %10120 = sst [smem:[#allocation15_spill]] %s4936_s14  ;;  %s5095_s23 = sadd.s32 4294967295, %s4968_s22   ;;  %s4968_s22 = sphi %s5052_s22, %s28_s22   ;;  %s4964_s21 = sphi %s5050_s21, %s11048_s21   ;;  %s4960_s20 = sphi %s5048_s20, %s11037_s20   ;;  %s4956_s19 = sphi %s5046_s19, %s11047_s19   ;;  %s4952_s18 = sphi %s5044_s18, %s11036_s18   ;;  %s4948_s17 = sphi %s5042_s17, %s11035_s17   ;;  %s4944_s16 = sphi %s5040_s16, %s11046_s16   ;;  %s4940_s15 = sphi %s5038_s15, %s11045_s15   ;;  %s4936_s14 = sphi %s5036_s14, %s11033_s14   ;;  %s4932_s13 = sphi %s5034_s13, %s11044_s13   ;;  %s4928_s12 = sphi %s5032_s12, %s11043_s12   ;;  %s4924_s11 = sphi %s5030_s11, %s11042_s11   ;;  %s4920_s10 = sphi %s5028_s10, %s11041_s10   ;;  %s4916_s30 = sphi %s5026_s30, %s11040_s30  }
  0x17   : > { %10121 = sst [smem:[#allocation16_spill]] %s4940_s15  ;;  %s37_s24 = sadd.s32 1, %s4960_s20 }
  0x18   : > { %10122 = sst [smem:[#allocation17_spill]] %s4948_s17  ;;  %p38_p0 = scmp.ge.s32.totalorder %s37_s24, 2 }
  0x19   : > { %10123 = sst [smem:[#allocation18_spill]] %s4952_s18  ;;  %s40_s25 = sadd.s32 1, %s4964_s21 }
  0x1a   : > { %10124 = sst [smem:[#allocation19_spill]] %s4956_s19  ;;  %p57_p1 = scmp.eq.s32.totalorder %s4968_s22, 0 }
  0x1b   : > { %10125 = sst [smem:[#allocation20_spill]] %s4960_s20  ;;  %p63_p2 = scmp.eq.s32.totalorder %s5095_s23, 0 }
  0x1c   : > { %s11050_s24 = smov (%p38_p0, %s37_s24), 0  ;;  %s11052_s25 = smov (!%p38_p0, %s40_s25), %s4964_s21 }
  0x1d   : > { %10126 = sst [smem:[#allocation21_spill]] %s11050_s24  ;;  %s45_s26 = ssub.s32 %s4960_s20, %s11050_s24 }
  0x1e   : > { %p42_p3 = scmp.ge.s32.totalorder %s11052_s25, 2  ;;  %s83_s27 = sadd.s32 1, %s4936_s14 }
  0x1f   : > { %p90_p4 = scmp.ne.s32.totalorder %s4936_s14, %s4932_s13  ;;  %p96_p6 = scmp.ne.s32.totalorder %s4932_s13, %s4928_s12 }
  0x20   : > { %s11054_s25 = smov (%p42_p3, %s11052_s25), 0  ;;  %p9616_p9 = scmp.lt.s32.totalorder %s4968_s22, 4 }
  0x21   : > { %10127 = sst [smem:[#allocation22_spill]] %s11054_s25  ;;  %s5111_s28 = ssub.s32 %s4964_s21, %s11054_s25 }
  0x22   : > { %s5114_s29 = sor.u32 %s45_s26, %s5111_s28  ;;  %p5122_p7 = por %p90_p4, %p57_p1 }
  0x23   : > { %p47_p5 = scmp.eq.s32.totalorder %s5114_s29, 0  ;;  %p5128_p8 = por %p96_p6, %p63_p2 }
  0x24   : > { %p9615_p10 = scmp.eq.s32.totalorder %s5111_s28, 0  ;;  %s351_s19 = sand.u32 1, %s4968_s22  }
  0x25   : > { %s353_s12 = sand.u32 1, %s4936_s14   ;;  %s9614_s5 = sshll.u32 %s4964_s21, 8 }
  0x26   : > { %s5138_s9 = scalar_select %p9615_p10, %s4936_s14, %s83_s27  }
  0x27   : > { %s4287_s8 = sshll.u32 %s353_s12, 7  ;;  %s10131_s1 = sld [smem:[#allocation167_spill]] }
  0x28   : > { %10130 = sst [smem:[#allocation23_spill]] %s5138_s9  ;;  %s355_s7 = scalar_lea.vmem [#allocation7], %s4287_s8 }
  0x29   : > { %s5142_s6 = sshll.u32 %s355_s7, 4  ;;  %p5155_p11 = pnand %p9616_p9, %p5122_p7  ;;  %s370_s6 = int_to_ptr.vmem [resolvable:$true] %s5142_s6 }
  0x2a   : > { %p4298_p12 = scmp.ge.s32.totalorder %s4968_s22, 1  ;;  %s5160_s7 = scalar_lea.sflag [#allocation8], %s351_s19 }
  0x2b   : > { %p4724_p0 = pneg %p5155_p11 }
  0x2d   : > { %s366_s18 = scalar_lea.hbm %s10131_s1, %s9614_s5  ;;  %s4727_s24 = scalar_lea.hbm %s10131_s1, 512 }
  0x2e   : > { %s367_s27 = sshll.u32 %s366_s18, 4  ;;  %s368_s27 = int_to_ptr.hbm [resolvable:$true] %s367_s27 }
  0x2f   : > { %s4720_s8 = sshra.s32 %s368_s27, 4  ;;  %s4721_s8 = int_to_ptr.hbm [resolvable:$true] %s4720_s8 }
  0x30   : > { %s4722_s12 = scalar_lea.hbm %s4721_s8, 128  ;;  %p4728_p6 = scmp.lt.s32.totalorder %s4721_s8, %s10131_s1 }
  0x31   : > { %p4723_p13 = scmp.ne.s32.totalorder %s4721_s8, %s4722_s12  ;;  %p4729_p7 = scmp.lt.s32.totalorder %s4727_s24, %s4722_s12 }
  0x33   : > { %p4725_p3 = pnand %p4724_p0, %p4723_p13  ;;  %p4730_p10 = por %p4729_p7, %p4728_p6 }
  0x35   : > { %p4726_p4 = pneg %p4725_p3 }
  0x37   : > { %p4731_p9 = pnand %p4730_p10, %p4726_p4 }
  0x39   : > { %4734 = shalt.err (!%p4731_p9)
}
  0x3a   : > { %s9617_s18 = smov 128   ;;  %s9619_s5 = smov 8  }
  0x3b   : > { %4458 = dma.hbm_to_vmem [thread:$0]  (!%p5155_p11), %s368_s27, 2048, %s370_s6, %s5160_s7, %s9617_s18, %s9617_s18, %s9619_s5  }
  0x3c   : > { %p405_p9 = scmp.lt.s32.totalorder %s4968_s22, 5  ;;  %s4277_s19 = sadd.s32 4294967294, %s4968_s22  }
  0x3d   : > { %s49_s8 = sadd.s32 1, %s4948_s17  ;;  %p56_p13 = scmp.ne.s32.totalorder %s4948_s17, %s4944_s16 }
  0x3e   : > { %p5179_p10 = pnand %p4298_p12, %p405_p9  ;;  %p62_p0 = scmp.ne.s32.totalorder %s4944_s16, %s4940_s15 }
  0x3f   : > { %s5188_s12 = scalar_select %p47_p5, %s4948_s17, %s49_s8  }
  0x40   : > { %p282_p3 = scmp.eq.s32.totalorder %s5095_s23, 3  ;;  %p288_p4 = scmp.eq.s32.totalorder %s4277_s19, 3 }
  0x41   : > { %10134 = sst [smem:[#allocation24_spill]] %s5188_s12  ;;  %p5197_p6 = por %p57_p1, %p56_p13 }
  0x42   : > { %p5203_p11 = por %p63_p2, %p62_p0  ;;  %p5207_p12 = por %p282_p3, %p56_p13 }
  0x43   : > { %p5211_p5 = por %p288_p4, %p62_p0  ;;  %s326_s3 = sand.u32 1, %s4948_s17  }
  0x44   : > { %s4412_s4 = sshll.u32 %s4960_s20, 4  ;;  %s4282_s24 = sshll.u32 %s326_s3, 7 }
  0x45   : > { %s10138_s27 = scalar_select %p5211_p5, 1, 0 }
  0x46   : > { %s10140_s19 = sshll.u32 %s4964_s21, 5  ;;  %s330_s5 = scalar_lea.vmem [#allocation4], %s4282_s24 }
  0x47   : > { %10139 = sst [smem:[#allocation25_spill]] %s10138_s27  ;;  %s336_s8 = sadd.s32 %s4412_s4, %s10140_s19 }
  0x48   : > { %s4286_s18 = sshll.u32 %s336_s8, 3  ;;  %s341_s1 = sshll.u32 %s330_s5, 4  ;;  %s342_s1 = int_to_ptr.vmem [resolvable:$true] %s341_s1 }
  0x49   : > { %s10141_s0 = sld [smem:[#allocation166_spill]]  ;;  %p10142_p7 = scmp.lt.s32.totalorder %s4968_s22, 4 }
  0x4a   : > { %s327_s20 = scalar_lea.sflag [#allocation5], %s326_s3  ;;  %s10143_s15 = smov 8  }
  0x4b   : > { %p4453_p9 = pnand %p10142_p7, %p5197_p6  ;;  %s10144_s4 = smov 128  }
  0x4c   : > { %s117_s24 = sadd.s32 1, %s4924_s11  ;;  %p124_p13 = scmp.ne.s32.totalorder %s4924_s11, %s4920_s10 }
  0x4d   : > { %p130_p0 = scmp.ne.s32.totalorder %s4920_s10, %s4916_s30  ;;  %s381_s5 = sand.u32 1, %s4924_s11  }
  0x4e   : > { %p126_p3 = por %p124_p13, %p57_p1  ;;  %p10146_p6 = scmp.eq.s32.totalorder %s5111_s28, 0 }
  0x4f   : > { %s338_s27 = scalar_lea.hbm %s10141_s0, %s4286_s18  ;;  %p5239_p4 = por %p130_p0, %p63_p2 }
  0x50   : > { %s339_s17 = sshll.u32 %s338_s27, 4  ;;  %s4293_s18 = sshll.u32 %s381_s5, 7  ;;  %s340_s17 = int_to_ptr.hbm [resolvable:$true] %s339_s17 }
  0x51   : > { %4455 = dma.hbm_to_vmem [thread:$0]  (!%p4453_p9), %s340_s17, 2048, %s342_s1, %s327_s20, %s10144_s4, %s10144_s4, %s10143_s15  }
  0x52   : > { %s5246_s12 = scalar_select %p10146_p6, %s4924_s11, %s117_s24  }
  0x53   : > { %s10147_s6 = sshll.u32 %s4964_s21, 8  ;;  %s383_s3 = scalar_lea.vmem [#allocation9], %s4293_s18 }
  0x54   : > { %s4912_s27 = sadd.s32 128, %s10147_s6  ;;  %s397_s19 = sshll.u32 %s383_s3, 4  ;;  %s398_s19 = int_to_ptr.vmem [resolvable:$true] %s397_s19 }
  0x55   : > { %s394_s30 = scalar_lea.hbm %s9597_s2, %s4912_s27  ;;  %p10148_p1 = pmov %p10142_p7 }
  0x56   : > { %s395_s20 = sshll.u32 %s394_s30, 4  ;;  %s4787_s5 = scalar_lea.hbm %s9597_s2, 512  ;;  %s396_s20 = int_to_ptr.hbm [resolvable:$true] %s395_s20 }
  0x57   : > { %p4459_p7 = pnand %p10148_p1, %p126_p3  ;;  %s4780_s8 = sshra.s32 %s396_s20, 4  ;;  %s4781_s8 = int_to_ptr.hbm [resolvable:$true] %s4780_s8 }
  0x58   : > { %s4782_s0 = scalar_lea.hbm %s4781_s8, 128 }
  0x59   : > { %p4783_p2 = scmp.ne.s32.totalorder %s4781_s8, %s4782_s0  ;;  %p4784_p9 = pneg %p4459_p7 }
  0x5a   : > { %p4789_p6 = scmp.lt.s32.totalorder %s4787_s5, %s4782_s0 }
  0x5b   : > { %p4785_p13 = pnand %p4784_p9, %p4783_p2 }
  0x5d   : > { %p4786_p0 = pneg %p4785_p13 }
  0x5f   : > { %p4791_p5 = pnand %p4789_p6, %p4786_p0 }
  0x61   : > { %4794 = shalt.err (!%p4791_p5)
}
  0x62   : > { %4461 = dma.hbm_to_vmem [thread:$0]  (!%p4459_p7), %s396_s20, 2048, %s398_s19, %s5160_s7, %s10144_s4, %s10144_s4, %s10143_s15  }
  0x63   : > { %409 = sbr.rel (%p5179_p10) target bundleno = 1362 (0x552), region = 56 }
  0x68   : > { %s5265_s18 = sand.u32 1, %s4944_s16  }
  0x69   : > { %s4299_s6 = sshll.u32 %s5265_s18, 7  ;;  %s412_s27 = scalar_lea.sflag [#allocation5], %s5265_s18 }
  0x6a   : > { %s5271_s0 = scalar_lea.vmem [#allocation4], %s4299_s6 }
  0x6b   : > { %4895 = dma.done.wait (%p5203_p11), %s412_s27, 2048  }
  0x6c   : > { %4897 = vsyncadd (%p5203_p11), %s412_s27, 4294965248  ;;  %s421_s15 = sand.u32 1, %s5095_s23   ;;  %s423_s7 = sand.u32 1, %s4932_s13  }
  0x6d   : > { %s4300_s9 = sshll.u32 %s423_s7, 7  ;;  %s422_s4 = scalar_lea.sflag [#allocation8], %s421_s15 }
  0x6e   : > { %s5279_s3 = scalar_lea.vmem [#allocation7], %s4300_s9 }
  0x6f   : > { %4899 = dma.done.wait (%p5128_p8), %s422_s4, 2048  }
  0x70   : > { %4901 = vsyncadd (%p5128_p8), %s422_s4, 4294965248  ;;  %s433_s19 = sand.u32 1, %s4920_s10  }
  0x71   : > { %s4301_s1 = sshll.u32 %s433_s19, 7 }
  0x72   : > { %s5286_s26 = scalar_lea.vmem [#allocation9], %s4301_s1 }
  0x73   : > { %4903 = dma.done.wait (%p5239_p4), %s422_s4, 2048  }
  0x74   : > { %4905 = vsyncadd (%p5239_p4), %s422_s4, 4294965248  ;;  %s10149_s23 = sld [smem:[#allocation18_spill]]  ;;  %vm492_vm0 = vcmask 261120   ;;  %v4972_v0 = vmov 0.0   ;;  %v507_v1 = vld [vmem:[%s5271_s0] sm:$0xff]  ;;  %v508_v2 = vld [vmem:[%s5271_s0 + $0x8] sm:$0xff]  ;;  %v670_v16 = vlaneseq }
  0x75   : > { %494 = vst.msk [vmem:[#allocation2 + $0x28] sm:$0xff] %vm492_vm0, %v4972_v0  ;;  %v509_v3 = vld [vmem:[%s5271_s0 + $0x10] sm:$0xff]  ;;  %v510_v4 = vld [vmem:[%s5271_s0 + $0x18] sm:$0xff]  ;;  %v511_v5 = vld [vmem:[%s5271_s0 + $0x20] sm:$0xff]  ;;  %s10152_s30 = sld [smem:[#allocation168_spill]]  ;;  %vm3075_vm14 = vcmask 257024  }
  0x76   : > { %495 = vst.msk [vmem:[#allocation2 + $0x40] sm:$0xff] %vm492_vm0, %v4972_v0  ;;  %v512_v6 = vld [vmem:[%s5271_s0 + $0x28] sm:$0xff]  ;;  %v513_v7 = vld [vmem:[%s5271_s0 + $0x30] sm:$0xff]  ;;  %v514_v8 = vld [vmem:[%s5271_s0 + $0x38] sm:$0xff]  ;;  %v5343_v20 = vshrl.u32 %v670_v16, 7  ;;  %s10327_s17 = sld [smem:[#allocation169_spill]] }
  0x77   : > { %496 = vst.msk [vmem:[#allocation2 + $0x58] sm:$0xff] %vm492_vm0, %v4972_v0  ;;  %v515_v9 = vld [vmem:[%s5271_s0 + $0x40] sm:$0xff]  ;;  %v516_v10 = vld [vmem:[%s5271_s0 + $0x48] sm:$0xff]  ;;  %s11003_s7 = sld [smem:[#allocation170_spill]]  ;;  %s9324_s9 = scalar_lea.vmem [#allocation10], %s4299_s6 }
  0x78   : > { %497 = vst.msk [vmem:[#allocation2 + $0x70] sm:$0xff] %vm492_vm0, %v4972_v0  ;;  %vm672_vm1 = vcmp.lt.s32.totalorder %v5343_v20, 3  ;;  %vm743_vm2 = vcmp.lt.s32.totalorder %v5343_v20, 2  ;;  %vm814_vm3 = vcmp.lt.s32.totalorder %v5343_v20, 1  ;;  %vm885_vm4 = vcmp.lt.s32.totalorder %v5343_v20, 7  ;;  %s11005_s1 = sld [smem:[#allocation171_spill]] }
  0x79   : > { %498 = vst.msk [vmem:[#allocation2 + $0x88] sm:$0xff] %vm492_vm0, %v4972_v0  ;;  %vm956_vm5 = vcmp.lt.s32.totalorder %v5343_v20, 6  ;;  %vm1027_vm6 = vcmp.lt.s32.totalorder %v5343_v20, 5  ;;  %s11016_s15 = sld [smem:[#allocation173_spill]] }
  0x7a   : > { %p553_p10 = scmp.gt.s32.totalorder %s10149_s23, 0  ;;  %499 = vst.msk [vmem:[#allocation2 + $0xa0] sm:$0xff] %vm492_vm0, %v4972_v0  ;;  %p569_p8 = scmp.lt.s32.totalorder %s10149_s23, 1 }
  0x7b   : > { %500 = vst.msk [vmem:[#allocation2 + $0xb8] sm:$0xff] %vm492_vm0, %v4972_v0  ;;  %s10153_s8 = smov %s10152_s30  ;;  %v1056_v23 = vld [vmem:[%s10152_s30] sm:$0x7f]  ;;  %s11025_s6 = sld [smem:[#allocation19_spill]] }
  0x7c   : > { %524 = vst.msk [vmem:[#allocation2 + $0x48] sm:$0xff] %vm492_vm0, %v507_v1  ;;  %s4587_s25 = scalar_select %p553_p10, 255, 0  ;;  %v591_v19 = vld [vmem:[#allocation2 + $0x28] sm:$0xff]  ;;  %v5360_v29 = vperm.slane %v1056_v23, 0  ;;  %v5376_v33 = vperm.slane %v1056_v23, 1 }
  0x7d   : > { %525 = vst.msk [vmem:[#allocation2 + $0x50] sm:$0xff] %vm492_vm0, %v508_v2  ;;  %v657_v22 = vrot.slane %v591_v19, 5  ;;  %v730_v25 = vrot.slane %v591_v19, 6  ;;  %v801_v27 = vrot.slane %v591_v19, 7  ;;  %v5380_v35 = vperm.slane %v1056_v23, 2  ;;  %v594_v51 = vld [vmem:[#allocation2 + $0x40] sm:$0xff]  ;;  %s10328_s28 = smov %s10327_s17 }
  0x7e   : > { %526 = vst.msk [vmem:[#allocation2 + $0x60] sm:$0xff] %vm492_vm0, %v509_v3  ;;  %v4588_v11 = vld [vmem:[%s5279_s3 + $0x60] sm:%s4587_s25]  ;;  %v4591_v12 = vld [vmem:[%s5279_s3 + $0x68] sm:%s4587_s25]  ;;  %v5386_v38 = vperm.slane %v1056_v23, 3  ;;  %v5395_v46 = vperm.slane %v1056_v23, 4  ;;  %v5404_v49 = vperm.slane %v1056_v23, 5 }
  0x7f   : > { %527 = vst.msk [vmem:[#allocation2 + $0x68] sm:$0xff] %vm492_vm0, %v510_v4  ;;  %v4594_v13 = vld [vmem:[%s5279_s3 + $0x70] sm:%s4587_s25]  ;;  %v4597_v14 = vld [vmem:[%s5279_s3 + $0x78] sm:%s4587_s25]  ;;  %v658_v57 = vrot.slane %v594_v51, 5  ;;  %v597_v2 = vld [vmem:[#allocation2 + $0x58] sm:$0xff]  ;;  %s4433_s4 = sshll.u32 %s10149_s23, 4 }
  0x80   : > { %528 = vst.msk [vmem:[#allocation2 + $0x78] sm:$0xff] %vm492_vm0, %v511_v5  ;;  %v4601_v15 = vld [vmem:[%s5279_s3 + $0x50] sm:%s4587_s25]  ;;  %v4604_v17 = vld [vmem:[%s5279_s3 + $0x58] sm:%s4587_s25]  ;;  %v5444_v3 = vld [vmem:[#allocation2 + $0x70] sm:$0xff]  ;;  %v732_v19 = vrot.slane %v597_v2, 6  ;;  %s11026_s30 = sld [smem:[#allocation174_spill]] }
  0x81   : > { %529 = vst.msk [vmem:[#allocation2 + $0x80] sm:$0xff] %vm492_vm0, %v512_v6  ;;  %v5425_v60 = vld [vmem:[%s10153_s8 + $0x8] sm:$0x7f]  ;;  %v731_v6 = vrot.slane %v594_v51, 6  ;;  %v660_v16 = vrot.slane %v5444_v3, 5  ;;  %s4408_s3 = sshll.u32 %s11025_s6, 5 }
  0x82   : > { %530 = vst.msk [vmem:[#allocation2 + $0x90] sm:$0xff] %vm492_vm0, %v513_v7  ;;  %v5442_v1 = vperm.slane %v5425_v60, 0  ;;  %v5446_v4 = vld [vmem:[#allocation2 + $0x88] sm:$0xff]  ;;  %s8034_s24 = scalar_select %p569_p8, 255, 0 }
  0x83   : > { %531 = vst.msk [vmem:[#allocation2 + $0x98] sm:$0xff] %vm492_vm0, %v514_v8  ;;  %v5451_v8 = vld [vmem:[#allocation2 + $0xa0] sm:$0xff]  ;;  %s4131_s19 = sadd.s32 %s4433_s4, %s4408_s3  ;;  %s4134_s23 = sshll.u32 %s9324_s9, 4  ;;  %s4135_s23 = int_to_ptr.vmem [resolvable:$true] %s4134_s23 }
  0x84   : > { %532 = vst.msk [vmem:[#allocation2 + $0xa8] sm:$0xff] %vm492_vm0, %v515_v9  ;;  %s4409_s25 = sshll.u32 %s4131_s19, 3 }
  0x85   : > { %533 = vst.msk [vmem:[#allocation2 + $0xb0] sm:$0xff] %vm492_vm0, %v516_v10  ;;  %v802_v10 = vrot.slane %v594_v51, 7 }
  0x86   : > { %565 = vst.msk [vmem:[#allocation2 + $0x18] sm:$0xff] %vm492_vm0, %v4588_v11  ;;  %s11027_s5 = smov %s11026_s30  ;;  %s4133_s20 = scalar_lea.hbm %s11026_s30, %s4409_s25 }
  0x87   : > { %566 = vst.msk [vmem:[#allocation2 + $0x20] sm:$0xff] %vm492_vm0, %v4591_v12  ;;  %s4136_s27 = sshll.u32 %s4133_s20, 4  ;;  %s4137_s27 = int_to_ptr.hbm [resolvable:$true] %s4136_s27 }
  0x88   : > { %567 = vst.msk [vmem:[#allocation2 + $0x30] sm:$0xff] %vm492_vm0, %v4594_v13  ;;  %v5456_v13 = vld [vmem:[#allocation2 + $0x48] sm:$0xff] }
  0x89   : > { %568 = vst.msk [vmem:[#allocation2 + $0x38] sm:$0xff] %vm492_vm0, %v4597_v14  ;;  %v5458_v14 = vld [vmem:[#allocation2 + $0xb8] sm:$0xff]  ;;  %v9635_v51 = vrot.slane %v5456_v13, 7 }
  0x8a   : > { %493 = vst.msk [vmem:[#allocation2 + $0x10] sm:$0xff] %vm492_vm0, %v4972_v0 }
  0x8b   : > { %501 = vst.msk [vmem:[#allocation2 + $0xd0] sm:$0xff] %vm492_vm0, %v4972_v0 }
  0x8c   : > { %502 = vst.msk [vmem:[#allocation2 + $0xe8] sm:$0xff] %vm492_vm0, %v4972_v0 }
  0x8d   : > { %503 = vst.msk [vmem:[#allocation2 + $0x100] sm:$0xff] %vm492_vm0, %v4972_v0  ;;  %v5341_v18 = vld [vmem:[#allocation2 + $0x18] sm:$0xff] }
  0x8e   : > { %504 = vst.msk [vmem:[#allocation2 + $0x118] sm:$0xff] %vm492_vm0, %v4972_v0  ;;  %v9639_v21 = vrot.slane %v5341_v18, 5  ;;  %v9637_v24 = vrot.slane %v5341_v18, 6  ;;  %v9634_v26 = vrot.slane %v5341_v18, 7  ;;  %v5378_v34 = vld [vmem:[#allocation2 + $0x20] sm:$0xff]  ;;  %v844_v39 = vrot.slane %v5341_v18, 1 }
  0x8f   : > { %505 = vst.msk [vmem:[#allocation2 + $0x130] sm:$0xff] %vm492_vm0, %v4972_v0  ;;  %v9633_v40 = vrot.slane %v5378_v34, 1  ;;  %v915_v42 = vrot.slane %v5341_v18, 2  ;;  %v9632_v43 = vrot.slane %v5378_v34, 2  ;;  %v1166_v45 = vmul.f32 %v5386_v38, %v5341_v18  ;;  %v5406_v50 = vld [vmem:[#allocation2 + $0x30] sm:$0xff] }
  0x90   : > { %506 = vst.msk [vmem:[#allocation2 + $0x148] sm:$0xff] %vm492_vm0, %v4972_v0  ;;  %v5357_v28 = vsel %vm672_vm1, %v657_v22, %v9639_v21  ;;  %v5366_v30 = vsel %vm743_vm2, %v730_v25, %v9637_v24  ;;  %v5372_v31 = vsel %vm814_vm3, %v801_v27, %v9634_v26  ;;  %v986_v54 = vrot.slane %v5341_v18, 3  ;;  %v5462_v22 = vld [vmem:[#allocation2 + $0x38] sm:$0xff]  ;;  %v5540_v26 = vld [vmem:[#allocation2 + $0x90] sm:$0xff] }
  0x91   : > { %563 = vst.msk [vmem:[#allocation2] sm:$0xff] %vm492_vm0, %v4601_v15  ;;  %v1067_v32 = vmul.f32 %v5360_v29, %v5357_v28  ;;  %v1100_v36 = vmul.f32 %v5376_v33, %v5366_v30  ;;  %v1133_v37 = vmul.f32 %v5380_v35, %v5372_v31  ;;  %v5401_v47 = vsel %vm885_vm4, %v844_v39, %v9633_v40 }
  0x92   : > { %564 = vst.msk [vmem:[#allocation2 + $0x8] sm:$0xff] %vm492_vm0, %v4604_v17  ;;  %v5412_v52 = vsel %vm956_vm5, %v915_v42, %v9632_v43  ;;  %v1199_v53 = vmul.f32 %v5395_v46, %v5401_v47  ;;  %v9629_v55 = vrot.slane %v5378_v34, 3  ;;  %v9628_v56 = vrot.slane %v5406_v50, 5  ;;  %v5485_v42 = vld [vmem:[#allocation2 + $0x60] sm:$0xff] }
  0x93   : > { %10150 = vst [vmem:[#allocation26_spill] sm:$0xff] %v5341_v18  ;;  %v1116_v41 = vadd.f32 %v1100_v36, %v1067_v32  ;;  %v1232_v59 = vmul.f32 %v5404_v49, %v5412_v52  ;;  %v5439_v0 = vperm.slane %v1056_v23, 6  ;;  %v9627_v5 = vrot.slane %v5406_v50, 6  ;;  %v5583_v23 = vld [vmem:[#allocation2 + $0x50] sm:$0xff] }
  0x94   : > { %10151 = vst [vmem:[#allocation27_spill] sm:$0xff] %v5343_v20  ;;  %v5431_v61 = vsel %vm1027_vm6, %v986_v54, %v9629_v55  ;;  %v5437_v62 = vsel %vm672_vm1, %v658_v57, %v9628_v56  ;;  %v9626_v9 = vrot.slane %v5406_v50, 7  ;;  %v659_v15 = vrot.slane %v597_v2, 5 }
  0x95   : > { %10154 = vst [vmem:[#allocation28_spill] sm:$0xff] %v5357_v28  ;;  %v1149_v44 = vadd.f32 %v1133_v37, %v1116_v41  ;;  %v1265_v7 = vmul.f32 %v5439_v0, %v5431_v61  ;;  %v1298_v11 = vmul.f32 %v5442_v1, %v5437_v62  ;;  %v661_v17 = vrot.slane %v5446_v4, 5 }
  0x96   : > { %10155 = vst [vmem:[#allocation29_spill] sm:$0xff] %v5360_v29  ;;  %v733_v25 = vrot.slane %v5444_v3, 6  ;;  %v5471_v32 = vsel %vm743_vm2, %v731_v6, %v9627_v5  ;;  %v5477_v36 = vsel %vm814_vm3, %v802_v10, %v9626_v9  ;;  %v5480_v39 = vperm.slane %v5425_v60, 1  ;;  %v5503_v9 = vld [vmem:[#allocation2 + $0x78] sm:$0xff] }
  0x97   : > { %10156 = vst [vmem:[#allocation30_spill] sm:$0xff] %v5366_v30  ;;  %v1182_v48 = vadd.f32 %v1166_v45, %v1149_v44  ;;  %v5483_v41 = vperm.slane %v5425_v60, 2  ;;  %v9630_v44 = vrot.slane %v5456_v13, 5  ;;  %v845_v54 = vrot.slane %v5406_v50, 1 }
  0x98   : > { %10157 = vst [vmem:[#allocation31_spill] sm:$0xff] %v5372_v31  ;;  %v9636_v57 = vrot.slane %v5462_v22, 1  ;;  %v804_v6 = vrot.slane %v5444_v3, 7  ;;  %v9638_v10 = vrot.slane %v5485_v42, 5  ;;  %v9640_v3 = vrot.slane %v5485_v42, 6 }
  0x99   : > { %10158 = vst [vmem:[#allocation32_spill] sm:$0xff] %v5376_v33  ;;  %v1215_v58 = vadd.f32 %v1199_v53, %v1182_v48  ;;  %v9631_v48 = vrot.slane %v5456_v13, 6  ;;  %v803_v53 = vrot.slane %v597_v2, 7  ;;  %v805_v2 = vrot.slane %v5446_v4, 7 }
  0x9a   : > { %10159 = vst [vmem:[#allocation33_spill] sm:$0xff] %v5378_v34  ;;  %v5509_v5 = vsel %vm672_vm1, %v659_v15, %v9630_v44  ;;  %v9641_v55 = vrot.slane %v5485_v42, 7  ;;  %v5530_v15 = vsel %vm885_vm4, %v845_v54, %v9636_v57  ;;  %v916_v44 = vrot.slane %v5406_v50, 2 }
  0x9b   : > { %10160 = vst [vmem:[#allocation34_spill] sm:$0xff] %v5380_v35  ;;  %v1248_v63 = vadd.f32 %v1232_v59, %v1215_v58  ;;  %v1331_v58 = vmul.f32 %v5480_v39, %v5471_v32  ;;  %v735_v59 = vrot.slane %v5451_v8, 6  ;;  %v5516_v56 = vsel %vm743_vm2, %v732_v19, %v9631_v48 }
  0x9c   : > { %10161 = vst [vmem:[#allocation35_spill] sm:$0xff] %v5386_v38  ;;  %v9644_v19 = vrot.slane %v5462_v22, 2  ;;  %v5535_v43 = vperm.slane %v5425_v60, 3  ;;  %v5538_v40 = vperm.slane %v5425_v60, 4  ;;  %v5547_v54 = vsel %vm672_vm1, %v660_v16, %v9638_v10  ;;  %v5566_v10 = vld [vmem:[#allocation2 + $0xa8] sm:$0xff] }
  0x9d   : > { %10162 = vst [vmem:[#allocation36_spill] sm:$0xff] %v5395_v46  ;;  %v1281_v12 = vadd.f32 %v1265_v7, %v1248_v63  ;;  %v1364_v7 = vmul.f32 %v5483_v41, %v5477_v36  ;;  %v5562_v24 = vsel %vm814_vm3, %v804_v6, %v9641_v55  ;;  %v987_v21 = vrot.slane %v5406_v50, 3 }
  0x9e   : > { %10163 = vst [vmem:[#allocation37_spill] sm:$0xff] %v5401_v47  ;;  %v1397_v16 = vmul.f32 %v5535_v43, %v5406_v50  ;;  %v847_v6 = vrot.slane %v5485_v42, 1  ;;  %v5581_v55 = vsel %vm956_vm5, %v916_v44, %v9644_v19  ;;  %v10198_v34 = vrot.slane %v5462_v22, 3  ;;  %v5620_v44 = vld [vmem:[#allocation2 + $0x98] sm:$0xff] }
  0x9f   : > { %10164 = vst [vmem:[#allocation38_spill] sm:$0xff] %v5404_v49  ;;  %v1314_v37 = vadd.f32 %v1298_v11, %v1281_v12  ;;  %v806_v11 = vrot.slane %v5451_v8, 7  ;;  %v849_v27 = vrot.slane %v5540_v26, 1  ;;  %v10213_v18 = vrot.slane %v5458_v14, 5 }
  0xa0   : > { %10165 = vst [vmem:[#allocation39_spill] sm:$0xff] %v5406_v50  ;;  %v918_v30 = vrot.slane %v5485_v42, 2 }
  0xa1   : > { %10166 = vst [vmem:[#allocation40_spill] sm:$0xff] %v5412_v52  ;;  %v1347_v12 = vadd.f32 %v1331_v58, %v1314_v37  ;;  %v807_v37 = vrot.slane %v5458_v14, 7  ;;  %v5524_v58 = vsel %vm814_vm3, %v803_v53, %v9635_v51  ;;  %v9646_v53 = vrot.slane %v5503_v9, 5 }
  0xa2   : > { %10167 = vst [vmem:[#allocation41_spill] sm:$0xff] %v5431_v61  ;;  %v848_v51 = vrot.slane %v5503_v9, 1  ;;  %v10195_v61 = vrot.slane %v5503_v9, 6  ;;  %v10208_v52 = vrot.slane %v5540_v26, 6 }
  0xa3   : > { %10168 = vst [vmem:[#allocation42_spill] sm:$0xff] %v5437_v62  ;;  %v1380_v48 = vadd.f32 %v1364_v7, %v1347_v12  ;;  %v846_v7 = vrot.slane %v5456_v13, 1  ;;  %v5555_v12 = vsel %vm743_vm2, %v733_v25, %v9640_v3  ;;  %v1430_v25 = vmul.f32 %v5538_v40, %v5530_v15 }
  0xa4   : > { %10169 = vst [vmem:[#allocation43_spill] sm:$0xff] %v5439_v0  ;;  %v5573_v3 = vperm.slane %v5425_v60, 5  ;;  %v5589_v63 = vsel %vm672_vm1, %v661_v17, %v9646_v53  ;;  %v10196_v17 = vrot.slane %v5446_v4, 6  ;;  %v5622_v4 = vld [vmem:[#allocation2 + $0xb0] sm:$0xff]  ;;  %v5644_v47 = vsel %vm743_vm2, %v735_v59, %v10208_v52 }
  0xa5   : > { %10170 = vst [vmem:[#allocation44_spill] sm:$0xff] %v5442_v1  ;;  %v1413_v57 = vadd.f32 %v1397_v16, %v1380_v48  ;;  %v5597_v48 = vperm.slane %v5425_v60, 6  ;;  %v5599_v16 = vld [vmem:[#allocation2 + $0x68] sm:$0xff]  ;;  %v10215_v52 = vrot.slane %v5566_v10, 6  ;;  %v10216_v59 = vrot.slane %v5458_v14, 6 }
  0xa6   : > { %10171 = vst [vmem:[#allocation45_spill] sm:$0xff] %v5456_v13  ;;  %v5607_v53 = vsel %vm743_vm2, %v10196_v17, %v10195_v61  ;;  %v1463_v60 = vmul.f32 %v5573_v3, %v5581_v55  ;;  %v10203_v61 = vrot.slane %v5540_v26, 5  ;;  %v10204_v17 = vrot.slane %v5451_v8, 5 }
  0xa7   : > { %10172 = vst [vmem:[#allocation46_spill] sm:$0xff] %v5462_v22  ;;  %v1446_v19 = vadd.f32 %v1430_v25, %v1413_v57  ;;  %v5614_v57 = vsel %vm1027_vm6, %v987_v21, %v10198_v34  ;;  %v5618_v25 = vld [vmem:[#allocation2 + $0x80] sm:$0xff]  ;;  %v10206_v21 = vrot.slane %v5503_v9, 7  ;;  %v10210_v8 = vrot.slane %v5540_v26, 7 }
  0xa8   : > { %10173 = vst [vmem:[#allocation47_spill] sm:$0xff] %v5471_v32  ;;  %v5630_v45 = vsel %vm672_vm1, %v10204_v17, %v10203_v61  ;;  %v850_v17 = vrot.slane %v5566_v10, 1  ;;  %v5667_v31 = vsel %vm743_vm2, %v10216_v59, %v10215_v52  ;;  %v10220_v59 = vrot.slane %v5583_v23, 1 }
  0xa9   : > { %10174 = vst [vmem:[#allocation48_spill] sm:$0xff] %v5477_v36  ;;  %v5636_v34 = vsel %vm814_vm3, %v805_v2, %v10206_v21  ;;  %v5650_v61 = vsel %vm814_vm3, %v806_v11, %v10210_v8  ;;  %v1479_v2 = vadd.f32 %v1463_v60, %v1446_v19  ;;  %v10212_v21 = vrot.slane %v5566_v10, 5  ;;  %v1058_v19 = vld [vmem:[%s10153_s8 + $0x10] sm:$0x7f] }
  0xaa   : > { %10175 = vst [vmem:[#allocation49_spill] sm:$0xff] %v5480_v39  ;;  %v1496_v60 = vmul.f32 %v5597_v48, %v5614_v57  ;;  %v5688_v11 = vsel %vm885_vm4, %v846_v7, %v10220_v59  ;;  %v5694_v14 = vperm.slane %v1058_v19, 0  ;;  %v921_v52 = vrot.slane %v5566_v10, 2 }
  0xab   : > { %10176 = vst [vmem:[#allocation50_spill] sm:$0xff] %v5483_v41  ;;  %v5659_v22 = vsel %vm672_vm1, %v10213_v18, %v10212_v21  ;;  %v10218_v18 = vrot.slane %v5566_v10, 7  ;;  %v5696_v21 = vperm.slane %v1058_v19, 1  ;;  %v5701_v59 = vperm.slane %v1058_v19, 2 }
  0xac   : > { %10177 = vst [vmem:[#allocation51_spill] sm:$0xff] %v5485_v42  ;;  %v10227_v28 = vrot.slane %v5618_v25, 1  ;;  %v10230_v41 = vrot.slane %v5620_v44, 1  ;;  %v10232_v1 = vrot.slane %v5622_v4, 1 }
  0xad   : > { %10178 = vst [vmem:[#allocation52_spill] sm:$0xff] %v5503_v9  ;;  %v5679_v8 = vsel %vm814_vm3, %v807_v37, %v10218_v18  ;;  %v920_v37 = vrot.slane %v5540_v26, 2  ;;  %v1512_v18 = vadd.f32 %v1496_v60, %v1479_v2  ;;  %v1529_v2 = vmul.f32 %v5694_v14, %v5509_v5 }
  0xae   : > { %10179 = vst [vmem:[#allocation53_spill] sm:$0xff] %v5509_v5  ;;  %v10225_v60 = vrot.slane %v5599_v16, 1  ;;  %v5718_v7 = vsel %vm885_vm4, %v848_v51, %v10227_v28  ;;  %v5736_v28 = vsel %vm885_vm4, %v850_v17, %v10232_v1  ;;  %v10234_v51 = vrot.slane %v5583_v23, 2 }
  0xaf   : > { %10180 = vst [vmem:[#allocation54_spill] sm:$0xff] %v5516_v56  ;;  %v10240_v17 = vrot.slane %v5620_v44, 2 }
  0xb0   : > { %10181 = vst [vmem:[#allocation55_spill] sm:$0xff] %v5530_v15  ;;  %v5712_v39 = vsel %vm885_vm4, %v847_v6, %v10225_v60  ;;  %v988_v6 = vrot.slane %v5456_v13, 3  ;;  %v989_v60 = vrot.slane %v5485_v42, 3 }
  0xb1   : > { %10182 = vst [vmem:[#allocation56_spill] sm:$0xff] %v5535_v43  ;;  %v1562_v43 = vmul.f32 %v5696_v21, %v5516_v56 }
  0xb2   : > { %10183 = vst [vmem:[#allocation57_spill] sm:$0xff] %v5538_v40  ;;  %v5722_v40 = vperm.slane %v1058_v19, 3 }
  0xb3   : > { %10184 = vst [vmem:[#allocation58_spill] sm:$0xff] %v5540_v26 }
  0xb4   : > { %10185 = vst [vmem:[#allocation59_spill] sm:$0xff] %v5547_v54 }
  0xb5   : > { %10186 = vst [vmem:[#allocation60_spill] sm:$0xff] %v5555_v12 }
  0xb6   : > { %10187 = vst [vmem:[#allocation61_spill] sm:$0xff] %v5562_v24 }
  0xb7   : > { %10188 = vst [vmem:[#allocation62_spill] sm:$0xff] %v5566_v10 }
  0xb8   : > { %10189 = vst [vmem:[#allocation63_spill] sm:$0xff] %v5573_v3  ;;  %v919_v3 = vrot.slane %v5503_v9, 2 }
  0xb9   : > { %10190 = vst [vmem:[#allocation64_spill] sm:$0xff] %v5581_v55 }
  0xba   : > { %10191 = vst [vmem:[#allocation65_spill] sm:$0xff] %v5583_v23 }
  0xbb   : > { %10192 = vst [vmem:[#allocation66_spill] sm:$0xff] %v5589_v63 }
  0xbc   : > { %10193 = vst [vmem:[#allocation67_spill] sm:$0xff] %v5597_v48  ;;  %v917_v48 = vrot.slane %v5456_v13, 2 }
  0xbd   : > { %10194 = vst [vmem:[#allocation68_spill] sm:$0xff] %v5599_v16 }
  0xbe   : > { %10197 = vst [vmem:[#allocation69_spill] sm:$0xff] %v5607_v53 }
  0xbf   : > { %10199 = vst [vmem:[#allocation70_spill] sm:$0xff] %v5614_v57  ;;  %v1545_v57 = vadd.f32 %v1529_v2, %v1512_v18  ;;  %v1595_v18 = vmul.f32 %v5701_v59, %v5524_v58  ;;  %v10238_v2 = vrot.slane %v5618_v25, 2 }
  0xc0   : > { %10200 = vst [vmem:[#allocation71_spill] sm:$0xff] %v5618_v25 }
  0xc1   : > { %10201 = vst [vmem:[#allocation72_spill] sm:$0xff] %v5620_v44  ;;  %v5756_v1 = vsel %vm956_vm5, %v919_v3, %v10238_v2  ;;  %v1628_v2 = vmul.f32 %v5722_v40, %v5456_v13  ;;  %v1073_v3 = vmul.f32 %v5360_v29, %v5547_v54 }
  0xc2   : > { %10202 = vst [vmem:[#allocation73_spill] sm:$0xff] %v5622_v4 }
  0xc3   : > { %10205 = vst [vmem:[#allocation74_spill] sm:$0xff] %v5630_v45 }
  0xc4   : > { %10207 = vst [vmem:[#allocation75_spill] sm:$0xff] %v5636_v34 }
  0xc5   : > { %10209 = vst [vmem:[#allocation76_spill] sm:$0xff] %v5644_v47 }
  0xc6   : > { %10211 = vst [vmem:[#allocation77_spill] sm:$0xff] %v5650_v61 }
  0xc7   : > { %10214 = vst [vmem:[#allocation78_spill] sm:$0xff] %v5659_v22 }
  0xc8   : > { %10217 = vst [vmem:[#allocation79_spill] sm:$0xff] %v5667_v31 }
  0xc9   : > { %10219 = vst [vmem:[#allocation80_spill] sm:$0xff] %v5679_v8 }
  0xca   : > { %10221 = vst [vmem:[#allocation81_spill] sm:$0xff] %v5688_v11 }
  0xcb   : > { %10222 = vst [vmem:[#allocation82_spill] sm:$0xff] %v5694_v14  ;;  %v5728_v14 = vsel %vm885_vm4, %v849_v27, %v10230_v41  ;;  %v10236_v27 = vrot.slane %v5599_v16, 2 }
  0xcc   : > { %10223 = vst [vmem:[#allocation83_spill] sm:$0xff] %v5696_v21  ;;  %v5742_v21 = vsel %vm956_vm5, %v917_v48, %v10234_v51  ;;  %v5762_v48 = vsel %vm956_vm5, %v920_v37, %v10240_v17  ;;  %v10242_v51 = vrot.slane %v5622_v4, 2  ;;  %v10244_v17 = vrot.slane %v5583_v23, 3 }
  0xcd   : > { %10224 = vst [vmem:[#allocation84_spill] sm:$0xff] %v5701_v59  ;;  %v5748_v41 = vsel %vm956_vm5, %v918_v30, %v10236_v27  ;;  %v1578_v27 = vadd.f32 %v1562_v43, %v1545_v57  ;;  %v1069_v57 = vmul.f32 %v5360_v29, %v5437_v62  ;;  %v5789_v59 = vperm.slane %v1058_v19, 4 }
  0xce   : > { %10226 = vst [vmem:[#allocation85_spill] sm:$0xff] %v5712_v39  ;;  %v5768_v30 = vsel %vm956_vm5, %v921_v52, %v10242_v51  ;;  %v5781_v52 = vsel %vm1027_vm6, %v988_v6, %v10244_v17  ;;  %v1071_v51 = vmul.f32 %v5360_v29, %v5509_v5  ;;  %v1104_v37 = vmul.f32 %v5376_v33, %v5516_v56 }
  0xcf   : > { %10228 = vst [vmem:[#allocation86_spill] sm:$0xff] %v5718_v7  ;;  %v1611_v43 = vadd.f32 %v1595_v18, %v1578_v27  ;;  %v5795_v17 = vperm.slane %v1058_v19, 5  ;;  %v1075_v18 = vmul.f32 %v5360_v29, %v5589_v63  ;;  %v1106_v27 = vmul.f32 %v5376_v33, %v5555_v12 }
  0xd0   : > { %10229 = vst [vmem:[#allocation87_spill] sm:$0xff] %v5722_v40  ;;  %v1661_v23 = vmul.f32 %v5789_v59, %v5688_v11  ;;  %v5803_v40 = vperm.slane %v1058_v19, 6  ;;  %v1108_v62 = vmul.f32 %v5376_v33, %v5607_v53  ;;  %v1120_v53 = vadd.f32 %v1104_v37, %v1071_v51 }
  0xd1   : > { %10231 = vst [vmem:[#allocation88_spill] sm:$0xff] %v5728_v14  ;;  %v1644_v6 = vadd.f32 %v1628_v2, %v1611_v43  ;;  %v1110_v2 = vmul.f32 %v5376_v33, %v5644_v47  ;;  %v1694_v43 = vmul.f32 %v5795_v17, %v5742_v21  ;;  %v1112_v47 = vmul.f32 %v5376_v33, %v5667_v31 }
  0xd2   : > { %10233 = vst [vmem:[#allocation89_spill] sm:$0xff] %v5736_v28  ;;  %v1135_v56 = vmul.f32 %v5380_v35, %v5477_v36  ;;  %v1137_v4 = vmul.f32 %v5380_v35, %v5524_v58 }
  0xd3   : > { %10235 = vst [vmem:[#allocation90_spill] sm:$0xff] %v5742_v21  ;;  %v1677_v19 = vadd.f32 %v1661_v23, %v1644_v6  ;;  %v1727_v23 = vmul.f32 %v5803_v40, %v5781_v52  ;;  %v1124_v6 = vadd.f32 %v1108_v62, %v1075_v18  ;;  %v1145_v62 = vmul.f32 %v5380_v35, %v5679_v8 }
  0xd4   : > { %10237 = vst [vmem:[#allocation91_spill] sm:$0xff] %v5748_v41  ;;  %v10252_v18 = vrot.slane %v5599_v16, 3  ;;  %v1168_v16 = vmul.f32 %v5386_v38, %v5406_v50 }
  0xd5   : > { %10239 = vst [vmem:[#allocation92_spill] sm:$0xff] %v5756_v1  ;;  %v1102_v1 = vmul.f32 %v5376_v33, %v5471_v32  ;;  %v1077_v32 = vmul.f32 %v5360_v29, %v5630_v45  ;;  %v1059_v45 = vld [vmem:[%s10153_s8 + $0x18] sm:$0x7f]  ;;  %v1710_v5 = vadd.f32 %v1694_v43, %v1677_v19 }
  0xd6   : > { %10241 = vst [vmem:[#allocation93_spill] sm:$0xff] %v5762_v48  ;;  %v5851_v19 = vperm.slane %v1059_v45, 3 }
  0xd7   : > { %10243 = vst [vmem:[#allocation94_spill] sm:$0xff] %v5768_v30  ;;  %v1079_v30 = vmul.f32 %v5360_v29, %v5659_v22  ;;  %v1118_v48 = vadd.f32 %v1102_v1, %v1069_v57  ;;  %v1139_v22 = vmul.f32 %v5380_v35, %v5562_v24  ;;  %v1141_v1 = vmul.f32 %v5380_v35, %v5636_v34 }
  0xd8   : > { %10245 = vst [vmem:[#allocation95_spill] sm:$0xff] %v5781_v52  ;;  %v1743_v37 = vadd.f32 %v1727_v23, %v1710_v5  ;;  %v5835_v57 = vperm.slane %v1059_v45, 1  ;;  %v1170_v23 = vmul.f32 %v5386_v38, %v5456_v13  ;;  %v6011_v13 = vld [vmem:[#allocation2 + $0x10] sm:$0xff] }
  0xd9   : > { %10246 = vst [vmem:[#allocation96_spill] sm:$0xff] %v5789_v59  ;;  %v1126_v59 = vadd.f32 %v1110_v2, %v1077_v32  ;;  %v1128_v51 = vadd.f32 %v1112_v47, %v1079_v30  ;;  %v5841_v32 = vperm.slane %v1059_v45, 2  ;;  %v5847_v2 = vsel %vm1027_vm6, %v989_v60, %v10252_v18 }
  0xda   : > { %10247 = vst [vmem:[#allocation97_spill] sm:$0xff] %v5795_v17  ;;  %v1122_v17 = vadd.f32 %v1106_v27, %v1073_v3  ;;  %v5833_v3 = vperm.slane %v1059_v45, 0  ;;  %v1143_v27 = vmul.f32 %v5380_v35, %v5650_v61  ;;  %v1151_v5 = vadd.f32 %v1135_v56, %v1118_v48 }
  0xdb   : > { %10248 = vst [vmem:[#allocation98_spill] sm:$0xff] %v5803_v40  ;;  %v1153_v47 = vadd.f32 %v1137_v4, %v1120_v53  ;;  %v1793_v40 = vmul.f32 %v5835_v57, %v5555_v12  ;;  %v1157_v36 = vadd.f32 %v1141_v1, %v1124_v6  ;;  %v1826_v56 = vmul.f32 %v5841_v32, %v5562_v24 }
  0xdc   : > { %10249 = vst [vmem:[#allocation99_spill] sm:$0xff] %v5833_v3  ;;  %v1760_v43 = vmul.f32 %v5833_v3, %v5547_v54  ;;  %v1155_v30 = vadd.f32 %v1139_v22, %v1122_v17  ;;  %v1159_v48 = vadd.f32 %v1143_v27, %v1126_v59  ;;  %v1161_v18 = vadd.f32 %v1145_v62, %v1128_v51  ;;  %v5874_v59 = vld [vmem:[%s10153_s8 + $0x20] sm:$0x7f] }
  0xdd   : > { %10250 = vst [vmem:[#allocation100_spill] sm:$0xff] %v5835_v57  ;;  %v1172_v53 = vmul.f32 %v5386_v38, %v5485_v42  ;;  %v1174_v22 = vmul.f32 %v5386_v38, %v5503_v9  ;;  %v1176_v4 = vmul.f32 %v5386_v38, %v5540_v26  ;;  %v1859_v6 = vmul.f32 %v5851_v19, %v5485_v42 }
  0xde   : > { %10251 = vst [vmem:[#allocation101_spill] sm:$0xff] %v5841_v32  ;;  %v1776_v60 = vadd.f32 %v1760_v43, %v1743_v37  ;;  %v5869_v1 = vperm.slane %v1059_v45, 4  ;;  %v1178_v37 = vmul.f32 %v5386_v38, %v5566_v10  ;;  %v1186_v51 = vadd.f32 %v1170_v23, %v1153_v47 }
  0xdf   : > { %10253 = vst [vmem:[#allocation102_spill] sm:$0xff] %v5847_v2  ;;  %v1203_v27 = vmul.f32 %v5395_v46, %v5688_v11  ;;  %v5880_v62 = vperm.slane %v1059_v45, 5  ;;  %v1188_v32 = vadd.f32 %v1172_v53, %v1155_v30  ;;  %v1190_v57 = vadd.f32 %v1174_v22, %v1157_v36 }
  0xe0   : > { %10254 = vst [vmem:[#allocation103_spill] sm:$0xff] %v5851_v19  ;;  %v1809_v17 = vadd.f32 %v1793_v40, %v1776_v60  ;;  %v1184_v40 = vadd.f32 %v1168_v16, %v1151_v5  ;;  %v1892_v60 = vmul.f32 %v5869_v1, %v5712_v39  ;;  %v5884_v19 = vperm.slane %v1059_v45, 6 }
  0xe1   : > { %10255 = vst [vmem:[#allocation104_spill] sm:$0xff] %v5869_v1  ;;  %v1201_v3 = vmul.f32 %v5395_v46, %v5530_v15  ;;  %v1205_v47 = vmul.f32 %v5395_v46, %v5712_v39  ;;  %v1207_v23 = vmul.f32 %v5395_v46, %v5718_v7  ;;  %v1925_v16 = vmul.f32 %v5880_v62, %v5748_v41  ;;  %v10270_v1 = vld [vmem:[#allocation93_spill] sm:$0xff] }
  0xe2   : > { %10256 = vst [vmem:[#allocation105_spill] sm:$0xff] %v5880_v62  ;;  %v1842_v43 = vadd.f32 %v1826_v56, %v1809_v17  ;;  %v5895_v5 = vperm.slane %v5874_v59, 0  ;;  %v10259_v45 = vrot.slane %v5618_v25, 3  ;;  %v10260_v36 = vrot.slane %v5503_v9, 3 }
  0xe3   : > { %10257 = vst [vmem:[#allocation106_spill] sm:$0xff] %v5884_v19  ;;  %v1192_v56 = vadd.f32 %v1176_v4, %v1159_v48  ;;  %v1219_v53 = vadd.f32 %v1203_v27, %v1186_v51  ;;  %v1236_v22 = vmul.f32 %v5404_v49, %v5742_v21  ;;  %v1194_v17 = vadd.f32 %v1178_v37, %v1161_v18 }
  0xe4   : > { %v1875_v11 = vadd.f32 %v1859_v6, %v1842_v43  ;;  %10258 = vst [vmem:[#allocation107_spill] sm:$0xff] %v5895_v5  ;;  %v5903_v30 = vsel %vm1027_vm6, %v10260_v36, %v10259_v45  ;;  %v1958_v43 = vmul.f32 %v5884_v19, %v5847_v2  ;;  %v5910_v62 = vperm.slane %v5874_v59, 1 }
  0xe5   : > { %10261 = vst [vmem:[#allocation108_spill] sm:$0xff] %v5903_v30  ;;  %v1209_v25 = vmul.f32 %v5395_v46, %v5728_v14  ;;  %v1211_v45 = vmul.f32 %v5395_v46, %v5736_v28  ;;  %v1217_v36 = vadd.f32 %v1201_v3, %v1184_v40  ;;  %v1221_v48 = vadd.f32 %v1205_v47, %v1188_v32  ;;  %v10264_v3 = vld [vmem:[#allocation92_spill] sm:$0xff]  ;;  %v10265_v40 = vld [vmem:[#allocation69_spill] sm:$0xff] }
  0xe6   : > { %v1908_v6 = vadd.f32 %v1892_v60, %v1875_v11  ;;  %10262 = vst [vmem:[#allocation109_spill] sm:$0xff] %v5910_v62  ;;  %v1223_v4 = vadd.f32 %v1207_v23, %v1190_v57  ;;  %v1991_v18 = vmul.f32 %v5895_v5, %v5589_v63  ;;  %v5919_v11 = vperm.slane %v5874_v59, 2 }
  0xe7   : > { %v1234_v37 = vmul.f32 %v5404_v49, %v5581_v55  ;;  %v1238_v27 = vmul.f32 %v5404_v49, %v5748_v41  ;;  %v1252_v60 = vadd.f32 %v1236_v22, %v1219_v53  ;;  %v1269_v19 = vmul.f32 %v5439_v0, %v5781_v52  ;;  %10286 = vst [vmem:[#allocation121_spill] sm:$0xff] %v6011_v13 }
  0xe8   : > { %v1941_v51 = vadd.f32 %v1925_v16, %v1908_v6  ;;  %10263 = vst [vmem:[#allocation110_spill] sm:$0xff] %v5919_v11  ;;  %v1240_v57 = vmul.f32 %v5404_v49, %v10264_v3  ;;  %v2024_v47 = vmul.f32 %v5910_v62, %v10265_v40  ;;  %v5932_v23 = vperm.slane %v5874_v59, 3 }
  0xe9   : > { %v10267_v16 = vrot.slane %v5620_v44, 3  ;;  %v10268_v6 = vrot.slane %v5540_v26, 3  ;;  %v1225_v22 = vadd.f32 %v1209_v25, %v1192_v56  ;;  %v1227_v5 = vadd.f32 %v1211_v45, %v1194_v17  ;;  %v5956_v56 = vld [vmem:[%s10153_s8 + $0x28] sm:$0x7f] }
  0xea   : > { %v1974_v32 = vadd.f32 %v1958_v43, %v1941_v51  ;;  %10266 = vst [vmem:[#allocation111_spill] sm:$0xff] %v5932_v23  ;;  %v1242_v52 = vmul.f32 %v5404_v49, %v10270_v1  ;;  %v10271_v43 = vld [vmem:[#allocation94_spill] sm:$0xff]  ;;  %v2057_v21 = vmul.f32 %v5919_v11, %v5636_v34  ;;  %v5949_v44 = vperm.slane %v5874_v59, 4  ;;  %v10281_v11 = vld [vmem:[#allocation49_spill] sm:$0xff] }
  0xeb   : > { %v5940_v53 = vsel %vm1027_vm6, %v10268_v6, %v10267_v16  ;;  %v1244_v51 = vmul.f32 %v5404_v49, %v10271_v43  ;;  %v1250_v55 = vadd.f32 %v1234_v37, %v1217_v36  ;;  %v1254_v15 = vadd.f32 %v1238_v27, %v1221_v48  ;;  %v10273_v16 = vld [vmem:[#allocation44_spill] sm:$0xff]  ;;  %v10275_v36 = vld [vmem:[#allocation70_spill] sm:$0xff] }
  0xec   : > { %10269 = vst [vmem:[#allocation112_spill] sm:$0xff] %v5940_v53  ;;  %v2007_v62 = vadd.f32 %v1991_v18, %v1974_v32  ;;  %v1285_v50 = vadd.f32 %v1269_v19, %v1252_v60  ;;  %v1302_v25 = vmul.f32 %v10273_v16, %v5547_v54  ;;  %v1256_v17 = vadd.f32 %v1240_v57, %v1223_v4 }
  0xed   : > { %10272 = vst [vmem:[#allocation113_spill] sm:$0xff] %v5949_v44  ;;  %v2090_v18 = vmul.f32 %v5932_v23, %v5503_v9  ;;  %v5961_v32 = vperm.slane %v5874_v59, 5  ;;  %v1258_v6 = vadd.f32 %v1242_v52, %v1225_v22  ;;  %v1267_v19 = vmul.f32 %v5439_v0, %v10275_v36  ;;  %v10277_v52 = vld [vmem:[#allocation73_spill] sm:$0xff]  ;;  %v5997_v36 = vld [vmem:[#allocation2] sm:$0xff] }
  0xee   : > { %v2040_v45 = vadd.f32 %v2024_v47, %v2007_v62  ;;  %v1271_v48 = vmul.f32 %v5439_v0, %v5847_v2  ;;  %v1273_v37 = vmul.f32 %v5439_v0, %v5903_v30  ;;  %v1275_v4 = vmul.f32 %v5439_v0, %v5940_v53  ;;  %10285 = vst [vmem:[#allocation120_spill] sm:$0xff] %v5997_v36 }
  0xef   : > { %10274 = vst [vmem:[#allocation114_spill] sm:$0xff] %v5961_v32  ;;  %v2123_v27 = vmul.f32 %v5949_v44, %v5718_v7  ;;  %v5974_v60 = vperm.slane %v5874_v59, 6  ;;  %v10278_v57 = vrot.slane %v10277_v52, 3  ;;  %v10279_v47 = vrot.slane %v5566_v10, 3  ;;  %v10288_v7 = vld [vmem:[#allocation74_spill] sm:$0xff] }
  0xf0   : > { %v2073_v62 = vadd.f32 %v2057_v21, %v2040_v45  ;;  %v1318_v23 = vadd.f32 %v1302_v25, %v1285_v50  ;;  %v1335_v54 = vmul.f32 %v10281_v11, %v5555_v12  ;;  %v5987_v21 = vperm.slane %v5956_v56, 0 }
  0xf1   : > { %10276 = vst [vmem:[#allocation115_spill] sm:$0xff] %v5974_v60  ;;  %v5982_v22 = vsel %vm1027_vm6, %v10279_v47, %v10278_v57  ;;  %v2156_v59 = vmul.f32 %v5961_v32, %v10264_v3  ;;  %v5992_v44 = vperm.slane %v5956_v56, 1  ;;  %v5995_v52 = vperm.slane %v5956_v56, 2 }
  0xf2   : > { %10280 = vst [vmem:[#allocation116_spill] sm:$0xff] %v5982_v22  ;;  %v2106_v45 = vadd.f32 %v2090_v18, %v2073_v62  ;;  %v1260_v57 = vadd.f32 %v1244_v51, %v1227_v5  ;;  %v1277_v50 = vmul.f32 %v5439_v0, %v5982_v22  ;;  %v6001_v25 = vadd.f32 %v1267_v19, %v1250_v55  ;;  %v10287_v5 = vld [vmem:[#allocation50_spill] sm:$0xff] }
  0xf3   : > { %10282 = vst [vmem:[#allocation117_spill] sm:$0xff] %v5987_v21  ;;  %v6003_v47 = vadd.f32 %v1271_v48, %v1254_v15  ;;  %v6005_v18 = vadd.f32 %v1273_v37, %v1256_v17  ;;  %v6007_v62 = vadd.f32 %v1275_v4, %v1258_v6  ;;  %v2189_v12 = vmul.f32 %v5974_v60, %v5903_v30  ;;  %v10289_v17 = vld [vmem:[#allocation76_spill] sm:$0xff]  ;;  %v6025_v4 = vld [vmem:[#allocation2 + $0x8] sm:$0xff] }
  0xf4   : > { %10283 = vst [vmem:[#allocation118_spill] sm:$0xff] %v5992_v44  ;;  %v2139_v32 = vadd.f32 %v2123_v27, %v2106_v45  ;;  %v1351_v3 = vadd.f32 %v1335_v54, %v1318_v23  ;;  %v1368_v51 = vmul.f32 %v10287_v5, %v5562_v24  ;;  %v2222_v55 = vmul.f32 %v5987_v21, %v10288_v7 }
  0xf5   : > { %10284 = vst [vmem:[#allocation119_spill] sm:$0xff] %v5995_v52  ;;  %v2255_v6 = vmul.f32 %v5992_v44, %v10289_v17  ;;  %v2288_v48 = vmul.f32 %v5995_v52, %v5650_v61  ;;  %v6023_v37 = vperm.slane %v5956_v56, 3  ;;  %v656_v54 = vrot.slane %v6011_v13, 5 }
  0xf6   : > { %v2172_v19 = vadd.f32 %v2156_v59, %v2139_v32  ;;  %10291 = vst [vmem:[#allocation123_spill] sm:$0xff] %v6025_v4  ;;  %v729_v27 = vrot.slane %v6011_v13, 6  ;;  %v6032_v59 = vperm.slane %v5956_v56, 4  ;;  %v800_v15 = vrot.slane %v6011_v13, 7 }
  0xf7   : > { %10290 = vst [vmem:[#allocation122_spill] sm:$0xff] %v6023_v37  ;;  %v843_v52 = vrot.slane %v5997_v36, 1  ;;  %v6037_v44 = vperm.slane %v5956_v56, 5  ;;  %v10294_v21 = vrot.slane %v5997_v36, 5  ;;  %v10295_v60 = vrot.slane %v5997_v36, 6 }
  0xf8   : > { %v2205_v32 = vadd.f32 %v2189_v12, %v2172_v19  ;;  %10292 = vst [vmem:[#allocation124_spill] sm:$0xff] %v6032_v59  ;;  %v9779_v19 = vrot.slane %v6025_v4, 1  ;;  %v10296_v13 = vrot.slane %v5997_v36, 7  ;;  %v914_v30 = vrot.slane %v5997_v36, 2 }
  0xf9   : > { %10293 = vst [vmem:[#allocation125_spill] sm:$0xff] %v6037_v44  ;;  %v687_v23 = vsel %vm672_vm1, %v656_v54, %v10294_v21  ;;  %v758_v12 = vsel %vm743_vm2, %v729_v27, %v10295_v60  ;;  %v2321_v21 = vmul.f32 %v6023_v37, %v5540_v26  ;;  %v985_v54 = vrot.slane %v5997_v36, 3 }
  0xfa   : > { %v2238_v45 = vadd.f32 %v2222_v55, %v2205_v32  ;;  %v829_v24 = vsel %vm814_vm3, %v800_v15, %v10296_v13  ;;  %v1065_v22 = vmul.f32 %v5360_v29, %v687_v23  ;;  %v1098_v60 = vmul.f32 %v5376_v33, %v758_v12  ;;  %v6068_v32 = vld [vmem:[%s10153_s8 + $0x30] sm:$0x7f]  ;;  %v10298_v23 = vld [vmem:[#allocation53_spill] sm:$0xff]  ;;  %v10301_v13 = vld [vmem:[#allocation56_spill] sm:$0xff] }
  0xfb   : > { %v900_v55 = vsel %vm885_vm4, %v843_v52, %v9779_v19  ;;  %v1131_v15 = vmul.f32 %v5380_v35, %v829_v24  ;;  %v6070_v61 = vadd.f32 %v1277_v50, %v1260_v57  ;;  %v1300_v12 = vmul.f32 %v10273_v16, %v10298_v23  ;;  %v10574_v20 = vld [vmem:[#allocation118_spill] sm:$0xff] }
  0xfc   : > { %v2271_v27 = vadd.f32 %v2255_v6, %v2238_v45  ;;  %v1114_v6 = vadd.f32 %v1098_v60, %v1065_v22  ;;  %v1164_v45 = vmul.f32 %v5386_v38, %v5997_v36  ;;  %v2354_v52 = vmul.f32 %v6032_v59, %v5728_v14 }
  0xfd   : > { %10297 = vst [vmem:[#allocation126_spill] sm:$0xff] %v6070_v61  ;;  %v6079_v24 = vperm.slane %v5956_v56, 6  ;;  %v10300_v19 = vrot.slane %v6025_v4, 2  ;;  %v1384_v50 = vadd.f32 %v1368_v51, %v1351_v3  ;;  %v1401_v61 = vmul.f32 %v10301_v13, %v5485_v42 }
  0xfe   : > { %v2304_v37 = vadd.f32 %v2288_v48, %v2271_v27  ;;  %v1147_v22 = vadd.f32 %v1131_v15, %v1114_v6  ;;  %v1197_v60 = vmul.f32 %v5395_v46, %v900_v55  ;;  %v2387_v48 = vmul.f32 %v6037_v44, %v10270_v1 }
  0xff   : > { %10299 = vst [vmem:[#allocation53_spill] sm:$0xff] %v6079_v24  ;;  %v971_v57 = vsel %vm956_vm5, %v914_v30, %v10300_v19  ;;  %v6091_v27 = vperm.slane %v6068_v32, 0  ;;  %v10303_v56 = vrot.slane %v6025_v4, 3  ;;  %v1304_v30 = vmul.f32 %v10273_v16, %v5589_v63  ;;  %v10304_v19 = vld [vmem:[#allocation78_spill] sm:$0xff] }
 0x100   : > { %v2337_v36 = vadd.f32 %v2321_v21, %v2304_v37  ;;  %v1306_v3 = vmul.f32 %v10273_v16, %v10288_v7  ;;  %v1180_v51 = vadd.f32 %v1164_v45, %v1147_v22  ;;  %v1230_v37 = vmul.f32 %v5404_v49, %v971_v57 }
 0x101   : > { %10302 = vst [vmem:[#allocation127_spill] sm:$0xff] %v6091_v27  ;;  %v1042_v59 = vsel %vm1027_vm6, %v985_v54, %v10303_v56  ;;  %v1308_v21 = vmul.f32 %v10273_v16, %v10304_v19  ;;  %v2420_v15 = vmul.f32 %v6079_v24, %v5940_v53  ;;  %v6107_v6 = vperm.slane %v6068_v32, 1  ;;  %v10306_v56 = vld [vmem:[#allocation57_spill] sm:$0xff]  ;;  %v10308_v24 = vld [vmem:[#allocation28_spill] sm:$0xff] }
 0x102   : > { %v2370_v55 = vadd.f32 %v2354_v52, %v2337_v36  ;;  %v1417_v54 = vadd.f32 %v1401_v61, %v1384_v50  ;;  %v1434_v42 = vmul.f32 %v10306_v56, %v5712_v39  ;;  %v1213_v44 = vadd.f32 %v1197_v60, %v1180_v51 }
 0x103   : > { %10305 = vst [vmem:[#allocation128_spill] sm:$0xff] %v6107_v6  ;;  %v1263_v4 = vmul.f32 %v5439_v0, %v1042_v59  ;;  %v1316_v45 = vadd.f32 %v1300_v12, %v6001_v25  ;;  %v2453_v22 = vmul.f32 %v6091_v27, %v10304_v19  ;;  %v6116_v36 = vperm.slane %v6068_v32, 2  ;;  %v10311_v27 = vld [vmem:[#allocation30_spill] sm:$0xff]  ;;  %v10323_v0 = vld [vmem:[#allocation41_spill] sm:$0xff] }
 0x104   : > { %v2403_v57 = vadd.f32 %v2387_v48, %v2370_v55  ;;  %v1320_v52 = vadd.f32 %v1304_v30, %v6003_v47  ;;  %v1337_v61 = vmul.f32 %v10281_v11, %v10265_v40  ;;  %v1246_v50 = vadd.f32 %v1230_v37, %v1213_v44  ;;  %v10310_v55 = vld [vmem:[#allocation63_spill] sm:$0xff] }
 0x105   : > { %10307 = vst [vmem:[#allocation129_spill] sm:$0xff] %v6116_v36  ;;  %v1296_v60 = vmul.f32 %v10273_v16, %v10308_v24  ;;  %v1322_v59 = vadd.f32 %v1306_v3, %v6005_v18  ;;  %v2486_v25 = vmul.f32 %v6107_v6, %v5667_v31  ;;  %v6127_v12 = vperm.slane %v6068_v32, 3  ;;  %v10314_v6 = vld [vmem:[#allocation31_spill] sm:$0xff] }
 0x106   : > { %v2436_v51 = vadd.f32 %v2420_v15, %v2403_v57  ;;  %v1450_v48 = vadd.f32 %v1434_v42, %v1417_v54  ;;  %v1467_v47 = vmul.f32 %v10310_v55, %v5748_v41  ;;  %v1279_v30 = vadd.f32 %v1263_v4, %v1246_v50  ;;  %v10313_v15 = vld [vmem:[#allocation54_spill] sm:$0xff] }
 0x107   : > { %10309 = vst [vmem:[#allocation28_spill] sm:$0xff] %v6127_v12  ;;  %v1329_v44 = vmul.f32 %v10281_v11, %v10311_v27  ;;  %v1324_v37 = vadd.f32 %v1308_v21, %v6007_v62  ;;  %v2519_v18 = vmul.f32 %v6116_v36, %v5679_v8  ;;  %v6137_v3 = vperm.slane %v6068_v32, 4 }
 0x108   : > { %v2469_v24 = vadd.f32 %v2453_v22, %v2436_v51  ;;  %v1333_v57 = vmul.f32 %v10281_v11, %v10313_v15  ;;  %v1353_v42 = vadd.f32 %v1337_v61, %v1320_v52  ;;  %v1312_v54 = vadd.f32 %v1296_v60, %v1279_v30  ;;  %v10316_v51 = vld [vmem:[#allocation67_spill] sm:$0xff]  ;;  %v10317_v52 = vld [vmem:[#allocation26_spill] sm:$0xff] }
 0x109   : > { %10312 = vst [vmem:[#allocation30_spill] sm:$0xff] %v6137_v3  ;;  %v1362_v4 = vmul.f32 %v10287_v5, %v10314_v6  ;;  %v1370_v27 = vmul.f32 %v10287_v5, %v5636_v34  ;;  %v2552_v62 = vmul.f32 %v6127_v12, %v5566_v10  ;;  %v6148_v21 = vperm.slane %v6068_v32, 5 }
 0x10a   : > { %v2502_v50 = vadd.f32 %v2486_v25, %v2469_v24  ;;  %v1483_v22 = vadd.f32 %v1467_v47, %v1450_v48  ;;  %v1500_v36 = vmul.f32 %v10316_v51, %v5847_v2  ;;  %v1345_v41 = vadd.f32 %v1329_v44, %v1312_v54  ;;  %v10319_v24 = vld [vmem:[#allocation37_spill] sm:$0xff]  ;;  %v10320_v2 = vld [vmem:[#allocation82_spill] sm:$0xff] }
 0x10b   : > { %10315 = vst [vmem:[#allocation54_spill] sm:$0xff] %v6148_v21  ;;  %v1395_v61 = vmul.f32 %v10301_v13, %v10317_v52  ;;  %v1339_v6 = vmul.f32 %v10281_v11, %v10289_v17  ;;  %v2585_v25 = vmul.f32 %v6137_v3, %v5736_v28  ;;  %v6159_v30 = vperm.slane %v6068_v32, 6 }
 0x10c   : > { %v2535_v60 = vadd.f32 %v2519_v18, %v2502_v50  ;;  %v1341_v48 = vmul.f32 %v10281_v11, %v5667_v31  ;;  %v1366_v47 = vmul.f32 %v10287_v5, %v5524_v58  ;;  %v1378_v44 = vadd.f32 %v1362_v4, %v1345_v41  ;;  %v10321_v11 = vld [vmem:[#allocation40_spill] sm:$0xff] }
 0x10d   : > { %10318 = vst [vmem:[#allocation31_spill] sm:$0xff] %v6159_v30  ;;  %v1428_v54 = vmul.f32 %v10306_v56, %v10319_v24  ;;  %v1386_v12 = vadd.f32 %v1370_v27, %v1353_v42  ;;  %v1403_v18 = vmul.f32 %v10301_v13, %v5503_v9  ;;  %v2618_v3 = vmul.f32 %v6148_v21, %v10271_v43  ;;  %v10322_v24 = vld [vmem:[#allocation116_spill] sm:$0xff] }
 0x10e   : > { %v2568_v50 = vadd.f32 %v2552_v62, %v2535_v60  ;;  %v1516_v32 = vadd.f32 %v1500_v36, %v1483_v22  ;;  %v1533_v39 = vmul.f32 %v10320_v2, %v5589_v63  ;;  %v1411_v31 = vadd.f32 %v1395_v61, %v1378_v44  ;;  %v10324_v60 = vld [vmem:[#allocation33_spill] sm:$0xff]  ;;  %v10326_v63 = vld [vmem:[#allocation86_spill] sm:$0xff] }
 0x10f   : > { %v1461_v16 = vmul.f32 %v10310_v55, %v10321_v11  ;;  %v1349_v41 = vadd.f32 %v1333_v57, %v1316_v45  ;;  %v1355_v4 = vadd.f32 %v1339_v6, %v1322_v59  ;;  %v2651_v42 = vmul.f32 %v6159_v30, %v10322_v24  ;;  %v10325_v22 = vld [vmem:[#allocation77_spill] sm:$0xff]  ;;  %v6188_v59 = vld [vmem:[%s10327_s17] ss:$0 sm:$0xff]  ;;  %v10332_v30 = vld [vmem:[#allocation47_spill] sm:$0xff]  ;;  %s11006_s17 = sld [smem:[#allocation172_spill]] }
 0x110   : > { %v2601_v19 = vadd.f32 %v2585_v25, %v2568_v50  ;;  %v1444_v27 = vadd.f32 %v1428_v54, %v1411_v31  ;;  %v1494_v62 = vmul.f32 %v10316_v51, %v10323_v0  ;;  %v643_v21 = vrot.slane %v10324_v60, 5  ;;  %10329 = vst [vmem:[#allocation26_spill] sm:$0xff] %v6188_v59  ;;  %v10330_v0 = vld [vmem:[#allocation83_spill] sm:$0xff]  ;;  %v10331_v25 = vld [vmem:[#allocation42_spill] sm:$0xff] }
 0x111   : > { %v716_v36 = vrot.slane %v10324_v60, 6  ;;  %v1372_v61 = vmul.f32 %v10287_v5, %v10325_v22  ;;  %v1419_v44 = vadd.f32 %v1403_v18, %v1386_v12  ;;  %v1436_v11 = vmul.f32 %v10306_v56, %v10326_v63 }
 0x112   : > { %v2634_v45 = vadd.f32 %v2618_v3, %v2601_v19  ;;  %v1549_v31 = vadd.f32 %v1533_v39, %v1516_v32  ;;  %v1566_v57 = vmul.f32 %v10330_v0, %v10265_v40  ;;  %v1477_v6 = vadd.f32 %v1461_v16, %v1444_v27 }
 0x113   : > { %v1527_v54 = vmul.f32 %v10320_v2, %v10331_v25  ;;  %v1357_v50 = vadd.f32 %v1341_v48, %v1324_v37  ;;  %v1374_v12 = vmul.f32 %v10287_v5, %v5679_v8  ;;  %v1560_v19 = vmul.f32 %v10330_v0, %v10332_v30  ;;  %v10340_v25 = vld [vmem:[#allocation84_spill] sm:$0xff] }
 0x114   : > { %v2667_v18 = vadd.f32 %v2651_v42, %v2634_v45  ;;  %v1510_v3 = vadd.f32 %v1494_v62, %v1477_v6  ;;  %v10333_v24 = vrot.slane %v10317_v52, 5  ;;  %v10335_v16 = vrot.slane %v10317_v52, 6  ;;  %v10338_v62 = vld [vmem:[#allocation92_spill] sm:$0xff] }
 0x115   : > { %v787_v37 = vrot.slane %v10324_v60, 7  ;;  %v1382_v48 = vadd.f32 %v1366_v47, %v1349_v41  ;;  %v1388_v42 = vadd.f32 %v1372_v61, %v1355_v4  ;;  %v1452_v27 = vadd.f32 %v1436_v11, %v1419_v44  ;;  %v10341_v4 = vld [vmem:[#allocation45_spill] sm:$0xff]  ;;  %v10342_v11 = vld [vmem:[#allocation39_spill] sm:$0xff]  ;;  %v10350_v5 = vld [vmem:[#allocation64_spill] sm:$0xff] }
 0x116   : > { %v6202_v39 = vsel %vm672_vm1, %v10333_v24, %v643_v21  ;;  %v6208_v32 = vsel %vm743_vm2, %v10335_v16, %v716_v36  ;;  %v6212_v30 = vadd.f32 %v6188_v59, %v2667_v18  ;;  %v1469_v45 = vmul.f32 %v10310_v55, %v10338_v62  ;;  %v10339_v24 = vld [vmem:[#allocation48_spill] sm:$0xff] }
 0x117   : > { %10334 = vst [vmem:[#allocation37_spill] sm:$0xff] %v6202_v39  ;;  %v1582_v6 = vadd.f32 %v1566_v57, %v1549_v31  ;;  %v1543_v21 = vadd.f32 %v1527_v54, %v1510_v3  ;;  %v1593_v8 = vmul.f32 %v10340_v25, %v10339_v24  ;;  %v1599_v36 = vmul.f32 %v10340_v25, %v5636_v34  ;;  %v10343_v31 = vld [vmem:[#allocation87_spill] sm:$0xff]  ;;  %v10349_v34 = vld [vmem:[#allocation96_spill] sm:$0xff] }
 0x118   : > { %10336 = vst [vmem:[#allocation40_spill] sm:$0xff] %v6208_v32  ;;  %v2706_v16 = vsel %vm492_vm0, %v6212_v30, 0.0  ;;  %v1068_v47 = vmul.f32 %v5360_v29, %v6202_v39  ;;  %v1101_v41 = vmul.f32 %v5376_v33, %v6208_v32  ;;  %v1399_v61 = vmul.f32 %v10301_v13, %v10341_v4  ;;  %v10346_v32 = vld [vmem:[#allocation81_spill] sm:$0xff] }
 0x119   : > { %10337 = vst [vmem:[#allocation41_spill] sm:$0xff] %v6212_v30  ;;  %2707 = vadd.xlane.f32.xlu1 %v2706_v16  ;;  %v1576_v44 = vadd.f32 %v1560_v19, %v1543_v21  ;;  %v1626_v57 = vmul.f32 %v10343_v31, %v10342_v11  ;;  %v10344_v54 = vrot.slane %v10317_v52, 7  ;;  %v1390_v3 = vadd.f32 %v1374_v12, %v1357_v50  ;;  %v10347_v21 = vld [vmem:[#allocation108_spill] sm:$0xff]  ;;  %v10348_v52 = vld [vmem:[#allocation55_spill] sm:$0xff]  ;;  %v10351_v33 = vld [vmem:[#allocation97_spill] sm:$0xff] }
 0x11a   : > { %v1405_v24 = vmul.f32 %v10301_v13, %v5540_v26  ;;  %v1407_v30 = vmul.f32 %v10301_v13, %v5566_v10  ;;  %v1432_v16 = vmul.f32 %v10306_v56, %v10346_v32  ;;  %v1485_v19 = vadd.f32 %v1469_v45, %v1452_v27  ;;  %v4691_v45 = vld [vmem:[#allocation2 + $0x28] sm:$0xff] }
 0x11b   : > { %v6234_v18 = vsel %vm814_vm3, %v10344_v54, %v787_v37  ;;  %v1502_v39 = vmul.f32 %v10316_v51, %v10347_v21  ;;  %v1609_v59 = vadd.f32 %v1593_v8, %v1576_v44  ;;  %v1659_v40 = vmul.f32 %v10349_v34, %v10348_v52 }
 0x11c   : > { %10345 = vst [vmem:[#allocation33_spill] sm:$0xff] %v6234_v18  ;;  %v1615_v37 = vadd.f32 %v1599_v36, %v1582_v6  ;;  %v1632_v50 = vmul.f32 %v10343_v31, %v5503_v9  ;;  %v1117_v12 = vadd.f32 %v1101_v41, %v1068_v47  ;;  %v1134_v54 = vmul.f32 %v5380_v35, %v6234_v18 }
 0x11d   : > { %v1415_v10 = vadd.f32 %v1399_v61, %v1382_v48  ;;  %v1642_v13 = vadd.f32 %v1626_v57, %v1609_v59  ;;  %v1692_v27 = vmul.f32 %v10351_v33, %v10350_v5  ;;  %v872_v29 = vrot.slane %v4691_v45, 1  ;;  %v10352_v48 = vld [vmem:[#allocation70_spill] sm:$0xff] }
 0x11e   : > { %v1421_v11 = vadd.f32 %v1405_v24, %v1388_v42  ;;  %v1423_v8 = vadd.f32 %v1407_v30, %v1390_v3  ;;  %v1438_v44 = vmul.f32 %v10306_v56, %v5728_v14  ;;  %v1440_v6 = vmul.f32 %v10306_v56, %v5736_v28  ;;  %v10353_v59 = vld [vmem:[#allocation98_spill] sm:$0xff]  ;;  %v10354_v24 = vld [vmem:[#allocation99_spill] sm:$0xff] }
 0x11f   : > { %v1518_v36 = vadd.f32 %v1502_v39, %v1485_v19  ;;  %v1535_v47 = vmul.f32 %v10320_v2, %v10288_v7  ;;  %v1675_v41 = vadd.f32 %v1659_v40, %v1642_v13  ;;  %v1725_v61 = vmul.f32 %v10353_v59, %v10352_v48  ;;  %v10357_v48 = vld [vmem:[#allocation90_spill] sm:$0xff] }
 0x120   : > { %v1648_v57 = vadd.f32 %v1632_v50, %v1615_v37  ;;  %v1665_v5 = vmul.f32 %v10349_v34, %v10326_v63  ;;  %v1150_v42 = vadd.f32 %v1134_v54, %v1117_v12  ;;  %v1167_v30 = vmul.f32 %v5386_v38, %v10324_v60 }
 0x121   : > { %v1708_v3 = vadd.f32 %v1692_v27, %v1675_v41  ;;  %v1758_v52 = vmul.f32 %v10354_v24, %v10298_v23  ;;  %v10355_v39 = vrot.slane %v10324_v60, 1  ;;  %v943_v13 = vrot.slane %v4691_v45, 2  ;;  %v10358_v23 = vld [vmem:[#allocation100_spill] sm:$0xff] }
 0x122   : > { %v1448_v19 = vadd.f32 %v1432_v16, %v1415_v10  ;;  %v1454_v37 = vadd.f32 %v1438_v44, %v1421_v11  ;;  %v1456_v50 = vadd.f32 %v1440_v6, %v1423_v8  ;;  %v1465_v12 = vmul.f32 %v10310_v55, %v10357_v48  ;;  %v10359_v16 = vld [vmem:[#allocation101_spill] sm:$0xff] }
 0x123   : > { %v6270_v40 = vsel %vm885_vm4, %v10355_v39, %v872_v29  ;;  %v1551_v54 = vadd.f32 %v1535_v47, %v1518_v36  ;;  %v1568_v27 = vmul.f32 %v10330_v0, %v10289_v17  ;;  %v1741_v41 = vadd.f32 %v1725_v61, %v1708_v3  ;;  %v10363_v3 = vld [vmem:[#allocation103_spill] sm:$0xff] }
 0x124   : > { %10356 = vst [vmem:[#allocation42_spill] sm:$0xff] %v6270_v40  ;;  %v1791_v18 = vmul.f32 %v10358_v23, %v10313_v15  ;;  %v1681_v9 = vadd.f32 %v1665_v5, %v1648_v57  ;;  %v1698_v29 = vmul.f32 %v10351_v33, %v10338_v62  ;;  %v1183_v39 = vadd.f32 %v1167_v30, %v1150_v42  ;;  %v10362_v57 = vld [vmem:[#allocation95_spill] sm:$0xff] }
 0x125   : > { %v1200_v10 = vmul.f32 %v5395_v46, %v6270_v40  ;;  %v1774_v11 = vadd.f32 %v1758_v52, %v1741_v41  ;;  %v1824_v8 = vmul.f32 %v10359_v16, %v5524_v58  ;;  %v10360_v44 = vrot.slane %v10324_v60, 2 }
 0x126   : > { %v1014_v36 = vrot.slane %v4691_v45, 3  ;;  %v1471_v15 = vmul.f32 %v10310_v55, %v10270_v1  ;;  %v1473_v47 = vmul.f32 %v10310_v55, %v10271_v43  ;;  %v1481_v61 = vadd.f32 %v1465_v12, %v1448_v19  ;;  %v10364_v12 = vld [vmem:[#allocation104_spill] sm:$0xff] }
 0x127   : > { %v6288_v6 = vsel %vm956_vm5, %v10360_v44, %v943_v13  ;;  %v1498_v5 = vmul.f32 %v10316_v51, %v10362_v57  ;;  %v1584_v42 = vadd.f32 %v1568_v27, %v1551_v54  ;;  %v1601_v58 = vmul.f32 %v10340_v25, %v10325_v22  ;;  %v10365_v54 = vld [vmem:[#allocation46_spill] sm:$0xff] }
 0x128   : > { %10361 = vst [vmem:[#allocation47_spill] sm:$0xff] %v6288_v6  ;;  %v1807_v30 = vadd.f32 %v1791_v18, %v1774_v11  ;;  %v1857_v52 = vmul.f32 %v10363_v3, %v10341_v4  ;;  %v1714_v13 = vadd.f32 %v1698_v29, %v1681_v9  ;;  %v1731_v45 = vmul.f32 %v10353_v59, %v10347_v21  ;;  %v6379_v21 = vld [vmem:[#allocation2 + $0x60] sm:$0xff] }
 0x129   : > { %v1216_v41 = vadd.f32 %v1200_v10, %v1183_v39  ;;  %v1233_v44 = vmul.f32 %v5404_v49, %v6288_v6  ;;  %v1890_v40 = vmul.f32 %v10364_v12, %v10346_v32  ;;  %v644_v27 = vrot.slane %v10365_v54, 5  ;;  %v10368_v10 = vld [vmem:[#allocation116_spill] sm:$0xff]  ;;  %v10369_v6 = vld [vmem:[#allocation105_spill] sm:$0xff] }
 0x12a   : > { %v1840_v19 = vadd.f32 %v1824_v8, %v1807_v30  ;;  %v10366_v43 = vrot.slane %v10324_v60, 3  ;;  %v1487_v9 = vadd.f32 %v1471_v15, %v1454_v37  ;;  %v1489_v29 = vadd.f32 %v1473_v47, %v1456_v50  ;;  %v10370_v50 = vld [vmem:[#allocation43_spill] sm:$0xff]  ;;  %v10371_v47 = vld [vmem:[#allocation106_spill] sm:$0xff] }
 0x12b   : > { %v1504_v39 = vmul.f32 %v10316_v51, %v5940_v53  ;;  %v1506_v11 = vmul.f32 %v10316_v51, %v10368_v10  ;;  %v1617_v8 = vadd.f32 %v1601_v58, %v1584_v42  ;;  %v1634_v32 = vmul.f32 %v10343_v31, %v5540_v26  ;;  %v10372_v42 = vld [vmem:[#allocation39_spill] sm:$0xff]  ;;  %v4694_v51 = vld [vmem:[#allocation2 + $0x40] sm:$0xff] }
 0x12c   : > { %v6311_v18 = vsel %vm1027_vm6, %v10366_v43, %v1014_v36  ;;  %v1873_v30 = vadd.f32 %v1857_v52, %v1840_v19  ;;  %v1923_v60 = vmul.f32 %v10369_v6, %v10357_v48  ;;  %v1747_v28 = vadd.f32 %v1731_v45, %v1714_v13  ;;  %10393 = vst [vmem:[#allocation39_spill] sm:$0xff] %v6379_v21 }
 0x12d   : > { %10367 = vst [vmem:[#allocation48_spill] sm:$0xff] %v6311_v18  ;;  %v1764_v43 = vmul.f32 %v10354_v24, %v10288_v7  ;;  %v1249_v37 = vadd.f32 %v1233_v44, %v1216_v41  ;;  %v1266_v36 = vmul.f32 %v10370_v50, %v6311_v18  ;;  %v1956_v10 = vmul.f32 %v10371_v47, %v10362_v57  ;;  %v10377_v41 = vld [vmem:[#allocation78_spill] sm:$0xff]  ;;  %v10378_v18 = vld [vmem:[#allocation59_spill] sm:$0xff] }
 0x12e   : > { %v1906_v15 = vadd.f32 %v1890_v40, %v1873_v30  ;;  %v10373_v58 = vrot.slane %v10372_v42, 5  ;;  %v717_v48 = vrot.slane %v10365_v54, 6  ;;  %v6334_v13 = vadd.f32 %v1498_v5, %v1481_v61  ;;  %v10379_v7 = vld [vmem:[#allocation107_spill] sm:$0xff]  ;;  %v10380_v5 = vld [vmem:[#allocation44_spill] sm:$0xff] }
 0x12f   : > { %v1520_v45 = vadd.f32 %v1504_v39, %v1487_v9  ;;  %v6336_v19 = vadd.f32 %v1506_v11, %v1489_v29  ;;  %v1537_v44 = vmul.f32 %v10320_v2, %v10377_v41  ;;  %v1650_v40 = vadd.f32 %v1634_v32, %v1617_v8  ;;  %v10381_v39 = vld [vmem:[#allocation60_spill] sm:$0xff]  ;;  %v10382_v11 = vld [vmem:[#allocation109_spill] sm:$0xff] }
 0x130   : > { %v6331_v52 = vsel %vm672_vm1, %v10373_v58, %v644_v27  ;;  %10375 = vst [vmem:[#allocation55_spill] sm:$0xff] %v6334_v13  ;;  %v1667_v57 = vmul.f32 %v10349_v34, %v5728_v14  ;;  %v1939_v30 = vadd.f32 %v1923_v60, %v1906_v15  ;;  %v1989_v4 = vmul.f32 %v10379_v7, %v10378_v18  ;;  %v6356_v60 = vld [vmem:[#allocation2 + $0x38] sm:$0xff]  ;;  %v10389_v15 = vld [vmem:[#allocation32_spill] sm:$0xff] }
 0x131   : > { %10374 = vst [vmem:[#allocation81_spill] sm:$0xff] %v6331_v52  ;;  %v1780_v27 = vadd.f32 %v1764_v43, %v1747_v28  ;;  %v1797_v58 = vmul.f32 %v10358_v23, %v10289_v17  ;;  %v1282_v61 = vadd.f32 %v1266_v36, %v1249_v37  ;;  %v1299_v9 = vmul.f32 %v10380_v5, %v6331_v52  ;;  %v10388_v37 = vld [vmem:[#allocation29_spill] sm:$0xff] }
 0x132   : > { %10376 = vst [vmem:[#allocation64_spill] sm:$0xff] %v6336_v19  ;;  %v1972_v29 = vadd.f32 %v1956_v10, %v1939_v30  ;;  %v2022_v19 = vmul.f32 %v10382_v11, %v10381_v39  ;;  %v10383_v8 = vrot.slane %v10372_v42, 6  ;;  %v788_v28 = vrot.slane %v6356_v60, 7  ;;  %v10390_v17 = vld [vmem:[#allocation61_spill] sm:$0xff]  ;;  %v10391_v11 = vld [vmem:[#allocation110_spill] sm:$0xff] }
 0x133   : > { %10385 = vst [vmem:[#allocation90_spill] sm:$0xff] %v6356_v60  ;;  %v6361_v43 = vmul.f32 %v10320_v2, %v10378_v18  ;;  %v6365_v10 = vmul.f32 %v10330_v0, %v10381_v39  ;;  %v1070_v36 = vmul.f32 %v10388_v37, %v6331_v52  ;;  %v2055_v5 = vmul.f32 %v10391_v11, %v10390_v17 }
 0x134   : > { %v6354_v32 = vsel %vm743_vm2, %v10383_v8, %v717_v48  ;;  %v1553_v48 = vadd.f32 %v1537_v44, %v1520_v45  ;;  %v1700_v8 = vmul.f32 %v10351_v33, %v10270_v1  ;;  %v2005_v13 = vadd.f32 %v1989_v4, %v1972_v29  ;;  %v10394_v45 = vld [vmem:[#allocation111_spill] sm:$0xff] }
 0x135   : > { %10384 = vst [vmem:[#allocation70_spill] sm:$0xff] %v6354_v32  ;;  %v1103_v30 = vmul.f32 %v10389_v15, %v6354_v32  ;;  %v1813_v18 = vadd.f32 %v1797_v58, %v1780_v27  ;;  %v1315_v39 = vadd.f32 %v1299_v9, %v1282_v61  ;;  %v1683_v52 = vadd.f32 %v1667_v57, %v1650_v40  ;;  %v10397_v61 = vld [vmem:[#allocation123_spill] sm:$0xff] }
 0x136   : > { %10386 = vst [vmem:[#allocation95_spill] sm:$0xff] %v6361_v43  ;;  %v1830_v43 = vmul.f32 %v10359_v16, %v10325_v22  ;;  %v2038_v34 = vadd.f32 %v2022_v19, %v2005_v13  ;;  %v2088_v44 = vmul.f32 %v6379_v21, %v10394_v45  ;;  %v10395_v4 = vrot.slane %v10372_v42, 7  ;;  %v10398_v13 = vld [vmem:[#allocation79_spill] sm:$0xff]  ;;  %v10399_v42 = vld [vmem:[#allocation85_spill] sm:$0xff] }
 0x137   : > { %10387 = vst [vmem:[#allocation46_spill] sm:$0xff] %v6365_v10  ;;  %v10392_v10 = vld [vmem:[#allocation49_spill] sm:$0xff]  ;;  %v1119_v27 = vadd.f32 %v1103_v30, %v1070_v36  ;;  %v642_v9 = vrot.slane %v10397_v61, 5  ;;  %v715_v40 = vrot.slane %v10397_v61, 6  ;;  %v1570_v19 = vmul.f32 %v10330_v0, %v10398_v13  ;;  %v10401_v36 = vld [vmem:[#allocation50_spill] sm:$0xff] }
 0x138   : > { %v1332_v2 = vmul.f32 %v10392_v10, %v6354_v32  ;;  %v6387_v29 = vsel %vm814_vm3, %v10395_v4, %v788_v28  ;;  %v1863_v57 = vmul.f32 %v10363_v3, %v5540_v26  ;;  %v2071_v32 = vadd.f32 %v2055_v5, %v2038_v34  ;;  %v10400_v21 = vld [vmem:[#allocation113_spill] sm:$0xff]  ;;  %v10404_v10 = vld [vmem:[#allocation91_spill] sm:$0xff]  ;;  %v10405_v0 = vld [vmem:[#allocation114_spill] sm:$0xff] }
 0x139   : > { %10396 = vst [vmem:[#allocation59_spill] sm:$0xff] %v6387_v29  ;;  %v1136_v58 = vmul.f32 %v5380_v35, %v6387_v29  ;;  %v2121_v45 = vmul.f32 %v10400_v21, %v10399_v42  ;;  %v1846_v28 = vadd.f32 %v1830_v43, %v1813_v18  ;;  %v1365_v30 = vmul.f32 %v10401_v36, %v6387_v29  ;;  %v10402_v35 = vld [vmem:[#allocation120_spill] sm:$0xff]  ;;  %v10410_v36 = vld [vmem:[#allocation66_spill] sm:$0xff] }
 0x13a   : > { %v1348_v4 = vadd.f32 %v1332_v2, %v1315_v39  ;;  %v10403_v33 = vrot.slane %v10402_v35, 5  ;;  %v2104_v11 = vadd.f32 %v2088_v44, %v2071_v32  ;;  %v2154_v22 = vmul.f32 %v10405_v0, %v10404_v10  ;;  %v10407_v32 = vld [vmem:[#allocation102_spill] sm:$0xff]  ;;  %v10408_v44 = vld [vmem:[#allocation115_spill] sm:$0xff] }
 0x13b   : > { %v873_v26 = vrot.slane %v4694_v51, 1  ;;  %v10406_v34 = vrot.slane %v10402_v35, 6  ;;  %v1716_v2 = vadd.f32 %v1700_v8, %v1683_v52  ;;  %v1733_v43 = vmul.f32 %v10353_v59, %v5940_v53 }
 0x13c   : > { %v673_v61 = vsel %vm672_vm1, %v10403_v33, %v642_v9  ;;  %v1896_v18 = vmul.f32 %v10364_v12, %v5728_v14  ;;  %v1152_v39 = vadd.f32 %v1136_v58, %v1119_v27  ;;  %v2137_v33 = vadd.f32 %v2121_v45, %v2104_v11  ;;  %v10411_v14 = vld [vmem:[#allocation117_spill] sm:$0xff] }
 0x13d   : > { %v744_v5 = vsel %vm743_vm2, %v10406_v34, %v715_v40  ;;  %v2187_v9 = vmul.f32 %v10408_v44, %v10407_v32  ;;  %v1169_v29 = vmul.f32 %v6356_v60, %v5386_v38  ;;  %v1066_v35 = vmul.f32 %v10388_v37, %v673_v61  ;;  %v10409_v40 = vld [vmem:[#allocation56_spill] sm:$0xff] }
 0x13e   : > { %v1879_v0 = vadd.f32 %v1863_v57, %v1846_v28  ;;  %v1381_v21 = vadd.f32 %v1365_v30, %v1348_v4  ;;  %v1398_v52 = vmul.f32 %v6356_v60, %v10409_v40  ;;  %v1099_v8 = vmul.f32 %v10389_v15, %v744_v5  ;;  %v10416_v30 = vld [vmem:[#allocation69_spill] sm:$0xff]  ;;  %v10417_v5 = vld [vmem:[#allocation118_spill] sm:$0xff] }
 0x13f   : > { %v2170_v34 = vadd.f32 %v2154_v22, %v2137_v33  ;;  %v2220_v27 = vmul.f32 %v10411_v14, %v10410_v36  ;;  %v10412_v11 = vrot.slane %v10365_v54, 1  ;;  %v944_v58 = vrot.slane %v4694_v51, 2 }
 0x140   : > { %v6433_v61 = vmul.f32 %v10340_v25, %v10390_v17  ;;  %v1749_v57 = vadd.f32 %v1733_v43, %v1716_v2  ;;  %v1766_v28 = vmul.f32 %v10354_v24, %v10377_v41  ;;  %v6437_v4 = vadd.f32 %v1099_v8, %v1066_v35  ;;  %v10419_v35 = vld [vmem:[#allocation119_spill] sm:$0xff] }
 0x141   : > { %v6429_v45 = vsel %vm885_vm4, %v10412_v11, %v873_v26  ;;  %v2203_v22 = vadd.f32 %v2187_v9, %v2170_v34  ;;  %v2253_v33 = vmul.f32 %v10417_v5, %v10416_v30  ;;  %v1185_v60 = vadd.f32 %v1169_v29, %v1152_v39 }
 0x142   : > { %10413 = vst [vmem:[#allocation60_spill] sm:$0xff] %v6429_v45  ;;  %v1202_v26 = vmul.f32 %v5395_v46, %v6429_v45  ;;  %v1912_v11 = vadd.f32 %v1896_v18, %v1879_v0  ;;  %v1929_v36 = vmul.f32 %v10369_v6, %v10270_v1  ;;  %v1414_v17 = vadd.f32 %v1398_v52, %v1381_v21  ;;  %v10422_v0 = vld [vmem:[#allocation80_spill] sm:$0xff] }
 0x143   : > { %10414 = vst [vmem:[#allocation29_spill] sm:$0xff] %v6433_v61  ;;  %v1431_v2 = vmul.f32 %v10306_v56, %v6429_v45  ;;  %v2236_v43 = vadd.f32 %v2220_v27, %v2203_v22  ;;  %v10418_v61 = vld [vmem:[#allocation75_spill] sm:$0xff]  ;;  %v10420_v9 = vrot.slane %v10365_v54, 2  ;;  %v1015_v39 = vrot.slane %v4694_v51, 3  ;;  %v10424_v22 = vld [vmem:[#allocation122_spill] sm:$0xff] }
 0x144   : > { %10415 = vst [vmem:[#allocation61_spill] sm:$0xff] %v6437_v4  ;;  %v2286_v8 = vmul.f32 %v10419_v35, %v10418_v61  ;;  %v1586_v34 = vadd.f32 %v1570_v19, %v1553_v48  ;;  %v1603_v18 = vmul.f32 %v10340_v25, %v10422_v0  ;;  %v1782_v30 = vadd.f32 %v1766_v28, %v1749_v57  ;;  %v6459_v27 = vld [vmem:[#allocation2 + $0x78] sm:$0xff]  ;;  %v10425_v28 = vld [vmem:[#allocation124_spill] sm:$0xff]  ;;  %v10433_v35 = vld [vmem:[#allocation53_spill] sm:$0xff] }
 0x145   : > { %v6453_v29 = vsel %vm956_vm5, %v10420_v9, %v944_v58  ;;  %v1799_v21 = vmul.f32 %v10358_v23, %v10398_v13  ;;  %v2269_v52 = vadd.f32 %v2253_v33, %v2236_v43  ;;  %10423 = vst [vmem:[#allocation91_spill] sm:$0xff] %v6459_v27  ;;  %v2319_v45 = vmul.f32 %v6459_v27, %v10424_v22  ;;  %v6471_v43 = vld [vmem:[#allocation2 + $0x50] sm:$0xff]  ;;  %v10445_v4 = vld [vmem:[#allocation128_spill] sm:$0xff] }
 0x146   : > { %10421 = vst [vmem:[#allocation85_spill] sm:$0xff] %v6453_v29  ;;  %v1218_v61 = vadd.f32 %v1202_v26, %v1185_v60  ;;  %v1235_v58 = vmul.f32 %v5404_v49, %v6453_v29  ;;  %v1945_v9 = vadd.f32 %v1929_v36, %v1912_v11  ;;  %v1962_v51 = vmul.f32 %v10371_v47, %v5940_v53  ;;  %v6480_v11 = vld [vmem:[#allocation2 + $0xa8] sm:$0xff] }
 0x147   : > { %v1447_v48 = vadd.f32 %v1431_v2, %v1414_v17  ;;  %v1464_v19 = vmul.f32 %v10310_v55, %v6453_v29  ;;  %v2302_v57 = vadd.f32 %v2286_v8, %v2269_v52  ;;  %v2352_v33 = vmul.f32 %v10425_v28, %v10326_v63  ;;  %10426 = vst [vmem:[#allocation102_spill] sm:$0xff] %v6471_v43  ;;  %v10430_v29 = vld [vmem:[#allocation125_spill] sm:$0xff] }
 0x148   : > { %v645_v27 = vrot.slane %v6471_v43, 5  ;;  %v10427_v60 = vrot.slane %v10365_v54, 3  ;;  %v1619_v26 = vadd.f32 %v1603_v18, %v1586_v34  ;;  %10429 = vst [vmem:[#allocation131_spill] sm:$0xff] %v6480_v11  ;;  %v1636_v17 = vmul.f32 %v6480_v11, %v10343_v31 }
 0x149   : > { %v1815_v2 = vadd.f32 %v1799_v21, %v1782_v30  ;;  %v1832_v8 = vmul.f32 %v10359_v16, %v10422_v0  ;;  %v2335_v52 = vadd.f32 %v2319_v45, %v2302_v57  ;;  %v2385_v63 = vmul.f32 %v10430_v29, %v10338_v62  ;;  %v10432_v21 = vld [vmem:[#allocation108_spill] sm:$0xff]  ;;  %v10434_v45 = vld [vmem:[#allocation45_spill] sm:$0xff] }
 0x14a   : > { %v6478_v36 = vsel %vm1027_vm6, %v10427_v60, %v1015_v39  ;;  %v1251_v28 = vadd.f32 %v1235_v58, %v1218_v61  ;;  %v1978_v39 = vadd.f32 %v1962_v51, %v1945_v9  ;;  %v1995_v34 = vmul.f32 %v10379_v7, %v10377_v41  ;;  %v10431_v60 = vld [vmem:[#allocation67_spill] sm:$0xff]  ;;  %v10437_v51 = vld [vmem:[#allocation89_spill] sm:$0xff]  ;;  %v10438_v62 = vld [vmem:[#allocation96_spill] sm:$0xff] }
 0x14b   : > { %10428 = vst [vmem:[#allocation130_spill] sm:$0xff] %v6478_v36  ;;  %v1268_v54 = vmul.f32 %v10370_v50, %v6478_v36  ;;  %v1480_v18 = vadd.f32 %v1464_v19, %v1447_v48  ;;  %v1497_v22 = vmul.f32 %v10431_v60, %v6478_v36  ;;  %v2368_v30 = vadd.f32 %v2352_v33, %v2335_v52  ;;  %v10439_v52 = vld [vmem:[#allocation74_spill] sm:$0xff]  ;;  %v10440_v36 = vld [vmem:[#allocation127_spill] sm:$0xff]  ;;  %v10441_v29 = vld [vmem:[#allocation44_spill] sm:$0xff] }
 0x14c   : > { %v2418_v5 = vmul.f32 %v10433_v35, %v10432_v21  ;;  %v10435_v57 = vrot.slane %v10434_v45, 5  ;;  %v718_v58 = vrot.slane %v6471_v43, 6  ;;  %v1652_v9 = vadd.f32 %v1636_v17, %v1619_v26  ;;  %v10443_v17 = vld [vmem:[#allocation82_spill] sm:$0xff] }
 0x14d   : > { %v1669_v41 = vmul.f32 %v10438_v62, %v10437_v51  ;;  %v1848_v48 = vadd.f32 %v1832_v8, %v1815_v2  ;;  %v1865_v19 = vmul.f32 %v6480_v11, %v10363_v3  ;;  %v2401_v33 = vadd.f32 %v2385_v63, %v2368_v30  ;;  %v10444_v8 = vld [vmem:[#allocation76_spill] sm:$0xff]  ;;  %v10449_v30 = vld [vmem:[#allocation77_spill] sm:$0xff] }
 0x14e   : > { %v6500_v61 = vsel %vm672_vm1, %v10435_v57, %v645_v27  ;;  %v2451_v21 = vmul.f32 %v10440_v36, %v10439_v52  ;;  %v1284_v35 = vadd.f32 %v1268_v54, %v1251_v28  ;;  %v2011_v27 = vadd.f32 %v1995_v34, %v1978_v39  ;;  %v10442_v57 = vld [vmem:[#allocation109_spill] sm:$0xff] }
 0x14f   : > { %10436 = vst [vmem:[#allocation45_spill] sm:$0xff] %v6500_v61  ;;  %v1301_v14 = vmul.f32 %v10441_v29, %v6500_v61  ;;  %v2028_v44 = vmul.f32 %v10442_v57, %v10398_v13  ;;  %v1513_v26 = vadd.f32 %v1497_v22, %v1480_v18  ;;  %v1530_v50 = vmul.f32 %v10443_v17, %v6500_v61  ;;  %v10451_v52 = vld [vmem:[#allocation49_spill] sm:$0xff] }
 0x150   : > { %v2434_v2 = vadd.f32 %v2418_v5, %v2401_v33  ;;  %v2484_v49 = vmul.f32 %v10445_v4, %v10444_v8  ;;  %v10446_v63 = vrot.slane %v10434_v45, 6  ;;  %v789_v54 = vrot.slane %v6471_v43, 7  ;;  %v10450_v33 = vld [vmem:[#allocation129_spill] sm:$0xff]  ;;  %v10452_v4 = vld [vmem:[#allocation110_spill] sm:$0xff] }
 0x151   : > { %v6526_v39 = vmul.f32 %v10438_v62, %v10399_v42  ;;  %v1685_v22 = vadd.f32 %v1669_v41, %v1652_v9  ;;  %v1881_v34 = vadd.f32 %v1865_v19, %v1848_v48  ;;  %v1898_v5 = vmul.f32 %v10364_v12, %v10437_v51  ;;  %v10453_v42 = vld [vmem:[#allocation83_spill] sm:$0xff]  ;;  %v10454_v9 = vld [vmem:[#allocation94_spill] sm:$0xff]  ;;  %v10455_v48 = vld [vmem:[#allocation97_spill] sm:$0xff] }
 0x152   : > { %v6521_v28 = vsel %vm743_vm2, %v10446_v63, %v718_v58  ;;  %v2467_v18 = vadd.f32 %v2451_v21, %v2434_v2  ;;  %v2517_v13 = vmul.f32 %v10450_v33, %v10449_v30  ;;  %v1317_v8 = vadd.f32 %v1301_v14, %v1284_v35  ;;  %v6540_v21 = vld [vmem:[#allocation2 + $0x90] sm:$0xff]  ;;  %v10457_v2 = vld [vmem:[#allocation28_spill] sm:$0xff]  ;;  %v10465_v33 = vld [vmem:[#allocation111_spill] sm:$0xff] }
 0x153   : > { %10447 = vst [vmem:[#allocation132_spill] sm:$0xff] %v6521_v28  ;;  %v1334_v58 = vmul.f32 %v10451_v52, %v6521_v28  ;;  %v2044_v63 = vadd.f32 %v2028_v44, %v2011_v27  ;;  %v2061_v36 = vmul.f32 %v10452_v4, %v10422_v0  ;;  %v1546_v29 = vadd.f32 %v1530_v50, %v1513_v26  ;;  %v10462_v0 = vld [vmem:[#allocation88_spill] sm:$0xff] }
 0x154   : > { %10448 = vst [vmem:[#allocation133_spill] sm:$0xff] %v6526_v39  ;;  %v1563_v41 = vmul.f32 %v10453_v42, %v6521_v28  ;;  %v1702_v19 = vmul.f32 %v10455_v48, %v10454_v9  ;;  %v2500_v39 = vadd.f32 %v2484_v49, %v2467_v18  ;;  %v2550_v14 = vmul.f32 %v6540_v21, %v10457_v2 }
 0x155   : > { %10456 = vst [vmem:[#allocation134_spill] sm:$0xff] %v6540_v21  ;;  %v10458_v35 = vrot.slane %v10434_v45, 7  ;;  %v6552_v50 = vmul.f32 %v10455_v48, %v10404_v10  ;;  %v6556_v27 = vmul.f32 %v10353_v59, %v10407_v32  ;;  %v1914_v49 = vadd.f32 %v1898_v5, %v1881_v34  ;;  %v10463_v21 = vld [vmem:[#allocation30_spill] sm:$0xff] }
 0x156   : > { %v1931_v26 = vmul.f32 %v10369_v6, %v10454_v9  ;;  %v2533_v18 = vadd.f32 %v2517_v13, %v2500_v39  ;;  %v2583_v45 = vmul.f32 %v10463_v21, %v10462_v0  ;;  %v1350_v30 = vadd.f32 %v1334_v58, %v1317_v8  ;;  %v4699_v39 = vld [vmem:[#allocation2 + $0x58] sm:$0xff]  ;;  %v10467_v0 = vld [vmem:[#allocation116_spill] sm:$0xff] }
 0x157   : > { %v6548_v44 = vsel %vm814_vm3, %v10458_v35, %v789_v54  ;;  %10460 = vst [vmem:[#allocation136_spill] sm:$0xff] %v6552_v50  ;;  %v10464_v54 = vld [vmem:[#allocation50_spill] sm:$0xff]  ;;  %v2077_v2 = vadd.f32 %v2061_v36, %v2044_v63  ;;  %v2094_v10 = vmul.f32 %v6480_v11, %v10465_v33  ;;  %v1579_v50 = vadd.f32 %v1563_v41, %v1546_v29  ;;  %v10468_v63 = vld [vmem:[#allocation113_spill] sm:$0xff]  ;;  %v10469_v11 = vld [vmem:[#allocation31_spill] sm:$0xff] }
 0x158   : > { %10459 = vst [vmem:[#allocation135_spill] sm:$0xff] %v6548_v44  ;;  %v1367_v35 = vmul.f32 %v10464_v54, %v6548_v44  ;;  %v1596_v32 = vmul.f32 %v10340_v25, %v6548_v44  ;;  %v1718_v34 = vadd.f32 %v1702_v19, %v1685_v22  ;;  %v2566_v5 = vadd.f32 %v2550_v14, %v2533_v18 }
 0x159   : > { %10461 = vst [vmem:[#allocation137_spill] sm:$0xff] %v6556_v27  ;;  %v10466_v27 = vld [vmem:[#allocation54_spill] sm:$0xff]  ;;  %v874_v52 = vrot.slane %v4699_v39, 1  ;;  %v1735_v8 = vmul.f32 %v10353_v59, %v10467_v0  ;;  %v1947_v58 = vadd.f32 %v1931_v26, %v1914_v49  ;;  %v1964_v36 = vmul.f32 %v10371_v47, %v10467_v0 }
 0x15a   : > { %v2616_v13 = vmul.f32 %v10466_v27, %v10270_v1  ;;  %v2127_v29 = vmul.f32 %v10468_v63, %v10437_v51  ;;  %v2599_v41 = vadd.f32 %v2583_v45, %v2566_v5  ;;  %v2649_v22 = vmul.f32 %v10469_v11, %v5940_v53  ;;  %v6580_v1 = vld [vmem:[#allocation2 + $0x68] sm:$0xff] }
 0x15b   : > { %v1383_v19 = vadd.f32 %v1367_v35, %v1350_v30  ;;  %v1400_v14 = vmul.f32 %v6471_v43, %v10409_v40  ;;  %v2110_v18 = vadd.f32 %v2094_v10, %v2077_v2  ;;  %10470 = vst [vmem:[#allocation138_spill] sm:$0xff] %v6580_v1  ;;  %v646_v27 = vrot.slane %v6580_v1, 5  ;;  %v10471_v45 = vld [vmem:[#allocation65_spill] sm:$0xff] }
 0x15c   : > { %v1612_v49 = vadd.f32 %v1596_v32, %v1579_v50  ;;  %v1629_v26 = vmul.f32 %v6471_v43, %v10343_v31  ;;  %v2632_v0 = vadd.f32 %v2616_v13, %v2599_v41  ;;  %v719_v51 = vrot.slane %v6580_v1, 6  ;;  %v10476_v32 = vld [vmem:[#allocation114_spill] sm:$0xff] }
 0x15d   : > { %v10472_v5 = vrot.slane %v10471_v45, 1  ;;  %v945_v35 = vrot.slane %v4699_v39, 2  ;;  %v6592_v53 = vadd.f32 %v1735_v8, %v1718_v34  ;;  %v6594_v2 = vadd.f32 %v1964_v36, %v1947_v58  ;;  %v10482_v58 = vld [vmem:[#allocation26_spill] sm:$0xff] }
 0x15e   : > { %v790_v10 = vrot.slane %v6580_v1, 7  ;;  %v1016_v50 = vrot.slane %v4699_v39, 3  ;;  %v6599_v11 = vmul.f32 %v10476_v32, %v10454_v9  ;;  %v2665_v13 = vadd.f32 %v2649_v22, %v2632_v0 }
 0x15f   : > { %v6590_v30 = vsel %vm885_vm4, %v10472_v5, %v874_v52  ;;  %10474 = vst [vmem:[#allocation139_spill] sm:$0xff] %v6592_v53  ;;  %v1416_v41 = vadd.f32 %v1400_v14, %v1383_v19  ;;  %v6603_v40 = vadd.f32 %v2127_v29, %v2110_v18  ;;  %v10479_v52 = vld [vmem:[#allocation51_spill] sm:$0xff]  ;;  %v1645_v8 = vadd.f32 %v1629_v26, %v1612_v49  ;;  %v4701_v29 = vld [vmem:[#allocation2 + $0x70] sm:$0xff]  ;;  %v6628_v18 = vld [vmem:[#allocation2 + $0x80] sm:$0xff] }
 0x160   : > { %10473 = vst [vmem:[#allocation65_spill] sm:$0xff] %v6590_v30  ;;  %v1433_v21 = vmul.f32 %v10306_v56, %v6590_v30  ;;  %v10480_v5 = vrot.slane %v10479_v52, 5  ;;  %v1662_v39 = vmul.f32 %v10438_v62, %v6590_v30  ;;  %v6614_v36 = vadd.f32 %v10482_v58, %v2665_v13 }
 0x161   : > { %10475 = vst [vmem:[#allocation140_spill] sm:$0xff] %v6594_v2  ;;  %v10484_v0 = vrot.slane %v10479_v52, 6  ;;  %v875_v19 = vrot.slane %v4701_v29, 1  ;;  %v10486_v14 = vrot.slane %v10471_v45, 2  ;;  %v647_v49 = vrot.slane %v6628_v18, 5  ;;  %v10496_v2 = vld [vmem:[#allocation52_spill] sm:$0xff] }
 0x162   : > { %10477 = vst [vmem:[#allocation141_spill] sm:$0xff] %v6599_v11  ;;  %v6609_v34 = vsel %vm672_vm1, %v10480_v5, %v646_v27  ;;  %v10488_v26 = vrot.slane %v10479_v52, 7  ;;  %v10490_v5 = vrot.slane %v10471_v45, 3  ;;  %v720_v52 = vrot.slane %v6628_v18, 6 }
 0x163   : > { %10478 = vst [vmem:[#allocation142_spill] sm:$0xff] %v6603_v40  ;;  %v6620_v22 = vsel %vm743_vm2, %v10484_v0, %v719_v51  ;;  %v6626_v27 = vsel %vm956_vm5, %v10486_v14, %v945_v35  ;;  %v946_v51 = vrot.slane %v4701_v29, 2  ;;  %v2700_v35 = vsel %vm492_vm0, %v6614_v36, 0.0  ;;  %v6651_v40 = vld [vmem:[#allocation2 + $0x98] sm:$0xff] }
 0x164   : > { %10481 = vst [vmem:[#allocation51_spill] sm:$0xff] %v6609_v34  ;;  %v6635_v13 = vsel %vm814_vm3, %v10488_v26, %v790_v10  ;;  %v6641_v58 = vsel %vm1027_vm6, %v10490_v5, %v1016_v50  ;;  %v1017_v0 = vrot.slane %v4701_v29, 3  ;;  %v1449_v14 = vadd.f32 %v1433_v21, %v1416_v41  ;;  %2701 = vadd.xlane.f32.xlu0 %v2700_v35  ;;  %v4704_v5 = vld [vmem:[#allocation2 + $0x88] sm:$0xff]  ;;  %v10493_v29 = vld [vmem:[#allocation68_spill] sm:$0xff] }
 0x165   : > { %10483 = vst [vmem:[#allocation26_spill] sm:$0xff] %v6614_v36  ;;  %v1466_v11 = vmul.f32 %v10310_v55, %v6626_v27  ;;  %v791_v10 = vrot.slane %v6628_v18, 7  ;;  %v1678_v26 = vadd.f32 %v1662_v39, %v1645_v8  ;;  %v1695_v45 = vmul.f32 %v10455_v48, %v6626_v27 }
 0x166   : > { %10485 = vst [vmem:[#allocation143_spill] sm:$0xff] %v6620_v22  ;;  %v648_v50 = vrot.slane %v6651_v40, 5  ;;  %v876_v36 = vrot.slane %v4704_v5, 1  ;;  %v10494_v21 = vrot.slane %v10493_v29, 1  ;;  %v947_v35 = vrot.slane %v4704_v5, 2 }
 0x167   : > { %10487 = vst [vmem:[#allocation144_spill] sm:$0xff] %v6626_v27  ;;  %v10497_v53 = vrot.slane %v10496_v2, 5  ;;  %v721_v39 = vrot.slane %v6651_v40, 6  ;;  %v10499_v9 = vrot.slane %v10493_v29, 2  ;;  %v1018_v56 = vrot.slane %v4704_v5, 3 }
 0x168   : > { %10489 = vst [vmem:[#allocation145_spill] sm:$0xff] %v6635_v13  ;;  %v6658_v41 = vsel %vm885_vm4, %v10494_v21, %v875_v19  ;;  %v792_v54 = vrot.slane %v6651_v40, 7  ;;  %v10501_v19 = vrot.slane %v10493_v29, 3  ;;  %v1482_v31 = vadd.f32 %v1466_v11, %v1449_v14  ;;  %v10507_v11 = vld [vmem:[#allocation58_spill] sm:$0xff] }
 0x169   : > { %10491 = vst [vmem:[#allocation146_spill] sm:$0xff] %v6641_v58  ;;  %v6664_v8 = vsel %vm672_vm1, %v10497_v53, %v647_v49  ;;  %v6671_v55 = vsel %vm956_vm5, %v10499_v9, %v946_v51  ;;  %v1499_v53 = vmul.f32 %v10431_v60, %v6641_v58  ;;  %v10503_v49 = vrot.slane %v10496_v2, 6 }
 0x16a   : > { %10492 = vst [vmem:[#allocation147_spill] sm:$0xff] %v6651_v40  ;;  %v6678_v21 = vsel %vm1027_vm6, %v10501_v19, %v1017_v0  ;;  %v10505_v9 = vrot.slane %v10496_v2, 7  ;;  %v1711_v5 = vadd.f32 %v1695_v45, %v1678_v26  ;;  %v1728_v0 = vmul.f32 %v10353_v59, %v6641_v58  ;;  %v4705_v19 = vld [vmem:[#allocation2 + $0xa0] sm:$0xff] }
 0x16b   : > { %10495 = vst [vmem:[#allocation68_spill] sm:$0xff] %v6658_v41  ;;  %v6686_v32 = vsel %vm743_vm2, %v10503_v49, %v720_v52  ;;  %v10508_v14 = vrot.slane %v10507_v11, 5  ;;  %v877_v60 = vrot.slane %v4705_v19, 1  ;;  %v10510_v52 = vld [vmem:[#allocation71_spill] sm:$0xff]  ;;  %v10515_v45 = vrot.slane %v10507_v11, 6 }
 0x16c   : > { %10498 = vst [vmem:[#allocation52_spill] sm:$0xff] %v6664_v8  ;;  %v6692_v51 = vsel %vm814_vm3, %v10505_v9, %v791_v10  ;;  %v10511_v49 = vrot.slane %v10510_v52, 1  ;;  %v10513_v10 = vrot.slane %v10510_v52, 2  ;;  %v10517_v9 = vrot.slane %v10510_v52, 3 }
 0x16d   : > { %10500 = vst [vmem:[#allocation148_spill] sm:$0xff] %v6671_v55  ;;  %v6700_v29 = vsel %vm672_vm1, %v10508_v14, %v648_v50  ;;  %v6718_v50 = vsel %vm743_vm2, %v10515_v45, %v721_v39  ;;  %v10522_v39 = vrot.slane %v10507_v11, 7  ;;  %v6743_v45 = vadd.f32 %v1499_v53, %v1482_v31  ;;  %v10531_v11 = vld [vmem:[#allocation62_spill] sm:$0xff] }
 0x16e   : > { %10502 = vst [vmem:[#allocation149_spill] sm:$0xff] %v6678_v21  ;;  %v6706_v2 = vsel %vm885_vm4, %v10511_v49, %v876_v36  ;;  %v6712_v26 = vsel %vm956_vm5, %v10513_v10, %v947_v35  ;;  %v6724_v14 = vsel %vm1027_vm6, %v10517_v9, %v1018_v56  ;;  %v6728_v36 = vmul.f32 %v10443_v17, %v6609_v34  ;;  %v6734_v49 = vld [vmem:[#allocation2 + $0xb0] sm:$0xff] }
 0x16f   : > { %10504 = vst [vmem:[#allocation150_spill] sm:$0xff] %v6686_v32  ;;  %v6732_v35 = vmul.f32 %v10453_v42, %v6620_v22  ;;  %v649_v10 = vrot.slane %v6734_v49, 5  ;;  %v6741_v52 = vsel %vm814_vm3, %v10522_v39, %v792_v54  ;;  %v948_v56 = vrot.slane %v4705_v19, 2  ;;  %v10524_v42 = vld [vmem:[#allocation123_spill] sm:$0xff] }
 0x170   : > { %10506 = vst [vmem:[#allocation151_spill] sm:$0xff] %v6692_v51  ;;  %v1019_v9 = vrot.slane %v4705_v19, 3  ;;  %v1744_v17 = vadd.f32 %v1728_v0, %v1711_v5  ;;  %v6756_v54 = vmul.f32 %v10340_v25, %v6635_v13  ;;  %v6760_v31 = vmul.f32 %v10438_v62, %v6658_v41 }
 0x171   : > { %10509 = vst [vmem:[#allocation58_spill] sm:$0xff] %v6700_v29  ;;  %v6764_v53 = vmul.f32 %v10455_v48, %v6671_v55  ;;  %v722_v5 = vrot.slane %v6734_v49, 6  ;;  %v1072_v0 = vmul.f32 %v10388_v37, %v6500_v61  ;;  %v10532_v19 = vrot.slane %v10531_v11, 5 }
 0x172   : > { %10512 = vst [vmem:[#allocation71_spill] sm:$0xff] %v6706_v2  ;;  %v1074_v61 = vmul.f32 %v10388_v37, %v6609_v34 }
 0x173   : > { %10514 = vst [vmem:[#allocation152_spill] sm:$0xff] %v6712_v26  ;;  %v6779_v39 = vsel %vm672_vm1, %v10532_v19, %v649_v10  ;;  %v1794_v19 = vmul.f32 %v10358_v23, %v6620_v22 }
 0x174   : > { %10516 = vst [vmem:[#allocation153_spill] sm:$0xff] %v6718_v50 }
 0x175   : > { %10518 = vst [vmem:[#allocation154_spill] sm:$0xff] %v6724_v14  ;;  %v10525_v14 = vld [vmem:[#allocation72_spill] sm:$0xff] }
 0x176   : > { %10519 = vst [vmem:[#allocation155_spill] sm:$0xff] %v6728_v36  ;;  %v1761_v36 = vmul.f32 %v10354_v24, %v6609_v34  ;;  %v10526_v58 = vrot.slane %v10525_v14, 1  ;;  %v10534_v48 = vrot.slane %v10525_v14, 2  ;;  %v1078_v34 = vmul.f32 %v10388_v37, %v6700_v29 }
 0x177   : > { %10520 = vst [vmem:[#allocation156_spill] sm:$0xff] %v6732_v35  ;;  %v786_v35 = vrot.slane %v10524_v42, 7 }
 0x178   : > { %10521 = vst [vmem:[#allocation157_spill] sm:$0xff] %v6734_v49  ;;  %v6752_v63 = vsel %vm885_vm4, %v10526_v58, %v877_v60  ;;  %v1105_v60 = vmul.f32 %v10389_v15, %v6521_v28  ;;  %v6773_v58 = vmul.f32 %v10353_v59, %v6678_v21  ;;  %v6785_v62 = vsel %vm956_vm5, %v10534_v48, %v948_v56 }
 0x179   : > { %10523 = vst [vmem:[#allocation158_spill] sm:$0xff] %v6741_v52  ;;  %v1107_v28 = vmul.f32 %v10389_v15, %v6620_v22  ;;  %v10536_v59 = vrot.slane %v10525_v14, 3  ;;  %v1777_v10 = vadd.f32 %v1761_v36, %v1744_v17  ;;  %v1076_v56 = vmul.f32 %v10388_v37, %v6664_v8  ;;  %v10542_v22 = vld [vmem:[#allocation34_spill] sm:$0xff] }
 0x17a   : > { %10527 = vst [vmem:[#allocation123_spill] sm:$0xff] %v6752_v63  ;;  %v1109_v14 = vmul.f32 %v10389_v15, %v6686_v32  ;;  %v10540_v17 = vrot.slane %v10531_v11, 6  ;;  %v1138_v23 = vmul.f32 %v10542_v22, %v6548_v44 }
 0x17b   : > { %10528 = vst [vmem:[#allocation72_spill] sm:$0xff] %v6760_v31  ;;  %v6795_v25 = vsel %vm1027_vm6, %v10536_v59, %v1019_v9  ;;  %v1111_v59 = vmul.f32 %v10389_v15, %v6718_v50  ;;  %v1121_v9 = vadd.f32 %v1105_v60, %v1072_v0  ;;  %v1140_v31 = vmul.f32 %v10542_v22, %v6635_v13 }
 0x17c   : > { %10529 = vst [vmem:[#allocation159_spill] sm:$0xff] %v6764_v53  ;;  %v6815_v36 = vsel %vm743_vm2, %v10540_v17, %v722_v5  ;;  %v1860_v15 = vmul.f32 %v6580_v1, %v10363_v3  ;;  %v1893_v5 = vmul.f32 %v10364_v12, %v6658_v41  ;;  %v10543_v17 = vld [vmem:[#allocation121_spill] sm:$0xff] }
 0x17d   : > { %10530 = vst [vmem:[#allocation160_spill] sm:$0xff] %v6773_v58  ;;  %v10538_v58 = vld [vmem:[#allocation120_spill] sm:$0xff]  ;;  %v871_v0 = vrot.slane %v10543_v17, 1  ;;  %v942_v60 = vrot.slane %v10543_v17, 2  ;;  %v1154_v12 = vadd.f32 %v1138_v23, %v1121_v9 }
 0x17e   : > { %10533 = vst [vmem:[#allocation62_spill] sm:$0xff] %v6779_v39  ;;  %v10539_v53 = vrot.slane %v10538_v58, 7  ;;  %v1123_v58 = vadd.f32 %v1107_v28, %v1074_v61  ;;  %v1142_v61 = vmul.f32 %v10542_v22, %v6692_v51  ;;  %v1144_v28 = vmul.f32 %v10542_v22, %v6741_v52 }
 0x17f   : > { %10535 = vst [vmem:[#allocation161_spill] sm:$0xff] %v6785_v62 }
 0x180   : > { %10537 = vst [vmem:[#allocation162_spill] sm:$0xff] %v6795_v25  ;;  %v815_v48 = vsel %vm814_vm3, %v10539_v53, %v786_v35  ;;  %v1810_v35 = vadd.f32 %v1794_v19, %v1777_v10  ;;  %v1827_v53 = vmul.f32 %v10359_v16, %v6635_v13  ;;  %v1125_v10 = vadd.f32 %v1109_v14, %v1076_v56 }
 0x181   : > { %10541 = vst [vmem:[#allocation120_spill] sm:$0xff] %v6815_v36  ;;  %v1127_v19 = vadd.f32 %v1111_v59, %v1078_v34  ;;  %v793_v13 = vrot.slane %v6734_v49, 7  ;;  %v1156_v3 = vadd.f32 %v1140_v31, %v1123_v58  ;;  %v1171_v56 = vmul.f32 %v6471_v43, %v5386_v38 }
 0x182   : > { %v1843_v24 = vadd.f32 %v1827_v53, %v1810_v35  ;;  %v1926_v35 = vmul.f32 %v10369_v6, %v6671_v55  ;;  %v1013_v53 = vrot.slane %v10543_v17, 3  ;;  %v1173_v34 = vmul.f32 %v6580_v1, %v5386_v38 }
 0x183   : > { %v1959_v59 = vmul.f32 %v10371_v47, %v6678_v21  ;;  %v10544_v49 = vrot.slane %v10524_v42, 1  ;;  %v1158_v31 = vadd.f32 %v1142_v61, %v1125_v10  ;;  %v1160_v9 = vadd.f32 %v1144_v28, %v1127_v19 }
 0x184   : > { %v1876_v44 = vadd.f32 %v1860_v15, %v1843_v24  ;;  %v10545_v15 = vrot.slane %v10524_v42, 2  ;;  %v1175_v58 = vmul.f32 %v6628_v18, %v5386_v38  ;;  %v1187_v10 = vadd.f32 %v1171_v56, %v1154_v12 }
 0x185   : > { %v886_v24 = vsel %vm885_vm4, %v10544_v49, %v871_v0  ;;  %v4707_v49 = vld [vmem:[#allocation2 + $0xb8] sm:$0xff]  ;;  %v1189_v19 = vadd.f32 %v1173_v34, %v1156_v3  ;;  %v1204_v61 = vmul.f32 %v5395_v46, %v6590_v30  ;;  %v1206_v28 = vmul.f32 %v5395_v46, %v6658_v41 }
 0x186   : > { %v1909_v14 = vadd.f32 %v1893_v5, %v1876_v44  ;;  %v957_v23 = vsel %vm956_vm5, %v10545_v15, %v942_v60  ;;  %v1177_v44 = vmul.f32 %v6651_v40, %v5386_v38  ;;  %v10546_v5 = vrot.slane %v10531_v11, 7 }
 0x187   : > { %v878_v0 = vrot.slane %v4707_v49, 1  ;;  %v1992_v60 = vmul.f32 %v10379_v7, %v6664_v8  ;;  %v2025_v11 = vmul.f32 %v10442_v57, %v6686_v32  ;;  %v1208_v3 = vmul.f32 %v5395_v46, %v6706_v2  ;;  %v4708_v57 = vld [vmem:[#allocation2 + $0x8] sm:$0xff] }
 0x188   : > { %v6859_v17 = vsel %vm814_vm3, %v10546_v5, %v793_v13  ;;  %v1942_v43 = vadd.f32 %v1926_v35, %v1909_v14  ;;  %v10548_v13 = vrot.slane %v10524_v42, 3  ;;  %v1132_v14 = vmul.f32 %v10542_v22, %v815_v48  ;;  %v10549_v42 = vld [vmem:[#allocation73_spill] sm:$0xff] }
 0x189   : > { %10547 = vst [vmem:[#allocation121_spill] sm:$0xff] %v6859_v17  ;;  %v1191_v5 = vadd.f32 %v1175_v58, %v1158_v31  ;;  %v1193_v12 = vadd.f32 %v1177_v44, %v1160_v9  ;;  %v1210_v56 = vmul.f32 %v5395_v46, %v6752_v63  ;;  %v949_v34 = vrot.slane %v4707_v49, 2  ;;  %v10552_v9 = vld [vmem:[#allocation38_spill] sm:$0xff] }
 0x18a   : > { %v1975_v15 = vadd.f32 %v1959_v59, %v1942_v43  ;;  %v1028_v35 = vsel %vm1027_vm6, %v10548_v13, %v1013_v53  ;;  %v1020_v43 = vrot.slane %v4707_v49, 3  ;;  %v2058_v41 = vmul.f32 %v10452_v4, %v6692_v51 }
 0x18b   : > { %v10550_v30 = vrot.slane %v10549_v42, 1  ;;  %v1220_v48 = vadd.f32 %v1204_v61, %v1187_v10  ;;  %v1222_v31 = vadd.f32 %v1206_v28, %v1189_v19  ;;  %v1239_v58 = vmul.f32 %v10552_v9, %v6671_v55  ;;  %v10554_v28 = vld [vmem:[#allocation113_spill] sm:$0xff]  ;;  %v10576_v55 = vld [vmem:[#allocation87_spill] sm:$0xff] }
 0x18c   : > { %v2008_v59 = vadd.f32 %v1992_v60, %v1975_v15  ;;  %v1237_v44 = vmul.f32 %v10552_v9, %v6626_v27  ;;  %v2091_v49 = vmul.f32 %v6628_v18, %v10465_v33  ;;  %v10553_v60 = vld [vmem:[#allocation61_spill] sm:$0xff]  ;;  %v1224_v22 = vadd.f32 %v1208_v3, %v1191_v5 }
 0x18d   : > { %v6884_v53 = vsel %vm885_vm4, %v10550_v30, %v878_v0  ;;  %v1148_v15 = vadd.f32 %v1132_v14, %v10553_v60  ;;  %v1226_v4 = vadd.f32 %v1210_v56, %v1193_v12  ;;  %v1165_v30 = vmul.f32 %v4708_v57, %v5386_v38  ;;  %v10555_v14 = vld [vmem:[#allocation43_spill] sm:$0xff] }
 0x18e   : > { %10551 = vst [vmem:[#allocation73_spill] sm:$0xff] %v6884_v53  ;;  %v2041_v13 = vadd.f32 %v2025_v11, %v2008_v59  ;;  %v1198_v0 = vmul.f32 %v5395_v46, %v886_v24  ;;  %v1241_v10 = vmul.f32 %v10552_v9, %v6712_v26  ;;  %v1243_v19 = vmul.f32 %v10552_v9, %v6785_v62 }
 0x18f   : > { %v2124_v11 = vmul.f32 %v10554_v28, %v6706_v2  ;;  %v1255_v59 = vadd.f32 %v1239_v58, %v1222_v31  ;;  %v1272_v5 = vmul.f32 %v10555_v14, %v6678_v21  ;;  %v1181_v12 = vadd.f32 %v1165_v30, %v1148_v15  ;;  %v10560_v31 = vld [vmem:[#allocation114_spill] sm:$0xff] }
 0x190   : > { %v2074_v61 = vadd.f32 %v2058_v41, %v2041_v13  ;;  %v1231_v3 = vmul.f32 %v10552_v9, %v957_v23  ;;  %v10556_v57 = vrot.slane %v10549_v42, 2  ;;  %v10558_v56 = vrot.slane %v10549_v42, 3 }
 0x191   : > { %v2157_v58 = vmul.f32 %v10560_v31, %v6712_v26  ;;  %v6920_v60 = vmul.f32 %v10388_v37, %v6779_v39  ;;  %v6922_v23 = vadd.f32 %v1237_v44, %v1220_v48  ;;  %v1214_v15 = vadd.f32 %v1198_v0, %v1181_v12  ;;  %v10566_v37 = vld [vmem:[#allocation37_spill] sm:$0xff]  ;;  %v10570_v12 = vld [vmem:[#allocation95_spill] sm:$0xff] }
 0x192   : > { %v6908_v24 = vsel %vm956_vm5, %v10556_v57, %v949_v34  ;;  %v6914_v41 = vsel %vm1027_vm6, %v10558_v56, %v1020_v43  ;;  %v2107_v13 = vadd.f32 %v2091_v49, %v2074_v61  ;;  %v1264_v34 = vmul.f32 %v10555_v14, %v1028_v35  ;;  %v10562_v57 = vld [vmem:[#allocation146_spill] sm:$0xff]  ;;  %v10564_v49 = vld [vmem:[#allocation115_spill] sm:$0xff] }
 0x193   : > { %10557 = vst [vmem:[#allocation61_spill] sm:$0xff] %v6908_v24  ;;  %v1257_v30 = vadd.f32 %v1241_v10, %v1224_v22  ;;  %v6927_v42 = vmul.f32 %v10555_v14, %v10562_v57  ;;  %v10563_v56 = vld [vmem:[#allocation154_spill] sm:$0xff]  ;;  %v6931_v9 = vadd.f32 %v1243_v19, %v1226_v4  ;;  %v1288_v46 = vadd.f32 %v1272_v5, %v1255_v59  ;;  %v10568_v22 = vld [vmem:[#allocation117_spill] sm:$0xff]  ;;  %v10569_v10 = vld [vmem:[#allocation55_spill] sm:$0xff] }
 0x194   : > { %10559 = vst [vmem:[#allocation163_spill] sm:$0xff] %v6914_v41  ;;  %v2140_v43 = vadd.f32 %v2124_v11, %v2107_v13  ;;  %v2190_v61 = vmul.f32 %v10564_v49, %v10563_v56  ;;  %v1247_v38 = vadd.f32 %v1231_v3, %v1214_v15  ;;  %v2223_v0 = vmul.f32 %v10568_v22, %v6700_v29  ;;  %v10571_v19 = vld [vmem:[#allocation40_spill] sm:$0xff]  ;;  %v10572_v59 = vld [vmem:[#allocation49_spill] sm:$0xff]  ;;  %v10573_v3 = vld [vmem:[#allocation155_spill] sm:$0xff] }
 0x195   : > { %10561 = vst [vmem:[#allocation164_spill] sm:$0xff] %v6920_v60  ;;  %v10567_v60 = vld [vmem:[#allocation44_spill] sm:$0xff]  ;;  %v1547_v11 = vadd.f32 %v10570_v12, %v10569_v10  ;;  %v1274_v13 = vmul.f32 %v10555_v14, %v10563_v56  ;;  %v1330_v5 = vmul.f32 %v10572_v59, %v10571_v19  ;;  %v1548_v15 = vadd.f32 %v10573_v3, %v6743_v45  ;;  %v10577_v57 = vld [vmem:[#allocation39_spill] sm:$0xff]  ;;  %v10580_v12 = vld [vmem:[#allocation50_spill] sm:$0xff] }
 0x196   : > { %10565 = vst [vmem:[#allocation165_spill] sm:$0xff] %v6931_v9  ;;  %v1297_v48 = vmul.f32 %v10567_v60, %v10566_v37  ;;  %v1305_v44 = vmul.f32 %v10567_v60, %v6664_v8  ;;  %v2173_v35 = vadd.f32 %v2157_v58, %v2140_v43  ;;  %v1280_v4 = vadd.f32 %v1264_v34, %v1247_v38  ;;  %v10575_v43 = vld [vmem:[#allocation46_spill] sm:$0xff]  ;;  %v10579_v34 = vld [vmem:[#allocation33_spill] sm:$0xff]  ;;  %v10581_v9 = vld [vmem:[#allocation156_spill] sm:$0xff] }
 0x197   : > { %v2256_v58 = vmul.f32 %v10574_v20, %v6718_v50  ;;  %v1580_v21 = vadd.f32 %v10575_v43, %v1547_v11  ;;  %v1630_v22 = vmul.f32 %v10577_v57, %v10576_v55  ;;  %v6954_v10 = vmul.f32 %v10555_v14, %v6795_v25  ;;  %v10583_v20 = vld [vmem:[#allocation29_spill] sm:$0xff]  ;;  %v4709_v49 = vld [vmem:[#allocation2 + $0x20] sm:$0xff] }
 0x198   : > { %v2206_v37 = vadd.f32 %v2190_v61, %v2173_v35  ;;  %v1313_v38 = vadd.f32 %v1297_v48, %v1280_v4  ;;  %v1363_v19 = vmul.f32 %v10580_v12, %v10579_v34  ;;  %v1581_v27 = vadd.f32 %v10581_v9, %v1548_v15  ;;  %v10582_v35 = vld [vmem:[#allocation119_spill] sm:$0xff]  ;;  %v10584_v14 = vld [vmem:[#allocation56_spill] sm:$0xff]  ;;  %v10585_v34 = vld [vmem:[#allocation122_spill] sm:$0xff] }
 0x199   : > { %10578 = vst [vmem:[#allocation37_spill] sm:$0xff] %v6954_v10  ;;  %v1321_v45 = vadd.f32 %v1305_v44, %v1288_v46  ;;  %v2289_v3 = vmul.f32 %v10582_v35, %v6741_v52  ;;  %v1613_v11 = vadd.f32 %v10583_v20, %v1580_v21  ;;  %v1338_v57 = vmul.f32 %v10572_v59, %v6686_v32  ;;  %v10587_v15 = vld [vmem:[#allocation57_spill] sm:$0xff]  ;;  %v10596_v52 = vld [vmem:[#allocation72_spill] sm:$0xff] }
 0x19a   : > { %v2239_v61 = vadd.f32 %v2223_v0, %v2206_v37  ;;  %v1346_v43 = vadd.f32 %v1330_v5, %v1313_v38  ;;  %v1396_v10 = vmul.f32 %v4709_v49, %v10584_v14  ;;  %v1614_v48 = vadd.f32 %v6756_v54, %v1581_v27  ;;  %v10586_v5 = vld [vmem:[#allocation42_spill] sm:$0xff]  ;;  %v10588_v27 = vld [vmem:[#allocation124_spill] sm:$0xff] }
 0x19b   : > { %v2322_v9 = vmul.f32 %v6651_v40, %v10585_v34  ;;  %v1646_v46 = vadd.f32 %v1630_v22, %v1613_v11  ;;  %v1631_v44 = vmul.f32 %v6580_v1, %v10576_v55  ;;  %v6970_v0 = vadd.f32 %v1274_v13, %v1257_v30  ;;  %v10590_v30 = vld [vmem:[#allocation125_spill] sm:$0xff]  ;;  %v10591_v34 = vld [vmem:[#allocation47_spill] sm:$0xff] }
 0x19c   : > { %v2272_v4 = vadd.f32 %v2256_v58, %v2239_v61  ;;  %v6974_v20 = vmul.f32 %v10567_v60, %v6700_v29  ;;  %v1379_v21 = vadd.f32 %v1363_v19, %v1346_v43  ;;  %v1429_v49 = vmul.f32 %v10587_v15, %v10586_v5  ;;  %v10589_v58 = vld [vmem:[#allocation133_spill] sm:$0xff]  ;;  %v10592_v1 = vld [vmem:[#allocation63_spill] sm:$0xff]  ;;  %v10593_v43 = vld [vmem:[#allocation136_spill] sm:$0xff] }
 0x19d   : > { %v2355_v54 = vmul.f32 %v10588_v27, %v6752_v63  ;;  %v1679_v38 = vadd.f32 %v10589_v58, %v1646_v46  ;;  %v1647_v22 = vadd.f32 %v1631_v44, %v1614_v48  ;;  %v6981_v61 = vadd.f32 %v1338_v57, %v1321_v45  ;;  %v10594_v5 = vld [vmem:[#allocation66_spill] sm:$0xff]  ;;  %v10597_v45 = vld [vmem:[#allocation53_spill] sm:$0xff]  ;;  %v10599_v44 = vld [vmem:[#allocation67_spill] sm:$0xff] }
 0x19e   : > { %v2305_v37 = vadd.f32 %v2289_v3, %v2272_v4  ;;  %v2388_v13 = vmul.f32 %v10590_v30, %v6785_v62  ;;  %v1412_v11 = vadd.f32 %v1396_v10, %v1379_v21  ;;  %v1462_v35 = vmul.f32 %v10592_v1, %v10591_v34  ;;  %v10595_v3 = vld [vmem:[#allocation99_spill] sm:$0xff]  ;;  %v10598_v10 = vld [vmem:[#allocation48_spill] sm:$0xff]  ;;  %v10601_v58 = vld [vmem:[#allocation69_spill] sm:$0xff] }
 0x19f   : > { %v1712_v40 = vadd.f32 %v10593_v43, %v1679_v38  ;;  %v1762_v4 = vmul.f32 %v10595_v3, %v10594_v5  ;;  %v1680_v27 = vadd.f32 %v10596_v52, %v1647_v22  ;;  %v6993_v48 = vmul.f32 %v10580_v12, %v6692_v51  ;;  %v10602_v38 = vld [vmem:[#allocation100_spill] sm:$0xff]  ;;  %v10603_v5 = vld [vmem:[#allocation159_spill] sm:$0xff]  ;;  %v10605_v63 = vld [vmem:[#allocation81_spill] sm:$0xff] }
 0x1a0   : > { %v2338_v19 = vadd.f32 %v2322_v9, %v2305_v37  ;;  %v2421_v57 = vmul.f32 %v10597_v45, %v6795_v25  ;;  %v1445_v46 = vadd.f32 %v1429_v49, %v1412_v11  ;;  %v1495_v21 = vmul.f32 %v10599_v44, %v10598_v10  ;;  %v10600_v9 = vld [vmem:[#allocation137_spill] sm:$0xff]  ;;  %v10604_v52 = vld [vmem:[#allocation127_spill] sm:$0xff]  ;;  %v10606_v1 = vld [vmem:[#allocation82_spill] sm:$0xff] }
 0x1a1   : > { %v1745_v37 = vadd.f32 %v10600_v9, %v1712_v40  ;;  %v1795_v43 = vmul.f32 %v10602_v38, %v10601_v58  ;;  %v1713_v62 = vadd.f32 %v10603_v5, %v1680_v27  ;;  %v2454_v22 = vmul.f32 %v10604_v52, %v6779_v39  ;;  %v10609_v58 = vld [vmem:[#allocation128_spill] sm:$0xff]  ;;  %v10610_v25 = vld [vmem:[#allocation70_spill] sm:$0xff]  ;;  %v10611_v39 = vld [vmem:[#allocation83_spill] sm:$0xff] }
 0x1a2   : > { %v2371_v34 = vadd.f32 %v2355_v54, %v2338_v19  ;;  %v1478_v30 = vadd.f32 %v1462_v35, %v1445_v46  ;;  %v1528_v12 = vmul.f32 %v10606_v1, %v10605_v63  ;;  %v1763_v49 = vmul.f32 %v10595_v3, %v6664_v8  ;;  %v10607_v54 = vld [vmem:[#allocation75_spill] sm:$0xff]  ;;  %v10608_v19 = vld [vmem:[#allocation160_spill] sm:$0xff] }
 0x1a3   : > { %v1778_v10 = vadd.f32 %v1762_v4, %v1745_v37  ;;  %v1828_v40 = vmul.f32 %v10359_v16, %v10607_v54  ;;  %v1746_v9 = vadd.f32 %v10608_v19, %v1713_v62  ;;  %v2487_v27 = vmul.f32 %v10609_v58, %v6815_v36  ;;  %v10612_v52 = vld [vmem:[#allocation103_spill] sm:$0xff]  ;;  %v10614_v37 = vld [vmem:[#allocation129_spill] sm:$0xff]  ;;  %v10616_v45 = vld [vmem:[#allocation84_spill] sm:$0xff] }
 0x1a4   : > { %v2404_v11 = vadd.f32 %v2388_v13, %v2371_v34  ;;  %v1511_v5 = vadd.f32 %v1495_v21, %v1478_v30  ;;  %v1561_v35 = vmul.f32 %v10611_v39, %v10610_v25  ;;  %v1796_v63 = vmul.f32 %v10602_v38, %v6686_v32  ;;  %v10613_v13 = vld [vmem:[#allocation91_spill] sm:$0xff]  ;;  %v10617_v39 = vld [vmem:[#allocation86_spill] sm:$0xff]  ;;  %v10618_v32 = vld [vmem:[#allocation104_spill] sm:$0xff] }
 0x1a5   : > { %v1811_v1 = vadd.f32 %v1795_v43, %v1778_v10  ;;  %v1861_v4 = vmul.f32 %v10613_v13, %v10612_v52  ;;  %v1779_v34 = vadd.f32 %v1763_v49, %v1746_v9  ;;  %v2520_v54 = vmul.f32 %v10614_v37, %v6859_v17  ;;  %v10615_v19 = vld [vmem:[#allocation59_spill] sm:$0xff]  ;;  %v10620_v10 = vld [vmem:[#allocation157_spill] sm:$0xff]  ;;  %v10621_v9 = vld [vmem:[#allocation90_spill] sm:$0xff] }
 0x1a6   : > { %v2437_v46 = vadd.f32 %v2421_v57, %v2404_v11  ;;  %v1544_v62 = vadd.f32 %v1528_v12, %v1511_v5  ;;  %v1594_v58 = vmul.f32 %v10616_v45, %v10615_v19  ;;  %v1829_v30 = vmul.f32 %v10359_v16, %v6692_v51  ;;  %v10619_v11 = vld [vmem:[#allocation28_spill] sm:$0xff] }
 0x1a7   : > { %v1844_v21 = vadd.f32 %v1828_v40, %v1811_v1  ;;  %v1894_v57 = vmul.f32 %v10618_v32, %v10617_v39  ;;  %v1812_v43 = vadd.f32 %v1796_v63, %v1779_v34  ;;  %v2553_v13 = vmul.f32 %v10620_v10, %v10619_v11  ;;  %v10622_v45 = vld [vmem:[#allocation92_spill] sm:$0xff]  ;;  %v10623_v40 = vld [vmem:[#allocation30_spill] sm:$0xff] }
 0x1a8   : > { %v2470_v25 = vadd.f32 %v2454_v22, %v2437_v46  ;;  %v1577_v49 = vadd.f32 %v1561_v35, %v1544_v62  ;;  %v1627_v17 = vmul.f32 %v10621_v9, %v10576_v55  ;;  %v1862_v12 = vmul.f32 %v6628_v18, %v10612_v52  ;;  %v10624_v46 = vld [vmem:[#allocation60_spill] sm:$0xff] }
 0x1a9   : > { %v1877_v19 = vadd.f32 %v1861_v4, %v1844_v21  ;;  %v1927_v22 = vmul.f32 %v10369_v6, %v10622_v45  ;;  %v1845_v1 = vadd.f32 %v1829_v30, %v1812_v43  ;;  %v2586_v39 = vmul.f32 %v10623_v40, %v6884_v53  ;;  %v10625_v34 = vld [vmem:[#allocation96_spill] sm:$0xff]  ;;  %v10628_v21 = vld [vmem:[#allocation85_spill] sm:$0xff] }
 0x1aa   : > { %v2503_v5 = vadd.f32 %v2487_v27, %v2470_v25  ;;  %v1610_v63 = vadd.f32 %v1594_v58, %v1577_v49  ;;  %v1660_v10 = vmul.f32 %v10625_v34, %v10624_v46  ;;  %v1895_v35 = vmul.f32 %v10618_v32, %v6706_v2  ;;  %v10626_v55 = vld [vmem:[#allocation108_spill] sm:$0xff]  ;;  %v10627_v25 = vld [vmem:[#allocation54_spill] sm:$0xff]  ;;  %v10629_v43 = vld [vmem:[#allocation97_spill] sm:$0xff] }
 0x1ab   : > { %v1910_v9 = vadd.f32 %v1894_v57, %v1877_v19  ;;  %v1960_v27 = vmul.f32 %v10371_v47, %v10626_v55  ;;  %v1878_v4 = vadd.f32 %v1862_v12, %v1845_v1  ;;  %v2619_v45 = vmul.f32 %v10627_v25, %v6908_v24  ;;  %v10630_v34 = vld [vmem:[#allocation74_spill] sm:$0xff]  ;;  %v10634_v25 = vld [vmem:[#allocation76_spill] sm:$0xff] }
 0x1ac   : > { %v2536_v62 = vadd.f32 %v2520_v54, %v2503_v5  ;;  %v1643_v30 = vadd.f32 %v1627_v17, %v1610_v63  ;;  %v1693_v53 = vmul.f32 %v10629_v43, %v10628_v21  ;;  %v1928_v58 = vmul.f32 %v10369_v6, %v6712_v26  ;;  %v10631_v5 = vld [vmem:[#allocation31_spill] sm:$0xff]  ;;  %v10632_v19 = vld [vmem:[#allocation130_spill] sm:$0xff]  ;;  %v10635_v43 = vld [vmem:[#allocation109_spill] sm:$0xff] }
 0x1ad   : > { %v1943_v46 = vadd.f32 %v1927_v22, %v1910_v9  ;;  %v1993_v54 = vmul.f32 %v10379_v7, %v10630_v34  ;;  %v1911_v57 = vadd.f32 %v1895_v35, %v1878_v4  ;;  %v2652_v55 = vmul.f32 %v10631_v5, %v6914_v41  ;;  %v10633_v1 = vld [vmem:[#allocation98_spill] sm:$0xff] }
 0x1ae   : > { %v2569_v49 = vadd.f32 %v2553_v13, %v2536_v62  ;;  %v1676_v12 = vadd.f32 %v1660_v10, %v1643_v30  ;;  %v1726_v24 = vmul.f32 %v10633_v1, %v10632_v19  ;;  %v1961_v17 = vmul.f32 %v10371_v47, %v10563_v56  ;;  %v10636_v62 = vld [vmem:[#allocation45_spill] sm:$0xff]  ;;  %v10638_v4 = vld [vmem:[#allocation110_spill] sm:$0xff] }
 0x1af   : > { %v1976_v21 = vadd.f32 %v1960_v27, %v1943_v46  ;;  %v2026_v13 = vmul.f32 %v10635_v43, %v10634_v25  ;;  %v1944_v22 = vadd.f32 %v1928_v58, %v1911_v57  ;;  %v1286_v34 = vadd.f32 %v6927_v42, %v6922_v23  ;;  %v10637_v10 = vld [vmem:[#allocation77_spill] sm:$0xff]  ;;  %v10640_v46 = vld [vmem:[#allocation134_spill] sm:$0xff] }
 0x1b0   : > { %v2602_v63 = vadd.f32 %v2586_v39, %v2569_v49  ;;  %v1709_v35 = vadd.f32 %v1693_v53, %v1676_v12  ;;  %v1759_v9 = vmul.f32 %v10595_v3, %v10636_v62  ;;  %v2059_v30 = vmul.f32 %v10638_v4, %v10637_v10  ;;  %v10639_v53 = vld [vmem:[#allocation132_spill] sm:$0xff] }
 0x1b1   : > { %v2009_v41 = vadd.f32 %v1993_v54, %v1976_v21  ;;  %v1977_v5 = vadd.f32 %v1961_v17, %v1944_v22  ;;  %v1994_v39 = vmul.f32 %v10379_v7, %v6700_v29  ;;  %v1387_v27 = vadd.f32 %v6993_v48, %v6981_v61  ;;  %v10641_v61 = vld [vmem:[#allocation135_spill] sm:$0xff]  ;;  %v10642_v17 = vld [vmem:[#allocation88_spill] sm:$0xff] }
 0x1b2   : > { %v2635_v19 = vadd.f32 %v2619_v45, %v2602_v63  ;;  %v1404_v25 = vmul.f32 %v6628_v18, %v10584_v14  ;;  %v1742_v23 = vadd.f32 %v1726_v24, %v1709_v35  ;;  %v1792_v42 = vmul.f32 %v10602_v38, %v10639_v53  ;;  %v7087_v63 = vld [vmem:[%s10328_s28] ss:$0 sm:$0xff]  ;;  %v10645_v35 = vld [vmem:[#allocation102_spill] sm:$0xff] }
 0x1b3   : > { %v1323_v58 = vadd.f32 %v6974_v20, %v6970_v0  ;;  %v2042_v45 = vadd.f32 %v2026_v13, %v2009_v41  ;;  %v2092_v54 = vmul.f32 %v10640_v46, %v10465_v33  ;;  %v1340_v57 = vmul.f32 %v10572_v59, %v6718_v50  ;;  %10643 = vst [vmem:[#allocation55_spill] sm:$0xff] %v7087_v63  ;;  %v10648_v53 = vld [vmem:[#allocation158_spill] sm:$0xff]  ;;  %v517_v46 = vld [vmem:[%s5271_s0 + $0x50] sm:$0xff] }
 0x1b4   : > { %v2668_v49 = vadd.f32 %v2652_v55, %v2635_v19  ;;  %v1775_v12 = vadd.f32 %v1759_v9, %v1742_v23  ;;  %v1825_v48 = vmul.f32 %v10359_v16, %v10641_v61  ;;  %v2125_v24 = vmul.f32 %v10554_v28, %v10642_v17  ;;  %v10646_v9 = vld [vmem:[#allocation51_spill] sm:$0xff]  ;;  %v10647_v23 = vld [vmem:[#allocation93_spill] sm:$0xff]  ;;  %534 = vst.msk [vmem:[#allocation2 + $0xc0] sm:$0xff] %vm492_vm0, %v517_v46  ;;  %v10651_v61 = vld [vmem:[#allocation112_spill] sm:$0xff] }
 0x1b5   : > { %v2075_v0 = vadd.f32 %v2059_v30, %v2042_v45  ;;  %v2010_v20 = vadd.f32 %v1994_v39, %v1977_v5  ;;  %v2027_v55 = vmul.f32 %v10635_v43, %v6718_v50  ;;  %v1420_v21 = vadd.f32 %v1404_v25, %v1387_v27  ;;  %v10649_v27 = vld [vmem:[#allocation50_spill] sm:$0xff]  ;;  %v10652_v17 = vld [vmem:[#allocation115_spill] sm:$0xff] }
 0x1b6   : > { %v7090_v41 = vadd.f32 %v7087_v63, %v2668_v49  ;;  %v1437_v13 = vmul.f32 %v10587_v15, %v6706_v2  ;;  %v1808_v22 = vadd.f32 %v1792_v42, %v1775_v12  ;;  %v1858_v62 = vmul.f32 %v10645_v35, %v10612_v52  ;;  %v10650_v42 = vld [vmem:[#allocation65_spill] sm:$0xff] }
 0x1b7   : > { %v1303_v10 = vmul.f32 %v10567_v60, %v10646_v9  ;;  %v2108_v30 = vadd.f32 %v2092_v54, %v2075_v0  ;;  %v2158_v5 = vmul.f32 %v10560_v31, %v10647_v23  ;;  %v1356_v39 = vadd.f32 %v1340_v57, %v1323_v58  ;;  %v10653_v57 = vld [vmem:[#allocation63_spill] sm:$0xff] }
 0x1b8   : > { %10644 = vst [vmem:[#allocation95_spill] sm:$0xff] %v7090_v41  ;;  %v2709_v19 = vsel %vm492_vm0, %v7090_v41, 0.0  ;;  %v1373_v25 = vmul.f32 %v10649_v27, %v10648_v53  ;;  %v1841_v49 = vadd.f32 %v1825_v48, %v1808_v22  ;;  %v1891_v45 = vmul.f32 %v10618_v32, %v10650_v42  ;;  %v10654_v48 = vld [vmem:[#allocation144_spill] sm:$0xff]  ;;  %v10667_v32 = vld [vmem:[#allocation118_spill] sm:$0xff] }
 0x1b9   : > { %2710 = vadd.xlane.f32.xlu1 %v2709_v19  ;;  %v2141_v12 = vadd.f32 %v2125_v24, %v2108_v30  ;;  %v2191_v35 = vmul.f32 %v10652_v17, %v10651_v61  ;;  %v2043_v54 = vadd.f32 %v2027_v55, %v2010_v20  ;;  %v2060_v0 = vmul.f32 %v10638_v4, %v10648_v53  ;;  %v10655_v42 = vld [vmem:[#allocation32_spill] sm:$0xff]  ;;  %v10657_v24 = vld [vmem:[#allocation165_spill] sm:$0xff]  ;;  %v10660_v55 = vld [vmem:[#allocation78_spill] sm:$0xff] }
 0x1ba   : > { %v1453_v58 = vadd.f32 %v1437_v13, %v1420_v21  ;;  %v1470_v23 = vmul.f32 %v10653_v57, %v6712_v26  ;;  %v1874_v19 = vadd.f32 %v1858_v62, %v1841_v49  ;;  %v1924_v22 = vmul.f32 %v10369_v6, %v10654_v48  ;;  %v10658_v30 = vld [vmem:[#allocation37_spill] sm:$0xff]  ;;  %v10663_v13 = vld [vmem:[#allocation143_spill] sm:$0xff]  ;;  %v10665_v48 = vld [vmem:[#allocation146_spill] sm:$0xff] }
 0x1bb   : > { %v7120_v41 = vmul.f32 %v10655_v42, %v6815_v36  ;;  %v7124_v46 = vadd.f32 %v10658_v30, %v10657_v24  ;;  %v2174_v20 = vadd.f32 %v2158_v5, %v2141_v12  ;;  %v10661_v61 = vld [vmem:[#allocation117_spill] sm:$0xff]  ;;  %v7128_v21 = vadd.f32 %v1303_v10, %v1286_v34  ;;  %v10668_v5 = vld [vmem:[#allocation147_spill] sm:$0xff] }
 0x1bc   : > { %v2224_v63 = vmul.f32 %v10661_v61, %v10660_v55  ;;  %v7132_v62 = vmul.f32 %v10572_v59, %v10663_v13  ;;  %v1907_v49 = vadd.f32 %v1891_v45, %v1874_v19  ;;  %v1957_v6 = vmul.f32 %v10371_v47, %v10665_v48 }
 0x1bd   : > { %10656 = vst [vmem:[#allocation40_spill] sm:$0xff] %v7120_v41  ;;  %v2207_v42 = vadd.f32 %v2191_v35, %v2174_v20  ;;  %v10666_v41 = vld [vmem:[#allocation79_spill] sm:$0xff]  ;;  %v2076_v30 = vadd.f32 %v2060_v0, %v2043_v54  ;;  %v2093_v12 = vmul.f32 %v10668_v5, %v10465_v33  ;;  %v7140_v55 = vadd.f32 %v1373_v25, %v1356_v39  ;;  %v10672_v54 = vld [vmem:[#allocation80_spill] sm:$0xff]  ;;  %v10674_v39 = vld [vmem:[#allocation145_spill] sm:$0xff] }
 0x1be   : > { %10659 = vst [vmem:[#allocation155_spill] sm:$0xff] %v7124_v46  ;;  %v2257_v24 = vmul.f32 %v10667_v32, %v10666_v41  ;;  %v7142_v34 = vadd.f32 %v1470_v23, %v1453_v58  ;;  %v1940_v10 = vadd.f32 %v1924_v22, %v1907_v49  ;;  %v1990_v45 = vmul.f32 %v10379_v7, %v10646_v9  ;;  %v10673_v0 = vld [vmem:[#allocation119_spill] sm:$0xff]  ;;  %v10675_v58 = vld [vmem:[#allocation138_spill] sm:$0xff]  ;;  %v10676_v22 = vld [vmem:[#allocation68_spill] sm:$0xff] }
 0x1bf   : > { %10662 = vst [vmem:[#allocation46_spill] sm:$0xff] %v7128_v21  ;;  %v7148_v19 = vmul.f32 %v10599_v44, %v10563_v56  ;;  %v2023_v35 = vmul.f32 %v10635_v43, %v10663_v13  ;;  %v2240_v41 = vadd.f32 %v2224_v63, %v2207_v42  ;;  %v2290_v20 = vmul.f32 %v10673_v0, %v10672_v54  ;;  %v518_v49 = vld [vmem:[%s5271_s0 + $0x58] sm:$0xff]  ;;  %v7162_v46 = vld [vmem:[#allocation2 + $0xc0] sm:$0xff]  ;;  %v7164_v13 = vld [vmem:[#allocation2 + $0xd0] sm:$0xff] }
 0x1c0   : > { %10664 = vst [vmem:[#allocation39_spill] sm:$0xff] %v7132_v62  ;;  %v1973_v48 = vadd.f32 %v1957_v6, %v1940_v10  ;;  %v2056_v25 = vmul.f32 %v10638_v4, %v10674_v39  ;;  %v2089_v23 = vmul.f32 %v10675_v58, %v10465_v33  ;;  %v2122_v9 = vmul.f32 %v10554_v28, %v10676_v22  ;;  %v10678_v42 = vld [vmem:[#allocation122_spill] sm:$0xff]  ;;  %v10679_v54 = vld [vmem:[#allocation131_spill] sm:$0xff]  ;;  %v10681_v58 = vld [vmem:[#allocation148_spill] sm:$0xff] }
 0x1c1   : > { %10669 = vst [vmem:[#allocation33_spill] sm:$0xff] %v7140_v55  ;;  %v2273_v63 = vadd.f32 %v2257_v24, %v2240_v41  ;;  %v2323_v6 = vmul.f32 %v10679_v54, %v10678_v42  ;;  %v2109_v10 = vadd.f32 %v2093_v12, %v2076_v30  ;;  %v10680_v55 = vld [vmem:[#allocation123_spill] sm:$0xff]  ;;  %v2155_v21 = vmul.f32 %v10560_v31, %v10681_v58  ;;  %v10682_v22 = vld [vmem:[#allocation149_spill] sm:$0xff]  ;;  %v10685_v54 = vld [vmem:[#allocation124_spill] sm:$0xff] }
 0x1c2   : > { %10670 = vst [vmem:[#allocation156_spill] sm:$0xff] %v7142_v34  ;;  %v2126_v39 = vmul.f32 %v10554_v28, %v10680_v55  ;;  %v2006_v62 = vadd.f32 %v1990_v45, %v1973_v48  ;;  %v10683_v34 = vld [vmem:[#allocation150_spill] sm:$0xff]  ;;  %v7180_v41 = vmul.f32 %v10673_v0, %v6692_v51  ;;  %v10684_v12 = vld [vmem:[#allocation89_spill] sm:$0xff]  ;;  %v7186_v58 = vmul.f32 %v6628_v18, %v10678_v42 }
 0x1c3   : > { %10671 = vst [vmem:[#allocation29_spill] sm:$0xff] %v7148_v19  ;;  %v2188_v19 = vmul.f32 %v10652_v17, %v10682_v22  ;;  %v2254_v24 = vmul.f32 %v10667_v32, %v10683_v34  ;;  %v2306_v30 = vadd.f32 %v2290_v20, %v2273_v63  ;;  %v2356_v45 = vmul.f32 %v10685_v54, %v10684_v12  ;;  %v10686_v5 = vld [vmem:[#allocation94_spill] sm:$0xff]  ;;  %v10687_v34 = vld [vmem:[#allocation125_spill] sm:$0xff] }
 0x1c4   : > { %535 = vst.msk [vmem:[#allocation2 + $0xc8] sm:$0xff] %vm492_vm0, %v518_v49  ;;  %v2221_v49 = vmul.f32 %v10661_v61, %v6664_v8  ;;  %v2039_v48 = vadd.f32 %v2023_v35, %v2006_v62  ;;  %v9978_v22 = vrot.slane %v7162_v46, 5  ;;  %v664_v8 = vrot.slane %v7164_v13, 5  ;;  %v10688_v51 = vld [vmem:[#allocation161_spill] sm:$0xff]  ;;  %v10694_v35 = vld [vmem:[#allocation162_spill] sm:$0xff] }
 0x1c5   : > { %10677 = vst [vmem:[#allocation42_spill] sm:$0xff] %v7164_v13  ;;  %v2339_v55 = vadd.f32 %v2323_v6, %v2306_v30  ;;  %v2389_v47 = vmul.f32 %v10687_v34, %v10686_v5  ;;  %v2142_v28 = vadd.f32 %v2126_v39, %v2109_v10  ;;  %v2159_v20 = vmul.f32 %v10560_v31, %v10688_v51 }
 0x1c6   : > { %v2072_v63 = vadd.f32 %v2056_v25, %v2039_v48  ;;  %v7196_v62 = vmul.f32 %v10685_v54, %v6706_v2  ;;  %v7200_v18 = vmul.f32 %v10687_v34, %v6712_v26  ;;  %v737_v6 = vrot.slane %v7164_v13, 6  ;;  %v10692_v26 = vld [vmem:[#allocation116_spill] sm:$0xff]  ;;  %v10693_v2 = vld [vmem:[#allocation53_spill] sm:$0xff] }
 0x1c7   : > { %v808_v5 = vrot.slane %v7164_v13, 7  ;;  %v2372_v39 = vadd.f32 %v2356_v45, %v2339_v55  ;;  %v7212_v48 = vsel %vm672_vm1, %v664_v8, %v9978_v22  ;;  %v2422_v34 = vmul.f32 %v10693_v2, %v10692_v26  ;;  %v10695_v8 = vld [vmem:[#allocation127_spill] sm:$0xff]  ;;  %v10696_v26 = vld [vmem:[#allocation128_spill] sm:$0xff] }
 0x1c8   : > { %v2105_v10 = vadd.f32 %v2089_v23, %v2072_v63  ;;  %10691 = vst [vmem:[#allocation47_spill] sm:$0xff] %v7212_v48  ;;  %v2192_v54 = vmul.f32 %v10652_v17, %v10694_v35  ;;  %v851_v30 = vrot.slane %v7162_v46, 1  ;;  %v2175_v23 = vadd.f32 %v2159_v20, %v2142_v28  ;;  %v10701_v20 = vld [vmem:[#allocation62_spill] sm:$0xff] }
 0x1c9   : > { %v2405_v55 = vadd.f32 %v2389_v47, %v2372_v39  ;;  %v7222_v63 = vmul.f32 %v10693_v2, %v10563_v56  ;;  %v7226_v22 = vmul.f32 %v10695_v8, %v6700_v29  ;;  %v7230_v42 = vmul.f32 %v10696_v26, %v6718_v50  ;;  %v519_v50 = vld [vmem:[%s5271_s0 + $0x60] sm:$0xff] }
 0x1ca   : > { %v2138_v45 = vadd.f32 %v2122_v9, %v2105_v10  ;;  %v10697_v35 = vrot.slane %v7162_v46, 6  ;;  %v10699_v47 = vrot.slane %v7162_v46, 7  ;;  %v2455_v9 = vmul.f32 %v10695_v8, %v7212_v48  ;;  %536 = vst.msk [vmem:[#allocation2 + $0xd8] sm:$0xff] %vm492_vm0, %v519_v50 }
 0x1cb   : > { %v7206_v12 = vld [vmem:[#allocation2 + $0xc8] sm:$0xff]  ;;  %v7248_v39 = vmul.f32 %v10661_v61, %v10701_v20  ;;  %v922_v56 = vrot.slane %v7162_v46, 2  ;;  %v7262_v8 = vadd.f32 %v2192_v54, %v2175_v23  ;;  %v1310_v61 = vmul.f32 %v10567_v60, %v7212_v48 }
 0x1cc   : > { %10689 = vst [vmem:[#allocation133_spill] sm:$0xff] %v7206_v12  ;;  %v7236_v13 = vsel %vm743_vm2, %v737_v6, %v10697_v35  ;;  %v7242_v28 = vsel %vm814_vm3, %v808_v5, %v10699_v47  ;;  %v2171_v10 = vadd.f32 %v2155_v21, %v2138_v45  ;;  %v2438_v35 = vadd.f32 %v2422_v34, %v2405_v55 }
 0x1cd   : > { %10698 = vst [vmem:[#allocation136_spill] sm:$0xff] %v7236_v13  ;;  %v7254_v6 = vmul.f32 %v10614_v37, %v10648_v53  ;;  %v10702_v5 = vrot.slane %v7206_v12, 1  ;;  %v7266_v21 = vmul.f32 %v10667_v32, %v6815_v36  ;;  %v993_v34 = vrot.slane %v7162_v46, 3 }
 0x1ce   : > { %10700 = vst [vmem:[#allocation66_spill] sm:$0xff] %v7242_v28  ;;  %v2204_v45 = vadd.f32 %v2188_v19, %v2171_v10  ;;  %v2488_v2 = vmul.f32 %v10696_v26, %v7236_v13  ;;  %v1343_v54 = vmul.f32 %v10572_v59, %v7236_v13  ;;  %v7280_v19 = vmul.f32 %v10619_v11, %v7162_v46  ;;  %v10706_v26 = vld [vmem:[#allocation126_spill] sm:$0xff] }
 0x1cf   : > { %v7260_v47 = vsel %vm885_vm4, %v851_v30, %v10702_v5  ;;  %v2521_v30 = vmul.f32 %v10614_v37, %v7242_v28  ;;  %v10704_v10 = vrot.slane %v7206_v12, 2  ;;  %v2471_v55 = vadd.f32 %v2455_v9, %v2438_v35  ;;  %v10707_v59 = vld [vmem:[#allocation82_spill] sm:$0xff] }
 0x1d0   : > { %10703 = vst [vmem:[#allocation72_spill] sm:$0xff] %v7260_v47  ;;  %v2237_v23 = vadd.f32 %v2221_v49, %v2204_v45  ;;  %v7290_v32 = vmul.f32 %v10623_v40, %v7260_v47  ;;  %v1326_v53 = vadd.f32 %v1310_v61, %v10706_v26  ;;  %v1376_v37 = vmul.f32 %v10649_v27, %v7242_v28  ;;  %v10708_v49 = vld [vmem:[#allocation83_spill] sm:$0xff] }
 0x1d1   : > { %v7286_v5 = vsel %vm956_vm5, %v922_v56, %v10704_v10  ;;  %v1539_v36 = vmul.f32 %v10707_v59, %v7212_v48  ;;  %v1572_v45 = vmul.f32 %v10708_v49, %v7236_v13  ;;  %v10709_v56 = vrot.slane %v7206_v12, 3  ;;  %v10711_v49 = vld [vmem:[#allocation64_spill] sm:$0xff] }
 0x1d2   : > { %10705 = vst [vmem:[#allocation48_spill] sm:$0xff] %v7286_v5  ;;  %v2270_v60 = vadd.f32 %v2254_v24, %v2237_v23  ;;  %v1409_v26 = vmul.f32 %v10584_v14, %v7162_v46  ;;  %v1442_v61 = vmul.f32 %v10587_v15, %v7260_v47  ;;  %v1359_v35 = vadd.f32 %v1343_v54, %v1326_v53  ;;  %v10712_v23 = vld [vmem:[#allocation84_spill] sm:$0xff] }
 0x1d3   : > { %v7304_v9 = vsel %vm1027_vm6, %v993_v34, %v10709_v56  ;;  %v1475_v10 = vmul.f32 %v10653_v57, %v7286_v5  ;;  %v1555_v24 = vadd.f32 %v1539_v36, %v10711_v49  ;;  %v1605_v12 = vmul.f32 %v10712_v23, %v7242_v28  ;;  %v10713_v57 = vld [vmem:[#allocation87_spill] sm:$0xff]  ;;  %v10714_v36 = vld [vmem:[#allocation96_spill] sm:$0xff] }
 0x1d4   : > { %10710 = vst [vmem:[#allocation137_spill] sm:$0xff] %v7304_v9  ;;  %v2303_v34 = vadd.f32 %v7180_v41, %v2270_v60  ;;  %v1508_v56 = vmul.f32 %v10599_v44, %v7304_v9  ;;  %v1768_v25 = vmul.f32 %v10595_v3, %v7212_v48  ;;  %v1801_v50 = vmul.f32 %v10602_v38, %v7236_v13  ;;  %v10715_v60 = vld [vmem:[#allocation97_spill] sm:$0xff]  ;;  %v10716_v44 = vld [vmem:[#allocation139_spill] sm:$0xff] }
 0x1d5   : > { %v1392_v53 = vadd.f32 %v1376_v37, %v1359_v35  ;;  %v1588_v54 = vadd.f32 %v1572_v45, %v1555_v24  ;;  %v1638_v20 = vmul.f32 %v10713_v57, %v7162_v46  ;;  %v1671_v49 = vmul.f32 %v10714_v36, %v7260_v47 }
 0x1d6   : > { %v2336_v23 = vadd.f32 %v7186_v58, %v2303_v34  ;;  %v1704_v41 = vmul.f32 %v10715_v60, %v7286_v5  ;;  %v1784_v15 = vadd.f32 %v1768_v25, %v10716_v44  ;;  %v1834_v3 = vmul.f32 %v10359_v16, %v7242_v28  ;;  %v10717_v16 = vld [vmem:[#allocation140_spill] sm:$0xff] }
 0x1d7   : > { %v1425_v38 = vadd.f32 %v1409_v26, %v1392_v53  ;;  %v1621_v37 = vadd.f32 %v1605_v12, %v1588_v54  ;;  %v1997_v45 = vmul.f32 %v10379_v7, %v7212_v48  ;;  %v2030_v35 = vmul.f32 %v10635_v43, %v7236_v13  ;;  %v520_v53 = vld [vmem:[%s5271_s0 + $0x68] sm:$0xff] }
 0x1d8   : > { %v2369_v24 = vadd.f32 %v7196_v62, %v2336_v23  ;;  %v1737_v58 = vmul.f32 %v10633_v1, %v7304_v9  ;;  %v1817_v34 = vadd.f32 %v1801_v50, %v1784_v15  ;;  %v1867_v44 = vmul.f32 %v10612_v52, %v7162_v46  ;;  %v10718_v62 = vld [vmem:[#allocation104_spill] sm:$0xff]  ;;  %537 = vst.msk [vmem:[#allocation2 + $0xe0] sm:$0xff] %vm492_vm0, %v520_v53 }
 0x1d9   : > { %v1458_v25 = vadd.f32 %v1442_v61, %v1425_v38  ;;  %v1654_v60 = vadd.f32 %v1638_v20, %v1621_v37  ;;  %v2013_v26 = vadd.f32 %v1997_v45, %v10717_v16  ;;  %v2063_v12 = vmul.f32 %v10638_v4, %v7242_v28  ;;  %v10719_v45 = vld [vmem:[#allocation105_spill] sm:$0xff] }
 0x1da   : > { %v2402_v54 = vadd.f32 %v7200_v18, %v2369_v24  ;;  %v1850_v13 = vadd.f32 %v1834_v3, %v1817_v34  ;;  %v1900_v23 = vmul.f32 %v10718_v62, %v7260_v47  ;;  %v2096_v15 = vmul.f32 %v10465_v33, %v7162_v46  ;;  %v10720_v3 = vld [vmem:[#allocation113_spill] sm:$0xff] }
 0x1db   : > { %v1491_v50 = vadd.f32 %v1475_v10, %v1458_v25  ;;  %v1687_v38 = vadd.f32 %v1671_v49, %v1654_v60  ;;  %v2046_v20 = vadd.f32 %v2030_v35, %v2013_v26  ;;  %v2504_v61 = vadd.f32 %v2488_v2, %v2471_v55  ;;  %v10721_v49 = vld [vmem:[#allocation106_spill] sm:$0xff] }
 0x1dc   : > { %v2435_v16 = vadd.f32 %v7222_v63, %v2402_v54  ;;  %v1883_v37 = vadd.f32 %v1867_v44, %v1850_v13  ;;  %v1933_v28 = vmul.f32 %v10719_v45, %v7286_v5  ;;  %v2129_v18 = vmul.f32 %v10720_v3, %v7260_v47  ;;  %v10722_v63 = vld [vmem:[#allocation54_spill] sm:$0xff] }
 0x1dd   : > { %v7357_v24 = vadd.f32 %v1508_v56, %v1491_v50  ;;  %v1720_v34 = vadd.f32 %v1704_v41, %v1687_v38  ;;  %v2079_v48 = vadd.f32 %v2063_v12, %v2046_v20  ;;  %v2537_v33 = vadd.f32 %v2521_v30, %v2504_v61  ;;  %v10723_v30 = vld [vmem:[#allocation147_spill] sm:$0xff]  ;;  %v10752_v47 = vld [vmem:[#allocation158_spill] sm:$0xff] }
 0x1de   : > { %v2468_v53 = vadd.f32 %v7226_v22, %v2435_v16  ;;  %v1916_v10 = vadd.f32 %v1900_v23, %v1883_v37  ;;  %v1966_v2 = vmul.f32 %v10721_v49, %v7304_v9  ;;  %v2620_v13 = vmul.f32 %v10722_v63, %v7286_v5  ;;  %v10724_v12 = vld [vmem:[#allocation31_spill] sm:$0xff] }
 0x1df   : > { %v7364_v55 = vadd.f32 %v1737_v58, %v1720_v34  ;;  %v2112_v60 = vadd.f32 %v2096_v15, %v2079_v48  ;;  %v2162_v35 = vmul.f32 %v10560_v31, %v7286_v5  ;;  %v2570_v56 = vadd.f32 %v7280_v19, %v2537_v33  ;;  %v10725_v19 = vld [vmem:[#allocation123_spill] sm:$0xff]  ;;  %v10760_v31 = vld [vmem:[#allocation68_spill] sm:$0xff] }
 0x1e0   : > { %v2501_v41 = vadd.f32 %v7230_v42, %v2468_v53  ;;  %v2551_v22 = vmul.f32 %v10723_v30, %v10619_v11  ;;  %v1949_v44 = vadd.f32 %v1933_v28, %v1916_v10  ;;  %v2241_v25 = vadd.f32 %v7248_v39, %v7262_v8  ;;  %v10726_v8 = vld [vmem:[#allocation156_spill] sm:$0xff]  ;;  %v10727_v39 = vld [vmem:[#allocation29_spill] sm:$0xff]  ;;  %v10730_v34 = vld [vmem:[#allocation39_spill] sm:$0xff] }
 0x1e1   : > { %v2145_v26 = vadd.f32 %v2129_v18, %v2112_v60  ;;  %v2195_v58 = vmul.f32 %v10652_v17, %v7304_v9  ;;  %v2603_v48 = vadd.f32 %v7290_v32, %v2570_v56  ;;  %v2653_v54 = vmul.f32 %v10724_v12, %v7304_v9  ;;  %v10729_v18 = vld [vmem:[#allocation46_spill] sm:$0xff]  ;;  %v10731_v10 = vld [vmem:[#allocation145_spill] sm:$0xff] }
 0x1e2   : > { %v1406_v33 = vmul.f32 %v10723_v30, %v10584_v14  ;;  %v2534_v42 = vadd.f32 %v7254_v6, %v2501_v41  ;;  %v2584_v28 = vmul.f32 %v10623_v40, %v10725_v19  ;;  %v7384_v23 = vadd.f32 %v1966_v2, %v1949_v44  ;;  %v10728_v6 = vld [vmem:[#allocation121_spill] sm:$0xff] }
 0x1e3   : > { %v1519_v15 = vadd.f32 %v10727_v39, %v10726_v8  ;;  %v1536_v50 = vmul.f32 %v10707_v59, %v6700_v29  ;;  %v2178_v32 = vadd.f32 %v2162_v35, %v2145_v26  ;;  %v2636_v38 = vadd.f32 %v2620_v13, %v2603_v48  ;;  %v10733_v13 = vld [vmem:[#allocation33_spill] sm:$0xff]  ;;  %v10737_v26 = vld [vmem:[#allocation44_spill] sm:$0xff]  ;;  %v10739_v39 = vld [vmem:[#allocation83_spill] sm:$0xff] }
 0x1e4   : > { %v2567_v20 = vadd.f32 %v2551_v22, %v2534_v42  ;;  %v2617_v61 = vmul.f32 %v10722_v63, %v10688_v51  ;;  %v2274_v16 = vadd.f32 %v7266_v21, %v2241_v25  ;;  %v2291_v37 = vmul.f32 %v10673_v0, %v10728_v6  ;;  %v10734_v41 = vld [vmem:[#allocation57_spill] sm:$0xff]  ;;  %v10735_v21 = vld [vmem:[#allocation162_spill] sm:$0xff] }
 0x1e5   : > { %v1352_v53 = vadd.f32 %v10730_v34, %v10729_v18  ;;  %v1369_v2 = vmul.f32 %v10649_v27, %v10731_v10  ;;  %v7399_v60 = vadd.f32 %v2195_v58, %v2178_v32  ;;  %v2669_v35 = vadd.f32 %v2653_v54, %v2636_v38  ;;  %v10736_v25 = vld [vmem:[#allocation62_spill] sm:$0xff]  ;;  %v10738_v8 = vld [vmem:[#allocation153_spill] sm:$0xff]  ;;  %v10740_v34 = vld [vmem:[#allocation55_spill] sm:$0xff] }
 0x1e6   : > { %v1422_v56 = vadd.f32 %v1406_v33, %v10733_v13  ;;  %v1439_v30 = vmul.f32 %v10734_v41, %v10725_v19  ;;  %v2600_v22 = vadd.f32 %v2584_v28, %v2567_v20  ;;  %v2650_v44 = vmul.f32 %v10724_v12, %v10735_v21  ;;  %v10742_v54 = vld [vmem:[#allocation164_spill] sm:$0xff]  ;;  %v10744_v13 = vld [vmem:[#allocation122_spill] sm:$0xff]  ;;  %v10745_v28 = vld [vmem:[#allocation157_spill] sm:$0xff] }
 0x1e7   : > { %10732 = vst [vmem:[#allocation69_spill] sm:$0xff] %v7399_v60  ;;  %v1309_v48 = vmul.f32 %v10737_v26, %v10736_v25  ;;  %v1552_v42 = vadd.f32 %v1536_v50, %v1519_v15  ;;  %v1569_v18 = vmul.f32 %v10739_v39, %v10738_v8  ;;  %v7411_v58 = vadd.f32 %v10740_v34, %v2669_v35  ;;  %v10743_v32 = vld [vmem:[#allocation40_spill] sm:$0xff]  ;;  %v10746_v29 = vld [vmem:[#allocation34_spill] sm:$0xff]  ;;  %v4711_v15 = vld [vmem:[#allocation2 + $0x68] sm:$0xff] }
 0x1e8   : > { %v1129_v33 = vadd.f32 %v10743_v32, %v10742_v54  ;;  %v2633_v38 = vadd.f32 %v2617_v61, %v2600_v22  ;;  %v2307_v10 = vadd.f32 %v2291_v37, %v2274_v16  ;;  %v2324_v20 = vmul.f32 %v10745_v28, %v10744_v13  ;;  %v521_v60 = vld [vmem:[%s5271_s0 + $0x70] sm:$0xff]  ;;  %v10748_v37 = vld [vmem:[#allocation63_spill] sm:$0xff] }
 0x1e9   : > { %10741 = vst [vmem:[#allocation159_spill] sm:$0xff] %v7411_v58  ;;  %v1146_v9 = vmul.f32 %v10746_v29, %v10728_v6  ;;  %v1385_v26 = vadd.f32 %v1369_v2, %v1352_v53  ;;  %v1402_v50 = vmul.f32 %v4711_v15, %v10584_v14  ;;  %v2712_v35 = vsel %vm492_vm0, %v7411_v58, 0.0  ;;  %v10747_v8 = vld [vmem:[#allocation116_spill] sm:$0xff]  ;;  %v10749_v32 = vld [vmem:[#allocation155_spill] sm:$0xff]  ;;  %v10751_v2 = vld [vmem:[#allocation49_spill] sm:$0xff] }
 0x1ea   : > { %538 = vst.msk [vmem:[#allocation2 + $0xf0] sm:$0xff] %vm492_vm0, %v521_v60  ;;  %v2193_v61 = vmul.f32 %v10652_v17, %v10747_v8  ;;  %v1455_v16 = vadd.f32 %v1439_v30, %v1422_v56  ;;  %v1472_v22 = vmul.f32 %v10748_v37, %v10688_v51  ;;  %v2666_v54 = vadd.f32 %v2650_v44, %v2633_v38  ;;  %v10750_v53 = vld [vmem:[#allocation120_spill] sm:$0xff]  ;;  %v10755_v14 = vld [vmem:[#allocation133_spill] sm:$0xff]  ;;  %v10758_v44 = vld [vmem:[#allocation142_spill] sm:$0xff] }
 0x1eb   : > { %2713 = vadd.xlane.f32.xlu2 %v2712_v35  ;;  %v1325_v29 = vadd.f32 %v1309_v48, %v10749_v32  ;;  %v1342_v5 = vmul.f32 %v10751_v2, %v10750_v53  ;;  %v1585_v15 = vadd.f32 %v1569_v18, %v1552_v42  ;;  %v10753_v13 = vld [vmem:[#allocation84_spill] sm:$0xff]  ;;  %v650_v8 = vrot.slane %v10755_v14, 5  ;;  %v10756_v30 = vld [vmem:[#allocation73_spill] sm:$0xff] }
 0x1ec   : > { %v1602_v58 = vmul.f32 %v10753_v13, %v10752_v47  ;;  %v7434_v60 = vadd.f32 %v10740_v34, %v2666_v54  ;;  %v2340_v56 = vadd.f32 %v2324_v20, %v2307_v10  ;;  %v10757_v17 = vld [vmem:[#allocation124_spill] sm:$0xff]  ;;  %v10759_v38 = vld [vmem:[#allocation141_spill] sm:$0xff]  ;;  %v1162_v48 = vadd.f32 %v1146_v9, %v1129_v33  ;;  %v10761_v47 = vld [vmem:[#allocation67_spill] sm:$0xff] }
 0x1ed   : > { %v2357_v0 = vmul.f32 %v10757_v17, %v10756_v30  ;;  %v2176_v35 = vadd.f32 %v10759_v38, %v10758_v44  ;;  %v1418_v32 = vadd.f32 %v1402_v50, %v1385_v26  ;;  %v1435_v42 = vmul.f32 %v10734_v41, %v10760_v31  ;;  %v10762_v20 = vld [vmem:[#allocation35_spill] sm:$0xff] }
 0x1ee   : > { %10754 = vst [vmem:[#allocation81_spill] sm:$0xff] %v7434_v60  ;;  %v1488_v18 = vadd.f32 %v1472_v22, %v1455_v16  ;;  %v1505_v2 = vmul.f32 %v10761_v47, %v10735_v21  ;;  %v2703_v54 = vsel %vm492_vm0, %v7434_v60, 0.0  ;;  %v723_v10 = vrot.slane %v10755_v14, 6  ;;  %v7450_v44 = vld [vmem:[#allocation2 + $0x98] sm:$0xff] }
 0x1ef   : > { %v1179_v30 = vmul.f32 %v10745_v28, %v10762_v20  ;;  %v1358_v17 = vadd.f32 %v1342_v5, %v1325_v29  ;;  %v1618_v3 = vadd.f32 %v1602_v58, %v1585_v15  ;;  %10763 = vst [vmem:[#allocation75_spill] sm:$0xff] %v7450_v44  ;;  %v1635_v9 = vmul.f32 %v7450_v44, %v10713_v57  ;;  %v10767_v58 = vld [vmem:[#allocation148_spill] sm:$0xff]  ;;  %v10768_v29 = vld [vmem:[#allocation61_spill] sm:$0xff] }
 0x1f0   : > { %2704 = vadd.xlane.f32.xlu0 %v2703_v54  ;;  %v1375_v31 = vmul.f32 %v10649_v27, %v10728_v6  ;;  %v10764_v26 = vrot.slane %v7162_v46, 5  ;;  %v794_v16 = vrot.slane %v10755_v14, 7  ;;  %v2373_v28 = vadd.f32 %v2357_v0, %v2340_v56  ;;  %v10769_v15 = vld [vmem:[#allocation125_spill] sm:$0xff]  ;;  %v10770_v54 = vld [vmem:[#allocation163_spill] sm:$0xff] }
 0x1f1   : > { %v1451_v5 = vadd.f32 %v1435_v42, %v1418_v32  ;;  %v1468_v22 = vmul.f32 %v10748_v37, %v10767_v58  ;;  %v2390_v38 = vmul.f32 %v10769_v15, %v10768_v29  ;;  %v10771_v20 = vld [vmem:[#allocation53_spill] sm:$0xff]  ;;  %v1521_v44 = vadd.f32 %v1505_v2, %v1488_v18  ;;  %v10774_v32 = vld [vmem:[#allocation42_spill] sm:$0xff]  ;;  %v10775_v37 = vld [vmem:[#allocation127_spill] sm:$0xff] }
 0x1f2   : > { %v7460_v50 = vsel %vm672_vm1, %v10764_v26, %v650_v8  ;;  %v2423_v60 = vmul.f32 %v10771_v20, %v10770_v54  ;;  %v1538_v27 = vmul.f32 %v10707_v59, %v10736_v25  ;;  %v1668_v8 = vmul.f32 %v10714_v36, %v10725_v19 }
 0x1f3   : > { %10766 = vst [vmem:[#allocation160_spill] sm:$0xff] %v7460_v50  ;;  %v10772_v26 = vrot.slane %v7162_v46, 6  ;;  %v1651_v56 = vadd.f32 %v1635_v9, %v1618_v3  ;;  %v879_v42 = vrot.slane %v10774_v32, 1  ;;  %v2406_v58 = vadd.f32 %v2390_v38, %v2373_v28  ;;  %v10778_v28 = vld [vmem:[#allocation128_spill] sm:$0xff] }
 0x1f4   : > { %v2456_v54 = vmul.f32 %v10775_v37, %v7460_v50  ;;  %v7482_v2 = vadd.f32 %v2193_v61, %v2176_v35  ;;  %v7484_v18 = vadd.f32 %v1179_v30, %v1162_v48  ;;  %v7486_v29 = vadd.f32 %v1375_v31, %v1358_v17  ;;  %v7499_v61 = vld [vmem:[#allocation2 + $0xd8] sm:$0xff]  ;;  %v7501_v30 = vld [vmem:[#allocation2 + $0xe8] sm:$0xff] }
 0x1f5   : > { %v7477_v0 = vsel %vm743_vm2, %v10772_v26, %v723_v10  ;;  %v10776_v19 = vrot.slane %v7162_v46, 7  ;;  %v7494_v10 = vadd.f32 %v1468_v22, %v1451_v5  ;;  %v950_v3 = vrot.slane %v10774_v32, 2  ;;  %10779 = vst [vmem:[#allocation91_spill] sm:$0xff] %v7499_v61  ;;  %v10781_v17 = vld [vmem:[#allocation149_spill] sm:$0xff] }
 0x1f6   : > { %10773 = vst [vmem:[#allocation70_spill] sm:$0xff] %v7477_v0  ;;  %v2439_v9 = vadd.f32 %v2423_v60, %v2406_v58  ;;  %v2489_v38 = vmul.f32 %v10778_v28, %v7477_v0  ;;  %v7505_v35 = vmul.f32 %v10761_v47, %v10781_v17  ;;  %v7507_v48 = vadd.f32 %v1538_v27, %v1521_v44  ;;  %v10785_v58 = vld [vmem:[#allocation129_spill] sm:$0xff] }
 0x1f7   : > { %v7492_v20 = vsel %vm814_vm3, %v10776_v19, %v794_v16  ;;  %10780 = vst [vmem:[#allocation59_spill] sm:$0xff] %v7501_v30  ;;  %v10782_v19 = vld [vmem:[#allocation97_spill] sm:$0xff]  ;;  %v1021_v16 = vrot.slane %v10774_v32, 3  ;;  %v1684_v5 = vadd.f32 %v1668_v8, %v1651_v56  ;;  %v10783_v60 = vrot.slane %v10755_v14, 1 }
 0x1f8   : > { %10777 = vst [vmem:[#allocation103_spill] sm:$0xff] %v7492_v20  ;;  %v1701_v31 = vmul.f32 %v10782_v19, %v10688_v51  ;;  %v2472_v26 = vadd.f32 %v2456_v54, %v2439_v9  ;;  %v2522_v0 = vmul.f32 %v10785_v58, %v7492_v20  ;;  %v665_v27 = vrot.slane %v7501_v30, 5 }
 0x1f9   : > { %v7516_v22 = vsel %vm885_vm4, %v10783_v60, %v879_v42  ;;  %v738_v51 = vrot.slane %v7501_v30, 6  ;;  %v7526_v8 = vmul.f32 %v10739_v39, %v10750_v53  ;;  %v10786_v56 = vrot.slane %v10755_v14, 2 }
 0x1fa   : > { %10784 = vst [vmem:[#allocation86_spill] sm:$0xff] %v7516_v22  ;;  %v2505_v32 = vadd.f32 %v2489_v38, %v2472_v26  ;;  %v2555_v42 = vmul.f32 %v10619_v11, %v10755_v14  ;;  %v7538_v9 = vmul.f32 %v10753_v13, %v10728_v6  ;;  %v10788_v60 = vrot.slane %v10755_v14, 3  ;;  %v10790_v38 = vld [vmem:[#allocation99_spill] sm:$0xff]  ;;  %v7554_v11 = vld [vmem:[#allocation2 + $0xe0] sm:$0xff] }
 0x1fb   : > { %v7532_v54 = vsel %vm956_vm5, %v10786_v56, %v950_v3  ;;  %v809_v20 = vrot.slane %v7501_v30, 7  ;;  %v1734_v3 = vmul.f32 %v10633_v1, %v10735_v21  ;;  %v1767_v26 = vmul.f32 %v10790_v38, %v10736_v25  ;;  %10791 = vst [vmem:[#allocation60_spill] sm:$0xff] %v7554_v11 }
 0x1fc   : > { %10787 = vst [vmem:[#allocation90_spill] sm:$0xff] %v7532_v54  ;;  %v7544_v44 = vsel %vm1027_vm6, %v10788_v60, %v1021_v16  ;;  %v2538_v56 = vadd.f32 %v2522_v0, %v2505_v32  ;;  %v2588_v50 = vmul.f32 %v10623_v40, %v7516_v22  ;;  %v1717_v14 = vadd.f32 %v1701_v31, %v1684_v5  ;;  %v10799_v40 = vld [vmem:[#allocation101_spill] sm:$0xff] }
 0x1fd   : > { %10789 = vst [vmem:[#allocation92_spill] sm:$0xff] %v7544_v44  ;;  %v2621_v16 = vmul.f32 %v10722_v63, %v7532_v54  ;;  %v10792_v60 = vrot.slane %v7499_v61, 5  ;;  %v10793_v30 = vrot.slane %v7499_v61, 6  ;;  %v2654_v25 = vmul.f32 %v10724_v12, %v7544_v44 }
 0x1fe   : > { %v2571_v32 = vadd.f32 %v2555_v42, %v2538_v56  ;;  %v10795_v54 = vrot.slane %v7499_v61, 7  ;;  %v994_v21 = vrot.slane %v7499_v61, 3  ;;  %v10798_v63 = vrot.slane %v7554_v11, 1 }
 0x1ff   : > { %v7562_v17 = vsel %vm672_vm1, %v665_v27, %v10792_v60  ;;  %v7568_v0 = vsel %vm743_vm2, %v738_v51, %v10793_v30  ;;  %v852_v60 = vrot.slane %v7499_v61, 1  ;;  %v923_v30 = vrot.slane %v7499_v61, 2 }
 0x200   : > { %10794 = vst [vmem:[#allocation108_spill] sm:$0xff] %v7568_v0  ;;  %v1541_v31 = vmul.f32 %v10707_v59, %v7562_v17  ;;  %v1574_v5 = vmul.f32 %v10739_v39, %v7568_v0  ;;  %v7580_v27 = vsel %vm814_vm3, %v809_v20, %v10795_v54  ;;  %v2604_v42 = vadd.f32 %v2588_v50, %v2571_v32  ;;  %v10797_v54 = vld [vmem:[#allocation100_spill] sm:$0xff] }
 0x201   : > { %10796 = vst [vmem:[#allocation85_spill] sm:$0xff] %v7580_v27  ;;  %v1607_v22 = vmul.f32 %v10753_v13, %v7580_v27  ;;  %v1770_v20 = vmul.f32 %v10790_v38, %v7562_v17  ;;  %v1803_v51 = vmul.f32 %v10797_v54, %v7568_v0  ;;  %v1800_v50 = vmul.f32 %v10797_v54, %v10750_v53 }
 0x202   : > { %v1557_v44 = vadd.f32 %v1541_v31, %v7357_v24  ;;  %v2637_v32 = vadd.f32 %v2621_v16, %v2604_v42  ;;  %v1640_v24 = vmul.f32 %v10713_v57, %v7499_v61  ;;  %v1750_v31 = vadd.f32 %v1734_v3, %v1717_v14 }
 0x203   : > { %v7603_v12 = vsel %vm885_vm4, %v852_v60, %v10798_v63  ;;  %v1786_v38 = vadd.f32 %v1770_v20, %v7364_v55  ;;  %v1836_v47 = vmul.f32 %v10799_v40, %v7580_v27  ;;  %v10800_v53 = vrot.slane %v7554_v11, 2 }
 0x204   : > { %v1590_v56 = vadd.f32 %v1574_v5, %v1557_v44  ;;  %v2670_v58 = vadd.f32 %v2654_v25, %v2637_v32  ;;  %v1673_v14 = vmul.f32 %v10714_v36, %v7603_v12  ;;  %v10801_v3 = vrot.slane %v7554_v11, 3  ;;  %v10807_v11 = vld [vmem:[#allocation136_spill] sm:$0xff] }
 0x205   : > { %v7612_v44 = vsel %vm956_vm5, %v923_v30, %v10800_v53  ;;  %v1819_v55 = vadd.f32 %v1803_v51, %v1786_v38  ;;  %v1869_v25 = vmul.f32 %v10612_v52, %v7499_v61  ;;  %v1999_v5 = vmul.f32 %v10379_v7, %v7562_v17 }
 0x206   : > { %v1623_v16 = vadd.f32 %v1607_v22, %v1590_v56  ;;  %v7620_v63 = vsel %vm1027_vm6, %v994_v21, %v10801_v3  ;;  %v7627_v53 = vadd.f32 %v10740_v34, %v2670_v58  ;;  %v1706_v60 = vmul.f32 %v10782_v19, %v7612_v44  ;;  %v10803_v3 = vld [vmem:[#allocation111_spill] sm:$0xff] }
 0x207   : > { %v2032_v30 = vmul.f32 %v10635_v43, %v7568_v0  ;;  %v1852_v42 = vadd.f32 %v1836_v47, %v1819_v55  ;;  %v1902_v21 = vmul.f32 %v10718_v62, %v7603_v12  ;;  %v2015_v38 = vadd.f32 %v1999_v5, %v7384_v23  ;;  %v10805_v5 = vld [vmem:[#allocation117_spill] sm:$0xff] }
 0x208   : > { %10802 = vst [vmem:[#allocation74_spill] sm:$0xff] %v7627_v53  ;;  %v1656_v22 = vadd.f32 %v1640_v24, %v1623_v16  ;;  %v2065_v51 = vmul.f32 %v10638_v4, %v7580_v27  ;;  %v1783_v56 = vadd.f32 %v1767_v26, %v1750_v31  ;;  %v2715_v58 = vsel %vm492_vm0, %v7627_v53, 0.0 }
 0x209   : > { %v1739_v32 = vmul.f32 %v10633_v1, %v7620_v63  ;;  %2716 = vadd.xlane.f32.xlu2 %v2715_v58  ;;  %v1885_v24 = vadd.f32 %v1869_v25, %v1852_v42  ;;  %v1935_v47 = vmul.f32 %v10719_v45, %v7612_v44  ;;  %v2048_v16 = vadd.f32 %v2032_v30, %v2015_v38  ;;  %v10806_v25 = vld [vmem:[#allocation113_spill] sm:$0xff]  ;;  %v10808_v30 = vld [vmem:[#allocation118_spill] sm:$0xff] }
 0x20a   : > { %v1689_v20 = vadd.f32 %v1673_v14, %v1656_v22  ;;  %v2098_v23 = vmul.f32 %v10803_v3, %v7499_v61  ;;  %v1587_v55 = vadd.f32 %v7526_v8, %v7507_v48  ;;  %v1968_v31 = vmul.f32 %v10721_v49, %v7620_v63  ;;  %v10804_v14 = vld [vmem:[#allocation47_spill] sm:$0xff] }
 0x20b   : > { %v2226_v22 = vmul.f32 %v10805_v5, %v10804_v14  ;;  %v1918_v53 = vadd.f32 %v1902_v21, %v1885_v24  ;;  %v2081_v58 = vadd.f32 %v2065_v51, %v2048_v16  ;;  %v2131_v42 = vmul.f32 %v10806_v25, %v7603_v12  ;;  %v10809_v14 = vld [vmem:[#allocation114_spill] sm:$0xff]  ;;  %v10811_v24 = vld [vmem:[#allocation119_spill] sm:$0xff]  ;;  %v10813_v25 = vld [vmem:[#allocation56_spill] sm:$0xff] }
 0x20c   : > { %v1722_v26 = vadd.f32 %v1706_v60, %v1689_v20  ;;  %v2259_v38 = vmul.f32 %v10808_v30, %v10807_v11  ;;  %v1816_v33 = vadd.f32 %v1800_v50, %v1783_v56  ;;  %v1833_v3 = vmul.f32 %v10799_v40, %v10728_v6  ;;  %v10810_v51 = vld [vmem:[#allocation66_spill] sm:$0xff] }
 0x20d   : > { %v2242_v8 = vadd.f32 %v2226_v22, %v7482_v2  ;;  %v1951_v60 = vadd.f32 %v1935_v47, %v1918_v53  ;;  %v2114_v20 = vadd.f32 %v2098_v23, %v2081_v58  ;;  %v2164_v21 = vmul.f32 %v10809_v14, %v7612_v44  ;;  %v7665_v5 = vld [vmem:[#allocation2 + $0xb0] sm:$0xff]  ;;  %v10815_v53 = vld [vmem:[#allocation52_spill] sm:$0xff]  ;;  %v10816_v22 = vld [vmem:[#allocation115_spill] sm:$0xff] }
 0x20e   : > { %v7658_v48 = vadd.f32 %v1739_v32, %v1722_v26  ;;  %v2292_v16 = vmul.f32 %v10811_v24, %v10810_v51  ;;  %10812 = vst [vmem:[#allocation130_spill] sm:$0xff] %v7665_v5  ;;  %v1408_v11 = vmul.f32 %v7665_v5, %v10813_v25  ;;  %v1517_v50 = vadd.f32 %v7505_v35, %v7494_v10  ;;  %v10814_v32 = vld [vmem:[#allocation122_spill] sm:$0xff]  ;;  %v10817_v10 = vld [vmem:[#allocation72_spill] sm:$0xff] }
 0x20f   : > { %v2275_v56 = vadd.f32 %v2259_v38, %v2242_v8  ;;  %v2325_v2 = vmul.f32 %v10814_v32, %v7162_v46  ;;  %v1534_v47 = vmul.f32 %v10707_v59, %v10815_v53  ;;  %v7675_v23 = vadd.f32 %v1968_v31, %v1951_v60  ;;  %v10818_v35 = vld [vmem:[#allocation124_spill] sm:$0xff]  ;;  %v10819_v8 = vld [vmem:[#allocation73_spill] sm:$0xff] }
 0x210   : > { %v2147_v26 = vadd.f32 %v2131_v42, %v2114_v20  ;;  %v2197_v58 = vmul.f32 %v10816_v22, %v7620_v63  ;;  %v1620_v51 = vadd.f32 %v7538_v9, %v1587_v55  ;;  %v1637_v24 = vmul.f32 %v7665_v5, %v10713_v57  ;;  %v10820_v46 = vld [vmem:[#allocation36_spill] sm:$0xff] }
 0x211   : > { %v2308_v30 = vadd.f32 %v2292_v16, %v2275_v56  ;;  %v2358_v38 = vmul.f32 %v10818_v35, %v10817_v10  ;;  %v1212_v32 = vmul.f32 %v10820_v46, %v10819_v8  ;;  %v1849_v6 = vadd.f32 %v1833_v3, %v1816_v33  ;;  %v10821_v53 = vld [vmem:[#allocation48_spill] sm:$0xff]  ;;  %v10822_v56 = vld [vmem:[#allocation150_spill] sm:$0xff] }
 0x212   : > { %v1866_v31 = vmul.f32 %v7665_v5, %v10612_v52  ;;  %v2180_v42 = vadd.f32 %v2164_v21, %v2147_v26  ;;  %v1424_v60 = vadd.f32 %v1408_v11, %v7486_v29  ;;  %v2391_v9 = vmul.f32 %v10769_v15, %v10821_v53  ;;  %v10824_v26 = vld [vmem:[#allocation137_spill] sm:$0xff] }
 0x213   : > { %v2341_v20 = vadd.f32 %v2325_v2, %v2308_v30  ;;  %v1441_v55 = vmul.f32 %v10734_v41, %v10819_v8  ;;  %v1550_v16 = vadd.f32 %v1534_v47, %v1517_v50  ;;  %v1567_v10 = vmul.f32 %v10739_v39, %v10822_v56  ;;  %v10825_v29 = vld [vmem:[#allocation53_spill] sm:$0xff]  ;;  %v10827_v47 = vld [vmem:[#allocation38_spill] sm:$0xff] }
 0x214   : > { %v7695_v35 = vadd.f32 %v2197_v58, %v2180_v42  ;;  %v1653_v33 = vadd.f32 %v1637_v24, %v1620_v51  ;;  %v1670_v3 = vmul.f32 %v10714_v36, %v10819_v8  ;;  %v2424_v30 = vmul.f32 %v10825_v29, %v10824_v26  ;;  %v10826_v50 = vld [vmem:[#allocation61_spill] sm:$0xff]  ;;  %v10829_v26 = vld [vmem:[#allocation151_spill] sm:$0xff] }
 0x215   : > { %v2374_v21 = vadd.f32 %v2358_v38, %v2341_v20  ;;  %v1228_v11 = vadd.f32 %v1212_v32, %v7484_v18  ;;  %v1882_v2 = vadd.f32 %v1866_v31, %v1849_v6  ;;  %v1899_v46 = vmul.f32 %v10718_v62, %v10819_v8  ;;  %v10828_v38 = vld [vmem:[#allocation63_spill] sm:$0xff] }
 0x216   : > { %10823 = vst [vmem:[#allocation98_spill] sm:$0xff] %v7695_v35  ;;  %v1245_v53 = vmul.f32 %v10827_v47, %v10826_v50  ;;  %v2457_v24 = vmul.f32 %v10775_v37, %v7562_v17  ;;  %v4973_v58 = vmov 32.0   ;;  %v1457_v51 = vadd.f32 %v1441_v55, %v1424_v60  ;;  %v10830_v55 = vld [vmem:[#allocation163_spill] sm:$0xff] }
 0x217   : > { %v2407_v56 = vadd.f32 %v2391_v9, %v2374_v21  ;;  %4625 = vrcp.f32 %v4973_v58  ;;  %v1474_v42 = vmul.f32 %v10828_v38, %v10826_v50  ;;  %v1583_v20 = vadd.f32 %v1567_v10, %v1550_v16  ;;  %v10831_v58 = vld [vmem:[#allocation43_spill] sm:$0xff]  ;;  %v10832_v10 = vld [vmem:[#allocation129_spill] sm:$0xff] }
 0x218   : > { %v1600_v6 = vmul.f32 %v10753_v13, %v10829_v26  ;;  %v1686_v18 = vadd.f32 %v1670_v3, %v1653_v33  ;;  %v1703_v32 = vmul.f32 %v10782_v19, %v10826_v50  ;;  %v2490_v9 = vmul.f32 %v10778_v28, %v7568_v0  ;;  %v10833_v3 = vld [vmem:[#allocation67_spill] sm:$0xff] }
 0x219   : > { %v2440_v31 = vadd.f32 %v2424_v30, %v2407_v56  ;;  %v1915_v21 = vadd.f32 %v1899_v46, %v1882_v2  ;;  %v1932_v47 = vmul.f32 %v10719_v45, %v10826_v50  ;;  %v1261_v60 = vadd.f32 %v1245_v53, %v1228_v11  ;;  %v4714_v56 = vld [vmem:[#allocation2 + $0x80] sm:$0xff] }
 0x21a   : > { %v1278_v37 = vmul.f32 %v10831_v58, %v10830_v55  ;;  %v2523_v26 = vmul.f32 %v10832_v10, %v7580_v27  ;;  %v1490_v33 = vadd.f32 %v1474_v42, %v1457_v51  ;;  %v1507_v5 = vmul.f32 %v10833_v3, %v10830_v55  ;;  %v10834_v58 = vld [vmem:[#allocation28_spill] sm:$0xff] }
 0x21b   : > { %v2473_v16 = vadd.f32 %v2457_v24, %v2440_v31  ;;  %v1616_v30 = vadd.f32 %v1600_v6, %v1583_v20  ;;  %v1633_v28 = vmul.f32 %v4714_v56, %v10713_v57  ;;  %v1719_v46 = vadd.f32 %v1703_v32, %v1686_v18  ;;  %v10835_v20 = vld [vmem:[#allocation30_spill] sm:$0xff]  ;;  %v10836_v18 = vld [vmem:[#allocation71_spill] sm:$0xff]  ;;  %v10838_v27 = vld [vmem:[#allocation44_spill] sm:$0xff] }
 0x21c   : > { %v1736_v11 = vmul.f32 %v10633_v1, %v10830_v55  ;;  %v2556_v24 = vmul.f32 %v10834_v58, %v7499_v61  ;;  %v1948_v31 = vadd.f32 %v1932_v47, %v1915_v21  ;;  %v1965_v51 = vmul.f32 %v10721_v49, %v10830_v55  ;;  %v10839_v47 = vld [vmem:[#allocation54_spill] sm:$0xff] }
 0x21d   : > { %v4626_v2 = vpop.eup %4625  ;;  %v2506_v53 = vadd.f32 %v2490_v9, %v2473_v16  ;;  %v1294_v10 = vadd.f32 %v1278_v37, %v1261_v60  ;;  %v2589_v6 = vmul.f32 %v10835_v20, %v7603_v12  ;;  %v1523_v56 = vadd.f32 %v1507_v5, %v1490_v33  ;;  %v10837_v16 = vld [vmem:[#allocation160_spill] sm:$0xff]  ;;  %v10840_v60 = vld [vmem:[#allocation99_spill] sm:$0xff] }
 0x21e   : > { %v2749_v42 = vmul.f32 32.0, %v4626_v2  ;;  %v1649_v29 = vadd.f32 %v1633_v28, %v1616_v30  ;;  %v1666_v32 = vmul.f32 %v10714_v36, %v10836_v18  ;;  %v1752_v9 = vadd.f32 %v1736_v11, %v1719_v46  ;;  %v10841_v30 = vld [vmem:[#allocation31_spill] sm:$0xff] }
 0x21f   : > { %v2539_v35 = vadd.f32 %v2523_v26, %v2506_v53  ;;  %v1311_v58 = vmul.f32 %v10838_v27, %v10837_v16  ;;  %v2622_v61 = vmul.f32 %v10839_v47, %v7612_v44  ;;  %v1981_v0 = vadd.f32 %v1965_v51, %v1948_v31  ;;  %v10843_v51 = vld [vmem:[#allocation70_spill] sm:$0xff] }
 0x220   : > { %v2750_v15 = vsub.f32 1.0, %v2749_v42  ;;  %v1540_v37 = vmul.f32 %v10707_v59, %v10837_v16  ;;  %v1769_v5 = vmul.f32 %v10840_v60, %v10837_v16  ;;  %v1998_v26 = vmul.f32 %v10379_v7, %v10837_v16  ;;  %v10844_v42 = vld [vmem:[#allocation49_spill] sm:$0xff] }
 0x221   : > { %v2572_v21 = vadd.f32 %v2556_v24, %v2539_v35  ;;  %v2655_v46 = vmul.f32 %v10841_v30, %v7620_v63  ;;  %vm2753_vm7 = vweird.f32 %v4626_v2  ;;  %v1682_v27 = vadd.f32 %v1666_v32, %v1649_v29  ;;  %v10842_v35 = vld [vmem:[#allocation152_spill] sm:$0xff]  ;;  %v2702_v24 = vpop.xlane.xlu0 %2701 }
 0x222   : > { %v2751_v28 = vmul.f32 %v4626_v2, %v2750_v15  ;;  %v1699_v11 = vmul.f32 %v10782_v19, %v10842_v35  ;;  %v1327_v31 = vadd.f32 %v1311_v58, %v1294_v10  ;;  %v1344_v18 = vmul.f32 %v10844_v42, %v10843_v51  ;;  %v10845_v35 = vld [vmem:[#allocation154_spill] sm:$0xff] }
 0x223   : > { %v2605_v33 = vadd.f32 %v2589_v6, %v2572_v21  ;;  %v1573_v15 = vmul.f32 %v10739_v39, %v10843_v51  ;;  %v1556_v20 = vadd.f32 %v1540_v37, %v1523_v56  ;;  %v1785_v6 = vadd.f32 %v1769_v5, %v1752_v9  ;;  %v10847_v56 = vld [vmem:[#allocation50_spill] sm:$0xff] }
 0x224   : > { %v2752_v53 = vadd.f32 %v4626_v2, %v2751_v28  ;;  %v1802_v21 = vmul.f32 %v10797_v54, %v10843_v51  ;;  %v2014_v29 = vadd.f32 %v1998_v26, %v1981_v0  ;;  %v2031_v32 = vmul.f32 %v10635_v43, %v10843_v51 }
 0x225   : > { %v2638_v47 = vadd.f32 %v2622_v61, %v2605_v33  ;;  %v1715_v58 = vadd.f32 %v1699_v11, %v1682_v27  ;;  %v1732_v42 = vmul.f32 %v10633_v1, %v10845_v35  ;;  %v1360_v16 = vadd.f32 %v1344_v18, %v1327_v31  ;;  %v10846_v61 = vld [vmem:[#allocation103_spill] sm:$0xff]  ;;  %v7782_v31 = vld [vmem:[#allocation2 + $0x100] sm:$0xff] }
 0x226   : > { %v7755_v30 = vsel %vm2753_vm7, %v4626_v2, %v2752_v53  ;;  %v1377_v9 = vmul.f32 %v10847_v56, %v10846_v61  ;;  %v10849_v2 = vld [vmem:[#allocation26_spill] sm:$0xff]  ;;  %v1589_v0 = vadd.f32 %v1573_v15, %v1556_v20  ;;  %v1818_v26 = vadd.f32 %v1802_v21, %v1785_v6  ;;  %10852 = vst [vmem:[#allocation77_spill] sm:$0xff] %v7782_v31  ;;  %v10853_v6 = vld [vmem:[#allocation133_spill] sm:$0xff]  ;;  %v10854_v35 = vld [vmem:[#allocation111_spill] sm:$0xff] }
 0x227   : > { %v2671_v28 = vadd.f32 %v2655_v46, %v2638_v47  ;;  %v2755_v10 = vmul.f32 %v7755_v30, %v2702_v24  ;;  %v1606_v47 = vmul.f32 %v10753_v13, %v10846_v61  ;;  %v1835_v33 = vmul.f32 %v10799_v40, %v10846_v61  ;;  %v10851_v20 = vld [vmem:[#allocation58_spill] sm:$0xff] }
 0x228   : > { %v2047_v46 = vadd.f32 %v2031_v32, %v2014_v29  ;;  %v2064_v27 = vmul.f32 %v10638_v4, %v10846_v61  ;;  %v1748_v53 = vadd.f32 %v1732_v42, %v1715_v58  ;;  %v1765_v24 = vmul.f32 %v10840_v60, %v10851_v20  ;;  %v7793_v56 = vld [vmem:[#allocation2 + $0xf0] sm:$0xff] }
 0x229   : > { %v7765_v37 = vadd.f32 %v10740_v34, %v2671_v28  ;;  %v7768_v5 = vsub.f32 %v10849_v2, %v2755_v10  ;;  %v1393_v15 = vadd.f32 %v1377_v9, %v1360_v16  ;;  %v1410_v21 = vmul.f32 %v10813_v25, %v10853_v6  ;;  %v10855_v2 = vld [vmem:[#allocation153_spill] sm:$0xff]  ;;  %v10856_v9 = vld [vmem:[#allocation158_spill] sm:$0xff] }
 0x22a   : > { %v1639_v29 = vmul.f32 %v10713_v57, %v10853_v6  ;;  %v1868_v32 = vmul.f32 %v10612_v52, %v10853_v6  ;;  %v1622_v28 = vadd.f32 %v1606_v47, %v1589_v0  ;;  %v1851_v10 = vadd.f32 %v1835_v33, %v1818_v26  ;;  %v10858_v0 = vld [vmem:[#allocation161_spill] sm:$0xff]  ;;  %v10859_v26 = vld [vmem:[#allocation162_spill] sm:$0xff] }
 0x22b   : > { %10848 = vst [vmem:[#allocation76_spill] sm:$0xff] %v7765_v37  ;;  %v2718_v11 = vsel %vm492_vm0, %v7765_v37, 0.0  ;;  %v2787_v34 = vmul.f32 %v7768_v5, %v7768_v5  ;;  %v2080_v58 = vadd.f32 %v2064_v27, %v2047_v46  ;;  %v2097_v42 = vmul.f32 %v10854_v35, %v10853_v6  ;;  %v10860_v46 = vld [vmem:[#allocation86_spill] sm:$0xff] }
 0x22c   : > { %10850 = vst [vmem:[#allocation45_spill] sm:$0xff] %v7768_v5  ;;  %2719 = vadd.xlane.f32.xlu2 %v2718_v11  ;;  %v1798_v16 = vmul.f32 %v10797_v54, %v10855_v2  ;;  %v1831_v25 = vmul.f32 %v10799_v40, %v10856_v9  ;;  %v10857_v11 = vld [vmem:[#allocation123_spill] sm:$0xff]  ;;  %v666_v20 = vrot.slane %v7782_v31, 5  ;;  %v1930_v47 = vmul.f32 %v10719_v45, %v10858_v0  ;;  %v10863_v61 = vld [vmem:[#allocation62_spill] sm:$0xff] }
 0x22d   : > { %v2803_v18 = vsel %vm492_vm0, %v2787_v34, 0.0  ;;  %v1897_v34 = vmul.f32 %v10718_v62, %v10857_v11  ;;  %v7806_v33 = vmul.f32 %v10721_v49, %v10859_v26  ;;  %v1443_v27 = vmul.f32 %v10734_v41, %v10860_v46  ;;  %v10862_v26 = vld [vmem:[#allocation113_spill] sm:$0xff] }
 0x22e   : > { %2804 = vadd.xlane.f32.xlu0 %v2803_v18  ;;  %v1781_v18 = vadd.f32 %v1765_v24, %v1748_v53  ;;  %v1426_v6 = vadd.f32 %v1410_v21, %v1393_v15  ;;  %v1672_v2 = vmul.f32 %v10714_v36, %v10860_v46  ;;  %v1901_v9 = vmul.f32 %v10718_v62, %v10860_v46  ;;  %v7815_v53 = vpop.xlane.xlu1 %2707  ;;  %v10864_v15 = vld [vmem:[#allocation120_spill] sm:$0xff] }
 0x22f   : > { %v10066_v11 = vrot.slane %v7793_v56, 5  ;;  %10861 = vst [vmem:[#allocation132_spill] sm:$0xff] %v7815_v53  ;;  %v1655_v24 = vadd.f32 %v1639_v29, %v1622_v28  ;;  %v1884_v0 = vadd.f32 %v1868_v32, %v1851_v10  ;;  %v2113_v5 = vadd.f32 %v2097_v42, %v2080_v58  ;;  %v10867_v32 = vld [vmem:[#allocation90_spill] sm:$0xff]  ;;  %v10868_v10 = vld [vmem:[#allocation92_spill] sm:$0xff] }
 0x230   : > { %v2130_v37 = vmul.f32 %v10862_v26, %v10860_v46  ;;  %v1996_v41 = vmul.f32 %v10379_v7, %v10863_v61  ;;  %v7823_v21 = vmul.f32 %v10635_v43, %v10864_v15  ;;  %v739_v29 = vrot.slane %v7782_v31, 6 }
 0x231   : > { %v7829_v62 = vsel %vm672_vm1, %v666_v20, %v10066_v11  ;;  %v1476_v28 = vmul.f32 %v10828_v38, %v10867_v32  ;;  %v1509_v58 = vmul.f32 %v10833_v3, %v10868_v10  ;;  %v1705_v61 = vmul.f32 %v10782_v19, %v10867_v32 }
 0x232   : > { %10866 = vst [vmem:[#allocation134_spill] sm:$0xff] %v7829_v62  ;;  %v1772_v42 = vmul.f32 %v10840_v60, %v7829_v62  ;;  %v1459_v15 = vadd.f32 %v1443_v27, %v1426_v6  ;;  %v1934_v46 = vmul.f32 %v10719_v45, %v10867_v32  ;;  %v10071_v20 = vrot.slane %v7793_v56, 6  ;;  %v10870_v45 = vld [vmem:[#allocation75_spill] sm:$0xff] }
 0x233   : > { %v1814_v11 = vadd.f32 %v1798_v16, %v1781_v18  ;;  %v1688_v53 = vadd.f32 %v1672_v2, %v1655_v24  ;;  %v1917_v36 = vadd.f32 %v1901_v9, %v1884_v0  ;;  %v2146_v57 = vadd.f32 %v2130_v37, %v2113_v5 }
 0x234   : > { %v2163_v38 = vmul.f32 %v10809_v14, %v10867_v32  ;;  %v7849_v3 = vsel %vm743_vm2, %v739_v29, %v10071_v20  ;;  %v810_v27 = vrot.slane %v7782_v31, 7  ;;  %v1864_v19 = vmul.f32 %v10870_v45, %v10612_v52 }
 0x235   : > { %10869 = vst [vmem:[#allocation135_spill] sm:$0xff] %v7849_v3  ;;  %v1847_v6 = vadd.f32 %v1831_v25, %v1814_v11  ;;  %v1738_v16 = vmul.f32 %v10633_v1, %v10868_v10  ;;  %v1788_v37 = vadd.f32 %v1772_v42, %v7658_v48  ;;  %v1805_v5 = vmul.f32 %v10797_v54, %v7849_v3  ;;  %v10871_v48 = vld [vmem:[#allocation121_spill] sm:$0xff] }
 0x236   : > { %v2001_v18 = vmul.f32 %v10379_v7, %v7829_v62  ;;  %v1492_v2 = vadd.f32 %v1476_v28, %v1459_v15  ;;  %v1967_v9 = vmul.f32 %v10721_v49, %v10868_v10  ;;  %v10072_v25 = vrot.slane %v7793_v56, 7 }
 0x237   : > { %v1880_v11 = vadd.f32 %v1864_v19, %v1847_v6  ;;  %v1721_v24 = vadd.f32 %v1705_v61, %v1688_v53  ;;  %v1950_v45 = vadd.f32 %v1934_v46, %v1917_v36  ;;  %v2179_v0 = vadd.f32 %v2163_v38, %v2146_v57  ;;  %v2711_v19 = vpop.xlane.xlu1 %2710 }
 0x238   : > { %v2196_v29 = vmul.f32 %v10816_v22, %v10868_v10  ;;  %v7868_v42 = vmul.f32 %v10638_v4, %v10871_v48  ;;  %v7872_v20 = vmul.f32 %v10862_v26, %v10819_v8  ;;  %v7878_v28 = vsel %vm814_vm3, %v810_v27, %v10072_v25  ;;  %v10887_v25 = vld [vmem:[#allocation124_spill] sm:$0xff] }
 0x239   : > { %10872 = vst [vmem:[#allocation88_spill] sm:$0xff] %v7878_v28  ;;  %v1913_v36 = vadd.f32 %v1897_v34, %v1880_v11  ;;  %v1821_v57 = vadd.f32 %v1805_v5, %v1788_v37  ;;  %v1838_v46 = vmul.f32 %v10799_v40, %v7878_v28  ;;  %v2017_v53 = vadd.f32 %v2001_v18, %v7675_v23  ;;  %v10874_v18 = vld [vmem:[#allocation117_spill] sm:$0xff] }
 0x23a   : > { %v2034_v61 = vmul.f32 %v10635_v43, %v7849_v3  ;;  %v7887_v8 = vmul.f32 %v10809_v14, %v10826_v50  ;;  %v7891_v15 = vmul.f32 %v10816_v22, %v10830_v55  ;;  %v1525_v38 = vadd.f32 %v1509_v58, %v1492_v2 }
 0x23b   : > { %v1946_v27 = vadd.f32 %v1930_v47, %v1913_v36  ;;  %v1754_v34 = vadd.f32 %v1738_v16, %v1721_v24  ;;  %v7893_v6 = vadd.f32 %v1967_v9, %v1950_v45  ;;  %v7895_v37 = vadd.f32 %v2196_v29, %v2179_v0  ;;  %v10876_v9 = vld [vmem:[#allocation60_spill] sm:$0xff]  ;;  %v10878_v0 = vld [vmem:[#allocation118_spill] sm:$0xff]  ;;  %v10881_v36 = vld [vmem:[#allocation119_spill] sm:$0xff] }
 0x23c   : > { %v2758_v23 = vmul.f32 %v7755_v30, %v2711_v19  ;;  %v1871_v5 = vmul.f32 %v10612_v52, %v7793_v56  ;;  %v2067_v50 = vmul.f32 %v10638_v4, %v7878_v28  ;;  %v2100_v55 = vmul.f32 %v10854_v35, %v7793_v56  ;;  %v10877_v45 = vld [vmem:[#allocation108_spill] sm:$0xff]  ;;  %v10880_v19 = vld [vmem:[#allocation85_spill] sm:$0xff] }
 0x23d   : > { %10873 = vst [vmem:[#allocation102_spill] sm:$0xff] %v7895_v37  ;;  %v1979_v58 = vadd.f32 %v7806_v33, %v1946_v27  ;;  %v1854_v47 = vadd.f32 %v1838_v46, %v1821_v57  ;;  %v2050_v16 = vadd.f32 %v2034_v61, %v2017_v53  ;;  %v7907_v2 = vmul.f32 %v10874_v18, %v7562_v17  ;;  %v10883_v17 = vld [vmem:[#allocation95_spill] sm:$0xff] }
 0x23e   : > { %v651_v11 = vrot.slane %v10876_v9, 5  ;;  %v2230_v24 = vmul.f32 %v10874_v18, %v7829_v62  ;;  %v7914_v29 = vmul.f32 %v10878_v0, %v10877_v45  ;;  %v7918_v48 = vmul.f32 %v10878_v0, %v7849_v3  ;;  %v10885_v53 = vld [vmem:[#allocation91_spill] sm:$0xff]  ;;  %v522_v3 = vld [vmem:[%s5271_s0 + $0x78] sm:$0xff] }
 0x23f   : > { %10875 = vst [vmem:[#allocation51_spill] sm:$0xff] %v7907_v2  ;;  %v2012_v33 = vadd.f32 %v1996_v41, %v1979_v58  ;;  %v7922_v57 = vmul.f32 %v10881_v36, %v10880_v19  ;;  %v7925_v46 = vsub.f32 %v10883_v17, %v2758_v23  ;;  %v10886_v61 = vrot.slane %v10885_v53, 5  ;;  %v10889_v41 = vld [vmem:[#allocation125_spill] sm:$0xff] }
 0x240   : > { %10879 = vst [vmem:[#allocation93_spill] sm:$0xff] %v7914_v29  ;;  %v724_v45 = vrot.slane %v10876_v9, 6  ;;  %v7937_v37 = vmul.f32 %v10887_v25, %v7603_v12  ;;  %v7941_v58 = vmul.f32 %v10889_v41, %v7612_v44  ;;  %v10891_v23 = vld [vmem:[#allocation53_spill] sm:$0xff]  ;;  %v10893_v31 = vrot.slane %v10885_v53, 6  ;;  %v10894_v44 = vld [vmem:[#allocation98_spill] sm:$0xff] }
 0x241   : > { %10882 = vst [vmem:[#allocation65_spill] sm:$0xff] %v7922_v57  ;;  %v7931_v27 = vsel %vm672_vm1, %v10886_v61, %v651_v11  ;;  %v7945_v19 = vmul.f32 %v10891_v23, %v7620_v63  ;;  %v7949_v11 = vadd.f32 %v1871_v5, %v1854_v47  ;;  %v2083_v61 = vadd.f32 %v2067_v50, %v2050_v16  ;;  %v10896_v47 = vld [vmem:[#allocation59_spill] sm:$0xff] }
 0x242   : > { %10884 = vst [vmem:[#allocation112_spill] sm:$0xff] %v7925_v46  ;;  %v1542_v17 = vmul.f32 %v10707_v59, %v7931_v27  ;;  %v7955_v12 = vsel %vm743_vm2, %v10893_v31, %v724_v45  ;;  %v2045_v59 = vadd.f32 %v7823_v21, %v2012_v33  ;;  %v2790_v5 = vmul.f32 %v7925_v46, %v7925_v46  ;;  %v10897_v33 = vld [vmem:[#allocation87_spill] sm:$0xff] }
 0x243   : > { %10888 = vst [vmem:[#allocation144_spill] sm:$0xff] %v7937_v37  ;;  %v795_v37 = vrot.slane %v10876_v9, 7  ;;  %v1575_v63 = vmul.f32 %v10739_v39, %v7955_v12  ;;  %v10895_v50 = vrot.slane %v10885_v53, 7  ;;  %v880_v16 = vrot.slane %v10896_v47, 1 }
 0x244   : > { %10890 = vst [vmem:[#allocation32_spill] sm:$0xff] %v7941_v58  ;;  %v2246_v58 = vadd.f32 %v2230_v24, %v10894_v44  ;;  %v1558_v62 = vadd.f32 %v1542_v17, %v1525_v38  ;;  %v951_v38 = vrot.slane %v10896_v47, 2  ;;  %v1022_v24 = vrot.slane %v10896_v47, 3  ;;  %v10902_v47 = vld [vmem:[#allocation96_spill] sm:$0xff] }
 0x245   : > { %10892 = vst [vmem:[#allocation165_spill] sm:$0xff] %v7945_v19  ;;  %v7970_v31 = vsel %vm814_vm3, %v10895_v50, %v795_v37  ;;  %v1641_v45 = vmul.f32 %v10897_v33, %v10876_v9  ;;  %v10898_v53 = vrot.slane %v10876_v9, 1  ;;  %v10899_v17 = vrot.slane %v10876_v9, 2  ;;  %v10903_v33 = vld [vmem:[#allocation132_spill] sm:$0xff] }
 0x246   : > { %539 = vst.msk [vmem:[#allocation2 + $0xf8] sm:$0xff] %vm492_vm0, %v522_v3  ;;  %v1591_v39 = vadd.f32 %v1575_v63, %v1558_v62  ;;  %v1608_v21 = vmul.f32 %v10753_v13, %v7970_v31  ;;  %v2812_v3 = vsel %vm492_vm0, %v2790_v5, 0.0  ;;  %v1771_v62 = vmul.f32 %v10840_v60, %v7931_v27 }
 0x247   : > { %v7984_v37 = vsel %vm885_vm4, %v10898_v53, %v880_v16  ;;  %v7990_v44 = vsel %vm956_vm5, %v10899_v17, %v951_v38  ;;  %v7994_v13 = vadd.f32 %v2100_v55, %v2083_v61  ;;  %2813 = vadd.xlane.f32.xlu2 %v2812_v3  ;;  %v10901_v63 = vrot.slane %v10876_v9, 3  ;;  %v10904_v3 = vld [vmem:[#allocation97_spill] sm:$0xff] }
 0x248   : > { %v1624_v50 = vadd.f32 %v1608_v21, %v1591_v39  ;;  %v1674_v16 = vmul.f32 %v10902_v47, %v7984_v37  ;;  %v2757_v38 = vmul.f32 %v7755_v30, %v10903_v33  ;;  %v1787_v53 = vadd.f32 %v1771_v62, %v1754_v34  ;;  %v10905_v39 = vld [vmem:[#allocation130_spill] sm:$0xff]  ;;  %v10906_v33 = vld [vmem:[#allocation104_spill] sm:$0xff] }
 0x249   : > { %10900 = vst [vmem:[#allocation37_spill] sm:$0xff] %v7994_v13  ;;  %v8000_v5 = vsel %vm1027_vm6, %v10901_v63, %v1022_v24  ;;  %v1804_v17 = vmul.f32 %v10797_v54, %v7955_v12  ;;  %v1837_v55 = vmul.f32 %v10799_v40, %v7970_v31  ;;  %v1707_v46 = vmul.f32 %v10904_v3, %v7990_v44 }
 0x24a   : > { %v1657_v61 = vadd.f32 %v1641_v45, %v1624_v50  ;;  %v2078_v24 = vadd.f32 %v7868_v42, %v2045_v59  ;;  %v2095_v21 = vmul.f32 %v10905_v39, %v10854_v35  ;;  %v1740_v63 = vmul.f32 %v10633_v1, %v8000_v5  ;;  %v10907_v42 = vld [vmem:[#allocation105_spill] sm:$0xff] }
 0x24b   : > { %v1820_v34 = vadd.f32 %v1804_v17, %v1787_v53  ;;  %v1870_v62 = vmul.f32 %v10612_v52, %v10876_v9  ;;  %v2000_v47 = vmul.f32 %v10379_v7, %v7931_v27  ;;  %v1903_v3 = vmul.f32 %v10906_v33, %v7984_v37 }
 0x24c   : > { %v1690_v50 = vadd.f32 %v1674_v16, %v1657_v61  ;;  %v1936_v59 = vmul.f32 %v10907_v42, %v7990_v44  ;;  %v2033_v39 = vmul.f32 %v10635_v43, %v7955_v12  ;;  %v2066_v57 = vmul.f32 %v10638_v4, %v7970_v31 }
 0x24d   : > { %v8021_v45 = vld [vmem:[#allocation2 + $0xf8] sm:$0xff]  ;;  %v1853_v19 = vadd.f32 %v1837_v55, %v1820_v34  ;;  %v2016_v61 = vadd.f32 %v2000_v47, %v7893_v6  ;;  %v2111_v29 = vadd.f32 %v2095_v21, %v2078_v24  ;;  %v10908_v2 = vrot.slane %v7793_v56, 5 }
 0x24e   : > { %v652_v1 = vrot.slane %v8021_v45, 5  ;;  %v725_v53 = vrot.slane %v8021_v45, 6  ;;  %v796_v17 = vrot.slane %v8021_v45, 7  ;;  %v1723_v16 = vadd.f32 %v1707_v46, %v1690_v50 }
 0x24f   : > { %v10910_v13 = vrot.slane %v7793_v56, 6  ;;  %v10912_v6 = vrot.slane %v7793_v56, 7  ;;  %v1886_v24 = vadd.f32 %v1870_v62, %v1853_v19  ;;  %v1969_v50 = vmul.f32 %v10721_v49, %v8000_v5  ;;  %v4610_v62 = vld [vmem:[%s5286_s26 + $0x8] sm:%s8034_s24] }
 0x250   : > { %v8043_v28 = vsel %vm672_vm1, %v10908_v2, %v652_v1  ;;  %v8058_v2 = vadd.f32 %v7918_v48, %v2246_v58  ;;  %v1756_v21 = vadd.f32 %v1740_v63, %v1723_v16  ;;  %v2049_v1 = vadd.f32 %v2033_v39, %v2016_v61  ;;  %v4607_v63 = vld [vmem:[%s5286_s26] sm:%s8034_s24]  ;;  %581 = vst.msk [vmem:[#allocation2 + $0x110] sm:$0xff] %vm492_vm0, %v4610_v62 }
 0x251   : > { %10909 = vst [vmem:[#allocation78_spill] sm:$0xff] %v8043_v28  ;;  %v8049_v55 = vsel %vm743_vm2, %v10910_v13, %v725_v53  ;;  %v8055_v46 = vsel %vm814_vm3, %v10912_v6, %v796_v17  ;;  %v1773_v34 = vmul.f32 %v10840_v60, %v8043_v28  ;;  %v1919_v47 = vadd.f32 %v1903_v3, %v1886_v24  ;;  %v10914_v17 = vld [vmem:[#allocation41_spill] sm:$0xff]  ;;  %v10915_v6 = vld [vmem:[#allocation160_spill] sm:$0xff] }
 0x252   : > { %10911 = vst [vmem:[#allocation143_spill] sm:$0xff] %v8049_v55  ;;  %v1806_v13 = vmul.f32 %v10797_v54, %v8049_v55  ;;  %v2099_v53 = vmul.f32 %v10854_v35, %v10876_v9  ;;  %v8069_v19 = vsub.f32 %v10914_v17, %v2757_v38  ;;  %v1839_v58 = vmul.f32 %v10799_v40, %v8055_v46 }
 0x253   : > { %10913 = vst [vmem:[#allocation146_spill] sm:$0xff] %v8055_v46  ;;  %v1789_v48 = vadd.f32 %v1773_v34, %v1756_v21  ;;  %v2144_v60 = vadd.f32 %v7872_v20, %v2111_v29  ;;  %v1952_v54 = vadd.f32 %v1936_v59, %v1919_v47  ;;  %v2002_v3 = vmul.f32 %v10379_v7, %v8043_v28 }
 0x254   : > { %v2082_v16 = vadd.f32 %v2066_v57, %v2049_v1  ;;  %v2132_v39 = vmul.f32 %v10862_v26, %v7984_v37  ;;  %580 = vst.msk [vmem:[#allocation2 + $0x108] sm:$0xff] %vm492_vm0, %v4607_v63  ;;  %v1872_v61 = vmul.f32 %v10612_v52, %v8021_v45  ;;  %v2227_v20 = vmul.f32 %v10874_v18, %v10915_v6  ;;  %v10921_v6 = vld [vmem:[#allocation122_spill] sm:$0xff] }
 0x255   : > { %v1822_v38 = vadd.f32 %v1806_v13, %v1789_v48  ;;  %v2177_v40 = vadd.f32 %v7887_v8, %v2144_v60  ;;  %v1985_v29 = vadd.f32 %v1969_v50, %v1952_v54  ;;  %v2035_v57 = vmul.f32 %v10635_v43, %v8049_v55  ;;  %v10916_v8 = vld [vmem:[#allocation70_spill] sm:$0xff] }
 0x256   : > { %v2115_v59 = vadd.f32 %v2099_v53, %v2082_v16  ;;  %v2165_v24 = vmul.f32 %v10809_v14, %v7990_v44  ;;  %v2101_v34 = vmul.f32 %v10854_v35, %v8021_v45  ;;  %v2260_v13 = vmul.f32 %v10878_v0, %v10916_v8 }
 0x257   : > { %v1855_v21 = vadd.f32 %v1839_v58, %v1822_v38  ;;  %v2210_v52 = vadd.f32 %v7891_v15, %v2177_v40  ;;  %v2018_v47 = vadd.f32 %v2002_v3, %v1985_v29  ;;  %v2068_v50 = vmul.f32 %v10638_v4, %v8055_v46  ;;  %v10918_v15 = vld [vmem:[#allocation103_spill] sm:$0xff]  ;;  %v4715_v40 = vld [vmem:[#allocation2 + $0xc8] sm:$0xff] }
 0x258   : > { %v2148_v1 = vadd.f32 %v2132_v39, %v2115_v59  ;;  %v2198_v53 = vmul.f32 %v10816_v22, %v8000_v5  ;;  %v8104_v17 = vmul.f32 %v10874_v18, %v7931_v27  ;;  %v2231_v48 = vmul.f32 %v10874_v18, %v8043_v28 }
 0x259   : > { %v2243_v58 = vadd.f32 %v2227_v20, %v2210_v52  ;;  %v2293_v60 = vmul.f32 %v10881_v36, %v10918_v15  ;;  %v2051_v63 = vadd.f32 %v2035_v57, %v2018_v47  ;;  %v8112_v54 = vmul.f32 %v10878_v0, %v7955_v12  ;;  %v10922_v57 = vld [vmem:[#allocation86_spill] sm:$0xff] }
 0x25a   : > { %10917 = vst [vmem:[#allocation79_spill] sm:$0xff] %v8104_v17  ;;  %v2181_v62 = vadd.f32 %v2165_v24, %v2148_v1  ;;  %v2264_v3 = vmul.f32 %v10878_v0, %v8049_v55  ;;  %v8116_v16 = vadd.f32 %v1872_v61, %v1855_v21  ;;  %v8120_v38 = vmul.f32 %v10881_v36, %v7970_v31  ;;  %v4616_v17 = vld [vmem:[%s5286_s26 + $0x18] sm:%s8034_s24] }
 0x25b   : > { %10919 = vst [vmem:[#allocation80_spill] sm:$0xff] %v8112_v54  ;;  %v2276_v39 = vadd.f32 %v2260_v13, %v2243_v58  ;;  %v2326_v20 = vmul.f32 %v4715_v40, %v10921_v6  ;;  %v2359_v59 = vmul.f32 %v10887_v25, %v10922_v57  ;;  %v8127_v24 = vmul.f32 %v10887_v25, %v7984_v37  ;;  %v10926_v58 = vld [vmem:[#allocation127_spill] sm:$0xff]  ;;  %v4613_v40 = vld [vmem:[%s5286_s26 + $0x10] sm:%s8034_s24] }
 0x25c   : > { %10920 = vst [vmem:[#allocation138_spill] sm:$0xff] %v8120_v38  ;;  %v2214_v29 = vadd.f32 %v2198_v53, %v2181_v62  ;;  %v2392_v61 = vmul.f32 %v10889_v41, %v10867_v32  ;;  %v2084_v21 = vadd.f32 %v2068_v50, %v2051_v63  ;;  %v8133_v8 = vmul.f32 %v10889_v41, %v7990_v44  ;;  %v10927_v32 = vld [vmem:[#allocation128_spill] sm:$0xff] }
 0x25d   : > { %10923 = vst [vmem:[#allocation131_spill] sm:$0xff] %v8127_v24  ;;  %v2309_v52 = vadd.f32 %v2293_v60, %v2276_v39  ;;  %v2425_v13 = vmul.f32 %v10891_v23, %v10868_v10  ;;  %v8139_v53 = vmul.f32 %v10891_v23, %v8000_v5  ;;  %v2458_v15 = vmul.f32 %v10926_v58, %v7931_v27  ;;  %v8145_v60 = vld [vmem:[#allocation2 + $0x108] sm:$0xff]  ;;  %v10930_v57 = vld [vmem:[#allocation28_spill] sm:$0xff]  ;;  %v10931_v27 = vld [vmem:[#allocation30_spill] sm:$0xff] }
 0x25e   : > { %10924 = vst [vmem:[#allocation89_spill] sm:$0xff] %v8133_v8  ;;  %v2714_v47 = vpop.xlane.xlu2 %2713  ;;  %v2247_v1 = vadd.f32 %v2231_v48, %v2214_v29  ;;  %v2491_v50 = vmul.f32 %v10927_v32, %v7955_v12  ;;  %v10928_v39 = vld [vmem:[#allocation129_spill] sm:$0xff]  ;;  %v8152_v48 = vld [vmem:[#allocation2 + $0x118] sm:$0xff]  ;;  %v8154_v29 = vld [vmem:[#allocation2 + $0x130] sm:$0xff]  ;;  %v8160_v8 = vmul.f32 %v10931_v27, %v7984_v37  ;;  %v10083_v37 = vrot.slane %v8145_v60, 5 }
 0x25f   : > { %10925 = vst [vmem:[#allocation94_spill] sm:$0xff] %v8139_v53  ;;  %v2759_v63 = vmul.f32 %v7755_v30, %v2714_v47  ;;  %v2342_v62 = vadd.f32 %v2326_v20, %v2309_v52  ;;  %v2524_v10 = vmul.f32 %v10928_v39, %v7970_v31  ;;  %v2557_v53 = vmul.f32 %v10930_v57, %v10876_v9  ;;  %v10933_v31 = vld [vmem:[#allocation54_spill] sm:$0xff]  ;;  %v10934_v24 = vld [vmem:[#allocation31_spill] sm:$0xff] }
 0x260   : > { %10929 = vst [vmem:[#allocation126_spill] sm:$0xff] %v8154_v29  ;;  %v667_v12 = vrot.slane %v8152_v48, 5  ;;  %v8164_v20 = vadd.f32 %v2101_v34, %v2084_v21  ;;  %v8168_v47 = vmul.f32 %v10933_v31, %v7990_v44  ;;  %v8172_v9 = vmul.f32 %v10934_v24, %v8000_v5  ;;  %v10938_v44 = vld [vmem:[#allocation81_spill] sm:$0xff] }
 0x261   : > { %582 = vst.msk [vmem:[#allocation2 + $0x120] sm:$0xff] %vm492_vm0, %v4613_v40  ;;  %v2375_v52 = vadd.f32 %v2359_v59, %v2342_v62  ;;  %v8174_v55 = vadd.f32 %v2264_v3, %v2247_v1  ;;  %v668_v40 = vrot.slane %v8154_v29, 5  ;;  %v740_v34 = vrot.slane %v8152_v48, 6  ;;  %v10936_v59 = vld [vmem:[#allocation159_spill] sm:$0xff] }
 0x262   : > { %10932 = vst [vmem:[#allocation82_spill] sm:$0xff] %v8164_v20  ;;  %v8180_v62 = vsub.f32 %v10936_v59, %v2759_v63  ;;  %v811_v38 = vrot.slane %v8152_v48, 7  ;;  %v8189_v3 = vsel %vm672_vm1, %v667_v12, %v10083_v37  ;;  %v853_v1 = vrot.slane %v7793_v56, 1  ;;  %v8195_v59 = vld [vmem:[#allocation2 + $0x110] sm:$0xff] }
 0x263   : > { %10935 = vst [vmem:[#allocation64_spill] sm:$0xff] %v8174_v55  ;;  %v2705_v21 = vpop.xlane.xlu0 %2704  ;;  %v2408_v28 = vadd.f32 %v2392_v61, %v2375_v52  ;;  %v854_v54 = vrot.slane %v8145_v60, 1  ;;  %v741_v61 = vrot.slane %v8154_v29, 6  ;;  %v10086_v52 = vrot.slane %v8145_v60, 7 }
 0x264   : > { %10937 = vst [vmem:[#allocation139_spill] sm:$0xff] %v8180_v62  ;;  %v2756_v5 = vmul.f32 %v7755_v30, %v2705_v21  ;;  %v924_v21 = vrot.slane %v7793_v56, 2  ;;  %v10940_v12 = vrot.slane %v8145_v60, 6  ;;  %v10094_v46 = vrot.slane %v8195_v59, 2 }
 0x265   : > { %v2441_v63 = vadd.f32 %v2425_v13, %v2408_v28  ;;  %583 = vst.msk [vmem:[#allocation2 + $0x128] sm:$0xff] %vm492_vm0, %v4616_v17  ;;  %v10088_v28 = vrot.slane %v8021_v45, 1  ;;  %v10091_v13 = vrot.slane %v8195_v59, 1  ;;  %v8216_v55 = vsel %vm814_vm3, %v811_v38, %v10086_v52 }
 0x266   : > { %v8202_v62 = vsub.f32 %v10938_v44, %v2756_v5  ;;  %v8208_v37 = vsel %vm743_vm2, %v740_v34, %v10940_v12  ;;  %v10092_v17 = vrot.slane %v8021_v45, 2  ;;  %v995_v44 = vrot.slane %v7793_v56, 3 }
 0x267   : > { %v2474_v29 = vadd.f32 %v2458_v15, %v2441_v63  ;;  %v8228_v15 = vsel %vm885_vm4, %v853_v1, %v10088_v28  ;;  %v8234_v38 = vsel %vm885_vm4, %v854_v54, %v10091_v13  ;;  %v925_v63 = vrot.slane %v8145_v60, 2 }
 0x268   : > { %10939 = vst [vmem:[#allocation140_spill] sm:$0xff] %v8202_v62  ;;  %v2788_v5 = vmul.f32 %v8202_v62, %v8202_v62  ;;  %v8222_v34 = vld [vmem:[#allocation2 + $0x120] sm:$0xff]  ;;  %v8241_v52 = vsel %vm956_vm5, %v924_v21, %v10092_v17  ;;  %v10093_v62 = vrot.slane %v8021_v45, 3  ;;  %v1904_v1 = vmul.f32 %v10906_v33, %v8228_v15 }
 0x269   : > { %v2507_v12 = vadd.f32 %v2491_v50, %v2474_v29  ;;  %v996_v54 = vrot.slane %v8145_v60, 3  ;;  %v1937_v50 = vmul.f32 %v10907_v42, %v8241_v52  ;;  %v8264_v20 = vsel %vm956_vm5, %v925_v63, %v10094_v46  ;;  %v10943_v46 = vld [vmem:[#allocation37_spill] sm:$0xff] }
 0x26a   : > { %v2806_v28 = vsel %vm492_vm0, %v2788_v5, 0.0  ;;  %v8256_v21 = vsel %vm1027_vm6, %v995_v44, %v10093_v62  ;;  %v1920_v17 = vadd.f32 %v1904_v1, %v7949_v11  ;;  %v10095_v5 = vrot.slane %v8222_v34, 6 }
 0x26b   : > { %v2540_v29 = vadd.f32 %v2524_v10, %v2507_v12  ;;  %2807 = vadd.xlane.f32.xlu1 %v2806_v28  ;;  %v1970_v28 = vmul.f32 %v10721_v49, %v8256_v21  ;;  %v2003_v44 = vmul.f32 %v10379_v7, %v8189_v3  ;;  %v2133_v11 = vmul.f32 %v10862_v26, %v8228_v15  ;;  %v8324_v49 = vld [vmem:[%s10328_s28] ss:$0 sm:$0xff] }
 0x26c   : > { %v1953_v13 = vadd.f32 %v1937_v50, %v1920_v17  ;;  %v10941_v1 = vrot.slane %v8222_v34, 5  ;;  %v8281_v63 = vsel %vm743_vm2, %v741_v61, %v10095_v5  ;;  %v2166_v17 = vmul.f32 %v10809_v14, %v8241_v52 }
 0x26d   : > { %v2573_v12 = vadd.f32 %v2557_v53, %v2540_v29  ;;  %10942 = vst [vmem:[#allocation147_spill] sm:$0xff] %v8281_v63  ;;  %v2036_v53 = vmul.f32 %v10635_v43, %v8208_v37  ;;  %v2149_v10 = vadd.f32 %v2133_v11, %v10943_v46  ;;  %v2069_v5 = vmul.f32 %v10638_v4, %v8216_v55 }
 0x26e   : > { %v699_v62 = vsel %vm672_vm1, %v668_v40, %v10941_v1  ;;  %v1986_v29 = vadd.f32 %v1970_v28, %v1953_v13  ;;  %v2199_v40 = vmul.f32 %v10816_v22, %v8256_v21  ;;  %v10944_v1 = vrot.slane %v8195_v59, 3 }
 0x26f   : > { %v2606_v50 = vadd.f32 %v8160_v8, %v2573_v12  ;;  %v2102_v43 = vmul.f32 %v10854_v35, %v8145_v60  ;;  %v2232_v8 = vmul.f32 %v10874_v18, %v8189_v3  ;;  %v2182_v28 = vadd.f32 %v2166_v17, %v2149_v10  ;;  %v10945_v12 = vld [vmem:[#allocation88_spill] sm:$0xff] }
 0x270   : > { %v1053_v61 = vsel %vm1027_vm6, %v996_v54, %v10944_v1  ;;  %v2019_v46 = vadd.f32 %v2003_v44, %v1986_v29  ;;  %v2296_v11 = vmul.f32 %v10881_v36, %v10945_v12  ;;  %v2135_v7 = vmul.f32 %v10862_v26, %v8234_v38 }
 0x271   : > { %v2639_v13 = vadd.f32 %v8168_v47, %v2606_v50  ;;  %v2265_v54 = vmul.f32 %v10878_v0, %v8208_v37  ;;  %v2329_v1 = vmul.f32 %v10921_v6, %v7793_v56  ;;  %v2362_v35 = vmul.f32 %v10887_v25, %v8228_v15 }
 0x272   : > { %v2052_v47 = vadd.f32 %v2036_v53, %v2019_v46  ;;  %v2215_v44 = vadd.f32 %v2199_v40, %v2182_v28  ;;  %v2312_v10 = vadd.f32 %v2296_v11, %v8058_v2  ;;  %v2168_v17 = vmul.f32 %v10809_v14, %v8264_v20 }
 0x273   : > { %v2672_v4 = vadd.f32 %v8172_v9, %v2639_v13  ;;  %v2201_v50 = vmul.f32 %v10816_v22, %v1053_v61  ;;  %v2298_v29 = vmul.f32 %v10881_v36, %v8216_v55  ;;  %v2395_v26 = vmul.f32 %v10889_v41, %v8241_v52 }
 0x274   : > { %v2085_v2 = vadd.f32 %v2069_v5, %v2052_v47  ;;  %v2248_v53 = vadd.f32 %v2232_v8, %v2215_v44  ;;  %v2345_v40 = vadd.f32 %v2329_v1, %v2312_v10  ;;  %v2234_v13 = vmul.f32 %v10874_v18, %v699_v62 }
 0x275   : > { %v8327_v9 = vadd.f32 %v8324_v49, %v2672_v4  ;;  %v2267_v46 = vmul.f32 %v10878_v0, %v8281_v63  ;;  %v2331_v28 = vmul.f32 %v10921_v6, %v8145_v60  ;;  %v2428_v11 = vmul.f32 %v10891_v23, %v8256_v21 }
 0x276   : > { %v2118_v22 = vadd.f32 %v2102_v43, %v2085_v2  ;;  %v2281_v4 = vadd.f32 %v2265_v54, %v2248_v53  ;;  %v2378_v14 = vadd.f32 %v2362_v35, %v2345_v40  ;;  %v2364_v5 = vmul.f32 %v10887_v25, %v8234_v38  ;;  %v10947_v54 = vld [vmem:[#allocation69_spill] sm:$0xff]  ;;  %v10948_v2 = vld [vmem:[#allocation51_spill] sm:$0xff] }
 0x277   : > { %10946 = vst [vmem:[#allocation156_spill] sm:$0xff] %v8327_v9  ;;  %v2721_v36 = vsel %vm492_vm0, %v8327_v9, 0.0  ;;  %v2397_v8 = vmul.f32 %v10889_v41, %v8264_v20  ;;  %v2430_v1 = vmul.f32 %v10891_v23, %v1053_v61  ;;  %v2461_v47 = vmul.f32 %v10926_v58, %v8189_v3 }
 0x278   : > { %2722 = vadd.xlane.f32.xlu0 %v2721_v36  ;;  %v2151_v44 = vadd.f32 %v2135_v7, %v2118_v22  ;;  %v2314_v10 = vadd.f32 %v2298_v29, %v2281_v4  ;;  %v2411_v63 = vadd.f32 %v2395_v26, %v2378_v14  ;;  %v2463_v9 = vmul.f32 %v10926_v58, %v699_v62  ;;  %v4717_v62 = vld [vmem:[#allocation2 + $0xd8] sm:$0xff] }
 0x279   : > { %v2494_v43 = vmul.f32 %v10927_v32, %v8208_v37  ;;  %v2527_v35 = vmul.f32 %v10928_v39, %v8216_v55  ;;  %v2560_v36 = vmul.f32 %v10930_v57, %v8145_v60  ;;  %v2244_v53 = vadd.f32 %v10948_v2, %v10947_v54  ;;  %v10949_v37 = vld [vmem:[#allocation93_spill] sm:$0xff] }
 0x27a   : > { %v2184_v40 = vadd.f32 %v2168_v17, %v2151_v44  ;;  %v2347_v23 = vadd.f32 %v2331_v28, %v2314_v10  ;;  %v2444_v3 = vadd.f32 %v2428_v11, %v2411_v63  ;;  %v2593_v7 = vmul.f32 %v10931_v27, %v8234_v38  ;;  %v8362_v63 = vld [vmem:[#allocation2 + $0x128] sm:$0xff]  ;;  %v10951_v44 = vld [vmem:[#allocation134_spill] sm:$0xff] }
 0x27b   : > { %v2626_v22 = vmul.f32 %v10933_v31, %v8264_v20  ;;  %v2659_v26 = vmul.f32 %v10934_v24, %v1053_v61  ;;  %v2277_v55 = vadd.f32 %v10949_v37, %v2244_v53  ;;  %v2327_v29 = vmul.f32 %v4717_v62, %v10921_v6  ;;  %v10950_v11 = vld [vmem:[#allocation65_spill] sm:$0xff]  ;;  %v10952_v20 = vld [vmem:[#allocation135_spill] sm:$0xff]  ;;  %v10953_v53 = vld [vmem:[#allocation74_spill] sm:$0xff] }
 0x27c   : > { %v2717_v14 = vpop.xlane.xlu2 %2716  ;;  %v2217_v54 = vadd.f32 %v2201_v50, %v2184_v40  ;;  %v2380_v17 = vadd.f32 %v2364_v5, %v2347_v23  ;;  %v2477_v28 = vadd.f32 %v2461_v47, %v2444_v3  ;;  %v2459_v10 = vmul.f32 %v10926_v58, %v10951_v44  ;;  %v10955_v44 = vld [vmem:[#allocation144_spill] sm:$0xff] }
 0x27d   : > { %v2760_v4 = vmul.f32 %v7755_v30, %v2717_v14  ;;  %v2310_v38 = vadd.f32 %v10950_v11, %v2277_v55  ;;  %v2492_v61 = vmul.f32 %v10927_v32, %v10952_v20  ;;  %v2789_v2 = vmul.f32 %v8069_v19, %v8069_v19 }
 0x27e   : > { %v2413_v14 = vadd.f32 %v2397_v8, %v2380_v17  ;;  %v2510_v50 = vadd.f32 %v2494_v43, %v2477_v28  ;;  %v653_v23 = vrot.slane %v8195_v59, 5  ;;  %v2250_v5 = vadd.f32 %v2234_v13, %v2217_v54 }
 0x27f   : > { %v8372_v37 = vsub.f32 %v10953_v53, %v2760_v4  ;;  %v2343_v47 = vadd.f32 %v2327_v29, %v2310_v38  ;;  %v2809_v40 = vsel %vm492_vm0, %v2789_v2, 0.0  ;;  %v654_v3 = vrot.slane %v8362_v63, 5  ;;  %v10959_v53 = vld [vmem:[#allocation77_spill] sm:$0xff] }
 0x280   : > { %v2446_v55 = vadd.f32 %v2430_v1, %v2413_v14  ;;  %v2543_v62 = vadd.f32 %v2527_v35, %v2510_v50  ;;  %v2525_v11 = vmul.f32 %v10928_v39, %v10945_v12  ;;  %2810 = vadd.xlane.f32.xlu1 %v2809_v40  ;;  %v2558_v43 = vmul.f32 %v10930_v57, %v7793_v56 }
 0x281   : > { %10954 = vst [vmem:[#allocation29_spill] sm:$0xff] %v8372_v37  ;;  %v2792_v4 = vmul.f32 %v8372_v37, %v8372_v37  ;;  %v2376_v8 = vadd.f32 %v10955_v44, %v2343_v47  ;;  %v2591_v13 = vmul.f32 %v10931_v27, %v8228_v15  ;;  %v8388_v29 = vmul.f32 %v10933_v31, %v8241_v52  ;;  %v10957_v15 = vld [vmem:[#allocation32_spill] sm:$0xff] }
 0x282   : > { %v2576_v1 = vadd.f32 %v2560_v36, %v2543_v62  ;;  %v8392_v12 = vmul.f32 %v10934_v24, %v8256_v21  ;;  %v10956_v35 = vrot.slane %v8145_v60, 5  ;;  %v726_v56 = vrot.slane %v8195_v59, 6 }
 0x283   : > { %v8401_v17 = vadd.f32 %v2267_v46, %v2250_v5  ;;  %v2409_v28 = vadd.f32 %v10957_v15, %v2376_v8  ;;  %v10958_v52 = vrot.slane %v8222_v34, 5  ;;  %v727_v21 = vrot.slane %v8362_v63, 6  ;;  %v10960_v46 = vld [vmem:[#allocation165_spill] sm:$0xff] }
 0x284   : > { %v8398_v54 = vsel %vm672_vm1, %v10956_v35, %v653_v23  ;;  %v8411_v38 = vadd.f32 %v2463_v9, %v2446_v55  ;;  %v2609_v20 = vadd.f32 %v2593_v7, %v2576_v1  ;;  %v8414_v2 = vsel %vm492_vm0, %v2792_v4, 0.0 }
 0x285   : > { %v8408_v36 = vsel %vm672_vm1, %v10958_v52, %v654_v3  ;;  %v881_v14 = vrot.slane %v10959_v53, 1  ;;  %v2442_v50 = vadd.f32 %v10960_v46, %v2409_v28  ;;  %v10108_v23 = vrot.slane %v8222_v34, 7  ;;  %v4619_v46 = vld [vmem:[%s5286_s26 + $0x20] sm:%s8034_s24] }
 0x286   : > { %v797_v5 = vrot.slane %v8195_v59, 7  ;;  %v952_v47 = vrot.slane %v10959_v53, 2  ;;  %v2642_v40 = vadd.f32 %v2626_v22, %v2609_v20  ;;  %v10961_v3 = vrot.slane %v8145_v60, 6  ;;  %584 = vst.msk [vmem:[#allocation2 + $0x138] sm:$0xff] %vm492_vm0, %v4619_v46 }
 0x287   : > { %v798_v7 = vrot.slane %v8362_v63, 7  ;;  %v10962_v55 = vrot.slane %v8021_v45, 1  ;;  %v2475_v4 = vadd.f32 %v2459_v10, %v2442_v50  ;;  %v882_v22 = vrot.slane %v8152_v48, 1 }
 0x288   : > { %v8425_v9 = vsel %vm743_vm2, %v10961_v3, %v726_v56  ;;  %v10963_v44 = vrot.slane %v8021_v45, 2  ;;  %v1023_v1 = vrot.slane %v10959_v53, 3  ;;  %v2675_v35 = vadd.f32 %v2659_v26, %v2642_v40 }
 0x289   : > { %v8432_v62 = vsel %vm885_vm4, %v10962_v55, %v881_v14  ;;  %v10964_v56 = vrot.slane %v8222_v34, 6  ;;  %v2508_v52 = vadd.f32 %v2492_v61, %v2475_v4  ;;  %v10965_v20 = vrot.slane %v8145_v60, 7  ;;  %v10967_v61 = vld [vmem:[#allocation106_spill] sm:$0xff] }
 0x28a   : > { %v8439_v8 = vsel %vm956_vm5, %v10963_v44, %v952_v47  ;;  %v1905_v10 = vmul.f32 %v10906_v33, %v8432_v62  ;;  %v953_v26 = vrot.slane %v8152_v48, 2  ;;  %v10966_v53 = vrot.slane %v8021_v45, 3  ;;  %v4622_v33 = vld [vmem:[%s5286_s26 + $0x28] sm:%s8034_s24]  ;;  %s11007_s24 = smov %s11006_s17  ;;  %s4119_s26 = scalar_lea.sflag [#allocation6], %s5265_s18 }
 0x28b   : > { %v8446_v15 = vsel %vm743_vm2, %v10964_v56, %v727_v21  ;;  %v1938_v28 = vmul.f32 %v10907_v42, %v8439_v8  ;;  %v8456_v14 = vsel %vm814_vm3, %v10965_v20, %v797_v5  ;;  %v8470_v50 = vadd.f32 %v8324_v49, %v2675_v35  ;;  %585 = vst.msk [vmem:[#allocation2 + $0x140] sm:$0xff] %vm492_vm0, %v4622_v33  ;;  %v10970_v44 = vld [vmem:[#allocation107_spill] sm:$0xff] }
 0x28c   : > { %v8463_v21 = vsel %vm1027_vm6, %v10966_v53, %v1023_v1  ;;  %v1024_v42 = vrot.slane %v8152_v48, 3  ;;  %v1921_v60 = vadd.f32 %v1905_v10, %v8116_v16  ;;  %v2541_v47 = vadd.f32 %v2525_v11, %v2508_v52  ;;  %v10969_v16 = vld [vmem:[#allocation113_spill] sm:$0xff]  ;;  %v10973_v52 = vld [vmem:[#allocation82_spill] sm:$0xff]  ;;  %v10974_v53 = vld [vmem:[#allocation115_spill] sm:$0xff] }
 0x28d   : > { %v1971_v5 = vmul.f32 %v10967_v61, %v8463_v21  ;;  %v8481_v40 = vsel %vm814_vm3, %v10108_v23, %v798_v7  ;;  %v10968_v3 = vrot.slane %v8195_v59, 1  ;;  %v2134_v48 = vmul.f32 %v10969_v16, %v8432_v62  ;;  %v10971_v7 = vld [vmem:[#allocation114_spill] sm:$0xff]  ;;  %v10976_v61 = vld [vmem:[#allocation109_spill] sm:$0xff] }
 0x28e   : > { %v2730_v11 = vsel %vm492_vm0, %v8470_v50, 0.0  ;;  %v1954_v4 = vadd.f32 %v1938_v28, %v1921_v60  ;;  %v2004_v1 = vmul.f32 %v10970_v44, %v8398_v54  ;;  %v2167_v35 = vmul.f32 %v10971_v7, %v8439_v8 }
 0x28f   : > { %v8487_v55 = vsel %vm885_vm4, %v10968_v3, %v882_v22  ;;  %2731 = vadd.xlane.f32.xlu2 %v2730_v11  ;;  %v2574_v56 = vadd.f32 %v2558_v43, %v2541_v47  ;;  %v10972_v22 = vrot.slane %v8195_v59, 2  ;;  %v2150_v20 = vadd.f32 %v2134_v48, %v10973_v52  ;;  %v10977_v47 = vld [vmem:[#allocation110_spill] sm:$0xff] }
 0x290   : > { %v2200_v46 = vmul.f32 %v10974_v53, %v8463_v21  ;;  %v10975_v28 = vrot.slane %v8195_v59, 3  ;;  %v1987_v60 = vadd.f32 %v1971_v5, %v1954_v4  ;;  %v2037_v43 = vmul.f32 %v10976_v61, %v8425_v9  ;;  %v10979_v5 = vld [vmem:[#allocation146_spill] sm:$0xff]  ;;  %v10980_v4 = vld [vmem:[#allocation119_spill] sm:$0xff] }
 0x291   : > { %v8502_v10 = vsel %vm956_vm5, %v10972_v22, %v953_v26  ;;  %v2070_v3 = vmul.f32 %v10977_v47, %v8456_v14  ;;  %v2607_v11 = vadd.f32 %v2591_v13, %v2574_v56  ;;  %v10978_v26 = vld [vmem:[#allocation111_spill] sm:$0xff]  ;;  %v2183_v48 = vadd.f32 %v2167_v35, %v2150_v20 }
 0x292   : > { %v1039_v33 = vsel %vm1027_vm6, %v10975_v28, %v1024_v42  ;;  %v2103_v44 = vmul.f32 %v10978_v26, %v8195_v59  ;;  %v2233_v22 = vmul.f32 %v10874_v18, %v8398_v54  ;;  %v2020_v52 = vadd.f32 %v2004_v1, %v1987_v60  ;;  %v10981_v60 = vld [vmem:[#allocation64_spill] sm:$0xff] }
 0x293   : > { %v2136_v23 = vmul.f32 %v10969_v16, %v8487_v55  ;;  %v2169_v42 = vmul.f32 %v10971_v7, %v8502_v10  ;;  %v2297_v28 = vmul.f32 %v10980_v4, %v10979_v5  ;;  %v2640_v61 = vadd.f32 %v8388_v29, %v2607_v11 }
 0x294   : > { %v2216_v13 = vadd.f32 %v2200_v46, %v2183_v48  ;;  %v2266_v56 = vmul.f32 %v10878_v0, %v8425_v9  ;;  %v2330_v35 = vmul.f32 %v10921_v6, %v8021_v45  ;;  %v2053_v20 = vadd.f32 %v2037_v43, %v2020_v52 }
 0x295   : > { %v2202_v1 = vmul.f32 %v10974_v53, %v1039_v33  ;;  %v2313_v16 = vadd.f32 %v2297_v28, %v10981_v60  ;;  %v2363_v7 = vmul.f32 %v10887_v25, %v8432_v62  ;;  %v2673_v47 = vadd.f32 %v8392_v12, %v2640_v61  ;;  %v10983_v61 = vld [vmem:[#allocation53_spill] sm:$0xff] }
 0x296   : > { %v2235_v29 = vmul.f32 %v10874_v18, %v8408_v36  ;;  %v2249_v46 = vadd.f32 %v2233_v22, %v2216_v13  ;;  %v2299_v11 = vmul.f32 %v10980_v4, %v8456_v14  ;;  %v2086_v26 = vadd.f32 %v2070_v3, %v2053_v20 }
 0x297   : > { %v2268_v43 = vmul.f32 %v10878_v0, %v8446_v15  ;;  %v2346_v48 = vadd.f32 %v2330_v35, %v2313_v16  ;;  %v2396_v53 = vmul.f32 %v10889_v41, %v8439_v8  ;;  %v8544_v52 = vadd.f32 %v8324_v49, %v2673_v47  ;;  %2819 = vadd.xlane.f32.xlu2 %v8414_v2 }
 0x298   : > { %v2282_v12 = vadd.f32 %v2266_v56, %v2249_v46  ;;  %v8549_v18 = vmul.f32 %v10980_v4, %v8481_v40  ;;  %v2332_v3 = vmul.f32 %v10921_v6, %v8195_v59  ;;  %v2119_v22 = vadd.f32 %v2103_v44, %v2086_v26  ;;  %v10984_v26 = vld [vmem:[#allocation102_spill] sm:$0xff] }
 0x299   : > { %10982 = vst [vmem:[#allocation46_spill] sm:$0xff] %v8544_v52  ;;  %v8555_v0 = vmul.f32 %v10921_v6, %v8362_v63  ;;  %v2379_v28 = vadd.f32 %v2363_v7, %v2346_v48  ;;  %v2429_v13 = vmul.f32 %v10983_v61, %v8463_v21  ;;  %v2724_v2 = vsel %vm492_vm0, %v8544_v52, 0.0  ;;  %v10985_v48 = vld [vmem:[#allocation79_spill] sm:$0xff] }
 0x29a   : > { %v2315_v56 = vadd.f32 %v2299_v11, %v2282_v12  ;;  %v2365_v35 = vmul.f32 %v10887_v25, %v8487_v55  ;;  %v2398_v20 = vmul.f32 %v10889_v41, %v8502_v10  ;;  %2725 = vadd.xlane.f32.xlu0 %v2724_v2  ;;  %v2152_v44 = vadd.f32 %v2136_v23, %v2119_v22 }
 0x29b   : > { %v2412_v60 = vadd.f32 %v2396_v53, %v2379_v28  ;;  %v2431_v16 = vmul.f32 %v10983_v61, %v1039_v33  ;;  %v2462_v7 = vmul.f32 %v10926_v58, %v8398_v54  ;;  %v2464_v46 = vmul.f32 %v10926_v58, %v8408_v36  ;;  %v4718_v28 = vld [vmem:[#allocation2 + $0xe0] sm:$0xff] }
 0x29c   : > { %v2348_v47 = vadd.f32 %v2332_v3, %v2315_v56  ;;  %v2495_v11 = vmul.f32 %v10927_v32, %v8425_v9  ;;  %v2245_v12 = vadd.f32 %v10985_v48, %v10984_v26  ;;  %v2185_v37 = vadd.f32 %v2169_v42, %v2152_v44  ;;  %v10986_v3 = vld [vmem:[#allocation80_spill] sm:$0xff]  ;;  %v10989_v26 = vld [vmem:[#allocation143_spill] sm:$0xff] }
 0x29d   : > { %v2445_v52 = vadd.f32 %v2429_v13, %v2412_v60  ;;  %v2528_v23 = vmul.f32 %v10928_v39, %v8456_v14  ;;  %v2561_v53 = vmul.f32 %v10930_v57, %v8195_v59  ;;  %v2594_v54 = vmul.f32 %v10931_v27, %v8487_v55  ;;  %v8585_v14 = vld [vmem:[#allocation2 + $0x148] sm:$0xff] }
 0x29e   : > { %v2381_v22 = vadd.f32 %v2365_v35, %v2348_v47  ;;  %v2278_v36 = vadd.f32 %v10986_v3, %v2245_v12  ;;  %v2328_v9 = vmul.f32 %v4718_v28, %v10921_v6  ;;  %v2218_v2 = vadd.f32 %v2202_v1, %v2185_v37  ;;  %v10987_v35 = vld [vmem:[#allocation138_spill] sm:$0xff]  ;;  %v10990_v3 = vld [vmem:[#allocation76_spill] sm:$0xff] }
 0x29f   : > { %v2478_v56 = vadd.f32 %v2462_v7, %v2445_v52  ;;  %v2627_v42 = vmul.f32 %v10933_v31, %v8502_v10  ;;  %v2660_v13 = vmul.f32 %v10934_v24, %v1039_v33  ;;  %v2720_v44 = vpop.xlane.xlu2 %2719  ;;  %v10988_v47 = vld [vmem:[#allocation78_spill] sm:$0xff]  ;;  %v2493_v48 = vmul.f32 %v10927_v32, %v10989_v26  ;;  %v8595_v33 = vld [vmem:[#allocation2 + $0x138] sm:$0xff] }
 0x2a0   : > { %v2414_v59 = vadd.f32 %v2398_v20, %v2381_v22  ;;  %v2311_v60 = vadd.f32 %v10987_v35, %v2278_v36  ;;  %v2460_v55 = vmul.f32 %v10926_v58, %v10988_v47  ;;  %v2761_v37 = vmul.f32 %v7755_v30, %v2720_v44  ;;  %v10991_v44 = vld [vmem:[#allocation126_spill] sm:$0xff] }
 0x2a1   : > { %v2251_v1 = vadd.f32 %v2235_v29, %v2218_v2  ;;  %v2511_v52 = vadd.f32 %v2495_v11, %v2478_v56  ;;  %v2526_v10 = vmul.f32 %v10928_v39, %v10979_v5  ;;  %v2559_v20 = vmul.f32 %v10930_v57, %v8021_v45  ;;  %v10992_v11 = vld [vmem:[#allocation131_spill] sm:$0xff] }
 0x2a2   : > { %v2447_v7 = vadd.f32 %v2431_v16, %v2414_v59  ;;  %v2344_v12 = vadd.f32 %v2328_v9, %v2311_v60  ;;  %v669_v22 = vrot.slane %v8585_v14, 5  ;;  %v8601_v36 = vsub.f32 %v10990_v3, %v2761_v37  ;;  %v10993_v60 = vld [vmem:[#allocation89_spill] sm:$0xff] }
 0x2a3   : > { %v2284_v28 = vadd.f32 %v2268_v43, %v2251_v1  ;;  %v2544_v35 = vadd.f32 %v2528_v23, %v2511_v52  ;;  %v812_v29 = vrot.slane %v10991_v44, 7  ;;  %v2592_v5 = vmul.f32 %v10931_v27, %v8432_v62  ;;  %v10995_v1 = vld [vmem:[#allocation94_spill] sm:$0xff] }
 0x2a4   : > { %v2377_v2 = vadd.f32 %v10992_v11, %v2344_v12  ;;  %v641_v16 = vrot.slane %v8595_v33, 5  ;;  %v855_v9 = vrot.slane %v8222_v34, 1  ;;  %v2625_v45 = vmul.f32 %v10933_v31, %v8439_v8 }
 0x2a5   : > { %v2577_v56 = vadd.f32 %v2561_v53, %v2544_v35  ;;  %v8613_v59 = vmul.f32 %v10934_v24, %v8463_v21  ;;  %v2793_v43 = vmul.f32 %v8601_v36, %v8601_v36  ;;  %v8617_v23 = vadd.f32 %v2464_v46, %v2447_v7 }
 0x2a6   : > { %v2410_v47 = vadd.f32 %v10993_v60, %v2377_v2  ;;  %v700_v62 = vsel %vm672_vm1, %v669_v22, %v641_v16  ;;  %v869_v53 = vrot.slane %v8362_v63, 1  ;;  %v2317_v8 = vadd.f32 %v8549_v18, %v2284_v28 }
 0x2a7   : > { %v2610_v26 = vadd.f32 %v2594_v54, %v2577_v56  ;;  %v2821_v21 = vsel %vm492_vm0, %v2793_v43, 0.0  ;;  %v10994_v37 = vrot.slane %v8222_v34, 7  ;;  %v883_v7 = vrot.slane %v10991_v44, 1 }
 0x2a8   : > { %v2443_v52 = vadd.f32 %v10995_v1, %v2410_v47  ;;  %2822 = vadd.xlane.f32.xlu2 %v2821_v21  ;;  %v912_v12 = vsel %vm885_vm4, %v855_v9, %v869_v53  ;;  %v926_v22 = vrot.slane %v8222_v34, 2  ;;  %v940_v18 = vrot.slane %v8362_v63, 2  ;;  %v8668_v21 = vld [vmem:[#allocation2 + $0x140] sm:$0xff] }
 0x2a9   : > { %v841_v46 = vsel %vm814_vm3, %v812_v29, %v10994_v37  ;;  %v2643_v3 = vadd.f32 %v2627_v42, %v2610_v26  ;;  %v954_v54 = vrot.slane %v10991_v44, 2  ;;  %v1011_v29 = vrot.slane %v8362_v63, 3 }
 0x2aa   : > { %v2300_v28 = vmul.f32 %v10980_v4, %v841_v46  ;;  %v2476_v35 = vadd.f32 %v2460_v55, %v2443_v52  ;;  %v1025_v11 = vrot.slane %v10991_v44, 3  ;;  %v2333_v2 = vmul.f32 %v10921_v6, %v8222_v34 }
 0x2ab   : > { %v2676_v56 = vadd.f32 %v2660_v13, %v2643_v3  ;;  %v997_v9 = vrot.slane %v8222_v34, 3  ;;  %v2366_v42 = vmul.f32 %v10887_v25, %v912_v12  ;;  %v2350_v60 = vadd.f32 %v8555_v0, %v2317_v8 }
 0x2ac   : > { %v2316_v43 = vadd.f32 %v2300_v28, %v8401_v17  ;;  %v2509_v47 = vadd.f32 %v2493_v48, %v2476_v35  ;;  %v8649_v4 = vsel %vm885_vm4, %v869_v53, %v883_v7  ;;  %v983_v55 = vsel %vm956_vm5, %v926_v22, %v940_v18  ;;  %v10996_v48 = vld [vmem:[#allocation147_spill] sm:$0xff] }
 0x2ad   : > { %v8654_v44 = vadd.f32 %v8324_v49, %v2676_v56  ;;  %v8658_v6 = vsel %vm956_vm5, %v940_v18, %v954_v54  ;;  %v2399_v13 = vmul.f32 %v10889_v41, %v983_v55  ;;  %v8663_v0 = vsel %vm1027_vm6, %v1011_v29, %v1025_v11 }
 0x2ae   : > { %v2349_v17 = vadd.f32 %v2333_v2, %v2316_v43  ;;  %v2542_v26 = vadd.f32 %v2526_v10, %v2509_v47  ;;  %v2496_v53 = vmul.f32 %v10927_v32, %v10996_v48  ;;  %v2529_v8 = vmul.f32 %v10928_v39, %v841_v46  ;;  %v10997_v2 = vld [vmem:[#allocation139_spill] sm:$0xff] }
 0x2af   : > { %v2733_v37 = vsel %vm492_vm0, %v8654_v44, 0.0  ;;  %v1054_v1 = vsel %vm1027_vm6, %v997_v9, %v1011_v29  ;;  %v2367_v10 = vmul.f32 %v10887_v25, %v8649_v4  ;;  %v2562_v46 = vmul.f32 %v10930_v57, %v8222_v34 }
 0x2b0   : > { %v2382_v52 = vadd.f32 %v2366_v42, %v2349_v17  ;;  %2734 = vadd.xlane.f32.xlu0 %v2733_v37  ;;  %v2575_v7 = vadd.f32 %v2559_v20, %v2542_v26  ;;  %v2432_v22 = vmul.f32 %v10983_v61, %v1054_v1  ;;  %v2512_v3 = vadd.f32 %v2496_v53, %v8411_v38 }
 0x2b1   : > { %v2400_v18 = vmul.f32 %v10889_v41, %v8658_v6  ;;  %v2465_v28 = vmul.f32 %v10926_v58, %v700_v62  ;;  %v655_v35 = vrot.slane %v8668_v21, 5  ;;  %v2595_v11 = vmul.f32 %v10931_v27, %v912_v12 }
 0x2b2   : > { %v2415_v54 = vadd.f32 %v2399_v13, %v2382_v52  ;;  %v2608_v29 = vadd.f32 %v2592_v5, %v2575_v7  ;;  %v2545_v25 = vadd.f32 %v2529_v8, %v2512_v3  ;;  %v2628_v20 = vmul.f32 %v10933_v31, %v983_v55 }
 0x2b3   : > { %v2791_v38 = vmul.f32 %v10997_v2, %v10997_v2  ;;  %v714_v56 = vrot.slane %v8595_v33, 6  ;;  %v728_v34 = vrot.slane %v8668_v21, 6  ;;  %v785_v41 = vrot.slane %v8595_v33, 7 }
 0x2b4   : > { %v2641_v9 = vadd.f32 %v2625_v45, %v2608_v29  ;;  %v2448_v43 = vadd.f32 %v2432_v22, %v2415_v54  ;;  %v2578_v62 = vadd.f32 %v2562_v46, %v2545_v25  ;;  %v799_v42 = vrot.slane %v8668_v21, 7 }
 0x2b5   : > { %v2661_v5 = vmul.f32 %v10934_v24, %v1054_v1  ;;  %v686_v12 = vsel %vm672_vm1, %v641_v16, %v655_v35  ;;  %v870_v47 = vrot.slane %v8668_v21, 1  ;;  %v884_v55 = vrot.slane %v8585_v14, 1 }
 0x2b6   : > { %v2674_v17 = vadd.f32 %v8613_v59, %v2641_v9  ;;  %v2611_v13 = vadd.f32 %v2595_v11, %v2578_v62  ;;  %v941_v45 = vrot.slane %v8668_v21, 2  ;;  %v955_v26 = vrot.slane %v8585_v14, 2 }
 0x2b7   : > { %v2433_v48 = vmul.f32 %v10983_v61, %v8663_v0  ;;  %v2815_v53 = vsel %vm492_vm0, %v2791_v38, 0.0  ;;  %v757_v8 = vsel %vm743_vm2, %v714_v56, %v728_v34  ;;  %v2383_v16 = vadd.f32 %v2367_v10, %v2350_v60 }
 0x2b8   : > { %v8708_v37 = vadd.f32 %v8324_v49, %v2674_v17  ;;  %v2481_v1 = vadd.f32 %v2465_v28, %v2448_v43  ;;  %v2644_v52 = vadd.f32 %v2628_v20, %v2611_v13  ;;  %v828_v59 = vsel %vm814_vm3, %v785_v41, %v799_v42 }
 0x2b9   : > { %v899_v7 = vsel %vm885_vm4, %v870_v47, %v884_v55  ;;  %v1012_v22 = vrot.slane %v8668_v21, 3  ;;  %v2416_v61 = vadd.f32 %v2400_v18, %v2383_v16  ;;  %v2466_v3 = vmul.f32 %v10926_v58, %v686_v12 }
 0x2ba   : > { %v2727_v46 = vsel %vm492_vm0, %v8708_v37, 0.0  ;;  %v2677_v60 = vadd.f32 %v2661_v5, %v2644_v52  ;;  %v970_v10 = vsel %vm956_vm5, %v941_v45, %v955_v26  ;;  %v1026_v54 = vrot.slane %v8585_v14, 3 }
 0x2bb   : > { %2728 = vadd.xlane.f32.xlu1 %v2727_v46  ;;  %v2449_v28 = vadd.f32 %v2433_v48, %v2416_v61  ;;  %v2499_v35 = vmul.f32 %v10927_v32, %v757_v8  ;;  %v2497_v29 = vmul.f32 %v10927_v32, %v8446_v15  ;;  %v2530_v18 = vmul.f32 %v10928_v39, %v8481_v40  ;;  %v2814_v8 = vpop.xlane.xlu2 %2813 }
 0x2bc   : > { %v8727_v58 = vadd.f32 %v8324_v49, %v2677_v60  ;;  %v2532_v25 = vmul.f32 %v10928_v39, %v828_v59  ;;  %v2565_v11 = vmul.f32 %v10930_v57, %v8668_v21  ;;  %v2598_v20 = vmul.f32 %v10931_v27, %v899_v7 }
 0x2bd   : > { %v2482_v38 = vadd.f32 %v2466_v3, %v2449_v28  ;;  %v2513_v34 = vadd.f32 %v2497_v29, %v8617_v23  ;;  %v2563_v9 = vmul.f32 %v10930_v57, %v8362_v63  ;;  %v742_v15 = vrot.slane %v8585_v14, 6 }
 0x2be   : > { %v2736_v40 = vsel %vm492_vm0, %v8727_v58, 0.0  ;;  %v2596_v43 = vmul.f32 %v10931_v27, %v8649_v4  ;;  %v813_v62 = vrot.slane %v8585_v14, 7  ;;  %v856_v21 = vrot.slane %v8595_v33, 1 }
 0x2bf   : > { %2737 = vadd.xlane.f32.xlu0 %v2736_v40  ;;  %v2515_v42 = vadd.f32 %v2499_v35, %v2482_v38  ;;  %v2546_v5 = vadd.f32 %v2530_v18, %v2513_v34  ;;  %v771_v23 = vsel %vm743_vm2, %v742_v15, %v714_v56  ;;  %v927_v63 = vrot.slane %v8595_v33, 2  ;;  %v2805_v56 = vpop.xlane.xlu0 %2804 }
 0x2c0   : > { %v2629_v12 = vmul.f32 %v10933_v31, %v8658_v6  ;;  %v842_v55 = vsel %vm814_vm3, %v813_v62, %v785_v41  ;;  %v998_v4 = vrot.slane %v8595_v33, 3  ;;  %v2498_v14 = vmul.f32 %v10927_v32, %v771_v23 }
 0x2c1   : > { %v2548_v17 = vadd.f32 %v2532_v25, %v2515_v42  ;;  %v2579_v13 = vadd.f32 %v2563_v9, %v2546_v5  ;;  %v913_v26 = vsel %vm885_vm4, %v856_v21, %v870_v47  ;;  %v2531_v48 = vmul.f32 %v10928_v39, %v842_v55 }
 0x2c2   : > { %v1041_v16 = vsel %vm1027_vm6, %v1012_v22, %v1026_v54  ;;  %v2631_v6 = vmul.f32 %v10933_v31, %v970_v10  ;;  %v2514_v52 = vadd.f32 %v2498_v14, %v2481_v1  ;;  %v2564_v41 = vmul.f32 %v10930_v57, %v8595_v33  ;;  %v10999_v14 = vld [vmem:[#allocation112_spill] sm:$0xff] }
 0x2c3   : > { %2816 = vadd.xlane.f32.xlu1 %v2815_v53  ;;  %v2581_v32 = vadd.f32 %v2565_v11, %v2548_v17  ;;  %v2612_v59 = vadd.f32 %v2596_v43, %v2579_v13  ;;  %v2662_v7 = vmul.f32 %v10934_v24, %v8663_v0  ;;  %v984_v39 = vsel %vm956_vm5, %v927_v63, %v941_v45 }
 0x2c4   : > { %v2547_v47 = vadd.f32 %v2531_v48, %v2514_v52  ;;  %v2597_v61 = vmul.f32 %v10931_v27, %v913_v26  ;;  %v2851_v3 = vmul.f32 %v2805_v56, %v7755_v30  ;;  %v2854_v46 = vmul.f32 %v2814_v8, %v7755_v30 }
 0x2c5   : > { %v2614_v1 = vadd.f32 %v2598_v20, %v2581_v32  ;;  %v2664_v60 = vmul.f32 %v10934_v24, %v1041_v16  ;;  %v2645_v57 = vadd.f32 %v2629_v12, %v2612_v59  ;;  %v1055_v33 = vsel %vm1027_vm6, %v998_v4, %v1012_v22  ;;  %v10998_v12 = vld [vmem:[#allocation45_spill] sm:$0xff] }
 0x2c6   : > { %v2580_v53 = vadd.f32 %v2564_v41, %v2547_v47  ;;  %v2630_v0 = vmul.f32 %v10933_v31, %v984_v39  ;;  %v2867_v10 = vadd.f32 1e-06, %v2851_v3  ;;  %v2870_v54 = vadd.f32 1e-06, %v2854_v46 }
 0x2c7   : > { %v2647_v45 = vadd.f32 %v2631_v6, %v2614_v1  ;;  %v2678_v28 = vadd.f32 %v2662_v7, %v2645_v57  ;;  %v2663_v27 = vmul.f32 %v10934_v24, %v1055_v33  ;;  %v11000_v7 = vld [vmem:[#allocation156_spill] sm:$0xff] }
 0x2c8   : > { %v2613_v35 = vadd.f32 %v2597_v61, %v2580_v53  ;;  %4627 = vrsqrt.f32 %v2867_v10  ;;  %vm2919_vm8 = vweird.f32 %v2870_v54  ;;  %vm2889_vm11 = vweird.f32 %v2867_v10  ;;  %v11001_v57 = vld [vmem:[#allocation140_spill] sm:$0xff] }
 0x2c9   : > { %v2680_v29 = vadd.f32 %v2664_v60, %v2647_v45  ;;  %v8773_v18 = vadd.f32 %v8324_v49, %v2678_v28  ;;  %4629 = vrsqrt.f32 %v2870_v54 }
 0x2ca   : > { %v2646_v25 = vadd.f32 %v2630_v0, %v2613_v35 }
 0x2cb   : > { %v8776_v51 = vadd.f32 %v8324_v49, %v2680_v29  ;;  %v2739_v31 = vsel %vm492_vm0, %v8773_v18, 0.0 }
 0x2cc   : > { %2740 = vadd.xlane.f32.xlu1 %v2739_v31  ;;  %v2679_v22 = vadd.f32 %v2663_v27, %v2646_v25 }
 0x2cd   : > { %v2745_v11 = vsel %vm492_vm0, %v8776_v51, 0.0 }
 0x2ce   : > { %v4628_v20 = vpop.eup %4627  ;;  %2746 = vadd.xlane.f32.xlu2 %v2745_v11  ;;  %v8783_v24 = vadd.f32 %v8324_v49, %v2679_v22 }
 0x2cf   : > { %v4630_v38 = vpop.eup %4629  ;;  %v2884_v34 = vmul.f32 %v4628_v20, %v2867_v10  ;;  %vm2890_vm10 = vweird.f32 %v4628_v20 }
 0x2d0   : > { %v2914_v9 = vmul.f32 %v4630_v38, %v2870_v54  ;;  %v2742_v15 = vsel %vm492_vm0, %v8783_v24, 0.0  ;;  %vm2920_vm9 = vweird.f32 %v4630_v38  ;;  %vm2891_vm13 = vmor %vm2889_vm11, %vm2890_vm10 }
 0x2d1   : > { %v2885_v40 = vmul.f32 %v4628_v20, %v2884_v34  ;;  %vm2921_vm12 = vmor %vm2919_vm8, %vm2920_vm9 }
 0x2d2   : > { %v2915_v43 = vmul.f32 %v4630_v38, %v2914_v9 }
 0x2d3   : > { %v2886_v62 = vmul.f32 0.5, %v2885_v40 }
 0x2d4   : > { %2743 = vadd.xlane.f32.xlu1 %v2742_v15  ;;  %v2916_v21 = vmul.f32 0.5, %v2915_v43 }
 0x2d5   : > { %v2887_v42 = vsub.f32 1.5, %v2886_v62 }
 0x2d6   : > { %v2917_v5 = vsub.f32 1.5, %v2916_v21  ;;  %v11002_v21 = vld [vmem:[#allocation46_spill] sm:$0xff] }
 0x2d7   : > { %v2888_v23 = vmul.f32 %v4628_v20, %v2887_v42 }
 0x2d8   : > { %v2918_v49 = vmul.f32 %v4630_v38, %v2917_v5 }
 0x2d9   : > { %v2892_v63 = vsel %vm2891_vm13, %v4628_v20, %v2888_v23 }
 0x2da   : > { %v3043_v55 = vmul.f32 %v2892_v63, %v10998_v12  ;;  %v2922_v4 = vsel %vm2921_vm12, %v4630_v38, %v2918_v49 }
 0x2db   : > { %v3046_v17 = vmul.f32 %v2922_v4, %v10999_v14  ;;  %v4424_v14 = vld [vmem:[%s11003_s7 + $0x8] sm:$0xff] }
 0x2dc   : > { %v3059_v13 = vpack.c.bf16 %v3043_v55, %v3043_v55  ;;  %3198 = vmatpush.bf16.msra.mxu0 %v4424_v14  ;;  %4434 = vmatpush.bf16.msra.mxu3 %v4424_v14 }
 0x2dd   : > { %v3062_v26 = vpack.c.bf16 %v3046_v17, %v3046_v17 }
 0x2de   : > { %3076 = vst.msk [vmem:[#allocation3] sm:$0xf] %vm3075_vm14, %v3059_v13  ;;  %v2808_v48 = vpop.xlane.xlu1 %2807 }
 0x2df   : > { %3079 = vst.msk [vmem:[#allocation3 + $0xc] sm:$0xf] %vm3075_vm14, %v3062_v26  ;;  %v2852_v56 = vmul.f32 %v2808_v48, %v7755_v30  ;;  %v4423_v48 = vld [vmem:[%s11003_s7] sm:$0xff] }
 0x2e0   : > { %3199 = vmatpush.bf16.msra.mxu0 %v4423_v48  ;;  %4435 = vmatpush.bf16.msra.mxu3 %v4423_v48 }
 0x2e1   : > { %v2868_v8 = vadd.f32 1e-06, %v2852_v56 }
 0x2e3   : > { %4631 = vrsqrt.f32 %v2868_v8  ;;  %vm2899_vm1 = vweird.f32 %v2868_v8 }
 0x2e9   : > { %v4632_v16 = vpop.eup %4631 }
 0x2ea   : > { %v2894_v6 = vmul.f32 %v4632_v16, %v2868_v8  ;;  %vm2900_vm15 = vweird.f32 %v4632_v16  ;;  %v11004_v8 = vld [vmem:[#allocation29_spill] sm:$0xff] }
 0x2eb   : > { %v2723_v52 = vpop.xlane.xlu0 %2722  ;;  %vm2901_vm2 = vmor %vm2899_vm1, %vm2900_vm15 }
 0x2ec   : > { %v2895_v41 = vmul.f32 %v4632_v16, %v2894_v6  ;;  %v2762_v32 = vmul.f32 %v7755_v30, %v2723_v52 }
 0x2ee   : > { %v2896_v59 = vmul.f32 0.5, %v2895_v41  ;;  %v8794_v39 = vsub.f32 %v11000_v7, %v2762_v32 }
 0x2f0   : > { %v2897_v47 = vsub.f32 1.5, %v2896_v59  ;;  %v2794_v61 = vmul.f32 %v8794_v39, %v8794_v39 }
 0x2f2   : > { %v2898_v3 = vmul.f32 %v4632_v16, %v2897_v47  ;;  %v2824_v46 = vsel %vm492_vm0, %v2794_v61, 0.0 }
 0x2f3   : > { %2825 = vadd.xlane.f32.xlu0 %v2824_v46  ;;  %v2811_v60 = vpop.xlane.xlu1 %2810 }
 0x2f4   : > { %v2902_v1 = vsel %vm2901_vm2, %v4632_v16, %v2898_v3  ;;  %v2853_v53 = vmul.f32 %v2811_v60, %v7755_v30 }
 0x2f5   : > { %v3044_v33 = vmul.f32 %v2902_v1, %v11001_v57 }
 0x2f6   : > { %v2869_v10 = vadd.f32 1e-06, %v2853_v53 }
 0x2f7   : > { %v3060_v0 = vpack.c.bf16 %v3044_v33, %v3044_v33 }
 0x2f8   : > { %4633 = vrsqrt.f32 %v2869_v10  ;;  %vm2909_vm4 = vweird.f32 %v2869_v10 }
 0x2f9   : > { %3077 = vst.msk [vmem:[#allocation3 + $0x4] sm:$0xf] %vm3075_vm14, %v3060_v0 }
 0x2fe   : > { %v4634_v54 = vpop.eup %4633 }
 0x2ff   : > { %v2904_v45 = vmul.f32 %v4634_v54, %v2869_v10  ;;  %vm2910_vm3 = vweird.f32 %v4634_v54 }
 0x300   : > { %vm2911_vm5 = vmor %vm2909_vm4, %vm2910_vm3  ;;  %v4415_v52 = vld [vmem:[#allocation3] sm:$0xff] }
 0x301   : > { %v2905_v27 = vmul.f32 %v4634_v54, %v2904_v45  ;;  %4349 = vmatmul.msk.bf16.vlgmr.msra.gmra.mxu0 %vm492_vm0, %v4415_v52 }
 0x302   : > { %v2732_v28 = vpop.xlane.xlu2 %2731 }
 0x303   : > { %v2765_v35 = vmul.f32 %v7755_v30, %v2732_v28  ;;  %v2906_v25 = vmul.f32 0.5, %v2905_v27 }
 0x305   : > { %v8804_v29 = vsub.f32 %v8470_v50, %v2765_v35  ;;  %v2907_v31 = vsub.f32 1.5, %v2906_v25 }
 0x307   : > { %v2797_v22 = vmul.f32 %v8804_v29, %v8804_v29  ;;  %v2908_v11 = vmul.f32 %v4634_v54, %v2907_v31 }
 0x309   : > { %v2833_v20 = vsel %vm492_vm0, %v2797_v22, 0.0  ;;  %v2912_v34 = vsel %vm2911_vm5, %v4634_v54, %v2908_v11 }
 0x30a   : > { %2834 = vadd.xlane.f32.xlu2 %v2833_v20  ;;  %v2820_v38 = vpop.xlane.xlu2 %2819  ;;  %v3045_v15 = vmul.f32 %v2912_v34, %v8069_v19 }
 0x30b   : > { %v2856_v9 = vmul.f32 %v2820_v38, %v7755_v30 }
 0x30c   : > { %v3061_v43 = vpack.c.bf16 %v3045_v15, %v3045_v15 }
 0x30d   : > { %v2726_v50 = vpop.xlane.xlu0 %2725  ;;  %v2872_v40 = vadd.f32 1e-06, %v2856_v9 }
 0x30e   : > { %v2763_v62 = vmul.f32 %v7755_v30, %v2726_v50  ;;  %3078 = vst.msk [vmem:[#allocation3 + $0x8] sm:$0xf] %vm3075_vm14, %v3061_v43 }
 0x30f   : > { %4635 = vrsqrt.f32 %v2872_v40  ;;  %vm2939_vm6 = vweird.f32 %v2872_v40 }
 0x310   : > { %v8814_v42 = vsub.f32 %v11002_v21, %v2763_v62 }
 0x312   : > { %v2795_v5 = vmul.f32 %v8814_v42, %v8814_v42 }
 0x314   : > { %v2827_v23 = vsel %vm492_vm0, %v2795_v5, 0.0 }
 0x315   : > { %v4636_v49 = vpop.eup %4635  ;;  %2828 = vadd.xlane.f32.xlu0 %v2827_v23  ;;  %v4416_v35 = vld [vmem:[#allocation3 + $0x8] sm:$0xff] }
 0x316   : > { %v2934_v63 = vmul.f32 %v4636_v49, %v2872_v40  ;;  %vm2940_vm7 = vweird.f32 %v4636_v49  ;;  %4350 = vmatmul.msk.bf16.gmra.mxu0 %vm492_vm0, %v4416_v35 }
 0x317   : > { %vm2941_vm8 = vmor %vm2939_vm6, %vm2940_vm7 }
 0x318   : > { %v2935_v19 = vmul.f32 %v4636_v49, %v2934_v63 }
 0x31a   : > { %v2936_v12 = vmul.f32 0.5, %v2935_v19 }
 0x31b   : > { %v2823_v55 = vpop.xlane.xlu2 %2822 }
 0x31c   : > { %v2857_v4 = vmul.f32 %v2823_v55, %v7755_v30  ;;  %v2937_v17 = vsub.f32 1.5, %v2936_v12 }
 0x31e   : > { %v2873_v13 = vadd.f32 1e-06, %v2857_v4  ;;  %v2938_v26 = vmul.f32 %v4636_v49, %v2937_v17 }
 0x320   : > { %4637 = vrsqrt.f32 %v2873_v13  ;;  %v2942_v56 = vsel %vm2941_vm8, %v4636_v49, %v2938_v26  ;;  %vm2949_vm9 = vweird.f32 %v2873_v13 }
 0x321   : > { %v3048_v16 = vmul.f32 %v2942_v56, %v11004_v8 }
 0x323   : > { %v2735_v6 = vpop.xlane.xlu0 %2734  ;;  %v3064_v41 = vpack.c.bf16 %v3048_v16, %v3048_v16 }
 0x324   : > { %v2766_v32 = vmul.f32 %v7755_v30, %v2735_v6 }
 0x325   : > { %3081 = vst.msk [vmem:[#allocation3 + $0x14] sm:$0xf] %vm3075_vm14, %v3064_v41 }
 0x326   : > { %v4638_v59 = vpop.eup %4637  ;;  %v8831_v7 = vsub.f32 %v8654_v44, %v2766_v32 }
 0x327   : > { %v2944_v47 = vmul.f32 %v4638_v59, %v2873_v13  ;;  %vm2950_vm10 = vweird.f32 %v4638_v59 }
 0x328   : > { %v2798_v61 = vmul.f32 %v8831_v7, %v8831_v7  ;;  %vm2951_vm11 = vmor %vm2949_vm9, %vm2950_vm10 }
 0x329   : > { %v2945_v3 = vmul.f32 %v4638_v59, %v2944_v47 }
 0x32a   : > { %v2836_v46 = vsel %vm492_vm0, %v2798_v61, 0.0 }
 0x32b   : > { %v2946_v1 = vmul.f32 0.5, %v2945_v3  ;;  %2837 = vadd.xlane.f32.xlu0 %v2836_v46 }
 0x32d   : > { %v2947_v60 = vsub.f32 1.5, %v2946_v1 }
 0x32e   : > { %v2729_v57 = vpop.xlane.xlu1 %2728 }
 0x32f   : > { %v2764_v33 = vmul.f32 %v7755_v30, %v2729_v57  ;;  %v2948_v53 = vmul.f32 %v4638_v59, %v2947_v60 }
 0x331   : > { %v8838_v44 = vsub.f32 %v8708_v37, %v2764_v33  ;;  %v2952_v0 = vsel %vm2951_vm11, %v4638_v59, %v2948_v53 }
 0x332   : > { %v3049_v10 = vmul.f32 %v2952_v0, %v8601_v36  ;;  %v2738_v54 = vpop.xlane.xlu0 %2737 }
 0x333   : > { %v2796_v45 = vmul.f32 %v8838_v44, %v8838_v44  ;;  %v2767_v28 = vmul.f32 %v7755_v30, %v2738_v54 }
 0x334   : > { %v3065_v27 = vpack.c.bf16 %v3049_v10, %v3049_v10 }
 0x335   : > { %v2830_v25 = vsel %vm492_vm0, %v2796_v45, 0.0  ;;  %v8846_v31 = vsub.f32 %v8727_v58, %v2767_v28 }
 0x336   : > { %3082 = vst.msk [vmem:[#allocation3 + $0x18] sm:$0xf] %vm3075_vm14, %v3065_v27  ;;  %2831 = vadd.xlane.f32.xlu1 %v2830_v25  ;;  %v2817_v37 = vpop.xlane.xlu1 %2816 }
 0x337   : > { %v2855_v36 = vmul.f32 %v2817_v37, %v7755_v30  ;;  %v2799_v22 = vmul.f32 %v8846_v31, %v8846_v31 }
 0x339   : > { %v2871_v11 = vadd.f32 1e-06, %v2855_v36  ;;  %v2839_v20 = vsel %vm492_vm0, %v2799_v22, 0.0 }
 0x33b   : > { %4639 = vrsqrt.f32 %v2871_v11  ;;  %vm2929_vm12 = vweird.f32 %v2871_v11 }
 0x33e   : > { %2840 = vadd.xlane.f32.xlu1 %v2839_v20 }
 0x33f   : > { %v2741_v38 = vpop.xlane.xlu1 %2740 }
 0x340   : > { %v2768_v58 = vmul.f32 %v7755_v30, %v2741_v38 }
 0x341   : > { %v4640_v34 = vpop.eup %4639  ;;  %v2747_v9 = vpop.xlane.xlu2 %2746 }
 0x342   : > { %v2924_v15 = vmul.f32 %v4640_v34, %v2871_v11  ;;  %v2770_v50 = vmul.f32 %v7755_v30, %v2747_v9  ;;  %v8857_v40 = vsub.f32 %v8773_v18, %v2768_v58  ;;  %vm2930_vm13 = vweird.f32 %v4640_v34 }
 0x343   : > { %vm2931_vm15 = vmor %vm2929_vm12, %vm2930_vm13 }
 0x344   : > { %v2925_v43 = vmul.f32 %v4640_v34, %v2924_v15  ;;  %v8860_v62 = vsub.f32 %v8776_v51, %v2770_v50  ;;  %v2800_v21 = vmul.f32 %v8857_v40, %v8857_v40 }
 0x346   : > { %v2926_v5 = vmul.f32 0.5, %v2925_v43  ;;  %v2842_v23 = vsel %vm492_vm0, %v2800_v21, 0.0  ;;  %v2802_v49 = vmul.f32 %v8860_v62, %v8860_v62  ;;  %v8891_v43 = vld [vmem:[%s11005_s1] ss:$0 sm:$0xff] }
 0x347   : > { %2843 = vadd.xlane.f32.xlu2 %v2842_v23  ;;  %v2744_v63 = vpop.xlane.xlu1 %2743 }
 0x348   : > { %v2927_v19 = vsub.f32 1.5, %v2926_v5  ;;  %v2769_v18 = vmul.f32 %v7755_v30, %v2744_v63  ;;  %v2848_v12 = vsel %vm492_vm0, %v2802_v49, 0.0 }
 0x349   : > { %2849 = vadd.xlane.f32.xlu1 %v2848_v12 }
 0x34a   : > { %v2928_v51 = vmul.f32 %v4640_v34, %v2927_v19  ;;  %v8870_v55 = vsub.f32 %v8783_v24, %v2769_v18 }
 0x34c   : > { %v2932_v4 = vsel %vm2931_vm15, %v4640_v34, %v2928_v51  ;;  %v2801_v14 = vmul.f32 %v8870_v55, %v8870_v55 }
 0x34d   : > { %v3047_v17 = vmul.f32 %v2932_v4, %v10997_v2 }
 0x34e   : > { %v2845_v13 = vsel %vm492_vm0, %v2801_v14, 0.0 }
 0x34f   : > { %v3063_v26 = vpack.c.bf16 %v3047_v17, %v3047_v17  ;;  %2846 = vadd.xlane.f32.xlu0 %v2845_v13 }
 0x351   : > { %3080 = vst.msk [vmem:[#allocation3 + $0x10] sm:$0xf] %vm3075_vm14, %v3063_v26 }
 0x358   : > { %v4417_v48 = vld [vmem:[#allocation3 + $0x10] sm:$0xff] }
 0x359   : > { %4351 = vmatmul.msk.bf16.gmra.mxu0 %vm492_vm0, %v4417_v48 }
 0x366   : > { %v2826_v56 = vpop.xlane.xlu0 %2825 }
 0x367   : > { %v2858_v24 = vmul.f32 %v2826_v56, %v7755_v30 }
 0x369   : > { %v2874_v8 = vadd.f32 1e-06, %v2858_v24 }
 0x36b   : > { %4641 = vrsqrt.f32 %v2874_v8  ;;  %vm2959_vm2 = vweird.f32 %v2874_v8 }
 0x371   : > { %v4642_v16 = vpop.eup %4641 }
 0x372   : > { %v2954_v6 = vmul.f32 %v4642_v16, %v2874_v8  ;;  %vm2960_vm1 = vweird.f32 %v4642_v16 }
 0x373   : > { %vm2961_vm3 = vmor %vm2959_vm2, %vm2960_vm1 }
 0x374   : > { %v2955_v52 = vmul.f32 %v4642_v16, %v2954_v6 }
 0x376   : > { %v2956_v41 = vmul.f32 0.5, %v2955_v52 }
 0x378   : > { %v2957_v32 = vsub.f32 1.5, %v2956_v41 }
 0x37a   : > { %v2958_v2 = vmul.f32 %v4642_v16, %v2957_v32 }
 0x37c   : > { %v2962_v59 = vsel %vm2961_vm3, %v4642_v16, %v2958_v2 }
 0x37d   : > { %v2835_v47 = vpop.xlane.xlu2 %2834  ;;  %v3050_v61 = vmul.f32 %v2962_v59, %v8794_v39 }
 0x37e   : > { %v2861_v3 = vmul.f32 %v2835_v47, %v7755_v30  ;;  %v3201_v21 = vpop.f32.mrf.mxu0 }
 0x37f   : > { %v3066_v46 = vpack.c.bf16 %v3050_v61, %v3050_v61  ;;  %v8895_v5 = vadd.f32 %v8891_v43, %v3201_v21 }
 0x380   : > { %v2877_v1 = vadd.f32 1e-06, %v2861_v3 }
 0x381   : > { %3083 = vst.msk [vmem:[#allocation3 + $0x1c] sm:$0xf] %vm3075_vm14, %v3066_v46  ;;  %v8898_v23 = vmul.f32 0.70710677, %v8895_v5 }
 0x382   : > { %4643 = vrsqrt.f32 %v2877_v1  ;;  %vm2989_vm4 = vweird.f32 %v2877_v1 }
 0x386   : > { %v3203_v51 = vpop.f32.mrf.mxu0 }
 0x387   : > { %v8906_v17 = vadd.f32 %v8891_v43, %v3203_v51 }
 0x388   : > { %v4644_v60 = vpop.eup %4643  ;;  %v2829_v57 = vpop.xlane.xlu0 %2828  ;;  %v4418_v9 = vld [vmem:[#allocation3 + $0x18] sm:$0xff] }
 0x389   : > { %v2984_v33 = vmul.f32 %v4644_v60, %v2877_v1  ;;  %v2859_v53 = vmul.f32 %v2829_v57, %v7755_v30  ;;  %vm2990_vm5 = vweird.f32 %v4644_v60  ;;  %4352 = vmatmul.msk.bf16.gmra.mxu0 %vm492_vm0, %v4418_v9  ;;  %v8910_v48 = vmul.f32 0.70710677, %v8906_v17 }
 0x38a   : > { %vm2991_vm6 = vmor %vm2989_vm4, %vm2990_vm5 }
 0x38b   : > { %v2985_v0 = vmul.f32 %v4644_v60, %v2984_v33  ;;  %v2875_v10 = vadd.f32 1e-06, %v2859_v53  ;;  %v3313_v32 = vmul.f32 %v8910_v48, %v8910_v48 }
 0x38d   : > { %v2986_v54 = vmul.f32 0.5, %v2985_v0  ;;  %4645 = vrsqrt.f32 %v2875_v10  ;;  %vm2969_vm7 = vweird.f32 %v2875_v10  ;;  %v8921_v0 = vmin.f32 %v3313_v32, 16.0 }
 0x38f   : > { %v2987_v45 = vsub.f32 1.5, %v2986_v54 }
 0x391   : > { %v2988_v39 = vmul.f32 %v4644_v60, %v2987_v45 }
 0x393   : > { %v4646_v28 = vpop.eup %4645  ;;  %v2992_v35 = vsel %vm2991_vm6, %v4644_v60, %v2988_v39  ;;  %v3206_v2 = vpop.f32.mrf.mxu0 }
 0x394   : > { %v3053_v27 = vmul.f32 %v2992_v35, %v8804_v29  ;;  %v2964_v25 = vmul.f32 %v4646_v28, %v2875_v10  ;;  %vm2970_vm8 = vweird.f32 %v4646_v28  ;;  %v8918_v3 = vadd.f32 %v8891_v43, %v3206_v2 }
 0x395   : > { %vm2971_vm9 = vmor %vm2969_vm7, %vm2970_vm8 }
 0x396   : > { %v3069_v37 = vpack.c.bf16 %v3053_v27, %v3053_v27  ;;  %v2965_v36 = vmul.f32 %v4646_v28, %v2964_v25  ;;  %v8924_v10 = vmul.f32 0.70710677, %v8918_v3  ;;  %v3315_v27 = vmul.f32 2.1237322e-06, %v8921_v0 }
 0x398   : > { %3086 = vst.msk [vmem:[#allocation3 + $0x28] sm:$0xf] %vm3075_vm14, %v3069_v37  ;;  %v2966_v22 = vmul.f32 0.5, %v2965_v36  ;;  %v3316_v21 = vadd.f32 0.00028619796, %v3315_v27 }
 0x39a   : > { %v2967_v11 = vsub.f32 1.5, %v2966_v22  ;;  %v3353_v22 = vmul.f32 %v8924_v10, %v8924_v10 }
 0x39b   : > { %v3208_v25 = vpop.f32.mrf.mxu0 }
 0x39c   : > { %v2968_v20 = vmul.f32 %v4646_v28, %v2967_v11 }
 0x39e   : > { %v2838_v38 = vpop.xlane.xlu0 %2837  ;;  %v2972_v58 = vsel %vm2971_vm9, %v4646_v28, %v2968_v20 }
 0x39f   : > { %v2862_v34 = vmul.f32 %v2838_v38, %v7755_v30  ;;  %v3051_v15 = vmul.f32 %v2972_v58, %v8814_v42  ;;  %v3273_v42 = vmul.f32 %v8898_v23, %v8898_v23 }
 0x3a1   : > { %v2878_v50 = vadd.f32 1e-06, %v2862_v34  ;;  %v3067_v29 = vpack.c.bf16 %v3051_v15, %v3051_v15  ;;  %v8903_v12 = vmin.f32 %v3273_v42, 16.0  ;;  %v8936_v34 = vadd.f32 %v8891_v43, %v3208_v25 }
 0x3a3   : > { %4647 = vrsqrt.f32 %v2878_v50  ;;  %3084 = vst.msk [vmem:[#allocation3 + $0x20] sm:$0xf] %vm3075_vm14, %v3067_v29  ;;  %v3286_v13 = vmul.f32 3.8918573e-05, %v8903_v12  ;;  %vm2999_vm10 = vweird.f32 %v2878_v50  ;;  %v3275_v41 = vmul.f32 2.1237322e-06, %v8903_v12 }
 0x3a5   : > { %v3287_v56 = vadd.f32 0.001143296, %v3286_v13  ;;  %v3276_v57 = vadd.f32 0.00028619796, %v3275_v41 }
 0x3a7   : > { %v3288_v16 = vmul.f32 %v3287_v56, %v8903_v12  ;;  %v3277_v28 = vmul.f32 %v3276_v57, %v8903_v12  ;;  %v4432_v56 = vld [vmem:[%s11006_s17 + $0x38] sm:$0xff] }
 0x3a8   : > { %4021 = vmatpush.bf16.msra.mxu1 %v4432_v56  ;;  %4436 = vmatpush.bf16.msra.mxu2 %v4432_v56 }
 0x3a9   : > { %v4648_v49 = vpop.eup %4647  ;;  %v2832_v63 = vpop.xlane.xlu1 %2831  ;;  %v3289_v46 = vadd.f32 0.014752088, %v3288_v16  ;;  %v3278_v15 = vadd.f32 0.0036580483, %v3277_v28  ;;  %v3317_v16 = vmul.f32 %v3316_v21, %v8921_v0 }
 0x3aa   : > { %v2860_v19 = vmul.f32 %v2832_v63, %v7755_v30  ;;  %v2994_v18 = vmul.f32 %v4648_v49, %v2878_v50  ;;  %vm3000_vm11 = vweird.f32 %v4648_v49 }
 0x3ab   : > { %vm3001_vm12 = vmor %vm2999_vm10, %vm3000_vm11  ;;  %v3290_v54 = vmul.f32 %v3289_v46, %v8903_v12 }
 0x3ac   : > { %v2876_v4 = vadd.f32 1e-06, %v2860_v19  ;;  %v2995_v14 = vmul.f32 %v4648_v49, %v2994_v18  ;;  %v3326_v18 = vmul.f32 3.8918573e-05, %v8921_v0 }
 0x3ad   : > { %v3291_v11 = vadd.f32 0.112945676, %v3290_v54 }
 0x3ae   : > { %4649 = vrsqrt.f32 %v2876_v4  ;;  %v2996_v26 = vmul.f32 0.5, %v2995_v14  ;;  %vm2979_vm15 = vweird.f32 %v2876_v4  ;;  %v8948_v14 = vmul.f32 0.70710677, %v8936_v34 }
 0x3af   : > { %v3292_v19 = vmul.f32 %v3291_v11, %v8903_v12  ;;  %v3327_v32 = vadd.f32 0.001143296, %v3326_v18  ;;  %v4429_v18 = vld [vmem:[%s11007_s24 + $0x20] sm:$0xff] }
 0x3b0   : > { %v2997_v24 = vsub.f32 1.5, %v2996_v26  ;;  %v3279_v26 = vmul.f32 %v3278_v15, %v8903_v12 }
 0x3b1   : > { %v2841_v8 = vpop.xlane.xlu1 %2840  ;;  %v3293_v41 = vadd.f32 0.4994258, %v3292_v19  ;;  %v3328_v25 = vmul.f32 %v3327_v32, %v8921_v0 }
 0x3b2   : > { %v2998_v6 = vmul.f32 %v4648_v49, %v2997_v24  ;;  %v2863_v52 = vmul.f32 %v2841_v8, %v7755_v30 }
 0x3b3   : > { %v3294_v57 = vmul.f32 %v3293_v41, %v8903_v12 }
 0x3b4   : > { %v4650_v59 = vpop.eup %4649  ;;  %v3002_v47 = vsel %vm3001_vm12, %v4648_v49, %v2998_v6  ;;  %v2879_v61 = vadd.f32 1e-06, %v2863_v52  ;;  %v3393_v6 = vmul.f32 %v8948_v14, %v8948_v14 }
 0x3b5   : > { %v2974_v1 = vmul.f32 %v4650_v59, %v2876_v4  ;;  %v3054_v60 = vmul.f32 %v3002_v47, %v8831_v7  ;;  %vm2980_vm13 = vweird.f32 %v4650_v59  ;;  %v8945_v4 = vmin.f32 %v3353_v22, 16.0 }
 0x3b6   : > { %4651 = vrsqrt.f32 %v2879_v61  ;;  %vm2981_vm1 = vmor %vm2979_vm15, %vm2980_vm13  ;;  %vm3009_vm2 = vweird.f32 %v2879_v61  ;;  %v8969_v46 = vmin.f32 %v3393_v6, 16.0  ;;  %v8982_v27 = vadd.f32 1.0, %v3294_v57 }
 0x3b7   : > { %v2975_v33 = vmul.f32 %v4650_v59, %v2974_v1  ;;  %v3070_v53 = vpack.c.bf16 %v3054_v60, %v3054_v60  ;;  %v3280_v60 = vadd.f32 0.05243302, %v3279_v26  ;;  %v3366_v32 = vmul.f32 3.8918573e-05, %v8945_v4 }
 0x3b8   : > { %v3395_v28 = vmul.f32 2.1237322e-06, %v8969_v46 }
 0x3b9   : > { %v2976_v45 = vmul.f32 0.5, %v2975_v33  ;;  %3087 = vst.msk [vmem:[#allocation3 + $0x2c] sm:$0xf] %vm3075_vm14, %v3070_v53  ;;  %v3318_v53 = vadd.f32 0.0036580483, %v3317_v16  ;;  %v3281_v22 = vmul.f32 %v3280_v60, %v8903_v12 }
 0x3ba   : > { %v2844_v39 = vpop.xlane.xlu2 %2843  ;;  %v3396_v15 = vadd.f32 0.00028619796, %v3395_v28  ;;  %v3406_v28 = vmul.f32 3.8918573e-05, %v8969_v46 }
 0x3bb   : > { %v2977_v35 = vsub.f32 1.5, %v2976_v45  ;;  %v2864_v7 = vmul.f32 %v2844_v39, %v7755_v30 }
 0x3bc   : > { %v4652_v37 = vpop.eup %4651  ;;  %v2850_v36 = vpop.xlane.xlu1 %2849 }
 0x3bd   : > { %v2978_v20 = vmul.f32 %v4650_v59, %v2977_v35  ;;  %v3004_v38 = vmul.f32 %v4652_v37, %v2879_v61  ;;  %v8933_v58 = vadd.f32 1e-06, %v2864_v7  ;;  %v2866_v9 = vmul.f32 %v2850_v36, %v7755_v30  ;;  %v4431_v61 = vld [vmem:[%s11007_s24 + $0x30] sm:$0xff] }
 0x3be   : > { %vm3010_vm3 = vweird.f32 %v4652_v37  ;;  %4022 = vmatpush.bf16.msra.mxu1 %v4431_v61  ;;  %4437 = vmatpush.bf16.msra.mxu2 %v4431_v61 }
 0x3bf   : > { %v2982_v50 = vsel %vm2981_vm1, %v4650_v59, %v2978_v20  ;;  %v3005_v29 = vmul.f32 %v4652_v37, %v3004_v38  ;;  %4653 = vrsqrt.f32 %v8933_v58  ;;  %v8941_v49 = vadd.f32 1e-06, %v2866_v9  ;;  %vm8962_vm4 = vmor %vm3009_vm2, %vm3010_vm3 }
 0x3c0   : > { %v3052_v42 = vmul.f32 %v2982_v50, %v8838_v44  ;;  %v4420_v63 = vld [vmem:[#allocation3 + $0x28] sm:$0xff]  ;;  %vm3019_vm5 = vweird.f32 %v8933_v58  ;;  %v3319_v20 = vmul.f32 %v3318_v53, %v8921_v0  ;;  %vm3301_vm1 = vweird.f32 %v8982_v27 }
 0x3c1   : > { %v3006_v51 = vmul.f32 0.5, %v3005_v29  ;;  %4655 = vrsqrt.f32 %v8941_v49  ;;  %4354 = vmatmul.msk.bf16.vlgmr.msra.gmra.mxu3 %vm492_vm0, %v4420_v63  ;;  %vm3039_vm7 = vweird.f32 %v8941_v49 }
 0x3c2   : > { %v3068_v13 = vpack.c.bf16 %v3052_v42, %v3052_v42  ;;  %v2847_v44 = vpop.xlane.xlu0 %2846  ;;  %v3329_v42 = vadd.f32 0.014752088, %v3328_v25  ;;  %v3320_v26 = vadd.f32 0.05243302, %v3319_v20  ;;  %v4427_v25 = vld [vmem:[%s11007_s24 + $0x10] sm:$0xff] }
 0x3c3   : > { %v3007_v24 = vsub.f32 1.5, %v3006_v51  ;;  %v2865_v8 = vmul.f32 %v2847_v44, %v7755_v30  ;;  %v3355_v30 = vmul.f32 2.1237322e-06, %v8945_v4 }
 0x3c4   : > { %3085 = vst.msk [vmem:[#allocation3 + $0x24] sm:$0xf] %vm3075_vm14, %v3068_v13  ;;  %v3282_v13 = vadd.f32 0.18741608, %v3281_v22  ;;  %v3330_v16 = vmul.f32 %v3329_v42, %v8921_v0 }
 0x3c5   : > { %v4654_v2 = vpop.eup %4653  ;;  %v3008_v59 = vmul.f32 %v4652_v37, %v3007_v24  ;;  %v8966_v47 = vadd.f32 1e-06, %v2865_v8  ;;  %v3356_v7 = vadd.f32 0.00028619796, %v3355_v30  ;;  %v3397_v8 = vmul.f32 %v3396_v15, %v8969_v46 }
 0x3c6   : > { %v3014_v1 = vmul.f32 %v4654_v2, %v8933_v58  ;;  %vm3020_vm6 = vweird.f32 %v4654_v2  ;;  %v3331_v60 = vadd.f32 0.112945676, %v3330_v16 }
 0x3c7   : > { %v3012_v33 = vsel %vm8962_vm4, %v4652_v37, %v3008_v59  ;;  %4657 = vrsqrt.f32 %v8966_v47  ;;  %v4656_v54 = vpop.eup %4655  ;;  %v3357_v21 = vmul.f32 %v3356_v7, %v8945_v4  ;;  %vm3021_vm9 = vmor %vm3019_vm5, %vm3020_vm6  ;;  %vm3029_vm11 = vweird.f32 %v8966_v47 }
 0x3c8   : > { %v3055_v45 = vmul.f32 %v3012_v33, %v8846_v31  ;;  %v3015_v39 = vmul.f32 %v4654_v2, %v3014_v1  ;;  %v3034_v35 = vmul.f32 %v4656_v54, %v8941_v49  ;;  %v4430_v31 = vld [vmem:[%s11007_s24 + $0x28] sm:$0xff]  ;;  %4659 = vrcp.f32 %v8982_v27 }
 0x3c9   : > { %4023 = vmatpush.bf16.msra.mxu1 %v4430_v31  ;;  %4438 = vmatpush.bf16.msra.mxu2 %v4430_v31  ;;  %vm3040_vm8 = vweird.f32 %v4656_v54  ;;  %v3358_v41 = vadd.f32 0.0036580483, %v3357_v21  ;;  %v3321_v1 = vmul.f32 %v3320_v26, %v8921_v0  ;;  %v3398_v33 = vadd.f32 0.0036580483, %v3397_v8  ;;  %v4425_v8 = vld [vmem:[%s11007_s24] sm:$0xff] }
 0x3ca   : > { %v3071_v36 = vpack.c.bf16 %v3055_v45, %v3055_v45  ;;  %v3016_v37 = vmul.f32 0.5, %v3015_v39  ;;  %v3035_v11 = vmul.f32 %v4656_v54, %v3034_v35  ;;  %vm9004_vm10 = vmor %vm3039_vm7, %vm3040_vm8  ;;  %v3332_v39 = vmul.f32 %v3331_v60, %v8921_v0 }
 0x3cb   : > { %v4419_v38 = vld [vmem:[#allocation3 + $0x20] sm:$0xff]  ;;  %v3359_v45 = vmul.f32 %v3358_v41, %v8945_v4 }
 0x3cc   : > { %3088 = vst.msk [vmem:[#allocation3 + $0x30] sm:$0xf] %vm3075_vm14, %v3071_v36  ;;  %v3017_v9 = vsub.f32 1.5, %v3016_v37  ;;  %v3036_v29 = vmul.f32 0.5, %v3035_v11  ;;  %4353 = vmatmul.msk.bf16.gmra.mxu0 %vm492_vm0, %v4419_v38  ;;  %v3333_v22 = vadd.f32 0.4994258, %v3332_v39 }
 0x3cd   : > { %v4658_v50 = vpop.eup %4657  ;;  %4024 = vmatpush.bf16.msra.mxu1 %v4429_v18  ;;  %4439 = vmatpush.bf16.msra.mxu2 %v4429_v18  ;;  %v3407_v11 = vadd.f32 0.001143296, %v3406_v28  ;;  %v3322_v38 = vadd.f32 0.18741608, %v3321_v1 }
 0x3ce   : > { %v3018_v63 = vmul.f32 %v4654_v2, %v3017_v9  ;;  %v3024_v19 = vmul.f32 %v4658_v50, %v8966_v47  ;;  %v3037_v51 = vsub.f32 1.5, %v3036_v29  ;;  %v9010_v6 = vpop.eup %4659  ;;  %vm3030_vm12 = vweird.f32 %v4658_v50 }
 0x3cf   : > { %v3297_v59 = vmul.f32 %v9010_v6, %v8982_v27  ;;  %vm9025_vm13 = vmor %vm3029_vm11, %vm3030_vm12  ;;  %v3360_v29 = vadd.f32 0.05243302, %v3359_v45  ;;  %v3334_v21 = vmul.f32 %v3333_v22, %v8921_v0  ;;  %vm3302_vm15 = vweird.f32 %v9010_v6 }
 0x3d0   : > { %v3022_v44 = vsel %vm3021_vm9, %v4654_v2, %v3018_v63  ;;  %v3025_v24 = vmul.f32 %v4658_v50, %v3024_v19  ;;  %v3038_v52 = vmul.f32 %v4656_v54, %v3037_v51  ;;  %v4428_v2 = vld [vmem:[%s11007_s24 + $0x18] sm:$0xff]  ;;  %v3307_v19 = vand.u32 2147483648, %v8982_v27  ;;  %vm9075_vm2 = vmor %vm3301_vm1, %vm3302_vm15 }
 0x3d1   : > { %v3056_v58 = vmul.f32 %v3022_v44, %v8857_v40  ;;  %4025 = vmatpush.bf16.msra.mxu1 %v4428_v2  ;;  %v3298_v47 = vsub.f32 1.0, %v3297_v59  ;;  %4440 = vmatpush.bf16.msra.mxu2 %v4428_v2  ;;  %v3408_v18 = vmul.f32 %v3407_v11, %v8969_v46  ;;  %v3323_v41 = vmul.f32 %v3322_v38, %v8921_v0 }
 0x3d2   : > { %v3026_v49 = vmul.f32 0.5, %v3025_v24  ;;  %v3042_v40 = vsel %vm9004_vm10, %v4656_v54, %v3038_v52  ;;  %v3367_v54 = vadd.f32 0.001143296, %v3366_v32  ;;  %v3305_v52 = vand.u32 2147483647, %v8982_v27 }
 0x3d3   : > { %v3072_v30 = vpack.c.bf16 %v3056_v58, %v3056_v58  ;;  %v3058_v61 = vmul.f32 %v3042_v40, %v8860_v62  ;;  %v3283_v62 = vmul.f32 %v3282_v13, %v8903_v12  ;;  %v3299_v37 = vmul.f32 %v9010_v6, %v3298_v47 }
 0x3d4   : > { %v3027_v57 = vsub.f32 1.5, %v3026_v49  ;;  %v3368_v31 = vmul.f32 %v3367_v54, %v8945_v4  ;;  %v3399_v12 = vmul.f32 %v3398_v33, %v8969_v46  ;;  %v9057_v13 = vadd.f32 1.0, %v3334_v21 }
 0x3d5   : > { %3089 = vst.msk [vmem:[#allocation3 + $0x34] sm:$0xf] %vm3075_vm14, %v3072_v30  ;;  %v3074_v35 = vpack.c.bf16 %v3058_v61, %v3058_v61  ;;  %4026 = vmatpush.bf16.msra.mxu1 %v4427_v25  ;;  %4441 = vmatpush.bf16.msra.mxu2 %v4427_v25  ;;  %v3409_v16 = vadd.f32 0.014752088, %v3408_v18  ;;  %v3284_v58 = vadd.f32 1.1283791, %v3283_v62  ;;  %v3361_v27 = vmul.f32 %v3360_v29, %v8945_v4 }
 0x3d6   : > { %v3028_v7 = vmul.f32 %v4658_v50, %v3027_v57  ;;  %v3211_v36 = vpop.f32.mrf.mxu0  ;;  %v3369_v42 = vadd.f32 0.014752088, %v3368_v31  ;;  %v3400_v44 = vadd.f32 0.05243302, %v3399_v12  ;;  %4661 = vrcp.f32 %v9057_v13 }
 0x3d7   : > { %3091 = vst.msk [vmem:[#allocation3 + $0x3c] sm:$0xf] %vm3075_vm14, %v3074_v35  ;;  %v9043_v9 = vadd.f32 %v8891_v43, %v3211_v36  ;;  %v3410_v59 = vmul.f32 %v3409_v16, %v8969_v46  ;;  %v3308_v40 = vor.u32 1.1754944e-38, %v3307_v19  ;;  %v3285_v53 = vmul.f32 %v3284_v58, %v8898_v23 }
 0x3d8   : > { %v3032_v20 = vsel %vm9025_vm13, %v4658_v50, %v3028_v7  ;;  %v4426_v50 = vld [vmem:[%s11007_s24 + $0x8] sm:$0xff]  ;;  %v3370_v26 = vmul.f32 %v3369_v42, %v8945_v4  ;;  %v3401_v1 = vmul.f32 %v3400_v44, %v8969_v46  ;;  %v3324_v45 = vadd.f32 1.1283791, %v3323_v41 }
 0x3d9   : > { %v3057_v15 = vmul.f32 %v3032_v20, %v8870_v55  ;;  %v9048_v63 = vmul.f32 0.70710677, %v9043_v9  ;;  %v3300_v55 = vadd.f32 %v9010_v6, %v3299_v37  ;;  %4027 = vmatpush.bf16.msra.mxu1 %v4426_v50  ;;  %4442 = vmatpush.bf16.msra.mxu2 %v4426_v50  ;;  %v3411_v33 = vadd.f32 0.112945676, %v3410_v59 }
 0x3da   : > { %v3371_v2 = vadd.f32 0.112945676, %v3370_v26  ;;  %v3362_v25 = vadd.f32 0.18741608, %v3361_v27  ;;  %v3402_v36 = vadd.f32 0.18741608, %v3401_v1  ;;  %v3325_v26 = vmul.f32 %v3324_v45, %v8910_v48 }
 0x3db   : > { %v3073_v51 = vpack.c.bf16 %v3057_v15, %v3057_v15  ;;  %v3433_v24 = vmul.f32 %v9048_v63, %v9048_v63  ;;  %v3304_v0 = vsel %vm9075_vm2, %v9010_v6, %v3300_v55  ;;  %v3412_v62 = vmul.f32 %v3411_v33, %v8969_v46 }
 0x3dc   : > { %v4421_v56 = vld [vmem:[#allocation3 + $0x30] sm:$0xff]  ;;  %v3372_v57 = vmul.f32 %v3371_v2, %v8945_v4  ;;  %v4662_v54 = vpop.eup %4661  ;;  %v3345_v15 = vand.u32 2147483647, %v9057_v13  ;;  %v3347_v29 = vand.u32 2147483648, %v9057_v13  ;;  %v3363_v44 = vmul.f32 %v3362_v25, %v8945_v4 }
 0x3dd   : > { %3090 = vst.msk [vmem:[#allocation3 + $0x38] sm:$0xf] %vm3075_vm14, %v3073_v51  ;;  %4355 = vmatmul.msk.bf16.gmra.mxu3 %vm492_vm0, %v4421_v56  ;;  %v9071_v32 = vmin.f32 %v3433_v24, 16.0  ;;  %4028 = vmatpush.bf16.msra.mxu1 %v4425_v8  ;;  %vm3306_vm14 = vcmp.eq.f32.partialorder %v3305_v52, 8.507059e+37  ;;  %v3337_v22 = vmul.f32 %v4662_v54, %v9057_v13  ;;  %v3413_v11 = vadd.f32 0.4994258, %v3412_v62 }
 0x3de   : > { %v3213_v30 = vpop.f32.mrf.mxu0  ;;  %4443 = vmatpush.bf16.msra.mxu2 %v4425_v8  ;;  %v3309_v39 = vsel %vm3306_vm14, %v3308_v40, %v3304_v0  ;;  %v3373_v35 = vadd.f32 0.4994258, %v3372_v57  ;;  %vm3342_vm3 = vweird.f32 %v4662_v54  ;;  %vm3341_vm4 = vweird.f32 %v9057_v13 }
 0x3df   : > { %v3435_v60 = vmul.f32 2.1237322e-06, %v9071_v32  ;;  %v9087_v61 = vadd.f32 %v8891_v43, %v3213_v30  ;;  %v3446_v47 = vmul.f32 3.8918573e-05, %v9071_v32  ;;  %v3310_v31 = vmul.f32 %v3309_v39, %v3285_v53  ;;  %vm3343_vm5 = vmor %vm3341_vm4, %vm3342_vm3 }
 0x3e0   : > { %v3374_v23 = vmul.f32 %v3373_v35, %v8945_v4  ;;  %v3338_v12 = vsub.f32 1.0, %v3337_v22  ;;  %v3414_v50 = vmul.f32 %v3413_v11, %v8969_v46  ;;  %v3348_v52 = vor.u32 1.1754944e-38, %v3347_v29 }
 0x3e1   : > { %v9093_v6 = vmul.f32 0.70710677, %v9087_v61  ;;  %v3436_v28 = vadd.f32 0.00028619796, %v3435_v60  ;;  %v3447_v7 = vadd.f32 0.001143296, %v3446_v47  ;;  %v3403_v2 = vmul.f32 %v3402_v36, %v8969_v46 }
 0x3e2   : > { %v9106_v42 = vadd.f32 1.0, %v3374_v23  ;;  %v3339_v51 = vmul.f32 %v4662_v54, %v3338_v12  ;;  %v4357_v56 = vclamps-f32 %v3310_v31, 1.0  ;;  %v9115_v16 = vadd.f32 1.0, %v3414_v50 }
 0x3e3   : > { %v3473_v37 = vmul.f32 %v9093_v6, %v9093_v6  ;;  %v3448_v20 = vmul.f32 %v3447_v7, %v9071_v32  ;;  %v3437_v21 = vmul.f32 %v3436_v28, %v9071_v32  ;;  %vm3346_vm6 = vcmp.eq.f32.partialorder %v3345_v15, 8.507059e+37 }
 0x3e4   : > { %4663 = vrcp.f32 %v9106_v42  ;;  %v3340_v8 = vadd.f32 %v4662_v54, %v3339_v51  ;;  %v4422_v48 = vld [vmem:[#allocation3 + $0x38] sm:$0xff]  ;;  %v3913_v27 = vadd.f32 1.0, %v4357_v56  ;;  %v3241_v30 = vmul.f32 0.5, %v8895_v5 }
 0x3e5   : > { %v9101_v38 = vmin.f32 %v3473_v37, 16.0  ;;  %v3449_v19 = vadd.f32 0.014752088, %v3448_v20  ;;  %v3438_v58 = vadd.f32 0.0036580483, %v3437_v21  ;;  %4665 = vrcp.f32 %v9115_v16 }
 0x3e6   : > { %v3344_v59 = vsel %vm3343_vm5, %v4662_v54, %v3340_v8  ;;  %v3242_v60 = vmul.f32 0.5, %v8906_v17  ;;  %v3364_v57 = vadd.f32 1.1283791, %v3363_v44  ;;  %v3404_v47 = vadd.f32 1.1283791, %v3403_v2 }
 0x3e7   : > { %v3475_v18 = vmul.f32 2.1237322e-06, %v9101_v38  ;;  %v3486_v55 = vmul.f32 3.8918573e-05, %v9101_v38  ;;  %v3450_v41 = vmul.f32 %v3449_v19, %v9071_v32  ;;  %v3349_v4 = vsel %vm3346_vm6, %v3348_v52, %v3344_v59 }
 0x3e8   : > { %v3350_v0 = vmul.f32 %v3349_v4, %v3325_v26  ;;  %v3439_v46 = vmul.f32 %v3438_v58, %v9071_v32  ;;  %v3387_v5 = vand.u32 2147483648, %v9106_v42  ;;  %v3929_v39 = vmul.f32 %v3913_v27, %v3241_v30 }
 0x3e9   : > { %v3476_v24 = vadd.f32 0.00028619796, %v3475_v18  ;;  %v3487_v49 = vadd.f32 0.001143296, %v3486_v55  ;;  %v3451_v40 = vadd.f32 0.112945676, %v3450_v41  ;;  %vm3381_vm7 = vweird.f32 %v9106_v42 }
 0x3ea   : > { %v4664_v1 = vpop.eup %4663  ;;  %v4358_v53 = vclamps-f32 %v3350_v0, 1.0  ;;  %v3385_v25 = vand.u32 2147483647, %v9106_v42  ;;  %v3440_v36 = vadd.f32 0.05243302, %v3439_v46  ;;  %v3388_v20 = vor.u32 1.1754944e-38, %v3387_v5 }
 0x3eb   : > { %v3477_v13 = vmul.f32 %v3476_v24, %v9101_v38  ;;  %v3488_v33 = vmul.f32 %v3487_v49, %v9101_v38  ;;  %v3377_v45 = vmul.f32 %v4664_v1, %v9106_v42  ;;  %v3452_v54 = vmul.f32 %v3451_v40, %v9071_v32  ;;  %v4666_v35 = vpop.eup %4665 }
 0x3ec   : > { %v3914_v17 = vadd.f32 1.0, %v4358_v53  ;;  %v3417_v37 = vmul.f32 %v4666_v35, %v9115_v16  ;;  %vm3382_vm8 = vweird.f32 %v4664_v1  ;;  %v3425_v15 = vand.u32 2147483647, %v9115_v16 }
 0x3ed   : > { %4356 = vmatmul.msk.bf16.gmra.mxu3 %vm492_vm0, %v4422_v48  ;;  %v3489_v28 = vadd.f32 0.014752088, %v3488_v33  ;;  %v3478_v62 = vadd.f32 0.0036580483, %v3477_v13  ;;  %v3378_v7 = vsub.f32 1.0, %v3377_v45  ;;  %v3427_v51 = vand.u32 2147483648, %v9115_v16  ;;  %vm3383_vm9 = vmor %vm3381_vm7, %vm3382_vm8 }
 0x3ee   : > { %v3453_v22 = vadd.f32 0.4994258, %v3452_v54  ;;  %v3930_v23 = vmul.f32 %v3914_v17, %v3242_v60  ;;  %v3418_v12 = vsub.f32 1.0, %v3417_v37  ;;  %vm3422_vm10 = vweird.f32 %v4666_v35 }
 0x3ef   : > { %v3490_v31 = vmul.f32 %v3489_v28, %v9101_v38  ;;  %v3379_v11 = vmul.f32 %v4664_v1, %v3378_v7  ;;  %v3479_v50 = vmul.f32 %v3478_v62, %v9101_v38  ;;  %v3365_v56 = vmul.f32 %v3364_v57, %v8924_v10 }
 0x3f0   : > { %v3454_v29 = vmul.f32 %v3453_v22, %v9071_v32  ;;  %v3945_v19 = vpack.c.bf16 %v3930_v23, %v3929_v39  ;;  %v3419_v55 = vmul.f32 %v4666_v35, %v3418_v12  ;;  %vm3386_vm11 = vcmp.eq.f32.partialorder %v3385_v25, 8.507059e+37 }
 0x3f1   : > { %v3491_v21 = vadd.f32 0.112945676, %v3490_v31  ;;  %v3380_v18 = vadd.f32 %v4664_v1, %v3379_v11  ;;  %vm3421_vm12 = vweird.f32 %v9115_v16  ;;  %v3405_v52 = vmul.f32 %v3404_v47, %v8948_v14 }
 0x3f2   : > { %v3455_v26 = vadd.f32 1.0, %v3454_v29  ;;  %4029 = vmatmul.bf16.vlgmr.msra.gmra.mxu1 %v3945_v19  ;;  %v3420_v58 = vadd.f32 %v4666_v35, %v3419_v55  ;;  %v3441_v42 = vmul.f32 %v3440_v36, %v9071_v32  ;;  %vm3423_vm13 = vmor %vm3421_vm12, %vm3422_vm10  ;;  %v3428_v49 = vor.u32 1.1754944e-38, %v3427_v51 }
 0x3f3   : > { %v3492_v44 = vmul.f32 %v3491_v21, %v9101_v38  ;;  %v3384_v24 = vsel %vm3383_vm9, %v4664_v1, %v3380_v18  ;;  %v3480_v2 = vadd.f32 0.05243302, %v3479_v50  ;;  %vm3426_vm15 = vcmp.eq.f32.partialorder %v3425_v15, 8.507059e+37 }
 0x3f4   : > { %v3389_v8 = vsel %vm3386_vm11, %v3388_v20, %v3384_v24  ;;  %4667 = vrcp.f32 %v3455_v26  ;;  %v3424_v48 = vsel %vm3423_vm13, %v4666_v35, %v3420_v58  ;;  %v3442_v13 = vadd.f32 0.18741608, %v3441_v42 }
 0x3f5   : > { %v3390_v41 = vmul.f32 %v3389_v8, %v3365_v56  ;;  %v3493_v59 = vadd.f32 0.4994258, %v3492_v44  ;;  %v3429_v4 = vsel %vm3426_vm15, %v3428_v49, %v3424_v48  ;;  %v3481_v16 = vmul.f32 %v3480_v2, %v9101_v38 }
 0x3f6   : > { %v3430_v27 = vmul.f32 %v3429_v4, %v3405_v52  ;;  %v3243_v57 = vmul.f32 0.5, %v8918_v3  ;;  %v3244_v46 = vmul.f32 0.5, %v8936_v34  ;;  %v3443_v47 = vmul.f32 %v3442_v13, %v9071_v32 }
 0x3f7   : > { %v4359_v10 = vclamps-f32 %v3390_v41, 1.0  ;;  %v3494_v30 = vmul.f32 %v3493_v59, %v9101_v38  ;;  %v3482_v45 = vadd.f32 0.18741608, %v3481_v16  ;;  %v3467_v54 = vand.u32 2147483648, %v3455_v26 }
 0x3f8   : > { %v4360_v40 = vclamps-f32 %v3430_v27, 1.0  ;;  %v3465_v35 = vand.u32 2147483647, %v3455_v26  ;;  %v3444_v17 = vadd.f32 1.1283791, %v3443_v47  ;;  %vm3461_vm2 = vweird.f32 %v3455_v26 }
 0x3f9   : > { %v3915_v14 = vadd.f32 1.0, %v4359_v10  ;;  %v3495_v1 = vadd.f32 1.0, %v3494_v30  ;;  %v3483_v3 = vmul.f32 %v3482_v45, %v9101_v38  ;;  %v3468_v34 = vor.u32 1.1754944e-38, %v3467_v54 }
 0x3fa   : > { %v4668_v0 = vpop.eup %4667  ;;  %v3916_v33 = vadd.f32 1.0, %v4360_v40  ;;  %vm3466_vm3 = vcmp.eq.f32.partialorder %v3465_v35, 8.507059e+37  ;;  %v3445_v22 = vmul.f32 %v3444_v17, %v9048_v63  ;;  %v3246_v44 = vmul.f32 0.5, %v9087_v61 }
 0x3fb   : > { %v3457_v60 = vmul.f32 %v4668_v0, %v3455_v26  ;;  %4669 = vrcp.f32 %v3495_v1  ;;  %v3931_v5 = vmul.f32 %v3915_v14, %v3243_v57  ;;  %vm3462_vm1 = vweird.f32 %v4668_v0 }
 0x3fc   : > { %v3932_v39 = vmul.f32 %v3916_v33, %v3244_v46  ;;  %vm3463_vm14 = vmor %vm3461_vm2, %vm3462_vm1  ;;  %v3484_v23 = vadd.f32 1.1283791, %v3483_v3  ;;  %v3507_v11 = vand.u32 2147483648, %v3495_v1  ;;  %v3505_v15 = vand.u32 2147483647, %v3495_v1 }
 0x3fd   : > { %v3458_v53 = vsub.f32 1.0, %v3457_v60  ;;  %vm3501_vm5 = vweird.f32 %v3495_v1  ;;  %v3245_v26 = vmul.f32 0.5, %v9043_v9 }
 0x3fe   : > { %v3946_v62 = vpack.c.bf16 %v3932_v39, %v3931_v5  ;;  %v3508_v38 = vor.u32 1.1754944e-38, %v3507_v11  ;;  %v3485_v21 = vmul.f32 %v3484_v23, %v9093_v6  ;;  %vm3506_vm7 = vcmp.eq.f32.partialorder %v3505_v15, 8.507059e+37 }
 0x3ff   : > { %v3459_v28 = vmul.f32 %v4668_v0, %v3458_v53 }
 0x401   : > { %v3460_v7 = vadd.f32 %v4668_v0, %v3459_v28  ;;  %v4670_v25 = vpop.eup %4669 }
 0x402   : > { %4034 = vmatmul.bf16.gmra.mxu1 %v3946_v62  ;;  %v3497_v32 = vmul.f32 %v4670_v25, %v3495_v1  ;;  %vm3502_vm4 = vweird.f32 %v4670_v25 }
 0x403   : > { %v3464_v36 = vsel %vm3463_vm14, %v4668_v0, %v3460_v7  ;;  %vm3503_vm6 = vmor %vm3501_vm5, %vm3502_vm4 }
 0x404   : > { %v3469_v37 = vsel %vm3466_vm3, %v3468_v34, %v3464_v36  ;;  %v3498_v31 = vsub.f32 1.0, %v3497_v32 }
 0x405   : > { %v3470_v20 = vmul.f32 %v3469_v37, %v3445_v22 }
 0x406   : > { %v3499_v12 = vmul.f32 %v4670_v25, %v3498_v31  ;;  %v3216_v52 = vpop.f32.mrf.mxu0 }
 0x407   : > { %v4361_v50 = vclamps-f32 %v3470_v20, 1.0  ;;  %v9155_v42 = vadd.f32 %v8891_v43, %v3216_v52 }
 0x408   : > { %v3500_v29 = vadd.f32 %v4670_v25, %v3499_v12 }
 0x409   : > { %v3917_v63 = vadd.f32 1.0, %v4361_v50  ;;  %v3263_v6 = vmul.f32 0.70710677, %v9155_v42 }
 0x40a   : > { %v3504_v19 = vsel %vm3503_vm6, %v4670_v25, %v3500_v29 }
 0x40b   : > { %v3509_v18 = vsel %vm3506_vm7, %v3508_v38, %v3504_v19  ;;  %v3933_v24 = vmul.f32 %v3917_v63, %v3245_v26  ;;  %v3513_v41 = vmul.f32 %v3263_v6, %v3263_v6 }
 0x40c   : > { %v3510_v51 = vmul.f32 %v3509_v18, %v3485_v21 }
 0x40d   : > { %v3514_v49 = vmin.f32 %v3513_v41, 16.0 }
 0x40e   : > { %v4362_v55 = vclamps-f32 %v3510_v51, 1.0  ;;  %v3218_v2 = vpop.f32.mrf.mxu0 }
 0x40f   : > { %v3515_v48 = vmul.f32 2.1237322e-06, %v3514_v49  ;;  %v9159_v59 = vadd.f32 %v8891_v43, %v3218_v2  ;;  %v3526_v9 = vmul.f32 3.8918573e-05, %v3514_v49 }
 0x410   : > { %v3918_v56 = vadd.f32 1.0, %v4362_v55 }
 0x411   : > { %v3516_v61 = vadd.f32 0.00028619796, %v3515_v48  ;;  %v9162_v10 = vmul.f32 0.70710677, %v9159_v59  ;;  %v3527_v4 = vadd.f32 0.001143296, %v3526_v9 }
 0x412   : > { %v3934_v8 = vmul.f32 %v3918_v56, %v3246_v44 }
 0x413   : > { %v3517_v27 = vmul.f32 %v3516_v61, %v3514_v49  ;;  %v3553_v30 = vmul.f32 %v9162_v10, %v9162_v10  ;;  %v3528_v13 = vmul.f32 %v3527_v4, %v3514_v49 }
 0x414   : > { %v3947_v58 = vpack.c.bf16 %v3934_v8, %v3933_v24 }
 0x415   : > { %v3554_v0 = vmin.f32 %v3553_v30, 16.0  ;;  %v3518_v16 = vadd.f32 0.0036580483, %v3517_v27  ;;  %v3529_v40 = vadd.f32 0.014752088, %v3528_v13 }
 0x416   : > { %4039 = vmatmul.bf16.gmra.mxu1 %v3947_v58 }
 0x417   : > { %v3555_v14 = vmul.f32 2.1237322e-06, %v3554_v0  ;;  %v3566_v1 = vmul.f32 3.8918573e-05, %v3554_v0  ;;  %v3530_v60 = vmul.f32 %v3529_v40, %v3514_v49  ;;  %v3519_v33 = vmul.f32 %v3518_v16, %v3514_v49 }
 0x419   : > { %v3556_v57 = vadd.f32 0.00028619796, %v3555_v14  ;;  %v3567_v46 = vadd.f32 0.001143296, %v3566_v1  ;;  %v3531_v47 = vadd.f32 0.112945676, %v3530_v60 }
 0x41a   : > { %v3520_v28 = vadd.f32 0.05243302, %v3519_v33 }
 0x41b   : > { %v3557_v53 = vmul.f32 %v3556_v57, %v3554_v0  ;;  %v3568_v45 = vmul.f32 %v3567_v46, %v3554_v0  ;;  %v3532_v5 = vmul.f32 %v3531_v47, %v3514_v49 }
 0x41c   : > { %v3521_v3 = vmul.f32 %v3520_v28, %v3514_v49 }
 0x41d   : > { %v3558_v39 = vadd.f32 0.0036580483, %v3557_v53  ;;  %v3569_v54 = vadd.f32 0.014752088, %v3568_v45  ;;  %v3533_v35 = vadd.f32 0.4994258, %v3532_v5 }
 0x41e   : > { %v3522_v22 = vadd.f32 0.18741608, %v3521_v3 }
 0x41f   : > { %v3559_v62 = vmul.f32 %v3558_v39, %v3554_v0  ;;  %v3570_v17 = vmul.f32 %v3569_v54, %v3554_v0  ;;  %v3534_v7 = vmul.f32 %v3533_v35, %v3514_v49 }
 0x420   : > { %v3523_v12 = vmul.f32 %v3522_v22, %v3514_v49 }
 0x421   : > { %v3571_v25 = vadd.f32 0.112945676, %v3570_v17  ;;  %v3535_v34 = vadd.f32 1.0, %v3534_v7  ;;  %v3560_v36 = vadd.f32 0.05243302, %v3559_v62 }
 0x422   : > { %v3524_v50 = vadd.f32 1.1283791, %v3523_v12  ;;  %v9201_v62 = vld [vmem:[%s11005_s1] ss:$0 sm:$0xff]  ;;  %v3248_v12 = vmul.f32 0.5, %v9159_v59 }
 0x423   : > { %v3572_v32 = vmul.f32 %v3571_v25, %v3554_v0  ;;  %4671 = vrcp.f32 %v3535_v34  ;;  %v3561_v31 = vmul.f32 %v3560_v36, %v3554_v0  ;;  %v3547_v18 = vand.u32 2147483648, %v3535_v34 }
 0x424   : > { %v3545_v63 = vand.u32 2147483647, %v3535_v34  ;;  %vm3541_vm9 = vweird.f32 %v3535_v34  ;;  %v3525_v24 = vmul.f32 %v3524_v50, %v3263_v6  ;;  %v3247_v36 = vmul.f32 0.5, %v9155_v42 }
 0x425   : > { %v3573_v37 = vadd.f32 0.4994258, %v3572_v32  ;;  %v3562_v15 = vadd.f32 0.18741608, %v3561_v31  ;;  %v3548_v52 = vor.u32 1.1754944e-38, %v3547_v18 }
 0x426   : > { %vm3546_vm11 = vcmp.eq.f32.partialorder %v3545_v63, 8.507059e+37 }
 0x427   : > { %v3574_v23 = vmul.f32 %v3573_v37, %v3554_v0  ;;  %v3563_v51 = vmul.f32 %v3562_v15, %v3554_v0 }
 0x429   : > { %v3575_v11 = vadd.f32 1.0, %v3574_v23  ;;  %v4672_v20 = vpop.eup %4671  ;;  %v3564_v49 = vadd.f32 1.1283791, %v3563_v51 }
 0x42a   : > { %v3537_v29 = vmul.f32 %v4672_v20, %v3535_v34  ;;  %vm3542_vm8 = vweird.f32 %v4672_v20 }
 0x42b   : > { %4673 = vrcp.f32 %v3575_v11  ;;  %vm3543_vm10 = vmor %vm3541_vm9, %vm3542_vm8  ;;  %v3585_v27 = vand.u32 2147483647, %v3575_v11  ;;  %v3587_v0 = vand.u32 2147483648, %v3575_v11  ;;  %vm3581_vm13 = vweird.f32 %v3575_v11 }
 0x42c   : > { %v3538_v21 = vsub.f32 1.0, %v3537_v29  ;;  %v3565_v47 = vmul.f32 %v3564_v49, %v9162_v10 }
 0x42d   : > { %v3588_v45 = vor.u32 1.1754944e-38, %v3587_v0  ;;  %vm3586_vm1 = vcmp.eq.f32.partialorder %v3585_v27, 8.507059e+37 }
 0x42e   : > { %v3539_v55 = vmul.f32 %v4672_v20, %v3538_v21 }
 0x430   : > { %v3540_v56 = vadd.f32 %v4672_v20, %v3539_v55 }
 0x431   : > { %v4674_v44 = vpop.eup %4673 }
 0x432   : > { %v3577_v41 = vmul.f32 %v4674_v44, %v3575_v11  ;;  %v3544_v48 = vsel %vm3543_vm10, %v4672_v20, %v3540_v56  ;;  %vm3582_vm12 = vweird.f32 %v4674_v44 }
 0x433   : > { %v3549_v61 = vsel %vm3546_vm11, %v3548_v52, %v3544_v48  ;;  %vm3583_vm15 = vmor %vm3581_vm13, %vm3582_vm12 }
 0x434   : > { %v3578_v4 = vsub.f32 1.0, %v3577_v41  ;;  %v3550_v13 = vmul.f32 %v3549_v61, %v3525_v24 }
 0x436   : > { %v3579_v14 = vmul.f32 %v4674_v44, %v3578_v4  ;;  %v4363_v54 = vclamps-f32 %v3550_v13, 1.0 }
 0x438   : > { %v3580_v33 = vadd.f32 %v4674_v44, %v3579_v14  ;;  %v3919_v11 = vadd.f32 1.0, %v4363_v54 }
 0x43a   : > { %v3584_v28 = vsel %vm3583_vm15, %v4674_v44, %v3580_v33  ;;  %v3935_v56 = vmul.f32 %v3919_v11, %v3247_v36 }
 0x43b   : > { %v3589_v17 = vsel %vm3586_vm1, %v3588_v45, %v3584_v28 }
 0x43c   : > { %v3590_v3 = vmul.f32 %v3589_v17, %v3565_v47 }
 0x43e   : > { %v4364_v23 = vclamps-f32 %v3590_v3, 1.0 }
 0x440   : > { %v3920_v50 = vadd.f32 1.0, %v4364_v23 }
 0x442   : > { %v3936_v59 = vmul.f32 %v3920_v50, %v3248_v12 }
 0x444   : > { %v3226_v38 = vpop.f32.mrf.mxu3  ;;  %v3948_v61 = vpack.c.bf16 %v3936_v59, %v3935_v56 }
 0x445   : > { %v9167_v19 = vadd.f32 %v8891_v43, %v3226_v38 }
 0x446   : > { %4044 = vmatmul.bf16.gmra.mxu1 %v3948_v61 }
 0x447   : > { %v9170_v26 = vmul.f32 0.70710677, %v9167_v19 }
 0x449   : > { %v3221_v8 = vpop.f32.mrf.mxu0  ;;  %v3673_v58 = vmul.f32 %v9170_v26, %v9170_v26 }
 0x44a   : > { %v9175_v2 = vadd.f32 %v8891_v43, %v3221_v8 }
 0x44b   : > { %v9177_v9 = vmin.f32 %v3673_v58, 16.0 }
 0x44c   : > { %v9180_v6 = vmul.f32 0.70710677, %v9175_v2  ;;  %v3228_v30 = vpop.f32.mrf.mxu3 }
 0x44d   : > { %v3675_v16 = vmul.f32 2.1237322e-06, %v9177_v9  ;;  %v9184_v40 = vadd.f32 %v8891_v43, %v3228_v30  ;;  %v3686_v1 = vmul.f32 3.8918573e-05, %v9177_v9 }
 0x44e   : > { %v3593_v60 = vmul.f32 %v9180_v6, %v9180_v6 }
 0x44f   : > { %v3676_v57 = vadd.f32 0.00028619796, %v3675_v16  ;;  %v9190_v46 = vmul.f32 0.70710677, %v9184_v40  ;;  %v3687_v43 = vadd.f32 0.001143296, %v3686_v1 }
 0x450   : > { %v9193_v53 = vmin.f32 %v3593_v60, 16.0 }
 0x451   : > { %v3223_v5 = vpop.f32.mrf.mxu0  ;;  %v3713_v39 = vmul.f32 %v9190_v46, %v9190_v46  ;;  %v3677_v7 = vmul.f32 %v3676_v57, %v9177_v9  ;;  %v3688_v22 = vmul.f32 %v3687_v43, %v9177_v9 }
 0x452   : > { %v3595_v35 = vmul.f32 2.1237322e-06, %v9193_v53  ;;  %v9204_v10 = vadd.f32 %v9201_v62, %v3223_v5  ;;  %v3606_v34 = vmul.f32 3.8918573e-05, %v9193_v53 }
 0x453   : > { %v9207_v25 = vmin.f32 %v3713_v39, 16.0  ;;  %v3689_v38 = vadd.f32 0.014752088, %v3688_v22  ;;  %v3678_v42 = vadd.f32 0.0036580483, %v3677_v7 }
 0x454   : > { %v3596_v32 = vadd.f32 0.00028619796, %v3595_v35  ;;  %v9212_v37 = vmul.f32 0.70710677, %v9204_v10  ;;  %v3607_v20 = vadd.f32 0.001143296, %v3606_v34 }
 0x455   : > { %v3715_v31 = vmul.f32 2.1237322e-06, %v9207_v25  ;;  %v3690_v63 = vmul.f32 %v3689_v38, %v9177_v9  ;;  %v3679_v49 = vmul.f32 %v3678_v42, %v9177_v9  ;;  %v3726_v14 = vmul.f32 3.8918573e-05, %v9207_v25 }
 0x456   : > { %v3597_v15 = vmul.f32 %v3596_v32, %v9193_v53  ;;  %v3633_v29 = vmul.f32 %v9212_v37, %v9212_v37  ;;  %v3608_v18 = vmul.f32 %v3607_v20, %v9193_v53 }
 0x457   : > { %v3716_v21 = vadd.f32 0.00028619796, %v3715_v31  ;;  %v3691_v41 = vadd.f32 0.112945676, %v3690_v63  ;;  %v3680_v33 = vadd.f32 0.05243302, %v3679_v49 }
 0x458   : > { %v3598_v51 = vadd.f32 0.0036580483, %v3597_v15  ;;  %v9221_v55 = vmin.f32 %v3633_v29, 16.0  ;;  %v3609_v24 = vadd.f32 0.014752088, %v3608_v18 }
 0x459   : > { %v3717_v44 = vmul.f32 %v3716_v21, %v9207_v25  ;;  %v3692_v0 = vmul.f32 %v3691_v41, %v9177_v9  ;;  %v3727_v7 = vadd.f32 0.001143296, %v3726_v14  ;;  %v3681_v11 = vmul.f32 %v3680_v33, %v9177_v9 }
 0x45a   : > { %v3599_v8 = vmul.f32 %v3598_v51, %v9193_v53  ;;  %v3635_v58 = vmul.f32 2.1237322e-06, %v9221_v55  ;;  %v3646_v52 = vmul.f32 3.8918573e-05, %v9221_v55  ;;  %v3610_v4 = vmul.f32 %v3609_v24, %v9193_v53 }
 0x45b   : > { %v3718_v48 = vadd.f32 0.0036580483, %v3717_v44  ;;  %v3693_v57 = vadd.f32 0.4994258, %v3692_v0  ;;  %v3728_v15 = vmul.f32 %v3727_v7, %v9207_v25  ;;  %v3682_v18 = vadd.f32 0.18741608, %v3681_v11 }
 0x45c   : > { %v3600_v27 = vadd.f32 0.05243302, %v3599_v8  ;;  %v3636_v30 = vadd.f32 0.00028619796, %v3635_v58  ;;  %v3647_v13 = vadd.f32 0.001143296, %v3646_v52 }
 0x45d   : > { %v3611_v16 = vadd.f32 0.112945676, %v3610_v4  ;;  %v3719_v47 = vmul.f32 %v3718_v48, %v9207_v25  ;;  %v3694_v28 = vmul.f32 %v3693_v57, %v9177_v9  ;;  %v3729_v56 = vadd.f32 0.014752088, %v3728_v15 }
 0x45e   : > { %v3637_v1 = vmul.f32 %v3636_v30, %v9221_v55  ;;  %v3648_v60 = vmul.f32 %v3647_v13, %v9221_v55  ;;  %v3601_v43 = vmul.f32 %v3600_v27, %v9193_v53  ;;  %v3683_v49 = vmul.f32 %v3682_v18, %v9177_v9 }
 0x45f   : > { %v3612_v45 = vmul.f32 %v3611_v16, %v9193_v53  ;;  %v9243_v36 = vadd.f32 1.0, %v3694_v28  ;;  %v3720_v32 = vadd.f32 0.05243302, %v3719_v47  ;;  %v3730_v30 = vmul.f32 %v3729_v56, %v9207_v25 }
 0x460   : > { %v3638_v5 = vadd.f32 0.0036580483, %v3637_v1  ;;  %v3231_v39 = vpop.f32.mrf.mxu3  ;;  %v3649_v54 = vadd.f32 0.014752088, %v3648_v60  ;;  %v3602_v23 = vadd.f32 0.18741608, %v3601_v43 }
 0x461   : > { %v9239_v35 = vadd.f32 %v9201_v62, %v3231_v39  ;;  %v3613_v17 = vadd.f32 0.4994258, %v3612_v45  ;;  %4675 = vrcp.f32 %v9243_v36  ;;  %v3721_v42 = vmul.f32 %v3720_v32, %v9207_v25  ;;  %v9288_v43 = vld [vmem:[%s11016_s15] ss:$0 sm:$0xff]  ;;  %s4824_s15 = sshra.s32 %s4137_s27, 4  ;;  %s4825_s15 = int_to_ptr.hbm [resolvable:$true] %s4824_s15 }
 0x462   : > { %v3639_v3 = vmul.f32 %v3638_v5, %v9221_v55  ;;  %v3650_v34 = vmul.f32 %v3649_v54, %v9221_v55  ;;  %v3603_v50 = vmul.f32 %v3602_v23, %v9193_v53  ;;  %v9280_v9 = vadd.f32 1.1283791, %v3683_v49  ;;  %s4826_s6 = scalar_lea.hbm %s4825_s15, 128  ;;  %p4831_p4 = scmp.lt.s32.totalorder %s4825_s15, %s11027_s5 }
 0x463   : > { %v9246_v22 = vmul.f32 0.70710677, %v9239_v35  ;;  %v3614_v31 = vmul.f32 %v3613_v17, %v9193_v53  ;;  %v3722_v8 = vadd.f32 0.18741608, %v3721_v42  ;;  %v3731_v39 = vadd.f32 0.112945676, %v3730_v30  ;;  %p4827_p11 = scmp.ne.s32.totalorder %s4825_s15, %s4826_s6 }
 0x464   : > { %v3651_v20 = vadd.f32 0.112945676, %v3650_v34  ;;  %v3640_v29 = vadd.f32 0.05243302, %v3639_v3  ;;  %v3604_v53 = vadd.f32 1.1283791, %v3603_v50  ;;  %vm3701_vm4 = vweird.f32 %v9243_v36 }
 0x465   : > { %v3615_v12 = vadd.f32 1.0, %v3614_v31  ;;  %v3753_v21 = vmul.f32 %v9246_v22, %v9246_v22  ;;  %v3723_v16 = vmul.f32 %v3722_v8, %v9207_v25  ;;  %v3705_v17 = vand.u32 2147483647, %v9243_v36  ;;  %v4070_v31 = vld [vmem:[%s5271_s0] sm:$0xff]  ;;  %p4828_p5 = pnand %p4827_p11, %p5207_p12 }
 0x466   : > { %v3652_v38 = vmul.f32 %v3651_v20, %v9221_v55  ;;  %v3641_v24 = vmul.f32 %v3640_v29, %v9221_v55  ;;  %v3605_v47 = vmul.f32 %v3604_v53, %v9180_v6  ;;  %v3707_v11 = vand.u32 2147483648, %v9243_v36 }
 0x467   : > { %4677 = vrcp.f32 %v3615_v12  ;;  %v9260_v59 = vpop.eup %4675  ;;  %v9263_v58 = vmin.f32 %v3753_v21, 16.0  ;;  %v3625_v1 = vand.u32 2147483647, %v3615_v12  ;;  %v3627_v33 = vand.u32 2147483648, %v3615_v12  ;;  %p4829_p3 = pneg %p4828_p5 }
 0x468   : > { %v3233_v51 = vpop.f32.mrf.mxu3  ;;  %v3653_v44 = vadd.f32 0.4994258, %v3652_v38  ;;  %v3697_v27 = vmul.f32 %v9260_v59, %v9243_v36  ;;  %v3642_v13 = vadd.f32 0.18741608, %v3641_v24  ;;  %v9292_v7 = vadd.f32 1.1283791, %v3723_v16 }
 0x469   : > { %v9258_v63 = vadd.f32 %v9201_v62, %v3233_v51  ;;  %v3755_v14 = vmul.f32 2.1237322e-06, %v9263_v58  ;;  %vm3621_vm14 = vweird.f32 %v3615_v12  ;;  %vm9294_vm3 = vcmp.eq.f32.partialorder %v3625_v1, 8.507059e+37 }
 0x46a   : > { %v3654_v41 = vmul.f32 %v3653_v44, %v9221_v55  ;;  %v3698_v5 = vsub.f32 1.0, %v3697_v27  ;;  %v3643_v54 = vmul.f32 %v3642_v13, %v9221_v55  ;;  %v3628_v23 = vor.u32 1.1754944e-38, %v3627_v33 }
 0x46b   : > { %v9266_v52 = vmul.f32 0.70710677, %v9258_v63  ;;  %v3756_v3 = vadd.f32 0.00028619796, %v3755_v14  ;;  %v3732_v38 = vmul.f32 %v3731_v39, %v9207_v25  ;;  %vm3702_vm6 = vweird.f32 %v9260_v59 }
 0x46c   : > { %v9272_v4 = vadd.f32 1.0, %v3654_v41  ;;  %v3699_v29 = vmul.f32 %v9260_v59, %v3698_v5  ;;  %v3644_v42 = vadd.f32 1.1283791, %v3643_v54  ;;  %v3708_v49 = vor.u32 1.1754944e-38, %v3707_v11  ;;  %vm9346_vm10 = vmor %vm3701_vm4, %vm3702_vm6 }
 0x46d   : > { %v4678_v48 = vpop.eup %4677  ;;  %v3793_v61 = vmul.f32 %v9266_v52, %v9266_v52  ;;  %v3757_v18 = vmul.f32 %v3756_v3, %v9263_v58  ;;  %v3733_v30 = vadd.f32 0.4994258, %v3732_v38  ;;  %vm3706_vm12 = vcmp.eq.f32.partialorder %v3705_v17, 8.507059e+37 }
 0x46e   : > { %v3617_v0 = vmul.f32 %v4678_v48, %v3615_v12  ;;  %4679 = vrcp.f32 %v9272_v4  ;;  %vm3622_vm2 = vweird.f32 %v4678_v48  ;;  %v3665_v56 = vand.u32 2147483647, %v9272_v4 }
 0x46f   : > { %v9283_v45 = vmin.f32 %v3793_v61, 16.0  ;;  %v4030_v32 = vpop.f32.mrf.mxu1  ;;  %vm3623_vm5 = vmor %vm3621_vm14, %vm3622_vm2  ;;  %v3667_v53 = vand.u32 2147483648, %v9272_v4  ;;  %v3700_v27 = vadd.f32 %v9260_v59, %v3699_v29  ;;  %v3645_v13 = vmul.f32 %v3644_v42, %v9212_v37  ;;  %v4071_v37 = vld [vmem:[%s5271_s0 + $0x8] sm:$0xff] }
 0x470   : > { %v3236_v60 = vpop.f32.mrf.mxu3  ;;  %v3618_v57 = vsub.f32 1.0, %v3617_v0  ;;  %v4031_v12 = vadd.f32 %v9288_v43, %v4030_v32  ;;  %v3758_v14 = vadd.f32 0.0036580483, %v3757_v18  ;;  %vm3661_vm8 = vweird.f32 %v9272_v4 }
 0x471   : > { %v9300_v34 = vadd.f32 %v9201_v62, %v3236_v60  ;;  %v3795_v15 = vmul.f32 2.1237322e-06, %v9283_v45  ;;  %vm9331_vm9 = vcmp.eq.f32.partialorder %v3665_v56, 8.507059e+37  ;;  %v3734_v1 = vmul.f32 %v3733_v30, %v9207_v25 }
 0x472   : > { %v3619_v28 = vmul.f32 %v4678_v48, %v3618_v57  ;;  %v4086_v51 = vadd.f32 %v4070_v31, %v4031_v12  ;;  %v3668_v5 = vor.u32 1.1754944e-38, %v3667_v53  ;;  %v3704_v54 = vsel %vm9346_vm10, %v9260_v59, %v3700_v27 }
 0x473   : > { %v9316_v24 = vmul.f32 0.70710677, %v9300_v34  ;;  %v3766_v31 = vmul.f32 3.8918573e-05, %v9263_v58  ;;  %v3759_v59 = vmul.f32 %v3758_v14, %v9263_v58  ;;  %v3709_v12 = vsel %vm3706_vm12, %v3708_v49, %v3704_v54 }
 0x474   : > { %v3620_v55 = vadd.f32 %v4678_v48, %v3619_v28  ;;  %v4680_v20 = vpop.eup %4679  ;;  %4102 = vst.msk [vmem:[%s9324_s9] sm:$0xff] %vm492_vm0, %v4086_v51  ;;  %v9355_v28 = vadd.f32 1.0, %v3734_v1  ;;  %v3725_v18 = vmul.f32 %v9292_v7, %v9190_v46 }
 0x475   : > { %v3657_v50 = vmul.f32 %v4680_v20, %v9272_v4  ;;  %vm3662_vm7 = vweird.f32 %v4680_v20  ;;  %v3833_v60 = vmul.f32 %v9316_v24, %v9316_v24  ;;  %v3767_v17 = vadd.f32 0.001143296, %v3766_v31 }
 0x476   : > { %v3624_v21 = vsel %vm3623_vm5, %v4678_v48, %v3620_v55  ;;  %v3796_v48 = vadd.f32 0.00028619796, %v3795_v15  ;;  %vm3663_vm11 = vmor %vm3661_vm8, %vm3662_vm7  ;;  %4681 = vrcp.f32 %v9355_v28  ;;  %v3745_v54 = vand.u32 2147483647, %v9355_v28 }
 0x477   : > { %v3629_v44 = vsel %vm9294_vm3, %v3628_v23, %v3624_v21  ;;  %v3658_v41 = vsub.f32 1.0, %v3657_v50  ;;  %v4032_v33 = vpop.f32.mrf.mxu1  ;;  %v9366_v11 = vmin.f32 %v3833_v60, 16.0  ;;  %v3249_v21 = vmul.f32 0.5, %v9175_v2 }
 0x478   : > { %v3238_v8 = vpop.f32.mrf.mxu3  ;;  %v3630_v0 = vmul.f32 %v3629_v44, %v3605_v47  ;;  %v3797_v25 = vmul.f32 %v3796_v48, %v9283_v45  ;;  %v4033_v39 = vadd.f32 %v9288_v43, %v4032_v33  ;;  %v3250_v50 = vmul.f32 0.5, %v9204_v10 }
 0x479   : > { %v9320_v61 = vadd.f32 %v9201_v62, %v3238_v8  ;;  %v3659_v16 = vmul.f32 %v4680_v20, %v3658_v41  ;;  %v3760_v44 = vadd.f32 0.05243302, %v3759_v59  ;;  %v4072_v8 = vld [vmem:[%s5271_s0 + $0x10] sm:$0xff]  ;;  %v3768_v41 = vmul.f32 %v3767_v17, %v9263_v58  ;;  %v4073_v59 = vld [vmem:[%s5271_s0 + $0x18] sm:$0xff] }
 0x47a   : > { %v4365_v6 = vclamps-f32 %v3630_v0, 1.0  ;;  %v4087_v55 = vadd.f32 %v4071_v37, %v4033_v39  ;;  %v3798_v29 = vadd.f32 0.0036580483, %v3797_v25  ;;  %v3806_v10 = vmul.f32 3.8918573e-05, %v9283_v45 }
 0x47b   : > { %v9339_v57 = vmul.f32 0.70710677, %v9320_v61  ;;  %v3660_v47 = vadd.f32 %v4680_v20, %v3659_v16  ;;  %v3846_v46 = vmul.f32 3.8918573e-05, %v9366_v11  ;;  %v3769_v16 = vadd.f32 0.014752088, %v3768_v41 }
 0x47c   : > { %4103 = vst.msk [vmem:[%s9324_s9 + $0x8] sm:$0xff] %vm492_vm0, %v4087_v55  ;;  %v3921_v36 = vadd.f32 1.0, %v4365_v6  ;;  %v4682_v53 = vpop.eup %4681  ;;  %v3799_v49 = vmul.f32 %v3798_v29, %v9283_v45  ;;  %v3807_v14 = vadd.f32 0.001143296, %v3806_v10  ;;  %v3747_v33 = vand.u32 2147483648, %v9355_v28 }
 0x47d   : > { %v3873_v3 = vmul.f32 %v9339_v57, %v9339_v57  ;;  %v3664_v32 = vsel %vm3663_vm11, %v4680_v20, %v3660_v47  ;;  %v3685_v20 = vmul.f32 %v9280_v9, %v9170_v26  ;;  %v3835_v26 = vmul.f32 2.1237322e-06, %v9366_v11 }
 0x47e   : > { %v3669_v23 = vsel %vm9331_vm9, %v3668_v5, %v3664_v32  ;;  %v3937_v48 = vmul.f32 %v3921_v36, %v3249_v21  ;;  %v3737_v30 = vmul.f32 %v4682_v53, %v9355_v28  ;;  %v3770_v37 = vmul.f32 %v3769_v16, %v9263_v58 }
 0x47f   : > { %v3670_v15 = vmul.f32 %v3669_v23, %v3645_v13  ;;  %v9372_v38 = vmin.f32 %v3873_v3, 16.0  ;;  %v9378_v51 = vmul.f32 %v3709_v12, %v3685_v20  ;;  %v4035_v56 = vpop.f32.mrf.mxu1  ;;  %v3836_v62 = vadd.f32 0.00028619796, %v3835_v26 }
 0x480   : > { %v4036_v2 = vadd.f32 %v9288_v43, %v4035_v56  ;;  %v3738_v60 = vsub.f32 1.0, %v3737_v30  ;;  %v3808_v47 = vmul.f32 %v3807_v14, %v9283_v45  ;;  %v3847_v5 = vadd.f32 0.001143296, %v3846_v46 }
 0x481   : > { %v4366_v42 = vclamps-f32 %v3670_v15, 1.0  ;;  %v3875_v7 = vmul.f32 2.1237322e-06, %v9372_v38  ;;  %v4367_v0 = vclamps-f32 %v9378_v51, 1.0  ;;  %v3886_v4 = vmul.f32 3.8918573e-05, %v9372_v38 }
 0x482   : > { %v4088_v13 = vadd.f32 %v4072_v8, %v4036_v2  ;;  %v3739_v39 = vmul.f32 %v4682_v53, %v3738_v60  ;;  %vm3742_vm13 = vweird.f32 %v4682_v53  ;;  %v3771_v3 = vadd.f32 0.112945676, %v3770_v37 }
 0x483   : > { %v3922_v9 = vadd.f32 1.0, %v4366_v42  ;;  %v3876_v25 = vadd.f32 0.00028619796, %v3875_v7  ;;  %v3809_v6 = vadd.f32 0.014752088, %v3808_v47  ;;  %v3848_v32 = vmul.f32 %v3847_v5, %v9366_v11 }
 0x484   : > { %4104 = vst.msk [vmem:[%s9324_s9 + $0x10] sm:$0xff] %vm492_vm0, %v4088_v13  ;;  %v3887_v31 = vadd.f32 0.001143296, %v3886_v4  ;;  %v3837_v55 = vmul.f32 %v3836_v62, %v9366_v11  ;;  %v3740_v15 = vadd.f32 %v4682_v53, %v3739_v39  ;;  %vm3741_vm15 = vweird.f32 %v9355_v28 }
 0x485   : > { %v3938_v27 = vmul.f32 %v3922_v9, %v3250_v50  ;;  %v3748_v12 = vor.u32 1.1754944e-38, %v3747_v33  ;;  %vm3743_vm1 = vmor %vm3741_vm15, %vm3742_vm13  ;;  %v3772_v29 = vmul.f32 %v3771_v3, %v9263_v58  ;;  %v3810_v42 = vmul.f32 %v3809_v6, %v9283_v45  ;;  %v4074_v3 = vld [vmem:[%s5271_s0 + $0x20] sm:$0xff] }
 0x486   : > { %v3849_v36 = vadd.f32 0.014752088, %v3848_v32  ;;  %v3877_v17 = vmul.f32 %v3876_v25, %v9372_v38  ;;  %v3744_v21 = vsel %vm3743_vm1, %v4682_v53, %v3740_v15  ;;  %vm3746_vm2 = vcmp.eq.f32.partialorder %v3745_v54, 8.507059e+37 }
 0x487   : > { %v3949_v1 = vpack.c.bf16 %v3938_v27, %v3937_v48  ;;  %v4037_v23 = vpop.f32.mrf.mxu1  ;;  %v3888_v50 = vmul.f32 %v3887_v31, %v9372_v38  ;;  %v3749_v26 = vsel %vm3746_vm2, %v3748_v12, %v3744_v21  ;;  %v3773_v9 = vadd.f32 0.4994258, %v3772_v29 }
 0x488   : > { %v4038_v20 = vadd.f32 %v9288_v43, %v4037_v23  ;;  %v3811_v28 = vadd.f32 0.112945676, %v3810_v42  ;;  %v3761_v56 = vmul.f32 %v3760_v44, %v9263_v58  ;;  %v3750_v8 = vmul.f32 %v3749_v26, %v3725_v18 }
 0x489   : > { %4049 = vmatmul.bf16.vlgmr.msra.gmra.mxu2 %v3949_v1  ;;  %v3850_v41 = vmul.f32 %v3849_v36, %v9366_v11  ;;  %v3889_v2 = vadd.f32 0.014752088, %v3888_v50  ;;  %v3800_v10 = vadd.f32 0.05243302, %v3799_v49  ;;  %v3838_v46 = vadd.f32 0.0036580483, %v3837_v55 }
 0x48a   : > { %v4089_v51 = vadd.f32 %v4073_v59, %v4038_v20  ;;  %v3774_v7 = vmul.f32 %v3773_v9, %v9263_v58  ;;  %v3812_v53 = vmul.f32 %v3811_v28, %v9283_v45  ;;  %v4368_v48 = vclamps-f32 %v3750_v8, 1.0 }
 0x48b   : > { %v3923_v27 = vadd.f32 1.0, %v4367_v0  ;;  %v3851_v30 = vadd.f32 0.112945676, %v3850_v41  ;;  %v3890_v13 = vmul.f32 %v3889_v2, %v9372_v38  ;;  %v3251_v16 = vmul.f32 0.5, %v9167_v19  ;;  %v4075_v41 = vld [vmem:[%s5271_s0 + $0x28] sm:$0xff] }
 0x48c   : > { %4105 = vst.msk [vmem:[%s9324_s9 + $0x18] sm:$0xff] %vm492_vm0, %v4089_v51  ;;  %v3878_v44 = vadd.f32 0.0036580483, %v3877_v17  ;;  %v9414_v18 = vadd.f32 1.0, %v3774_v7  ;;  %v3813_v14 = vadd.f32 0.4994258, %v3812_v53  ;;  %v3801_v37 = vmul.f32 %v3800_v10, %v9283_v45 }
 0x48d   : > { %v3252_v49 = vmul.f32 0.5, %v9184_v40  ;;  %v3924_v62 = vadd.f32 1.0, %v4368_v48  ;;  %v3852_v1 = vmul.f32 %v3851_v30, %v9366_v11  ;;  %v3891_v60 = vadd.f32 0.112945676, %v3890_v13 }
 0x48e   : > { %v3762_v33 = vadd.f32 0.18741608, %v3761_v56  ;;  %v3839_v0 = vmul.f32 %v3838_v46, %v9366_v11  ;;  %4683 = vrcp.f32 %v9414_v18  ;;  %v3939_v47 = vmul.f32 %v3923_v27, %v3251_v16 }
 0x48f   : > { %v3940_v19 = vmul.f32 %v3924_v62, %v3252_v49  ;;  %v3814_v5 = vmul.f32 %v3813_v14, %v9283_v45  ;;  %v3853_v4 = vadd.f32 0.4994258, %v3852_v1  ;;  %v3879_v25 = vmul.f32 %v3878_v44, %v9372_v38 }
 0x490   : > { %v3892_v40 = vmul.f32 %v3891_v60, %v9372_v38  ;;  %v3763_v31 = vmul.f32 %v3762_v33, %v9263_v58  ;;  %v3802_v59 = vadd.f32 0.18741608, %v3801_v37  ;;  %v3840_v15 = vadd.f32 0.05243302, %v3839_v0 }
 0x491   : > { %v3950_v39 = vpack.c.bf16 %v3940_v19, %v3939_v47  ;;  %v9425_v6 = vadd.f32 1.0, %v3814_v5  ;;  %v3854_v32 = vmul.f32 %v3853_v4, %v9366_v11  ;;  %v3880_v20 = vadd.f32 0.05243302, %v3879_v25 }
 0x492   : > { %v3893_v23 = vadd.f32 0.4994258, %v3892_v40  ;;  %v3764_v21 = vadd.f32 1.1283791, %v3763_v31  ;;  %v3803_v58 = vmul.f32 %v3802_v59, %v9283_v45  ;;  %v3841_v50 = vmul.f32 %v3840_v15, %v9366_v11 }
 0x493   : > { %v4040_v54 = vpop.f32.mrf.mxu1  ;;  %4685 = vrcp.f32 %v9425_v6  ;;  %v9431_v42 = vadd.f32 1.0, %v3854_v32  ;;  %v3881_v9 = vmul.f32 %v3880_v20, %v9372_v38  ;;  %v3787_v28 = vand.u32 2147483648, %v9414_v18 }
 0x494   : > { %v4041_v55 = vadd.f32 %v9288_v43, %v4040_v54  ;;  %v4684_v12 = vpop.eup %4683  ;;  %v3894_v36 = vmul.f32 %v3893_v23, %v9372_v38  ;;  %v3785_v10 = vand.u32 2147483647, %v9414_v18  ;;  %v3765_v45 = vmul.f32 %v3764_v21, %v9246_v22 }
 0x495   : > { %v3777_v17 = vmul.f32 %v4684_v12, %v9414_v18  ;;  %4687 = vrcp.f32 %v9431_v42  ;;  %vm3782_vm14 = vweird.f32 %v4684_v12  ;;  %v3804_v53 = vadd.f32 1.1283791, %v3803_v58 }
 0x496   : > { %v4090_v29 = vadd.f32 %v4074_v3, %v4041_v55  ;;  %v9440_v26 = vadd.f32 1.0, %v3894_v36  ;;  %v3842_v48 = vadd.f32 0.18741608, %v3841_v50  ;;  %vm3781_vm3 = vweird.f32 %v9414_v18 }
 0x497   : > { %v3778_v51 = vsub.f32 1.0, %v3777_v17  ;;  %v3882_v13 = vadd.f32 0.18741608, %v3881_v9  ;;  %vm3783_vm4 = vmor %vm3781_vm3, %vm3782_vm14  ;;  %v3788_v44 = vor.u32 1.1754944e-38, %v3787_v28  ;;  %vm3786_vm5 = vcmp.eq.f32.partialorder %v3785_v10, 8.507059e+37 }
 0x498   : > { %4106 = vst.msk [vmem:[%s9324_s9 + $0x20] sm:$0xff] %vm492_vm0, %v4090_v29  ;;  %4689 = vrcp.f32 %v9440_v26  ;;  %v3827_v22 = vand.u32 2147483648, %v9425_v6  ;;  %v3825_v18 = vand.u32 2147483647, %v9425_v6  ;;  %v3805_v47 = vmul.f32 %v3804_v53, %v9266_v52 }
 0x499   : > { %4054 = vmatmul.bf16.gmra.mxu2 %v3950_v39  ;;  %v4686_v56 = vpop.eup %4685  ;;  %v3779_v2 = vmul.f32 %v4684_v12, %v3778_v51  ;;  %vm3821_vm7 = vweird.f32 %v9425_v6  ;;  %v3843_v4 = vmul.f32 %v3842_v48, %v9366_v11  ;;  %v3883_v25 = vmul.f32 %v3882_v13, %v9372_v38 }
 0x49a   : > { %v3817_v7 = vmul.f32 %v4686_v56, %v9425_v6  ;;  %vm3822_vm6 = vweird.f32 %v4686_v56  ;;  %v3828_v40 = vor.u32 1.1754944e-38, %v3827_v22  ;;  %vm3826_vm9 = vcmp.eq.f32.partialorder %v3825_v18, 8.507059e+37  ;;  %v4077_v22 = vld [vmem:[%s5271_s0 + $0x38] sm:$0xff] }
 0x49b   : > { %v4042_v8 = vpop.f32.mrf.mxu1  ;;  %v3780_v27 = vadd.f32 %v4684_v12, %v3779_v2  ;;  %v9451_v30 = vpop.eup %4687  ;;  %vm3823_vm8 = vmor %vm3821_vm7, %vm3822_vm6  ;;  %v3905_v52 = vand.u32 2147483647, %v9440_v26  ;;  %v3907_v6 = vand.u32 2147483648, %v9440_v26  ;;  %v3884_v38 = vadd.f32 1.1283791, %v3883_v25 }
 0x49c   : > { %v4043_v46 = vadd.f32 %v9288_v43, %v4042_v8  ;;  %v3818_v14 = vsub.f32 1.0, %v3817_v7  ;;  %v3857_v62 = vmul.f32 %v9451_v30, %v9431_v42  ;;  %vm3862_vm10 = vweird.f32 %v9451_v30 }
 0x49d   : > { %v3784_v49 = vsel %vm3783_vm4, %v4684_v12, %v3780_v27  ;;  %vm3861_vm12 = vweird.f32 %v9431_v42  ;;  %v3865_v59 = vand.u32 2147483647, %v9431_v42  ;;  %v3867_v15 = vand.u32 2147483648, %v9431_v42 }
 0x49e   : > { %v4091_v16 = vadd.f32 %v4075_v41, %v4043_v46  ;;  %v3789_v1 = vsel %vm3786_vm5, %v3788_v44, %v3784_v49  ;;  %v3819_v60 = vmul.f32 %v4686_v56, %v3818_v14  ;;  %v4690_v33 = vpop.eup %4689  ;;  %v3858_v0 = vsub.f32 1.0, %v3857_v62  ;;  %vm9472_vm13 = vmor %vm3861_vm12, %vm3862_vm10  ;;  %v4076_v44 = vld [vmem:[%s5271_s0 + $0x30] sm:$0xff] }
 0x49f   : > { %v3790_v37 = vmul.f32 %v3789_v1, %v3765_v45  ;;  %v3897_v5 = vmul.f32 %v4690_v33, %v9440_v26  ;;  %vm3902_vm11 = vweird.f32 %v4690_v33  ;;  %vm3901_vm15 = vweird.f32 %v9440_v26 }
 0x4a0   : > { %4107 = vst.msk [vmem:[%s9324_s9 + $0x28] sm:$0xff] %vm492_vm0, %v4091_v16  ;;  %v3820_v19 = vadd.f32 %v4686_v56, %v3819_v60  ;;  %v3859_v39 = vmul.f32 %v9451_v30, %v3858_v0  ;;  %v3253_v17 = vmul.f32 0.5, %v9239_v35  ;;  %v3254_v21 = vmul.f32 0.5, %v9258_v63  ;;  %vm3903_vm1 = vmor %vm3901_vm15, %vm3902_vm11  ;;  %v4078_v60 = vld [vmem:[%s5271_s0 + $0x40] sm:$0xff]  ;;  %v4079_v0 = vld [vmem:[%s5271_s0 + $0x48] sm:$0xff] }
 0x4a1   : > { %v4369_v54 = vclamps-f32 %v3790_v37, 1.0  ;;  %v3898_v32 = vsub.f32 1.0, %v3897_v5  ;;  %v3844_v58 = vadd.f32 1.1283791, %v3843_v4  ;;  %v3908_v50 = vor.u32 1.1754944e-38, %v3907_v6  ;;  %v4080_v4 = vld [vmem:[%s5271_s0 + $0x50] sm:$0xff] }
 0x4a2   : > { %v3824_v3 = vsel %vm3823_vm8, %v4686_v56, %v3820_v19  ;;  %v3860_v11 = vadd.f32 %v9451_v30, %v3859_v39  ;;  %vm3906_vm2 = vcmp.eq.f32.partialorder %v3905_v52, 8.507059e+37  ;;  %v3868_v28 = vor.u32 1.1754944e-38, %v3867_v15  ;;  %v4082_v52 = vld [vmem:[%s5271_s0 + $0x60] sm:$0xff] }
 0x4a3   : > { %v3829_v31 = vsel %vm3826_vm9, %v3828_v40, %v3824_v3  ;;  %v3899_v23 = vmul.f32 %v4690_v33, %v3898_v32  ;;  %v3925_v20 = vadd.f32 1.0, %v4369_v54  ;;  %v3885_v8 = vmul.f32 %v3884_v38, %v9339_v57  ;;  %v4081_v54 = vld [vmem:[%s5271_s0 + $0x58] sm:$0xff] }
 0x4a4   : > { %v3830_v55 = vmul.f32 %v3829_v31, %v3805_v47  ;;  %v3864_v42 = vsel %vm9472_vm13, %v9451_v30, %v3860_v11  ;;  %vm3866_vm14 = vcmp.eq.f32.partialorder %v3865_v59, 8.507059e+37  ;;  %v3845_v63 = vmul.f32 %v3844_v58, %v9316_v24 }
 0x4a5   : > { %v3900_v36 = vadd.f32 %v4690_v33, %v3899_v23  ;;  %v3941_v41 = vmul.f32 %v3925_v20, %v3253_v17  ;;  %v3869_v35 = vsel %vm3866_vm14, %v3868_v28, %v3864_v42  ;;  %v3256_v48 = vmul.f32 0.5, %v9320_v61  ;;  %v4083_v23 = vld [vmem:[%s5271_s0 + $0x68] sm:$0xff]  ;;  %v4085_v17 = vld [vmem:[%s5271_s0 + $0x78] sm:$0xff] }
 0x4a6   : > { %v4370_v12 = vclamps-f32 %v3830_v55, 1.0  ;;  %v3870_v45 = vmul.f32 %v3869_v35, %v3845_v63  ;;  %v3255_v27 = vmul.f32 0.5, %v9300_v34 }
 0x4a7   : > { %v3904_v9 = vsel %vm3903_vm1, %v4690_v33, %v3900_v36 }
 0x4a8   : > { %v3926_v51 = vadd.f32 1.0, %v4370_v12  ;;  %v3909_v56 = vsel %vm3906_vm2, %v3908_v50, %v3904_v9  ;;  %v4371_v7 = vclamps-f32 %v3870_v45, 1.0  ;;  %v4084_v12 = vld [vmem:[%s5271_s0 + $0x70] sm:$0xff]  ;;  %s4830_s0 = scalar_lea.hbm %s11027_s5, 512 }
 0x4a9   : > { %v3910_v10 = vmul.f32 %v3909_v56, %v3885_v8  ;;  %p4832_p1 = scmp.lt.s32.totalorder %s4830_s0, %s4826_s6 }
 0x4aa   : > { %v3942_v26 = vmul.f32 %v3926_v51, %v3254_v21  ;;  %v3927_v57 = vadd.f32 1.0, %v4371_v7 }
 0x4ab   : > { %v4372_v46 = vclamps-f32 %v3910_v10, 1.0  ;;  %p4833_p7 = por %p4832_p1, %p4831_p4 }
 0x4ac   : > { %v3951_v2 = vpack.c.bf16 %v3942_v26, %v3941_v41  ;;  %v3943_v13 = vmul.f32 %v3927_v57, %v3255_v27 }
 0x4ad   : > { %v3928_v53 = vadd.f32 1.0, %v4372_v46  ;;  %p4834_p2 = pnand %p4833_p7, %p4829_p3 }
 0x4ae   : > { %4059 = vmatmul.bf16.gmra.mxu2 %v3951_v2 }
 0x4af   : > { %v3944_v30 = vmul.f32 %v3928_v53, %v3256_v48 }
 0x4b1   : > { %v3952_v24 = vpack.c.bf16 %v3944_v30, %v3943_v13 }
 0x4be   : > { %4064 = vmatmul.bf16.gmra.mxu2 %v3952_v24 }
 0x4c3   : > { %v4045_v16 = vpop.f32.mrf.mxu1 }
 0x4c4   : > { %v4046_v14 = vadd.f32 %v9288_v43, %v4045_v16 }
 0x4c6   : > { %v4092_v49 = vadd.f32 %v4076_v44, %v4046_v14 }
 0x4c8   : > { %4108 = vst.msk [vmem:[%s9324_s9 + $0x30] sm:$0xff] %vm492_vm0, %v4092_v49 }
 0x4cb   : > { %v4047_v61 = vpop.f32.mrf.mxu1 }
 0x4cc   : > { %v4048_v34 = vadd.f32 %v9288_v43, %v4047_v61 }
 0x4ce   : > { %v4093_v62 = vadd.f32 %v4077_v22, %v4048_v34 }
 0x4d0   : > { %4109 = vst.msk [vmem:[%s9324_s9 + $0x38] sm:$0xff] %vm492_vm0, %v4093_v62 }
 0x50c   : > { %v4050_v1 = vpop.f32.mrf.mxu2 }
 0x50d   : > { %v4051_v18 = vadd.f32 %v9288_v43, %v4050_v1 }
 0x50f   : > { %v4094_v33 = vadd.f32 %v4078_v60, %v4051_v18 }
 0x511   : > { %4110 = vst.msk [vmem:[%s9324_s9 + $0x40] sm:$0xff] %vm492_vm0, %v4094_v33 }
 0x514   : > { %v4052_v37 = vpop.f32.mrf.mxu2 }
 0x515   : > { %v4053_v47 = vadd.f32 %v9288_v43, %v4052_v37 }
 0x517   : > { %v4095_v19 = vadd.f32 %v4079_v0, %v4053_v47 }
 0x519   : > { %4111 = vst.msk [vmem:[%s9324_s9 + $0x48] sm:$0xff] %vm492_vm0, %v4095_v19 }
 0x51c   : > { %v4055_v5 = vpop.f32.mrf.mxu2 }
 0x51d   : > { %v4056_v25 = vadd.f32 %v9288_v43, %v4055_v5 }
 0x51f   : > { %v4096_v40 = vadd.f32 %v4080_v4, %v4056_v25 }
 0x521   : > { %4112 = vst.msk [vmem:[%s9324_s9 + $0x50] sm:$0xff] %vm492_vm0, %v4096_v40 }
 0x524   : > { %v4057_v39 = vpop.f32.mrf.mxu2 }
 0x525   : > { %v4058_v3 = vadd.f32 %v9288_v43, %v4057_v39 }
 0x527   : > { %v4097_v32 = vadd.f32 %v4081_v54, %v4058_v3 }
 0x529   : > { %4113 = vst.msk [vmem:[%s9324_s9 + $0x58] sm:$0xff] %vm492_vm0, %v4097_v32 }
 0x531   : > { %v4060_v31 = vpop.f32.mrf.mxu2 }
 0x532   : > { %v4061_v6 = vadd.f32 %v9288_v43, %v4060_v31 }
 0x534   : > { %v4098_v55 = vadd.f32 %v4082_v52, %v4061_v6 }
 0x536   : > { %4114 = vst.msk [vmem:[%s9324_s9 + $0x60] sm:$0xff] %vm492_vm0, %v4098_v55 }
 0x539   : > { %v4062_v11 = vpop.f32.mrf.mxu2 }
 0x53a   : > { %v4063_v38 = vadd.f32 %v9288_v43, %v4062_v11 }
 0x53c   : > { %v4099_v59 = vadd.f32 %v4083_v23, %v4063_v38 }
 0x53e   : > { %4115 = vst.msk [vmem:[%s9324_s9 + $0x68] sm:$0xff] %vm492_vm0, %v4099_v59 }
 0x541   : > { %v4065_v15 = vpop.f32.mrf.mxu2 }
 0x542   : > { %v4066_v20 = vadd.f32 %v9288_v43, %v4065_v15 }
 0x544   : > { %v4100_v29 = vadd.f32 %v4084_v12, %v4066_v20 }
 0x546   : > { %4116 = vst.msk [vmem:[%s9324_s9 + $0x70] sm:$0xff] %vm492_vm0, %v4100_v29 }
 0x549   : > { %v4067_v36 = vpop.f32.mrf.mxu2 }
 0x54a   : > { %v4068_v21 = vadd.f32 %v9288_v43, %v4067_v36 }
 0x54c   : > { %v4101_v58 = vadd.f32 %v4085_v17, %v4068_v21 }
 0x54e   : > { %4117 = vst.msk [vmem:[%s9324_s9 + $0x78] sm:$0xff] %vm492_vm0, %v4101_v58 }
 0x54f   : > { %4837 = shalt.err (!%p4834_p2)
}
 0x550   : > { %s4974_s18 = smov 128   ;;  %s4975_s9 = smov 8  }
 0x551   : > { %4450 = dma.vmem_to_hbm [thread:$0]  (%p5207_p12), %s4135_s23, 2048, %s4137_s27, %s4119_s26, %s4974_s18, %s4974_s18, %s4975_s9  }
 0x552 PF: > { %s11028_s14 = sld [smem:[#allocation16_spill]]  ;;  %p4467_p9 = scmp.ge.s32.totalorder %s4968_s22, 2 }
 0x553   : > { %s11029_s17 = sld [smem:[#allocation25_spill]] }
 0x558   : > { %s4151_s30 = sand.u32 1, %s11028_s14  }
 0x559   : > { %p11030_p13 = scmp.ne.s32.totalorder %s11029_s17, 0  ;;  %s4152_s20 = scalar_lea.sflag [#allocation6], %s4151_s30 }
 0x55b   : > { %p4463_p0 = pnand %p4467_p9, %p11030_p13 }
 0x55d   : > { %p4464_p6 = pneg %p4463_p0 }
 0x55f   : > { %4907 = dma.done.wait (%p4464_p6), %s4152_s20, 2048  }
 0x560   : > { %4909 = vsyncadd (%p4464_p6), %s4152_s20, 4294965248  ;;  %s28_s22 = sadd.s32 1, %s4968_s22   ;;  %s11032_s29 = sld [smem:[#allocation15_spill]] }
 0x561   : > { %p9548_p10 = scmp.ge.s32.totalorder %s28_s22, 6   ;;  %s11033_s14 = sld [smem:[#allocation23_spill]] }
 0x562   : > { %s11034_s23 = sld [smem:[#allocation17_spill]]  ;;  %s11040_s30 = smov %s4920_s10 }
 0x563   : > { %s11035_s17 = sld [smem:[#allocation24_spill]]  ;;  %s11041_s10 = smov %s4924_s11 }
 0x564   : > { %s11036_s18 = sld [smem:[#allocation20_spill]]  ;;  %s11042_s11 = smov %s5246_s12 }
 0x565   : > { %s11037_s20 = sld [smem:[#allocation21_spill]]  ;;  %s11043_s12 = smov %s4932_s13 }
 0x566   : > { %s11038_s27 = sld [smem:[#allocation22_spill]]  ;;  %s11044_s13 = smov %s11032_s29 }
 0x567   : > { %s11045_s15 = smov %s4944_s16  ;;  %s11047_s19 = smov %s4964_s21 }
 0x568   : > { %s11046_s16 = smov %s11034_s23  ;;  %27 = sbr.rel (!%p9548_p10) target bundleno = 22 (0x16), region = 128 }
 0x56c   : > { %s11048_s21 = smov %s11038_s27 }
 0x56d   :  { %4158 = vsyncpa [#allocation5], 1 }
 0x56e   :  { %4160 = vsyncpa [#allocation5 + $0x1], 1 }
 0x56f   :  { %4161 = vsyncpa [#allocation8], 1 }
 0x570   :  { %4163 = vsyncpa [#allocation8 + $0x1], 1 }
 0x571   :  { %4164 = vsyncpa [#allocation6], 1 }
 0x572   :  { %4166 = vsyncpa [#allocation6 + $0x1], 1 }

</bundles_post_ra>
